<compile_context>
chip_gen: v7x
topology: tpu7x:2x2x1
jax: 0.10.0
libtpu: 0.0.40
codegen_flags: <defaults>
</compile_context>

<pallas_src>
import math
from functools import partial

import jax
import jax.numpy as jnp
from jax.experimental import pallas as pl

EPS = 1e-5
ACT_DTYPE = jnp.bfloat16   # inter-layer activation / MXU-input dtype


# ------------------------- fused conv+BN Pallas kernels -------------------------

def _conv_bn_kernel(a_ref, b_ref, g_ref, be_ref, o_ref, *, relu, inv_m):
    # conv as matmul on the MXU, f32 accumulation
    y = jnp.dot(a_ref[...], b_ref[...], preferred_element_type=jnp.float32)
    # training-mode batch statistics (biased variance, like PyTorch BN)
    mean = jnp.sum(y, axis=0, keepdims=True) * inv_m
    var = jnp.sum(y * y, axis=0, keepdims=True) * inv_m - mean * mean
    var = jnp.maximum(var, 0.0)                       # guard one-pass cancellation
    scale = g_ref[...] * jax.lax.rsqrt(var + EPS)     # EUP slot
    bias = be_ref[...] - mean * scale
    out = y * scale + bias
    if relu:
        out = jnp.maximum(out, 0.0)
    o_ref[...] = out.astype(o_ref.dtype)


def _conv_bn_res_kernel(a_ref, b_ref, r_ref, g_ref, be_ref, o_ref, *, relu, inv_m):
    y = jnp.dot(a_ref[...], b_ref[...], preferred_element_type=jnp.float32)
    mean = jnp.sum(y, axis=0, keepdims=True) * inv_m
    var = jnp.sum(y * y, axis=0, keepdims=True) * inv_m - mean * mean
    var = jnp.maximum(var, 0.0)
    scale = g_ref[...] * jax.lax.rsqrt(var + EPS)
    bias = be_ref[...] - mean * scale
    out = y * scale + bias + r_ref[...].astype(jnp.float32)
    if relu:
        out = jnp.maximum(out, 0.0)
    o_ref[...] = out.astype(o_ref.dtype)


def conv_bn_fused(a, b, gamma, beta, residual=None, *, relu):
    """a: (M, K) bf16 patches, b: (K, Cout) bf16 weights, gamma/beta: (1, Cout) f32.
    Single-step pallas_call: whole arrays live in VMEM (few hundred KB max here)."""
    M, _ = a.shape
    Cout = b.shape[1]
    inv_m = 1.0 / float(M)
    out_shape = jax.ShapeDtypeStruct((M, Cout), ACT_DTYPE)
    if residual is None:
        return pl.pallas_call(
            partial(_conv_bn_kernel, relu=relu, inv_m=inv_m),
            out_shape=out_shape,
        )(a, b, gamma, beta)
    return pl.pallas_call(
        partial(_conv_bn_res_kernel, relu=relu, inv_m=inv_m),
        out_shape=out_shape,
    )(a, b, residual, gamma, beta)


# ------------------------------- conv + BN glue ---------------------------------

def _im2col(x, kh, kw, stride, padding):
    # x: (N, H, W, C) -> (N*Ho*Wo, kh*kw*C), patch ordering (kh, kw, C)
    N, H, W, C = x.shape
    if padding:
        x = jnp.pad(x, ((0, 0), (padding, padding), (padding, padding), (0, 0)))
    Ho = (H + 2 * padding - kh) // stride + 1
    Wo = (W + 2 * padding - kw) // stride + 1
    if kh == 1 and kw == 1:
        patches = x[:, :stride * Ho:stride, :stride * Wo:stride, :]
        return patches.reshape(N * Ho * Wo, C), (N, Ho, Wo)
    cols = [x[:, i:i + stride * Ho:stride, j:j + stride * Wo:stride, :]
            for i in range(kh) for j in range(kw)]
    patches = jnp.concatenate(cols, axis=-1)
    return patches.reshape(N * Ho * Wo, kh * kw * C), (N, Ho, Wo)


def conv_bn(x, w_mat, gamma, beta, residual=None, *, k, stride, padding, relu):
    """Conv2d (no bias) + BatchNorm2d (batch stats) [+ residual] [+ ReLU].
    x: (N, H, W, Cin) bf16; w_mat: (k*k*Cin, Cout) bf16 (pre-reshaped at init)."""
    a, (N, Ho, Wo) = _im2col(x, k, k, stride, padding)
    Cout = w_mat.shape[1]
    res = residual.reshape(-1, Cout) if residual is not None else None
    out = conv_bn_fused(a.astype(ACT_DTYPE), w_mat, gamma, beta, res, relu=relu)
    return out.reshape(N, Ho, Wo, Cout)


# --------------------------- parameters / static config -------------------------

def _conv_init(key, cout, cin, k):
    fan_in = cin * k * k
    bound = 1.0 / math.sqrt(fan_in)
    w = jax.random.uniform(key, (cout, cin, k, k), jnp.float32, -bound, bound)
    # pre-transpose/reshape ONCE: (Cout,Cin,kh,kw) -> (kh*kw*Cin, Cout), bf16 for MXU
    return jnp.transpose(w, (2, 3, 1, 0)).reshape(k * k * cin, cout).astype(ACT_DTYPE)


def _bn_init(c):
    return {"gamma": jnp.ones((1, c), jnp.float32),
            "beta": jnp.zeros((1, c), jnp.float32)}


def init_bottleneck(key, in_c, out_c, stride):
    k1, k2, k3, k4 = jax.random.split(key, 4)
    params = {
        "conv1": _conv_init(k1, out_c, in_c, 1), "bn1": _bn_init(out_c),
        "conv2": _conv_init(k2, out_c, out_c, 3), "bn2": _bn_init(out_c),
        "conv3": _conv_init(k3, out_c * 4, out_c, 1), "bn3": _bn_init(out_c * 4),
    }
    has_res = (stride != 1) or (in_c != out_c * 4)
    if has_res:
        params["res_conv"] = _conv_init(k4, out_c * 4, in_c, 1)
        params["res_bn"] = _bn_init(out_c * 4)
    config = {"stride": stride, "has_res": has_res}   # static (kept out of the pytree)
    return params, config


def init_shared_layers(key):
    n = (110 - 2) // 9  # = 12 bottleneck blocks per stage
    keys = jax.random.split(key, 1 + 2 * n)
    params = {"conv1": _conv_init(keys[0], 16, 3, 3), "bn1": _bn_init(16)}
    config = {"conv_2x": [], "conv_3x": []}
    params["conv_2x"], params["conv_3x"] = [], []
    in_c = 16
    for i in range(n):
        p, c = init_bottleneck(keys[1 + i], in_c, 16, 1)
        params["conv_2x"].append(p); config["conv_2x"].append(c)
        in_c = 64
    for i in range(n):
        stride = 2 if i == 0 else 1
        p, c = init_bottleneck(keys[1 + n + i], in_c, 32, stride)
        params["conv_3x"].append(p); config["conv_3x"].append(c)
        in_c = 128
    return params, config


# ----------------------------------- forward ------------------------------------

def bottleneck_forward(p, cfg, x):
    out = conv_bn(x, p["conv1"], p["bn1"]["gamma"], p["bn1"]["beta"],
                  k=1, stride=cfg["stride"], padding=0, relu=True)
    out = conv_bn(out, p["conv2"], p["bn2"]["gamma"], p["bn2"]["beta"],
                  k=3, stride=1, padding=1, relu=True)
    if cfg["has_res"]:
        res = conv_bn(x, p["res_conv"], p["res_bn"]["gamma"], p["res_bn"]["beta"],
                      k=1, stride=cfg["stride"], padding=0, relu=False)
    else:
        res = x
    # conv3 -> bn3 -> (+ residual) -> ReLU, fused in one kernel
    out = conv_bn(out, p["conv3"], p["bn3"]["gamma"], p["bn3"]["beta"], residual=res,
                  k=1, stride=1, padding=0, relu=True)
    return out


def shared_layers_forward(config, params, x_nchw):
    x = jnp.transpose(x_nchw, (0, 2, 3, 1)).astype(ACT_DTYPE)    # NCHW -> NHWC bf16
    out = conv_bn(x, params["conv1"], params["bn1"]["gamma"], params["bn1"]["beta"],
                  k=3, stride=1, padding=1, relu=True)
    for p, cfg in zip(params["conv_2x"], config["conv_2x"]):
        out = bottleneck_forward(p, cfg, out)
    for p, cfg in zip(params["conv_3x"], config["conv_3x"]):
        out = bottleneck_forward(p, cfg, out)
    return jnp.transpose(out, (0, 3, 1, 2)).astype(jnp.float32)  # back to NCHW f32


# ------------------------------------- main --------------------------------------

if __name__ == "__main__":
    key = jax.random.PRNGKey(0)
    pkey, xkey = jax.random.split(key)
    params, config = init_shared_layers(pkey)
    x = jax.random.normal(xkey, (2, 3, 16, 16), jnp.float32)     # NCHW like PyTorch

    # one jitted XLA program for the whole backbone (config is static via closure)
    fwd = jax.jit(partial(shared_layers_forward, config))
    out = jax.block_until_ready(fwd(params, x))

    assert out.shape == (2, 128, 8, 8), out.shape
    assert bool(jnp.all(jnp.isfinite(out)))
    print("KERNEL_OK")
</pallas_src>

<mosaic_0001>
module attributes {stable_mosaic.version = 11 : i64} {
  func.func @_conv_bn_kernel(%arg0: memref<512x27xbf16, #tpu.memory_space<vmem>>, %arg1: memref<27x16xbf16, #tpu.memory_space<vmem>>, %arg2: memref<1x16xf32, #tpu.memory_space<vmem>>, %arg3: memref<1x16xf32, #tpu.memory_space<vmem>>, %arg4: memref<512x16xbf16, #tpu.memory_space<vmem>>) attributes {dimension_semantics = [], scalar_prefetch = 0 : i64, scratch_operands = 0 : i64, tpu.core_type = #tpu.core_type<tc>} {
    %c0 = arith.constant 0 : index
    %c0_0 = arith.constant 0 : index
    %0 = vector.load %arg0[%c0, %c0_0] : memref<512x27xbf16, #tpu.memory_space<vmem>>, vector<512x27xbf16>
    %c0_1 = arith.constant 0 : index
    %c0_2 = arith.constant 0 : index
    %1 = vector.load %arg1[%c0_1, %c0_2] : memref<27x16xbf16, #tpu.memory_space<vmem>>, vector<27x16xbf16>
    %cst = arith.constant dense<0.000000e+00> : vector<512x16xf32>
    %2 = tpu.matmul %0, %1, %cst {dimension_numbers = #tpu.dot_dimension_numbers<[1], [0], [0], [1], [0, 0, 1, 1], [], []>} : vector<512x27xbf16>, vector<27x16xbf16>, vector<512x16xf32> -> vector<512x16xf32>
    %cst_3 = arith.constant dense<0.000000e+00> : vector<16xf32>
    %3 = vector.multi_reduction <add>, %2, %cst_3 [0] : vector<512x16xf32> to vector<16xf32>
    %4 = vector.shape_cast %3 : vector<16xf32> to vector<1x16xf32>
    %cst_4 = arith.constant 0.001953125 : f32
    %5 = vector.broadcast %cst_4 : f32 to vector<1x16xf32>
    %6 = arith.mulf %4, %5 : vector<1x16xf32>
    %7 = arith.mulf %2, %2 : vector<512x16xf32>
    %cst_5 = arith.constant dense<0.000000e+00> : vector<16xf32>
    %8 = vector.multi_reduction <add>, %7, %cst_5 [0] : vector<512x16xf32> to vector<16xf32>
    %9 = vector.shape_cast %8 : vector<16xf32> to vector<1x16xf32>
    %cst_6 = arith.constant 0.001953125 : f32
    %10 = vector.broadcast %cst_6 : f32 to vector<1x16xf32>
    %11 = arith.mulf %9, %10 : vector<1x16xf32>
    %12 = arith.mulf %6, %6 : vector<1x16xf32>
    %13 = arith.subf %11, %12 : vector<1x16xf32>
    %cst_7 = arith.constant 0.000000e+00 : f32
    %14 = vector.broadcast %cst_7 : f32 to vector<1x16xf32>
    %15 = arith.maximumf %13, %14 : vector<1x16xf32>
    %c0_8 = arith.constant 0 : index
    %c0_9 = arith.constant 0 : index
    %16 = vector.load %arg2[%c0_8, %c0_9] : memref<1x16xf32, #tpu.memory_space<vmem>>, vector<1x16xf32>
    %cst_10 = arith.constant 9.99999974E-6 : f32
    %17 = vector.broadcast %cst_10 : f32 to vector<1x16xf32>
    %18 = arith.addf %15, %17 : vector<1x16xf32>
    %19 = math.rsqrt %18 : vector<1x16xf32>
    %20 = arith.mulf %16, %19 : vector<1x16xf32>
    %c0_11 = arith.constant 0 : index
    %c0_12 = arith.constant 0 : index
    %21 = vector.load %arg3[%c0_11, %c0_12] : memref<1x16xf32, #tpu.memory_space<vmem>>, vector<1x16xf32>
    %22 = arith.mulf %6, %20 : vector<1x16xf32>
    %23 = arith.subf %21, %22 : vector<1x16xf32>
    %24 = vector.broadcast %20 : vector<1x16xf32> to vector<512x16xf32>
    %25 = arith.mulf %2, %24 : vector<512x16xf32>
    %26 = vector.broadcast %23 : vector<1x16xf32> to vector<512x16xf32>
    %27 = arith.addf %25, %26 : vector<512x16xf32>
    %cst_13 = arith.constant 0.000000e+00 : f32
    %28 = vector.broadcast %cst_13 : f32 to vector<512x16xf32>
    %29 = arith.maximumf %27, %28 : vector<512x16xf32>
    %30 = arith.truncf %29 : vector<512x16xf32> to vector<512x16xbf16>
    %c0_14 = arith.constant 0 : index
    %c0_15 = arith.constant 0 : index
    %31 = vector.load %arg4[%c0_14, %c0_15] : memref<512x16xbf16, #tpu.memory_space<vmem>>, vector<512x16xbf16>
    tpu.vector_store %arg4[%c0_14, %c0_15], %30 {strides = array<i32>} : memref<512x16xbf16, #tpu.memory_space<vmem>>, vector<512x16xbf16>,
    return
  }
}

module attributes {stable_mosaic.version = 11 : i64} {
  func.func @_conv_bn_kernel(%arg0: memref<512x16xbf16, #tpu.memory_space<vmem>>, %arg1: memref<16x16xbf16, #tpu.memory_space<vmem>>, %arg2: memref<1x16xf32, #tpu.memory_space<vmem>>, %arg3: memref<1x16xf32, #tpu.memory_space<vmem>>, %arg4: memref<512x16xbf16, #tpu.memory_space<vmem>>) attributes {dimension_semantics = [], scalar_prefetch = 0 : i64, scratch_operands = 0 : i64, tpu.core_type = #tpu.core_type<tc>} {
    %c0 = arith.constant 0 : index
    %c0_0 = arith.constant 0 : index
    %0 = vector.load %arg0[%c0, %c0_0] : memref<512x16xbf16, #tpu.memory_space<vmem>>, vector<512x16xbf16>
    %c0_1 = arith.constant 0 : index
    %c0_2 = arith.constant 0 : index
    %1 = vector.load %arg1[%c0_1, %c0_2] : memref<16x16xbf16, #tpu.memory_space<vmem>>, vector<16x16xbf16>
    %cst = arith.constant dense<0.000000e+00> : vector<512x16xf32>
    %2 = tpu.matmul %0, %1, %cst {dimension_numbers = #tpu.dot_dimension_numbers<[1], [0], [0], [1], [0, 0, 1, 1], [], []>} : vector<512x16xbf16>, vector<16x16xbf16>, vector<512x16xf32> -> vector<512x16xf32>
    %cst_3 = arith.constant dense<0.000000e+00> : vector<16xf32>
    %3 = vector.multi_reduction <add>, %2, %cst_3 [0] : vector<512x16xf32> to vector<16xf32>
    %4 = vector.shape_cast %3 : vector<16xf32> to vector<1x16xf32>
    %cst_4 = arith.constant 0.001953125 : f32
    %5 = vector.broadcast %cst_4 : f32 to vector<1x16xf32>
    %6 = arith.mulf %4, %5 : vector<1x16xf32>
    %7 = arith.mulf %2, %2 : vector<512x16xf32>
    %cst_5 = arith.constant dense<0.000000e+00> : vector<16xf32>
    %8 = vector.multi_reduction <add>, %7, %cst_5 [0] : vector<512x16xf32> to vector<16xf32>
    %9 = vector.shape_cast %8 : vector<16xf32> to vector<1x16xf32>
    %cst_6 = arith.constant 0.001953125 : f32
    %10 = vector.broadcast %cst_6 : f32 to vector<1x16xf32>
    %11 = arith.mulf %9, %10 : vector<1x16xf32>
    %12 = arith.mulf %6, %6 : vector<1x16xf32>
    %13 = arith.subf %11, %12 : vector<1x16xf32>
    %cst_7 = arith.constant 0.000000e+00 : f32
    %14 = vector.broadcast %cst_7 : f32 to vector<1x16xf32>
    %15 = arith.maximumf %13, %14 : vector<1x16xf32>
    %c0_8 = arith.constant 0 : index
    %c0_9 = arith.constant 0 : index
    %16 = vector.load %arg2[%c0_8, %c0_9] : memref<1x16xf32, #tpu.memory_space<vmem>>, vector<1x16xf32>
    %cst_10 = arith.constant 9.99999974E-6 : f32
    %17 = vector.broadcast %cst_10 : f32 to vector<1x16xf32>
    %18 = arith.addf %15, %17 : vector<1x16xf32>
    %19 = math.rsqrt %18 : vector<1x16xf32>
    %20 = arith.mulf %16, %19 : vector<1x16xf32>
    %c0_11 = arith.constant 0 : index
    %c0_12 = arith.constant 0 : index
    %21 = vector.load %arg3[%c0_11, %c0_12] : memref<1x16xf32, #tpu.memory_space<vmem>>, vector<1x16xf32>
    %22 = arith.mulf %6, %20 : vector<1x16xf32>
    %23 = arith.subf %21, %22 : vector<1x16xf32>
    %24 = vector.broadcast %20 : vector<1x16xf32> to vector<512x16xf32>
    %25 = arith.mulf %2, %24 : vector<512x16xf32>
    %26 = vector.broadcast %23 : vector<1x16xf32> to vector<512x16xf32>
    %27 = arith.addf %25, %26 : vector<512x16xf32>
    %cst_13 = arith.constant 0.000000e+00 : f32
    %28 = vector.broadcast %cst_13 : f32 to vector<512x16xf32>
    %29 = arith.maximumf %27, %28 : vector<512x16xf32>
    %30 = arith.truncf %29 : vector<512x16xf32> to vector<512x16xbf16>
    %c0_14 = arith.constant 0 : index
    %c0_15 = arith.constant 0 : index
    %31 = vector.load %arg4[%c0_14, %c0_15] : memref<512x16xbf16, #tpu.memory_space<vmem>>, vector<512x16xbf16>
    tpu.vector_store %arg4[%c0_14, %c0_15], %30 {strides = array<i32>} : memref<512x16xbf16, #tpu.memory_space<vmem>>, vector<512x16xbf16>,
    return
  }
}

module attributes {stable_mosaic.version = 11 : i64} {
  func.func @_conv_bn_kernel(%arg0: memref<512x144xbf16, #tpu.memory_space<vmem>>, %arg1: memref<144x16xbf16, #tpu.memory_space<vmem>>, %arg2: memref<1x16xf32, #tpu.memory_space<vmem>>, %arg3: memref<1x16xf32, #tpu.memory_space<vmem>>, %arg4: memref<512x16xbf16, #tpu.memory_space<vmem>>) attributes {dimension_semantics = [], scalar_prefetch = 0 : i64, scratch_operands = 0 : i64, tpu.core_type = #tpu.core_type<tc>} {
    %c0 = arith.constant 0 : index
    %c0_0 = arith.constant 0 : index
    %0 = vector.load %arg0[%c0, %c0_0] : memref<512x144xbf16, #tpu.memory_space<vmem>>, vector<512x144xbf16>
    %c0_1 = arith.constant 0 : index
    %c0_2 = arith.constant 0 : index
    %1 = vector.load %arg1[%c0_1, %c0_2] : memref<144x16xbf16, #tpu.memory_space<vmem>>, vector<144x16xbf16>
    %cst = arith.constant dense<0.000000e+00> : vector<512x16xf32>
    %2 = tpu.matmul %0, %1, %cst {dimension_numbers = #tpu.dot_dimension_numbers<[1], [0], [0], [1], [0, 0, 1, 1], [], []>} : vector<512x144xbf16>, vector<144x16xbf16>, vector<512x16xf32> -> vector<512x16xf32>
    %cst_3 = arith.constant dense<0.000000e+00> : vector<16xf32>
    %3 = vector.multi_reduction <add>, %2, %cst_3 [0] : vector<512x16xf32> to vector<16xf32>
    %4 = vector.shape_cast %3 : vector<16xf32> to vector<1x16xf32>
    %cst_4 = arith.constant 0.001953125 : f32
    %5 = vector.broadcast %cst_4 : f32 to vector<1x16xf32>
    %6 = arith.mulf %4, %5 : vector<1x16xf32>
    %7 = arith.mulf %2, %2 : vector<512x16xf32>
    %cst_5 = arith.constant dense<0.000000e+00> : vector<16xf32>
    %8 = vector.multi_reduction <add>, %7, %cst_5 [0] : vector<512x16xf32> to vector<16xf32>
    %9 = vector.shape_cast %8 : vector<16xf32> to vector<1x16xf32>
    %cst_6 = arith.constant 0.001953125 : f32
    %10 = vector.broadcast %cst_6 : f32 to vector<1x16xf32>
    %11 = arith.mulf %9, %10 : vector<1x16xf32>
    %12 = arith.mulf %6, %6 : vector<1x16xf32>
    %13 = arith.subf %11, %12 : vector<1x16xf32>
    %cst_7 = arith.constant 0.000000e+00 : f32
    %14 = vector.broadcast %cst_7 : f32 to vector<1x16xf32>
    %15 = arith.maximumf %13, %14 : vector<1x16xf32>
    %c0_8 = arith.constant 0 : index
    %c0_9 = arith.constant 0 : index
    %16 = vector.load %arg2[%c0_8, %c0_9] : memref<1x16xf32, #tpu.memory_space<vmem>>, vector<1x16xf32>
    %cst_10 = arith.constant 9.99999974E-6 : f32
    %17 = vector.broadcast %cst_10 : f32 to vector<1x16xf32>
    %18 = arith.addf %15, %17 : vector<1x16xf32>
    %19 = math.rsqrt %18 : vector<1x16xf32>
    %20 = arith.mulf %16, %19 : vector<1x16xf32>
    %c0_11 = arith.constant 0 : index
    %c0_12 = arith.constant 0 : index
    %21 = vector.load %arg3[%c0_11, %c0_12] : memref<1x16xf32, #tpu.memory_space<vmem>>, vector<1x16xf32>
    %22 = arith.mulf %6, %20 : vector<1x16xf32>
    %23 = arith.subf %21, %22 : vector<1x16xf32>
    %24 = vector.broadcast %20 : vector<1x16xf32> to vector<512x16xf32>
    %25 = arith.mulf %2, %24 : vector<512x16xf32>
    %26 = vector.broadcast %23 : vector<1x16xf32> to vector<512x16xf32>
    %27 = arith.addf %25, %26 : vector<512x16xf32>
    %cst_13 = arith.constant 0.000000e+00 : f32
    %28 = vector.broadcast %cst_13 : f32 to vector<512x16xf32>
    %29 = arith.maximumf %27, %28 : vector<512x16xf32>
    %30 = arith.truncf %29 : vector<512x16xf32> to vector<512x16xbf16>
    %c0_14 = arith.constant 0 : index
    %c0_15 = arith.constant 0 : index
    %31 = vector.load %arg4[%c0_14, %c0_15] : memref<512x16xbf16, #tpu.memory_space<vmem>>, vector<512x16xbf16>
    tpu.vector_store %arg4[%c0_14, %c0_15], %30 {strides = array<i32>} : memref<512x16xbf16, #tpu.memory_space<vmem>>, vector<512x16xbf16>,
    return
  }
}

module attributes {stable_mosaic.version = 11 : i64} {
  func.func @_conv_bn_kernel(%arg0: memref<512x16xbf16, #tpu.memory_space<vmem>>, %arg1: memref<16x64xbf16, #tpu.memory_space<vmem>>, %arg2: memref<1x64xf32, #tpu.memory_space<vmem>>, %arg3: memref<1x64xf32, #tpu.memory_space<vmem>>, %arg4: memref<512x64xbf16, #tpu.memory_space<vmem>>) attributes {dimension_semantics = [], scalar_prefetch = 0 : i64, scratch_operands = 0 : i64, tpu.core_type = #tpu.core_type<tc>} {
    %c0 = arith.constant 0 : index
    %c0_0 = arith.constant 0 : index
    %0 = vector.load %arg0[%c0, %c0_0] : memref<512x16xbf16, #tpu.memory_space<vmem>>, vector<512x16xbf16>
    %c0_1 = arith.constant 0 : index
    %c0_2 = arith.constant 0 : index
    %1 = vector.load %arg1[%c0_1, %c0_2] : memref<16x64xbf16, #tpu.memory_space<vmem>>, vector<16x64xbf16>
    %cst = arith.constant dense<0.000000e+00> : vector<512x64xf32>
    %2 = tpu.matmul %0, %1, %cst {dimension_numbers = #tpu.dot_dimension_numbers<[1], [0], [0], [1], [0, 0, 1, 1], [], []>} : vector<512x16xbf16>, vector<16x64xbf16>, vector<512x64xf32> -> vector<512x64xf32>
    %cst_3 = arith.constant dense<0.000000e+00> : vector<64xf32>
    %3 = vector.multi_reduction <add>, %2, %cst_3 [0] : vector<512x64xf32> to vector<64xf32>
    %4 = vector.shape_cast %3 : vector<64xf32> to vector<1x64xf32>
    %cst_4 = arith.constant 0.001953125 : f32
    %5 = vector.broadcast %cst_4 : f32 to vector<1x64xf32>
    %6 = arith.mulf %4, %5 : vector<1x64xf32>
    %7 = arith.mulf %2, %2 : vector<512x64xf32>
    %cst_5 = arith.constant dense<0.000000e+00> : vector<64xf32>
    %8 = vector.multi_reduction <add>, %7, %cst_5 [0] : vector<512x64xf32> to vector<64xf32>
    %9 = vector.shape_cast %8 : vector<64xf32> to vector<1x64xf32>
    %cst_6 = arith.constant 0.001953125 : f32
    %10 = vector.broadcast %cst_6 : f32 to vector<1x64xf32>
    %11 = arith.mulf %9, %10 : vector<1x64xf32>
    %12 = arith.mulf %6, %6 : vector<1x64xf32>
    %13 = arith.subf %11, %12 : vector<1x64xf32>
    %cst_7 = arith.constant 0.000000e+00 : f32
    %14 = vector.broadcast %cst_7 : f32 to vector<1x64xf32>
    %15 = arith.maximumf %13, %14 : vector<1x64xf32>
    %c0_8 = arith.constant 0 : index
    %c0_9 = arith.constant 0 : index
    %16 = vector.load %arg2[%c0_8, %c0_9] : memref<1x64xf32, #tpu.memory_space<vmem>>, vector<1x64xf32>
    %cst_10 = arith.constant 9.99999974E-6 : f32
    %17 = vector.broadcast %cst_10 : f32 to vector<1x64xf32>
    %18 = arith.addf %15, %17 : vector<1x64xf32>
    %19 = math.rsqrt %18 : vector<1x64xf32>
    %20 = arith.mulf %16, %19 : vector<1x64xf32>
    %c0_11 = arith.constant 0 : index
    %c0_12 = arith.constant 0 : index
    %21 = vector.load %arg3[%c0_11, %c0_12] : memref<1x64xf32, #tpu.memory_space<vmem>>, vector<1x64xf32>
    %22 = arith.mulf %6, %20 : vector<1x64xf32>
    %23 = arith.subf %21, %22 : vector<1x64xf32>
    %24 = vector.broadcast %20 : vector<1x64xf32> to vector<512x64xf32>
    %25 = arith.mulf %2, %24 : vector<512x64xf32>
    %26 = vector.broadcast %23 : vector<1x64xf32> to vector<512x64xf32>
    %27 = arith.addf %25, %26 : vector<512x64xf32>
    %28 = arith.truncf %27 : vector<512x64xf32> to vector<512x64xbf16>
    %c0_13 = arith.constant 0 : index
    %c0_14 = arith.constant 0 : index
    %29 = vector.load %arg4[%c0_13, %c0_14] : memref<512x64xbf16, #tpu.memory_space<vmem>>, vector<512x64xbf16>
    tpu.vector_store %arg4[%c0_13, %c0_14], %28 {strides = array<i32>} : memref<512x64xbf16, #tpu.memory_space<vmem>>, vector<512x64xbf16>,
    return
  }
}

module attributes {stable_mosaic.version = 11 : i64} {
  func.func @_conv_bn_res_kernel(%arg0: memref<512x16xbf16, #tpu.memory_space<vmem>>, %arg1: memref<16x64xbf16, #tpu.memory_space<vmem>>, %arg2: memref<512x64xbf16, #tpu.memory_space<vmem>>, %arg3: memref<1x64xf32, #tpu.memory_space<vmem>>, %arg4: memref<1x64xf32, #tpu.memory_space<vmem>>, %arg5: memref<512x64xbf16, #tpu.memory_space<vmem>>) attributes {dimension_semantics = [], scalar_prefetch = 0 : i64, scratch_operands = 0 : i64, tpu.core_type = #tpu.core_type<tc>} {
    %c0 = arith.constant 0 : index
    %c0_0 = arith.constant 0 : index
    %0 = vector.load %arg0[%c0, %c0_0] : memref<512x16xbf16, #tpu.memory_space<vmem>>, vector<512x16xbf16>
    %c0_1 = arith.constant 0 : index
    %c0_2 = arith.constant 0 : index
    %1 = vector.load %arg1[%c0_1, %c0_2] : memref<16x64xbf16, #tpu.memory_space<vmem>>, vector<16x64xbf16>
    %cst = arith.constant dense<0.000000e+00> : vector<512x64xf32>
    %2 = tpu.matmul %0, %1, %cst {dimension_numbers = #tpu.dot_dimension_numbers<[1], [0], [0], [1], [0, 0, 1, 1], [], []>} : vector<512x16xbf16>, vector<16x64xbf16>, vector<512x64xf32> -> vector<512x64xf32>
    %cst_3 = arith.constant dense<0.000000e+00> : vector<64xf32>
    %3 = vector.multi_reduction <add>, %2, %cst_3 [0] : vector<512x64xf32> to vector<64xf32>
    %4 = vector.shape_cast %3 : vector<64xf32> to vector<1x64xf32>
    %cst_4 = arith.constant 0.001953125 : f32
    %5 = vector.broadcast %cst_4 : f32 to vector<1x64xf32>
    %6 = arith.mulf %4, %5 : vector<1x64xf32>
    %7 = arith.mulf %2, %2 : vector<512x64xf32>
    %cst_5 = arith.constant dense<0.000000e+00> : vector<64xf32>
    %8 = vector.multi_reduction <add>, %7, %cst_5 [0] : vector<512x64xf32> to vector<64xf32>
    %9 = vector.shape_cast %8 : vector<64xf32> to vector<1x64xf32>
    %cst_6 = arith.constant 0.001953125 : f32
    %10 = vector.broadcast %cst_6 : f32 to vector<1x64xf32>
    %11 = arith.mulf %9, %10 : vector<1x64xf32>
    %12 = arith.mulf %6, %6 : vector<1x64xf32>
    %13 = arith.subf %11, %12 : vector<1x64xf32>
    %cst_7 = arith.constant 0.000000e+00 : f32
    %14 = vector.broadcast %cst_7 : f32 to vector<1x64xf32>
    %15 = arith.maximumf %13, %14 : vector<1x64xf32>
    %c0_8 = arith.constant 0 : index
    %c0_9 = arith.constant 0 : index
    %16 = vector.load %arg3[%c0_8, %c0_9] : memref<1x64xf32, #tpu.memory_space<vmem>>, vector<1x64xf32>
    %cst_10 = arith.constant 9.99999974E-6 : f32
    %17 = vector.broadcast %cst_10 : f32 to vector<1x64xf32>
    %18 = arith.addf %15, %17 : vector<1x64xf32>
    %19 = math.rsqrt %18 : vector<1x64xf32>
    %20 = arith.mulf %16, %19 : vector<1x64xf32>
    %c0_11 = arith.constant 0 : index
    %c0_12 = arith.constant 0 : index
    %21 = vector.load %arg4[%c0_11, %c0_12] : memref<1x64xf32, #tpu.memory_space<vmem>>, vector<1x64xf32>
    %22 = arith.mulf %6, %20 : vector<1x64xf32>
    %23 = arith.subf %21, %22 : vector<1x64xf32>
    %24 = vector.broadcast %20 : vector<1x64xf32> to vector<512x64xf32>
    %25 = arith.mulf %2, %24 : vector<512x64xf32>
    %26 = vector.broadcast %23 : vector<1x64xf32> to vector<512x64xf32>
    %27 = arith.addf %25, %26 : vector<512x64xf32>
    %c0_13 = arith.constant 0 : index
    %c0_14 = arith.constant 0 : index
    %28 = vector.load %arg2[%c0_13, %c0_14] : memref<512x64xbf16, #tpu.memory_space<vmem>>, vector<512x64xbf16>
    %29 = arith.extf %28 : vector<512x64xbf16> to vector<512x64xf32>
    %30 = arith.addf %27, %29 : vector<512x64xf32>
    %cst_15 = arith.constant 0.000000e+00 : f32
    %31 = vector.broadcast %cst_15 : f32 to vector<512x64xf32>
    %32 = arith.maximumf %30, %31 : vector<512x64xf32>
    %33 = arith.truncf %32 : vector<512x64xf32> to vector<512x64xbf16>
    %c0_16 = arith.constant 0 : index
    %c0_17 = arith.constant 0 : index
    %34 = vector.load %arg5[%c0_16, %c0_17] : memref<512x64xbf16, #tpu.memory_space<vmem>>, vector<512x64xbf16>
    tpu.vector_store %arg5[%c0_16, %c0_17], %33 {strides = array<i32>} : memref<512x64xbf16, #tpu.memory_space<vmem>>, vector<512x64xbf16>,
    return
  }
}

module attributes {stable_mosaic.version = 11 : i64} {
  func.func @_conv_bn_kernel(%arg0: memref<512x64xbf16, #tpu.memory_space<vmem>>, %arg1: memref<64x16xbf16, #tpu.memory_space<vmem>>, %arg2: memref<1x16xf32, #tpu.memory_space<vmem>>, %arg3: memref<1x16xf32, #tpu.memory_space<vmem>>, %arg4: memref<512x16xbf16, #tpu.memory_space<vmem>>) attributes {dimension_semantics = [], scalar_prefetch = 0 : i64, scratch_operands = 0 : i64, tpu.core_type = #tpu.core_type<tc>} {
    %c0 = arith.constant 0 : index
    %c0_0 = arith.constant 0 : index
    %0 = vector.load %arg0[%c0, %c0_0] : memref<512x64xbf16, #tpu.memory_space<vmem>>, vector<512x64xbf16>
    %c0_1 = arith.constant 0 : index
    %c0_2 = arith.constant 0 : index
    %1 = vector.load %arg1[%c0_1, %c0_2] : memref<64x16xbf16, #tpu.memory_space<vmem>>, vector<64x16xbf16>
    %cst = arith.constant dense<0.000000e+00> : vector<512x16xf32>
    %2 = tpu.matmul %0, %1, %cst {dimension_numbers = #tpu.dot_dimension_numbers<[1], [0], [0], [1], [0, 0, 1, 1], [], []>} : vector<512x64xbf16>, vector<64x16xbf16>, vector<512x16xf32> -> vector<512x16xf32>
    %cst_3 = arith.constant dense<0.000000e+00> : vector<16xf32>
    %3 = vector.multi_reduction <add>, %2, %cst_3 [0] : vector<512x16xf32> to vector<16xf32>
    %4 = vector.shape_cast %3 : vector<16xf32> to vector<1x16xf32>
    %cst_4 = arith.constant 0.001953125 : f32
    %5 = vector.broadcast %cst_4 : f32 to vector<1x16xf32>
    %6 = arith.mulf %4, %5 : vector<1x16xf32>
    %7 = arith.mulf %2, %2 : vector<512x16xf32>
    %cst_5 = arith.constant dense<0.000000e+00> : vector<16xf32>
    %8 = vector.multi_reduction <add>, %7, %cst_5 [0] : vector<512x16xf32> to vector<16xf32>
    %9 = vector.shape_cast %8 : vector<16xf32> to vector<1x16xf32>
    %cst_6 = arith.constant 0.001953125 : f32
    %10 = vector.broadcast %cst_6 : f32 to vector<1x16xf32>
    %11 = arith.mulf %9, %10 : vector<1x16xf32>
    %12 = arith.mulf %6, %6 : vector<1x16xf32>
    %13 = arith.subf %11, %12 : vector<1x16xf32>
    %cst_7 = arith.constant 0.000000e+00 : f32
    %14 = vector.broadcast %cst_7 : f32 to vector<1x16xf32>
    %15 = arith.maximumf %13, %14 : vector<1x16xf32>
    %c0_8 = arith.constant 0 : index
    %c0_9 = arith.constant 0 : index
    %16 = vector.load %arg2[%c0_8, %c0_9] : memref<1x16xf32, #tpu.memory_space<vmem>>, vector<1x16xf32>
    %cst_10 = arith.constant 9.99999974E-6 : f32
    %17 = vector.broadcast %cst_10 : f32 to vector<1x16xf32>
    %18 = arith.addf %15, %17 : vector<1x16xf32>
    %19 = math.rsqrt %18 : vector<1x16xf32>
    %20 = arith.mulf %16, %19 : vector<1x16xf32>
    %c0_11 = arith.constant 0 : index
    %c0_12 = arith.constant 0 : index
    %21 = vector.load %arg3[%c0_11, %c0_12] : memref<1x16xf32, #tpu.memory_space<vmem>>, vector<1x16xf32>
    %22 = arith.mulf %6, %20 : vector<1x16xf32>
    %23 = arith.subf %21, %22 : vector<1x16xf32>
    %24 = vector.broadcast %20 : vector<1x16xf32> to vector<512x16xf32>
    %25 = arith.mulf %2, %24 : vector<512x16xf32>
    %26 = vector.broadcast %23 : vector<1x16xf32> to vector<512x16xf32>
    %27 = arith.addf %25, %26 : vector<512x16xf32>
    %cst_13 = arith.constant 0.000000e+00 : f32
    %28 = vector.broadcast %cst_13 : f32 to vector<512x16xf32>
    %29 = arith.maximumf %27, %28 : vector<512x16xf32>
    %30 = arith.truncf %29 : vector<512x16xf32> to vector<512x16xbf16>
    %c0_14 = arith.constant 0 : index
    %c0_15 = arith.constant 0 : index
    %31 = vector.load %arg4[%c0_14, %c0_15] : memref<512x16xbf16, #tpu.memory_space<vmem>>, vector<512x16xbf16>
    tpu.vector_store %arg4[%c0_14, %c0_15], %30 {strides = array<i32>} : memref<512x16xbf16, #tpu.memory_space<vmem>>, vector<512x16xbf16>,
    return
  }
}

module attributes {stable_mosaic.version = 11 : i64} {
  func.func @_conv_bn_kernel(%arg0: memref<128x64xbf16, #tpu.memory_space<vmem>>, %arg1: memref<64x32xbf16, #tpu.memory_space<vmem>>, %arg2: memref<1x32xf32, #tpu.memory_space<vmem>>, %arg3: memref<1x32xf32, #tpu.memory_space<vmem>>, %arg4: memref<128x32xbf16, #tpu.memory_space<vmem>>) attributes {dimension_semantics = [], scalar_prefetch = 0 : i64, scratch_operands = 0 : i64, tpu.core_type = #tpu.core_type<tc>} {
    %c0 = arith.constant 0 : index
    %c0_0 = arith.constant 0 : index
    %0 = vector.load %arg0[%c0, %c0_0] : memref<128x64xbf16, #tpu.memory_space<vmem>>, vector<128x64xbf16>
    %c0_1 = arith.constant 0 : index
    %c0_2 = arith.constant 0 : index
    %1 = vector.load %arg1[%c0_1, %c0_2] : memref<64x32xbf16, #tpu.memory_space<vmem>>, vector<64x32xbf16>
    %cst = arith.constant dense<0.000000e+00> : vector<128x32xf32>
    %2 = tpu.matmul %0, %1, %cst {dimension_numbers = #tpu.dot_dimension_numbers<[1], [0], [0], [1], [0, 0, 1, 1], [], []>} : vector<128x64xbf16>, vector<64x32xbf16>, vector<128x32xf32> -> vector<128x32xf32>
    %cst_3 = arith.constant dense<0.000000e+00> : vector<32xf32>
    %3 = vector.multi_reduction <add>, %2, %cst_3 [0] : vector<128x32xf32> to vector<32xf32>
    %4 = vector.shape_cast %3 : vector<32xf32> to vector<1x32xf32>
    %cst_4 = arith.constant 7.812500e-03 : f32
    %5 = vector.broadcast %cst_4 : f32 to vector<1x32xf32>
    %6 = arith.mulf %4, %5 : vector<1x32xf32>
    %7 = arith.mulf %2, %2 : vector<128x32xf32>
    %cst_5 = arith.constant dense<0.000000e+00> : vector<32xf32>
    %8 = vector.multi_reduction <add>, %7, %cst_5 [0] : vector<128x32xf32> to vector<32xf32>
    %9 = vector.shape_cast %8 : vector<32xf32> to vector<1x32xf32>
    %cst_6 = arith.constant 7.812500e-03 : f32
    %10 = vector.broadcast %cst_6 : f32 to vector<1x32xf32>
    %11 = arith.mulf %9, %10 : vector<1x32xf32>
    %12 = arith.mulf %6, %6 : vector<1x32xf32>
    %13 = arith.subf %11, %12 : vector<1x32xf32>
    %cst_7 = arith.constant 0.000000e+00 : f32
    %14 = vector.broadcast %cst_7 : f32 to vector<1x32xf32>
    %15 = arith.maximumf %13, %14 : vector<1x32xf32>
    %c0_8 = arith.constant 0 : index
    %c0_9 = arith.constant 0 : index
    %16 = vector.load %arg2[%c0_8, %c0_9] : memref<1x32xf32, #tpu.memory_space<vmem>>, vector<1x32xf32>
    %cst_10 = arith.constant 9.99999974E-6 : f32
    %17 = vector.broadcast %cst_10 : f32 to vector<1x32xf32>
    %18 = arith.addf %15, %17 : vector<1x32xf32>
    %19 = math.rsqrt %18 : vector<1x32xf32>
    %20 = arith.mulf %16, %19 : vector<1x32xf32>
    %c0_11 = arith.constant 0 : index
    %c0_12 = arith.constant 0 : index
    %21 = vector.load %arg3[%c0_11, %c0_12] : memref<1x32xf32, #tpu.memory_space<vmem>>, vector<1x32xf32>
    %22 = arith.mulf %6, %20 : vector<1x32xf32>
    %23 = arith.subf %21, %22 : vector<1x32xf32>
    %24 = vector.broadcast %20 : vector<1x32xf32> to vector<128x32xf32>
    %25 = arith.mulf %2, %24 : vector<128x32xf32>
    %26 = vector.broadcast %23 : vector<1x32xf32> to vector<128x32xf32>
    %27 = arith.addf %25, %26 : vector<128x32xf32>
    %cst_13 = arith.constant 0.000000e+00 : f32
    %28 = vector.broadcast %cst_13 : f32 to vector<128x32xf32>
    %29 = arith.maximumf %27, %28 : vector<128x32xf32>
    %30 = arith.truncf %29 : vector<128x32xf32> to vector<128x32xbf16>
    %c0_14 = arith.constant 0 : index
    %c0_15 = arith.constant 0 : index
    %31 = vector.load %arg4[%c0_14, %c0_15] : memref<128x32xbf16, #tpu.memory_space<vmem>>, vector<128x32xbf16>
    tpu.vector_store %arg4[%c0_14, %c0_15], %30 {strides = array<i32>} : memref<128x32xbf16, #tpu.memory_space<vmem>>, vector<128x32xbf16>,
    return
  }
}

module attributes {stable_mosaic.version = 11 : i64} {
  func.func @_conv_bn_kernel(%arg0: memref<128x288xbf16, #tpu.memory_space<vmem>>, %arg1: memref<288x32xbf16, #tpu.memory_space<vmem>>, %arg2: memref<1x32xf32, #tpu.memory_space<vmem>>, %arg3: memref<1x32xf32, #tpu.memory_space<vmem>>, %arg4: memref<128x32xbf16, #tpu.memory_space<vmem>>) attributes {dimension_semantics = [], scalar_prefetch = 0 : i64, scratch_operands = 0 : i64, tpu.core_type = #tpu.core_type<tc>} {
    %c0 = arith.constant 0 : index
    %c0_0 = arith.constant 0 : index
    %0 = vector.load %arg0[%c0, %c0_0] : memref<128x288xbf16, #tpu.memory_space<vmem>>, vector<128x288xbf16>
    %c0_1 = arith.constant 0 : index
    %c0_2 = arith.constant 0 : index
    %1 = vector.load %arg1[%c0_1, %c0_2] : memref<288x32xbf16, #tpu.memory_space<vmem>>, vector<288x32xbf16>
    %cst = arith.constant dense<0.000000e+00> : vector<128x32xf32>
    %2 = tpu.matmul %0, %1, %cst {dimension_numbers = #tpu.dot_dimension_numbers<[1], [0], [0], [1], [0, 0, 1, 1], [], []>} : vector<128x288xbf16>, vector<288x32xbf16>, vector<128x32xf32> -> vector<128x32xf32>
    %cst_3 = arith.constant dense<0.000000e+00> : vector<32xf32>
    %3 = vector.multi_reduction <add>, %2, %cst_3 [0] : vector<128x32xf32> to vector<32xf32>
    %4 = vector.shape_cast %3 : vector<32xf32> to vector<1x32xf32>
    %cst_4 = arith.constant 7.812500e-03 : f32
    %5 = vector.broadcast %cst_4 : f32 to vector<1x32xf32>
    %6 = arith.mulf %4, %5 : vector<1x32xf32>
    %7 = arith.mulf %2, %2 : vector<128x32xf32>
    %cst_5 = arith.constant dense<0.000000e+00> : vector<32xf32>
    %8 = vector.multi_reduction <add>, %7, %cst_5 [0] : vector<128x32xf32> to vector<32xf32>
    %9 = vector.shape_cast %8 : vector<32xf32> to vector<1x32xf32>
    %cst_6 = arith.constant 7.812500e-03 : f32
    %10 = vector.broadcast %cst_6 : f32 to vector<1x32xf32>
    %11 = arith.mulf %9, %10 : vector<1x32xf32>
    %12 = arith.mulf %6, %6 : vector<1x32xf32>
    %13 = arith.subf %11, %12 : vector<1x32xf32>
    %cst_7 = arith.constant 0.000000e+00 : f32
    %14 = vector.broadcast %cst_7 : f32 to vector<1x32xf32>
    %15 = arith.maximumf %13, %14 : vector<1x32xf32>
    %c0_8 = arith.constant 0 : index
    %c0_9 = arith.constant 0 : index
    %16 = vector.load %arg2[%c0_8, %c0_9] : memref<1x32xf32, #tpu.memory_space<vmem>>, vector<1x32xf32>
    %cst_10 = arith.constant 9.99999974E-6 : f32
    %17 = vector.broadcast %cst_10 : f32 to vector<1x32xf32>
    %18 = arith.addf %15, %17 : vector<1x32xf32>
    %19 = math.rsqrt %18 : vector<1x32xf32>
    %20 = arith.mulf %16, %19 : vector<1x32xf32>
    %c0_11 = arith.constant 0 : index
    %c0_12 = arith.constant 0 : index
    %21 = vector.load %arg3[%c0_11, %c0_12] : memref<1x32xf32, #tpu.memory_space<vmem>>, vector<1x32xf32>
    %22 = arith.mulf %6, %20 : vector<1x32xf32>
    %23 = arith.subf %21, %22 : vector<1x32xf32>
    %24 = vector.broadcast %20 : vector<1x32xf32> to vector<128x32xf32>
    %25 = arith.mulf %2, %24 : vector<128x32xf32>
    %26 = vector.broadcast %23 : vector<1x32xf32> to vector<128x32xf32>
    %27 = arith.addf %25, %26 : vector<128x32xf32>
    %cst_13 = arith.constant 0.000000e+00 : f32
    %28 = vector.broadcast %cst_13 : f32 to vector<128x32xf32>
    %29 = arith.maximumf %27, %28 : vector<128x32xf32>
    %30 = arith.truncf %29 : vector<128x32xf32> to vector<128x32xbf16>
    %c0_14 = arith.constant 0 : index
    %c0_15 = arith.constant 0 : index
    %31 = vector.load %arg4[%c0_14, %c0_15] : memref<128x32xbf16, #tpu.memory_space<vmem>>, vector<128x32xbf16>
    tpu.vector_store %arg4[%c0_14, %c0_15], %30 {strides = array<i32>} : memref<128x32xbf16, #tpu.memory_space<vmem>>, vector<128x32xbf16>,
    return
  }
}

module attributes {stable_mosaic.version = 11 : i64} {
  func.func @_conv_bn_kernel(%arg0: memref<128x64xbf16, #tpu.memory_space<vmem>>, %arg1: memref<64x128xbf16, #tpu.memory_space<vmem>>, %arg2: memref<1x128xf32, #tpu.memory_space<vmem>>, %arg3: memref<1x128xf32, #tpu.memory_space<vmem>>, %arg4: memref<128x128xbf16, #tpu.memory_space<vmem>>) attributes {dimension_semantics = [], scalar_prefetch = 0 : i64, scratch_operands = 0 : i64, tpu.core_type = #tpu.core_type<tc>} {
    %c0 = arith.constant 0 : index
    %c0_0 = arith.constant 0 : index
    %0 = vector.load %arg0[%c0, %c0_0] : memref<128x64xbf16, #tpu.memory_space<vmem>>, vector<128x64xbf16>
    %c0_1 = arith.constant 0 : index
    %c0_2 = arith.constant 0 : index
    %1 = vector.load %arg1[%c0_1, %c0_2] : memref<64x128xbf16, #tpu.memory_space<vmem>>, vector<64x128xbf16>
    %cst = arith.constant dense<0.000000e+00> : vector<128x128xf32>
    %2 = tpu.matmul %0, %1, %cst {dimension_numbers = #tpu.dot_dimension_numbers<[1], [0], [0], [1], [0, 0, 1, 1], [], []>} : vector<128x64xbf16>, vector<64x128xbf16>, vector<128x128xf32> -> vector<128x128xf32>
    %cst_3 = arith.constant dense<0.000000e+00> : vector<128xf32>
    %3 = vector.multi_reduction <add>, %2, %cst_3 [0] : vector<128x128xf32> to vector<128xf32>
    %4 = vector.shape_cast %3 : vector<128xf32> to vector<1x128xf32>
    %cst_4 = arith.constant 7.812500e-03 : f32
    %5 = vector.broadcast %cst_4 : f32 to vector<1x128xf32>
    %6 = arith.mulf %4, %5 : vector<1x128xf32>
    %7 = arith.mulf %2, %2 : vector<128x128xf32>
    %cst_5 = arith.constant dense<0.000000e+00> : vector<128xf32>
    %8 = vector.multi_reduction <add>, %7, %cst_5 [0] : vector<128x128xf32> to vector<128xf32>
    %9 = vector.shape_cast %8 : vector<128xf32> to vector<1x128xf32>
    %cst_6 = arith.constant 7.812500e-03 : f32
    %10 = vector.broadcast %cst_6 : f32 to vector<1x128xf32>
    %11 = arith.mulf %9, %10 : vector<1x128xf32>
    %12 = arith.mulf %6, %6 : vector<1x128xf32>
    %13 = arith.subf %11, %12 : vector<1x128xf32>
    %cst_7 = arith.constant 0.000000e+00 : f32
    %14 = vector.broadcast %cst_7 : f32 to vector<1x128xf32>
    %15 = arith.maximumf %13, %14 : vector<1x128xf32>
    %c0_8 = arith.constant 0 : index
    %c0_9 = arith.constant 0 : index
    %16 = vector.load %arg2[%c0_8, %c0_9] : memref<1x128xf32, #tpu.memory_space<vmem>>, vector<1x128xf32>
    %cst_10 = arith.constant 9.99999974E-6 : f32
    %17 = vector.broadcast %cst_10 : f32 to vector<1x128xf32>
    %18 = arith.addf %15, %17 : vector<1x128xf32>
    %19 = math.rsqrt %18 : vector<1x128xf32>
    %20 = arith.mulf %16, %19 : vector<1x128xf32>
    %c0_11 = arith.constant 0 : index
    %c0_12 = arith.constant 0 : index
    %21 = vector.load %arg3[%c0_11, %c0_12] : memref<1x128xf32, #tpu.memory_space<vmem>>, vector<1x128xf32>
    %22 = arith.mulf %6, %20 : vector<1x128xf32>
    %23 = arith.subf %21, %22 : vector<1x128xf32>
    %24 = vector.broadcast %20 : vector<1x128xf32> to vector<128x128xf32>
    %25 = arith.mulf %2, %24 : vector<128x128xf32>
    %26 = vector.broadcast %23 : vector<1x128xf32> to vector<128x128xf32>
    %27 = arith.addf %25, %26 : vector<128x128xf32>
    %28 = arith.truncf %27 : vector<128x128xf32> to vector<128x128xbf16>
    %c0_13 = arith.constant 0 : index
    %c0_14 = arith.constant 0 : index
    %29 = vector.load %arg4[%c0_13, %c0_14] : memref<128x128xbf16, #tpu.memory_space<vmem>>, vector<128x128xbf16>
    tpu.vector_store %arg4[%c0_13, %c0_14], %28 {strides = array<i32>} : memref<128x128xbf16, #tpu.memory_space<vmem>>, vector<128x128xbf16>,
    return
  }
}

module attributes {stable_mosaic.version = 11 : i64} {
  func.func @_conv_bn_res_kernel(%arg0: memref<128x32xbf16, #tpu.memory_space<vmem>>, %arg1: memref<32x128xbf16, #tpu.memory_space<vmem>>, %arg2: memref<128x128xbf16, #tpu.memory_space<vmem>>, %arg3: memref<1x128xf32, #tpu.memory_space<vmem>>, %arg4: memref<1x128xf32, #tpu.memory_space<vmem>>, %arg5: memref<128x128xbf16, #tpu.memory_space<vmem>>) attributes {dimension_semantics = [], scalar_prefetch = 0 : i64, scratch_operands = 0 : i64, tpu.core_type = #tpu.core_type<tc>} {
    %c0 = arith.constant 0 : index
    %c0_0 = arith.constant 0 : index
    %0 = vector.load %arg0[%c0, %c0_0] : memref<128x32xbf16, #tpu.memory_space<vmem>>, vector<128x32xbf16>
    %c0_1 = arith.constant 0 : index
    %c0_2 = arith.constant 0 : index
    %1 = vector.load %arg1[%c0_1, %c0_2] : memref<32x128xbf16, #tpu.memory_space<vmem>>, vector<32x128xbf16>
    %cst = arith.constant dense<0.000000e+00> : vector<128x128xf32>
    %2 = tpu.matmul %0, %1, %cst {dimension_numbers = #tpu.dot_dimension_numbers<[1], [0], [0], [1], [0, 0, 1, 1], [], []>} : vector<128x32xbf16>, vector<32x128xbf16>, vector<128x128xf32> -> vector<128x128xf32>
    %cst_3 = arith.constant dense<0.000000e+00> : vector<128xf32>
    %3 = vector.multi_reduction <add>, %2, %cst_3 [0] : vector<128x128xf32> to vector<128xf32>
    %4 = vector.shape_cast %3 : vector<128xf32> to vector<1x128xf32>
    %cst_4 = arith.constant 7.812500e-03 : f32
    %5 = vector.broadcast %cst_4 : f32 to vector<1x128xf32>
    %6 = arith.mulf %4, %5 : vector<1x128xf32>
    %7 = arith.mulf %2, %2 : vector<128x128xf32>
    %cst_5 = arith.constant dense<0.000000e+00> : vector<128xf32>
    %8 = vector.multi_reduction <add>, %7, %cst_5 [0] : vector<128x128xf32> to vector<128xf32>
    %9 = vector.shape_cast %8 : vector<128xf32> to vector<1x128xf32>
    %cst_6 = arith.constant 7.812500e-03 : f32
    %10 = vector.broadcast %cst_6 : f32 to vector<1x128xf32>
    %11 = arith.mulf %9, %10 : vector<1x128xf32>
    %12 = arith.mulf %6, %6 : vector<1x128xf32>
    %13 = arith.subf %11, %12 : vector<1x128xf32>
    %cst_7 = arith.constant 0.000000e+00 : f32
    %14 = vector.broadcast %cst_7 : f32 to vector<1x128xf32>
    %15 = arith.maximumf %13, %14 : vector<1x128xf32>
    %c0_8 = arith.constant 0 : index
    %c0_9 = arith.constant 0 : index
    %16 = vector.load %arg3[%c0_8, %c0_9] : memref<1x128xf32, #tpu.memory_space<vmem>>, vector<1x128xf32>
    %cst_10 = arith.constant 9.99999974E-6 : f32
    %17 = vector.broadcast %cst_10 : f32 to vector<1x128xf32>
    %18 = arith.addf %15, %17 : vector<1x128xf32>
    %19 = math.rsqrt %18 : vector<1x128xf32>
    %20 = arith.mulf %16, %19 : vector<1x128xf32>
    %c0_11 = arith.constant 0 : index
    %c0_12 = arith.constant 0 : index
    %21 = vector.load %arg4[%c0_11, %c0_12] : memref<1x128xf32, #tpu.memory_space<vmem>>, vector<1x128xf32>
    %22 = arith.mulf %6, %20 : vector<1x128xf32>
    %23 = arith.subf %21, %22 : vector<1x128xf32>
    %24 = vector.broadcast %20 : vector<1x128xf32> to vector<128x128xf32>
    %25 = arith.mulf %2, %24 : vector<128x128xf32>
    %26 = vector.broadcast %23 : vector<1x128xf32> to vector<128x128xf32>
    %27 = arith.addf %25, %26 : vector<128x128xf32>
    %c0_13 = arith.constant 0 : index
    %c0_14 = arith.constant 0 : index
    %28 = vector.load %arg2[%c0_13, %c0_14] : memref<128x128xbf16, #tpu.memory_space<vmem>>, vector<128x128xbf16>
    %29 = arith.extf %28 : vector<128x128xbf16> to vector<128x128xf32>
    %30 = arith.addf %27, %29 : vector<128x128xf32>
    %cst_15 = arith.constant 0.000000e+00 : f32
    %31 = vector.broadcast %cst_15 : f32 to vector<128x128xf32>
    %32 = arith.maximumf %30, %31 : vector<128x128xf32>
    %33 = arith.truncf %32 : vector<128x128xf32> to vector<128x128xbf16>
    %c0_16 = arith.constant 0 : index
    %c0_17 = arith.constant 0 : index
    %34 = vector.load %arg5[%c0_16, %c0_17] : memref<128x128xbf16, #tpu.memory_space<vmem>>, vector<128x128xbf16>
    tpu.vector_store %arg5[%c0_16, %c0_17], %33 {strides = array<i32>} : memref<128x128xbf16, #tpu.memory_space<vmem>>, vector<128x128xbf16>,
    return
  }
}

module attributes {stable_mosaic.version = 11 : i64} {
  func.func @_conv_bn_kernel(%arg0: memref<128x128xbf16, #tpu.memory_space<vmem>>, %arg1: memref<128x32xbf16, #tpu.memory_space<vmem>>, %arg2: memref<1x32xf32, #tpu.memory_space<vmem>>, %arg3: memref<1x32xf32, #tpu.memory_space<vmem>>, %arg4: memref<128x32xbf16, #tpu.memory_space<vmem>>) attributes {dimension_semantics = [], scalar_prefetch = 0 : i64, scratch_operands = 0 : i64, tpu.core_type = #tpu.core_type<tc>} {
    %c0 = arith.constant 0 : index
    %c0_0 = arith.constant 0 : index
    %0 = vector.load %arg0[%c0, %c0_0] : memref<128x128xbf16, #tpu.memory_space<vmem>>, vector<128x128xbf16>
    %c0_1 = arith.constant 0 : index
    %c0_2 = arith.constant 0 : index
    %1 = vector.load %arg1[%c0_1, %c0_2] : memref<128x32xbf16, #tpu.memory_space<vmem>>, vector<128x32xbf16>
    %cst = arith.constant dense<0.000000e+00> : vector<128x32xf32>
    %2 = tpu.matmul %0, %1, %cst {dimension_numbers = #tpu.dot_dimension_numbers<[1], [0], [0], [1], [0, 0, 1, 1], [], []>} : vector<128x128xbf16>, vector<128x32xbf16>, vector<128x32xf32> -> vector<128x32xf32>
    %cst_3 = arith.constant dense<0.000000e+00> : vector<32xf32>
    %3 = vector.multi_reduction <add>, %2, %cst_3 [0] : vector<128x32xf32> to vector<32xf32>
    %4 = vector.shape_cast %3 : vector<32xf32> to vector<1x32xf32>
    %cst_4 = arith.constant 7.812500e-03 : f32
    %5 = vector.broadcast %cst_4 : f32 to vector<1x32xf32>
    %6 = arith.mulf %4, %5 : vector<1x32xf32>
    %7 = arith.mulf %2, %2 : vector<128x32xf32>
    %cst_5 = arith.constant dense<0.000000e+00> : vector<32xf32>
    %8 = vector.multi_reduction <add>, %7, %cst_5 [0] : vector<128x32xf32> to vector<32xf32>
    %9 = vector.shape_cast %8 : vector<32xf32> to vector<1x32xf32>
    %cst_6 = arith.constant 7.812500e-03 : f32
    %10 = vector.broadcast %cst_6 : f32 to vector<1x32xf32>
    %11 = arith.mulf %9, %10 : vector<1x32xf32>
    %12 = arith.mulf %6, %6 : vector<1x32xf32>
    %13 = arith.subf %11, %12 : vector<1x32xf32>
    %cst_7 = arith.constant 0.000000e+00 : f32
    %14 = vector.broadcast %cst_7 : f32 to vector<1x32xf32>
    %15 = arith.maximumf %13, %14 : vector<1x32xf32>
    %c0_8 = arith.constant 0 : index
    %c0_9 = arith.constant 0 : index
    %16 = vector.load %arg2[%c0_8, %c0_9] : memref<1x32xf32, #tpu.memory_space<vmem>>, vector<1x32xf32>
    %cst_10 = arith.constant 9.99999974E-6 : f32
    %17 = vector.broadcast %cst_10 : f32 to vector<1x32xf32>
    %18 = arith.addf %15, %17 : vector<1x32xf32>
    %19 = math.rsqrt %18 : vector<1x32xf32>
    %20 = arith.mulf %16, %19 : vector<1x32xf32>
    %c0_11 = arith.constant 0 : index
    %c0_12 = arith.constant 0 : index
    %21 = vector.load %arg3[%c0_11, %c0_12] : memref<1x32xf32, #tpu.memory_space<vmem>>, vector<1x32xf32>
    %22 = arith.mulf %6, %20 : vector<1x32xf32>
    %23 = arith.subf %21, %22 : vector<1x32xf32>
    %24 = vector.broadcast %20 : vector<1x32xf32> to vector<128x32xf32>
    %25 = arith.mulf %2, %24 : vector<128x32xf32>
    %26 = vector.broadcast %23 : vector<1x32xf32> to vector<128x32xf32>
    %27 = arith.addf %25, %26 : vector<128x32xf32>
    %cst_13 = arith.constant 0.000000e+00 : f32
    %28 = vector.broadcast %cst_13 : f32 to vector<128x32xf32>
    %29 = arith.maximumf %27, %28 : vector<128x32xf32>
    %30 = arith.truncf %29 : vector<128x32xf32> to vector<128x32xbf16>
    %c0_14 = arith.constant 0 : index
    %c0_15 = arith.constant 0 : index
    %31 = vector.load %arg4[%c0_14, %c0_15] : memref<128x32xbf16, #tpu.memory_space<vmem>>, vector<128x32xbf16>
    tpu.vector_store %arg4[%c0_14, %c0_15], %30 {strides = array<i32>} : memref<128x32xbf16, #tpu.memory_space<vmem>>, vector<128x32xbf16>,
    return
  }
}

</mosaic_0001>

<bundles_post_ra>
// kernel: shared_layers_forward.75
= control target key start
LH: loop header
LB: loop body
LE: loop exit
PB: predicated region body
PF: predicated region fallthrough
CT: control target
= control target key end

     0   :  { %vm354_vm0 = vcmask 1044480   ;;  %vm355_vm1 = vcmask 1045504   ;;  %vm257_vm2 = vcmask 220160   ;;  %v1859_v1 = vmov 65535   ;;  %s3517_s1 = inlined_call_operand.vmem [shape: bf16[27,16], index: 1, kind: input, shape index: {}]   ;;  %s3518_s0 = inlined_call_operand.vmem [shape: bf16[512,27], index: 0, kind: input, shape index: {}]   ;;  %s3519_s2 = inlined_call_operand.vmem [shape: f32[1,16], index: 2, kind: input, shape index: {}]   ;;  %s3520_s3 = inlined_call_operand.vmem [shape: f32[1,16], index: 3, kind: input, shape index: {}]   ;;  %s3521_s4 = inlined_call_operand.vmem [shape: bf16[512,16], index: 4, kind: output, shape index: {}]  }
   0x1   :  { %v1823_v0 = vld [vmem:[%s3517_s1] sm:$0xff]   ;;  %v356_v2 = vsel %vm354_vm0, 4294967295, %v1859_v1  ;;  %v1824_v3 = vld [vmem:[%s3517_s1 + $0x8] sm:$0x3f]   ;;  %v1827_v8 = vld [vmem:[%s3518_s0 + $0x10] sm:$0xff]   ;;  %vm650_vm3 = vcmask 130048  }
   0x2   :  { %1750 = vmatprep.subr.bf16.mxu0 %v1823_v0  ;;  %v357_v4 = vsel %vm355_vm1, %v356_v2, 0  ;;  %v1825_v5 = vld [vmem:[%s3518_s0] sm:$0xff]   ;;  %1818 = vmatprep.subr.bf16.mxu1 %v1823_v0  ;;  %v1826_v7 = vld [vmem:[%s3518_s0 + $0x8] sm:$0xff]   ;;  %v1828_v9 = vld [vmem:[%s3518_s0 + $0x18] sm:$0xff]   ;;  %vm1453_vm4 = vcmask 125952  }
   0x3   :  { %1751 = vmatpush3.bf16.msra.mxu0 %v1823_v0  ;;  %v359_v6 = vand.u32 %v1824_v3, %v357_v4  ;;  %1820 = vmatpush3.bf16.msra.mxu1 %v1823_v0  ;;  %v1829_v10 = vld [vmem:[%s3518_s0 + $0x20] sm:$0xff]   ;;  %v1842_v12 = vld [vmem:[%s3518_s0 + $0x88] sm:$0xff]   ;;  %v1843_v13 = vld [vmem:[%s3518_s0 + $0x90] sm:$0xff]  }
   0x4   :  { %1754 = vmatprep.mubr.msk.bf16.mxu0 %vm257_vm2, %v1825_v5  ;;  %v1841_v11 = vld [vmem:[%s3518_s0 + $0x80] sm:$0xff]   ;;  %v1830_v14 = vld [vmem:[%s3518_s0 + $0x28] sm:$0xff]   ;;  %v1831_v15 = vld [vmem:[%s3518_s0 + $0x30] sm:$0xff]  }
   0x5   :  { %1752 = vmatprep.subr.bf16.mxu0 %v359_v6  ;;  %1819 = vmatprep.subr.bf16.mxu1 %v359_v6  ;;  %v1844_v16 = vld [vmem:[%s3518_s0 + $0x98] sm:$0xff]   ;;  %v1845_v17 = vld [vmem:[%s3518_s0 + $0xa0] sm:$0xff]   ;;  %v1846_v20 = vld [vmem:[%s3518_s0 + $0xa8] sm:$0xff]  }
   0x6   :  { %1786 = vmatprep.mubr.msk.bf16.mxu1 %vm257_vm2, %v1841_v11  ;;  %v1832_v18 = vld [vmem:[%s3518_s0 + $0x38] sm:$0xff]   ;;  %v1833_v19 = vld [vmem:[%s3518_s0 + $0x40] sm:$0xff]   ;;  %v1847_v21 = vld [vmem:[%s3518_s0 + $0xb0] sm:$0xff]  }
   0x7   :  { %1753 = vmatpush3.bf16.msra.mxu0 %v359_v6  ;;  %1821 = vmatpush3.bf16.msra.mxu1 %v359_v6  ;;  %v1834_v22 = vld [vmem:[%s3518_s0 + $0x48] sm:$0xff]   ;;  %v1835_v23 = vld [vmem:[%s3518_s0 + $0x50] sm:$0xff]   ;;  %v1848_v24 = vld [vmem:[%s3518_s0 + $0xb8] sm:$0xff]  }
   0x8   :  { %v1849_v25 = vld [vmem:[%s3518_s0 + $0xc0] sm:$0xff]   ;;  %v1836_v26 = vld [vmem:[%s3518_s0 + $0x58] sm:$0xff]   ;;  %v1850_v28 = vld [vmem:[%s3518_s0 + $0xc8] sm:$0xff]  }
   0x9   :  { %v1837_v27 = vld [vmem:[%s3518_s0 + $0x60] sm:$0xff]   ;;  %v1851_v29 = vld [vmem:[%s3518_s0 + $0xd0] sm:$0xff]   ;;  %v1838_v30 = vld [vmem:[%s3518_s0 + $0x68] sm:$0xff]  }
   0xa   :  { %1755 = vmatmul.mubr.msk.bf16.vlgmr.msra.gmra.mrb[0].mxu0 %vm257_vm2, %v1826_v7  ;;  %1787 = vmatmul.mubr.msk.bf16.vlgmr.msra.gmra.mrb[0].mxu1 %vm257_vm2, %v1842_v12  ;;  %v1839_v31 = vld [vmem:[%s3518_s0 + $0x70] sm:$0xff]   ;;  %v1852_v32 = vld [vmem:[%s3518_s0 + $0xd8] sm:$0xff]   ;;  %v1853_v33 = vld [vmem:[%s3518_s0 + $0xe0] sm:$0xff]  }
   0xb   :  { %1758 = vmatprep.mubr.msk.bf16.mxu0 %vm257_vm2, %v1827_v8  ;;  %1790 = vmatprep.mubr.msk.bf16.mxu1 %vm257_vm2, %v1843_v13  ;;  %v1840_v34 = vld [vmem:[%s3518_s0 + $0x78] sm:$0xff]   ;;  %v1854_v35 = vld [vmem:[%s3518_s0 + $0xe8] sm:$0xff]   ;;  %v1855_v36 = vld [vmem:[%s3518_s0 + $0xf0] sm:$0xff]  }
   0xc   :  { %v1856_v37 = vld [vmem:[%s3518_s0 + $0xf8] sm:$0xff]  }
  0x12   :  { %1759 = vmatmul.mubr.msk.bf16.gmra.mrb[4].mxu0 %vm257_vm2, %v1828_v9  ;;  %1791 = vmatmul.mubr.msk.bf16.gmra.mrb[4].mxu1 %vm257_vm2, %v1844_v16 }
  0x13   :  { %1762 = vmatprep.mubr.msk.bf16.mxu0 %vm257_vm2, %v1829_v10  ;;  %1794 = vmatprep.mubr.msk.bf16.mxu1 %vm257_vm2, %v1845_v17 }
  0x1a   :  { %1763 = vmatmul.mubr.msk.bf16.gmra.mrb[8].mxu0 %vm257_vm2, %v1830_v14  ;;  %1795 = vmatmul.mubr.msk.bf16.gmra.mrb[8].mxu1 %vm257_vm2, %v1846_v20 }
  0x1b   :  { %1766 = vmatprep.mubr.msk.bf16.mxu0 %vm257_vm2, %v1831_v15  ;;  %1798 = vmatprep.mubr.msk.bf16.mxu1 %vm257_vm2, %v1847_v21 }
  0x22   :  { %1767 = vmatmul.mubr.msk.bf16.gmra.mrb[12].mxu0 %vm257_vm2, %v1832_v18  ;;  %1799 = vmatmul.mubr.msk.bf16.gmra.mrb[12].mxu1 %vm257_vm2, %v1848_v24 }
  0x23   :  { %1770 = vmatprep.mubr.msk.bf16.mxu0 %vm257_vm2, %v1833_v19  ;;  %1802 = vmatprep.mubr.msk.bf16.mxu1 %vm257_vm2, %v1849_v25 }
  0x2a   :  { %1771 = vmatmul.mubr.msk.bf16.gmra.mrb[16].mxu0 %vm257_vm2, %v1834_v22  ;;  %1803 = vmatmul.mubr.msk.bf16.gmra.mrb[16].mxu1 %vm257_vm2, %v1850_v28 }
  0x2b   :  { %1774 = vmatprep.mubr.msk.bf16.mxu0 %vm257_vm2, %v1835_v23  ;;  %1806 = vmatprep.mubr.msk.bf16.mxu1 %vm257_vm2, %v1851_v29 }
  0x32   :  { %1775 = vmatmul.mubr.msk.bf16.gmra.mrb[20].mxu0 %vm257_vm2, %v1836_v26  ;;  %1807 = vmatmul.mubr.msk.bf16.gmra.mrb[20].mxu1 %vm257_vm2, %v1852_v32 }
  0x33   :  { %1778 = vmatprep.mubr.msk.bf16.mxu0 %vm257_vm2, %v1837_v27  ;;  %1810 = vmatprep.mubr.msk.bf16.mxu1 %vm257_vm2, %v1853_v33 }
  0x3a   :  { %1779 = vmatmul.mubr.msk.bf16.gmra.mrb[24].mxu0 %vm257_vm2, %v1838_v30  ;;  %1811 = vmatmul.mubr.msk.bf16.gmra.mrb[24].mxu1 %vm257_vm2, %v1854_v35 }
  0x3b   :  { %1782 = vmatprep.mubr.msk.bf16.mxu0 %vm257_vm2, %v1839_v31  ;;  %1814 = vmatprep.mubr.msk.bf16.mxu1 %vm257_vm2, %v1855_v36 }
  0x42   :  { %1783 = vmatmul.mubr.msk.bf16.gmra.mrb[28].mxu0 %vm257_vm2, %v1840_v34  ;;  %1815 = vmatmul.mubr.msk.bf16.gmra.mrb[28].mxu1 %vm257_vm2, %v1856_v37 }
  0xdd   :  { %v2019_v38 = vpop.f32.mrb[0].mxu0  ;;  %v2059_v3 = vpop.f32.mrb[0].mxu1 }
  0xde   :  { %v2021_v39 = vpop.f32.mrb[1].mxu0  ;;  %v787_v43 = vmul.f32 %v2019_v38, %v2019_v38  ;;  %v654_v48 = vsel %vm650_vm3, %v2019_v38, 0.0  ;;  %3564 = vst [vmem:[#allocation2_spill] sm:$0xff] %v2059_v3  ;;  %v2068_v8 = vpop.f32.mrb[1].mxu1 }
  0xdf   :  { %v785_v40 = vmul.f32 %v2021_v39, %v2021_v39  ;;  %v2025_v41 = vpop.f32.mrb[2].mxu0  ;;  %v651_v44 = vsel %vm650_vm3, %v2021_v39, 0.0  ;;  %3565 = vst [vmem:[#allocation3_spill] sm:$0xff] %v2068_v8  ;;  %v2070_v11 = vpop.f32.mrb[2].mxu1 }
  0xe0   :  { %v2027_v42 = vpop.f32.mrb[3].mxu0  ;;  %v788_v50 = vmul.f32 %v2025_v41, %v2025_v41  ;;  %v852_v54 = vsel %vm650_vm3, %v787_v43, 0.0  ;;  %v656_v55 = vsel %vm650_vm3, %v2025_v41, 0.0  ;;  %v2077_v15 = vpop.f32.mrb[3].mxu1 }
  0xe1   :  { %v652_v45 = vsel %vm650_vm3, %v2027_v42, 0.0  ;;  %v786_v46 = vmul.f32 %v2027_v42, %v2027_v42  ;;  %v849_v49 = vsel %vm650_vm3, %v785_v40, 0.0  ;;  %3566 = vst [vmem:[#allocation4_spill] sm:$0xff] %v2077_v15 }
  0xe2   :  { %v653_v47 = vadd.f32 %v652_v45, %v651_v44  ;;  %v854_v60 = vsel %vm650_vm3, %v788_v50, 0.0 }
  0xe3   :  { %v850_v51 = vsel %vm650_vm3, %v786_v46, 0.0 }
  0xe4   :  { %v655_v52 = vadd.f32 %v654_v48, %v653_v47  ;;  %v851_v53 = vadd.f32 %v850_v51, %v849_v49 }
  0xe5   :  { %v2046_v56 = vpop.f32.mrb[4].mxu0  ;;  %v2095_v31 = vpop.f32.mrb[4].mxu1 }
  0xe6   :  { %v853_v57 = vadd.f32 %v852_v54, %v851_v53  ;;  %v2048_v58 = vpop.f32.mrb[5].mxu0  ;;  %v657_v59 = vadd.f32 %v656_v55, %v655_v52  ;;  %v791_v4 = vmul.f32 %v2046_v56, %v2046_v56  ;;  %v662_v12 = vsel %vm650_vm3, %v2046_v56, 0.0  ;;  %v2104_v36 = vpop.f32.mrb[5].mxu1 }
  0xe7   :  { %v658_v61 = vsel %vm650_vm3, %v2048_v58, 0.0  ;;  %v789_v62 = vmul.f32 %v2048_v58, %v2048_v58  ;;  %v2055_v63 = vpop.f32.mrb[6].mxu0  ;;  %v2106_v43 = vpop.f32.mrb[6].mxu1 }
  0xe8   :  { %v659_v0 = vadd.f32 %v658_v61, %v657_v59  ;;  %v855_v1 = vadd.f32 %v854_v60, %v853_v57  ;;  %v2057_v2 = vpop.f32.mrb[7].mxu0  ;;  %v792_v13 = vmul.f32 %v2055_v63, %v2055_v63  ;;  %v860_v18 = vsel %vm650_vm3, %v791_v4, 0.0  ;;  %v2113_v47 = vpop.f32.mrb[7].mxu1 }
  0xe9   :  { %v856_v5 = vsel %vm650_vm3, %v789_v62, 0.0  ;;  %v660_v6 = vsel %vm650_vm3, %v2057_v2, 0.0  ;;  %v790_v7 = vmul.f32 %v2057_v2, %v2057_v2  ;;  %v664_v19 = vsel %vm650_vm3, %v2055_v63, 0.0 }
  0xea   :  { %v857_v9 = vadd.f32 %v856_v5, %v855_v1  ;;  %v661_v10 = vadd.f32 %v660_v6, %v659_v0  ;;  %v862_v24 = vsel %vm650_vm3, %v792_v13, 0.0 }
  0xeb   :  { %v858_v14 = vsel %vm650_vm3, %v790_v7, 0.0 }
  0xec   :  { %v663_v16 = vadd.f32 %v662_v12, %v661_v10  ;;  %v859_v17 = vadd.f32 %v858_v14, %v857_v9 }
  0xed   :  { %v2082_v20 = vpop.f32.mrb[8].mxu0  ;;  %v2131_v4 = vpop.f32.mrb[8].mxu1 }
  0xee   :  { %v861_v21 = vadd.f32 %v860_v18, %v859_v17  ;;  %v2084_v22 = vpop.f32.mrb[9].mxu0  ;;  %v665_v23 = vadd.f32 %v664_v19, %v663_v16  ;;  %v795_v32 = vmul.f32 %v2082_v20, %v2082_v20  ;;  %v670_v44 = vsel %vm650_vm3, %v2082_v20, 0.0  ;;  %v2140_v10 = vpop.f32.mrb[9].mxu1 }
  0xef   :  { %v666_v25 = vsel %vm650_vm3, %v2084_v22, 0.0  ;;  %v793_v26 = vmul.f32 %v2084_v22, %v2084_v22  ;;  %v2091_v27 = vpop.f32.mrb[10].mxu0  ;;  %v2142_v14 = vpop.f32.mrb[10].mxu1 }
  0xf0   :  { %v667_v28 = vadd.f32 %v666_v25, %v665_v23  ;;  %v863_v29 = vadd.f32 %v862_v24, %v861_v21  ;;  %v2093_v30 = vpop.f32.mrb[11].mxu0  ;;  %v796_v45 = vmul.f32 %v2091_v27, %v2091_v27  ;;  %v868_v50 = vsel %vm650_vm3, %v795_v32, 0.0  ;;  %v2149_v19 = vpop.f32.mrb[11].mxu1 }
  0xf1   :  { %v864_v33 = vsel %vm650_vm3, %v793_v26, 0.0  ;;  %v668_v34 = vsel %vm650_vm3, %v2093_v30, 0.0  ;;  %v794_v35 = vmul.f32 %v2093_v30, %v2093_v30  ;;  %v672_v51 = vsel %vm650_vm3, %v2091_v27, 0.0 }
  0xf2   :  { %v865_v37 = vadd.f32 %v864_v33, %v863_v29  ;;  %v669_v40 = vadd.f32 %v668_v34, %v667_v28  ;;  %v870_v57 = vsel %vm650_vm3, %v796_v45, 0.0 }
  0xf3   :  { %v866_v46 = vsel %vm650_vm3, %v794_v35, 0.0 }
  0xf4   :  { %v671_v48 = vadd.f32 %v670_v44, %v669_v40  ;;  %v867_v49 = vadd.f32 %v866_v46, %v865_v37 }
  0xf5   :  { %v2118_v52 = vpop.f32.mrb[12].mxu0  ;;  %v2167_v46 = vpop.f32.mrb[12].mxu1 }
  0xf6   :  { %v869_v53 = vadd.f32 %v868_v50, %v867_v49  ;;  %v2120_v54 = vpop.f32.mrb[13].mxu0  ;;  %v673_v55 = vadd.f32 %v672_v51, %v671_v48  ;;  %v799_v5 = vmul.f32 %v2118_v52, %v2118_v52  ;;  %v678_v16 = vsel %vm650_vm3, %v2118_v52, 0.0 }
  0xf7   :  { %v674_v59 = vsel %vm650_vm3, %v2120_v54, 0.0  ;;  %v797_v60 = vmul.f32 %v2120_v54, %v2120_v54  ;;  %v2127_v61 = vpop.f32.mrb[14].mxu0 }
  0xf8   :  { %v675_v62 = vadd.f32 %v674_v59, %v673_v55  ;;  %v871_v0 = vadd.f32 %v870_v57, %v869_v53  ;;  %v2129_v1 = vpop.f32.mrb[15].mxu0  ;;  %v800_v17 = vmul.f32 %v2127_v61, %v2127_v61  ;;  %v876_v24 = vsel %vm650_vm3, %v799_v5, 0.0  ;;  %v2176_v53 = vpop.f32.mrb[13].mxu1 }
  0xf9   :  { %v872_v6 = vsel %vm650_vm3, %v797_v60, 0.0  ;;  %v676_v7 = vsel %vm650_vm3, %v2129_v1, 0.0  ;;  %v798_v9 = vmul.f32 %v2129_v1, %v2129_v1  ;;  %v680_v25 = vsel %vm650_vm3, %v2127_v61, 0.0  ;;  %v2178_v59 = vpop.f32.mrb[14].mxu1 }
  0xfa   :  { %v873_v12 = vadd.f32 %v872_v6, %v871_v0  ;;  %v677_v13 = vadd.f32 %v676_v7, %v675_v62  ;;  %v878_v33 = vsel %vm650_vm3, %v800_v17, 0.0  ;;  %v2185_v5 = vpop.f32.mrb[15].mxu1 }
  0xfb   :  { %v874_v18 = vsel %vm650_vm3, %v798_v9, 0.0 }
  0xfc   :  { %v679_v21 = vadd.f32 %v678_v16, %v677_v13  ;;  %v875_v23 = vadd.f32 %v874_v18, %v873_v12 }
  0xfd   :  { %v2154_v26 = vpop.f32.mrb[16].mxu0 }
  0xfe   :  { %3567 = vst [vmem:[#allocation5_spill] sm:$0xff] %v2154_v26  ;;  %v877_v28 = vadd.f32 %v876_v24, %v875_v23  ;;  %v2156_v29 = vpop.f32.mrb[17].mxu0  ;;  %v681_v32 = vadd.f32 %v680_v25, %v679_v21  ;;  %v803_v48 = vmul.f32 %v2154_v26, %v2154_v26  ;;  %v686_v60 = vsel %vm650_vm3, %v2154_v26, 0.0 }
  0xff   :  { %v682_v34 = vsel %vm650_vm3, %v2156_v29, 0.0  ;;  %v801_v35 = vmul.f32 %v2156_v29, %v2156_v29  ;;  %v2163_v37 = vpop.f32.mrb[18].mxu0  ;;  %v818_v26 = vmul.f32 %v2077_v15, %v2077_v15 }
 0x100   :  { %3568 = vst [vmem:[#allocation6_spill] sm:$0xff] %v2163_v37  ;;  %v683_v40 = vadd.f32 %v682_v34, %v681_v32  ;;  %v879_v44 = vadd.f32 %v878_v33, %v877_v28  ;;  %v2165_v45 = vpop.f32.mrb[19].mxu0  ;;  %v804_v62 = vmul.f32 %v2163_v37, %v2163_v37  ;;  %v884_v9 = vsel %vm650_vm3, %v803_v48, 0.0  ;;  %v2203_v34 = vpop.f32.mrb[16].mxu1 }
 0x101   :  { %3569 = vst [vmem:[#allocation7_spill] sm:$0xff] %v2165_v45  ;;  %v880_v49 = vsel %vm650_vm3, %v801_v35, 0.0  ;;  %v684_v50 = vsel %vm650_vm3, %v2165_v45, 0.0  ;;  %v802_v51 = vmul.f32 %v2165_v45, %v2165_v45  ;;  %v688_v12 = vsel %vm650_vm3, %v2163_v37, 0.0 }
 0x102   :  { %v881_v55 = vadd.f32 %v880_v49, %v879_v44  ;;  %v685_v57 = vadd.f32 %v684_v50, %v683_v40  ;;  %v886_v21 = vsel %vm650_vm3, %v804_v62, 0.0  ;;  %v2212_v49 = vpop.f32.mrb[17].mxu1 }
 0x103   :  { %v882_v0 = vsel %vm650_vm3, %v802_v51, 0.0 }
 0x104   :  { %v687_v6 = vadd.f32 %v686_v60, %v685_v57  ;;  %v883_v7 = vadd.f32 %v882_v0, %v881_v55  ;;  %v2214_v55 = vpop.f32.mrb[18].mxu1 }
 0x105   :  { %v2190_v13 = vpop.f32.mrb[20].mxu0  ;;  %v2221_v0 = vpop.f32.mrb[19].mxu1 }
 0x106   :  { %3570 = vst [vmem:[#allocation8_spill] sm:$0xff] %v2190_v13  ;;  %v885_v16 = vadd.f32 %v884_v9, %v883_v7  ;;  %v2192_v17 = vpop.f32.mrb[21].mxu0  ;;  %v689_v18 = vadd.f32 %v688_v12, %v687_v6  ;;  %v807_v35 = vmul.f32 %v2190_v13, %v2190_v13  ;;  %v694_v57 = vsel %vm650_vm3, %v2190_v13, 0.0 }
 0x107   :  { %3571 = vst [vmem:[#allocation9_spill] sm:$0xff] %v2192_v17  ;;  %v690_v23 = vsel %vm650_vm3, %v2192_v17, 0.0  ;;  %v805_v24 = vmul.f32 %v2192_v17, %v2192_v17  ;;  %v2199_v25 = vpop.f32.mrb[22].mxu0  ;;  %v817_v13 = vmul.f32 %v2068_v8, %v2068_v8 }
 0x108   :  { %3572 = vst [vmem:[#allocation10_spill] sm:$0xff] %v2199_v25  ;;  %v691_v28 = vadd.f32 %v690_v23, %v689_v18  ;;  %v887_v32 = vadd.f32 %v886_v21, %v885_v16  ;;  %v2201_v33 = vpop.f32.mrb[23].mxu0  ;;  %v808_v60 = vmul.f32 %v2199_v25, %v2199_v25  ;;  %v892_v9 = vsel %vm650_vm3, %v807_v35, 0.0 }
 0x109   :  { %3573 = vst [vmem:[#allocation11_spill] sm:$0xff] %v2201_v33  ;;  %v888_v40 = vsel %vm650_vm3, %v805_v24, 0.0  ;;  %v692_v44 = vsel %vm650_vm3, %v2201_v33, 0.0  ;;  %v806_v48 = vmul.f32 %v2201_v33, %v2201_v33  ;;  %v696_v12 = vsel %vm650_vm3, %v2199_v25, 0.0 }
 0x10a   :  { %v889_v50 = vadd.f32 %v888_v40, %v887_v32  ;;  %v693_v51 = vadd.f32 %v692_v44, %v691_v28  ;;  %v894_v24 = vsel %vm650_vm3, %v808_v60, 0.0 }
 0x10b   :  { %v890_v62 = vsel %vm650_vm3, %v806_v48, 0.0 }
 0x10c   :  { %v695_v6 = vadd.f32 %v694_v57, %v693_v51  ;;  %v891_v7 = vadd.f32 %v890_v62, %v889_v50  ;;  %v2239_v50 = vpop.f32.mrb[20].mxu1 }
 0x10d   :  { %v2226_v16 = vpop.f32.mrb[24].mxu0 }
 0x10e   :  { %3574 = vst [vmem:[#allocation12_spill] sm:$0xff] %v2226_v16  ;;  %v893_v18 = vadd.f32 %v892_v9, %v891_v7  ;;  %v2228_v21 = vpop.f32.mrb[25].mxu0  ;;  %v697_v23 = vadd.f32 %v696_v12, %v695_v6  ;;  %v811_v51 = vmul.f32 %v2226_v16, %v2226_v16  ;;  %v2248_v6 = vpop.f32.mrb[21].mxu1 }
 0x10f   :  { %3575 = vst [vmem:[#allocation13_spill] sm:$0xff] %v2228_v21  ;;  %v698_v28 = vsel %vm650_vm3, %v2228_v21, 0.0  ;;  %v809_v32 = vmul.f32 %v2228_v21, %v2228_v21  ;;  %v2235_v40 = vpop.f32.mrb[26].mxu0  ;;  %v2250_v12 = vpop.f32.mrb[22].mxu1 }
 0x110   :  { %3576 = vst [vmem:[#allocation14_spill] sm:$0xff] %v2235_v40  ;;  %v699_v35 = vadd.f32 %v698_v28, %v697_v23  ;;  %v895_v44 = vadd.f32 %v894_v24, %v893_v18  ;;  %v2237_v48 = vpop.f32.mrb[27].mxu0  ;;  %v702_v18 = vsel %vm650_vm3, %v2226_v16, 0.0  ;;  %v812_v23 = vmul.f32 %v2235_v40, %v2235_v40  ;;  %v2257_v28 = vpop.f32.mrb[23].mxu1 }
 0x111   :  { %3577 = vst [vmem:[#allocation15_spill] sm:$0xff] %v2237_v48  ;;  %v896_v57 = vsel %vm650_vm3, %v809_v32, 0.0  ;;  %v700_v60 = vsel %vm650_vm3, %v2237_v48, 0.0  ;;  %v810_v62 = vmul.f32 %v2237_v48, %v2237_v48  ;;  %v900_v48 = vsel %vm650_vm3, %v811_v51, 0.0 }
 0x112   :  { %v897_v7 = vadd.f32 %v896_v57, %v895_v44  ;;  %v701_v9 = vadd.f32 %v700_v60, %v699_v35  ;;  %v704_v44 = vsel %vm650_vm3, %v2235_v40, 0.0  ;;  %v902_v25 = vsel %vm650_vm3, %v812_v23, 0.0  ;;  %v2275_v40 = vpop.f32.mrb[24].mxu1 }
 0x113   :  { %v898_v24 = vsel %vm650_vm3, %v810_v62, 0.0  ;;  %3582 = vst [vmem:[#allocation20_spill] sm:$0xff] %v2275_v40 }
 0x114   :  { %v703_v32 = vadd.f32 %v702_v18, %v701_v9  ;;  %v899_v21 = vadd.f32 %v898_v24, %v897_v7 }
 0x115   :  { %v2262_v35 = vpop.f32.mrb[28].mxu0 }
 0x116   :  { %3578 = vst [vmem:[#allocation16_spill] sm:$0xff] %v2262_v35  ;;  %v901_v57 = vadd.f32 %v900_v48, %v899_v21  ;;  %v2264_v60 = vpop.f32.mrb[29].mxu0  ;;  %v705_v16 = vadd.f32 %v704_v44, %v703_v32  ;;  %v815_v21 = vmul.f32 %v2262_v35, %v2262_v35  ;;  %v2284_v44 = vpop.f32.mrb[25].mxu1 }
 0x117   :  { %3579 = vst [vmem:[#allocation17_spill] sm:$0xff] %v2264_v60  ;;  %v706_v62 = vsel %vm650_vm3, %v2264_v60, 0.0  ;;  %v813_v9 = vmul.f32 %v2264_v60, %v2264_v60  ;;  %v2271_v7 = vpop.f32.mrb[30].mxu0 }
 0x118   :  { %3580 = vst [vmem:[#allocation18_spill] sm:$0xff] %v2271_v7  ;;  %v707_v51 = vadd.f32 %v706_v62, %v705_v16  ;;  %v903_v18 = vadd.f32 %v902_v25, %v901_v57  ;;  %v2273_v24 = vpop.f32.mrb[31].mxu0  ;;  %v2286_v25 = vpop.f32.mrb[26].mxu1  ;;  %v710_v57 = vsel %vm650_vm3, %v2262_v35, 0.0  ;;  %v816_v62 = vmul.f32 %v2271_v7, %v2271_v7 }
 0x119   :  { %3581 = vst [vmem:[#allocation19_spill] sm:$0xff] %v2273_v24  ;;  %v904_v48 = vsel %vm650_vm3, %v813_v9, 0.0  ;;  %v708_v23 = vsel %vm650_vm3, %v2273_v24, 0.0  ;;  %v814_v32 = vmul.f32 %v2273_v24, %v2273_v24  ;;  %3583 = vst [vmem:[#allocation21_spill] sm:$0xff] %v2286_v25  ;;  %v2295_v33 = vpop.f32.mrb[27].mxu1 }
 0x11a   :  { %v905_v60 = vadd.f32 %v904_v48, %v903_v18  ;;  %v709_v16 = vadd.f32 %v708_v23, %v707_v51  ;;  %v908_v18 = vsel %vm650_vm3, %v815_v21, 0.0  ;;  %v712_v51 = vsel %vm650_vm3, %v2271_v7, 0.0 }
 0x11b   :  { %v906_v9 = vsel %vm650_vm3, %v814_v32, 0.0  ;;  %v714_v48 = vsel %vm650_vm3, %v2068_v8, 0.0  ;;  %v910_v37 = vsel %vm650_vm3, %v816_v62, 0.0  ;;  %v912_v32 = vsel %vm650_vm3, %v817_v13, 0.0 }
 0x11c   :  { %v711_v24 = vadd.f32 %v710_v57, %v709_v16  ;;  %v907_v17 = vadd.f32 %v906_v9, %v905_v60  ;;  %v2306_v60 = vpop.f32.mrb[28].mxu1  ;;  %v819_v21 = vmul.f32 %v2059_v3, %v2059_v3  ;;  %v716_v57 = vsel %vm650_vm3, %v2077_v15, 0.0 }
 0x11d   :  { %3584 = vst [vmem:[#allocation22_spill] sm:$0xff] %v2306_v60  ;;  %v2312_v9 = vpop.f32.mrb[29].mxu1  ;;  %v718_v13 = vsel %vm650_vm3, %v2059_v3, 0.0  ;;  %v822_v8 = vmul.f32 %v2113_v47, %v2113_v47 }
 0x11e   :  { %v909_v23 = vadd.f32 %v908_v18, %v907_v17  ;;  %v713_v35 = vadd.f32 %v712_v51, %v711_v24  ;;  %3585 = vst [vmem:[#allocation23_spill] sm:$0xff] %v2312_v9  ;;  %v2314_v62 = vpop.f32.mrb[30].mxu1  ;;  %v821_v18 = vmul.f32 %v2104_v36, %v2104_v36 }
 0x11f   :  { %3586 = vst [vmem:[#allocation24_spill] sm:$0xff] %v2314_v62  ;;  %v2323_v51 = vpop.f32.mrb[31].mxu1 }
 0x120   :  { %v715_v45 = vadd.f32 %v714_v48, %v713_v35  ;;  %v911_v16 = vadd.f32 %v910_v37, %v909_v23  ;;  %v820_v37 = vmul.f32 %v2070_v11, %v2070_v11  ;;  %v914_v35 = vsel %vm650_vm3, %v818_v26, 0.0  ;;  %3587 = vst [vmem:[#allocation25_spill] sm:$0xff] %v2323_v51 }
 0x121   :  { %v920_v26 = vsel %vm650_vm3, %v821_v18, 0.0  ;;  %v922_v18 = vsel %vm650_vm3, %v822_v8, 0.0  ;;  %v826_v8 = vmul.f32 %v2149_v19, %v2149_v19 }
 0x122   :  { %v913_v17 = vadd.f32 %v912_v32, %v911_v16  ;;  %v717_v24 = vadd.f32 %v716_v57, %v715_v45  ;;  %v916_v32 = vsel %vm650_vm3, %v819_v21, 0.0  ;;  %v720_v45 = vsel %vm650_vm3, %v2070_v11, 0.0 }
 0x123   :  { %v722_v16 = vsel %vm650_vm3, %v2104_v36, 0.0  ;;  %v918_v15 = vsel %vm650_vm3, %v820_v37, 0.0  ;;  %v823_v21 = vmul.f32 %v2095_v31, %v2095_v31  ;;  %v824_v37 = vmul.f32 %v2106_v43, %v2106_v43 }
 0x124   :  { %v719_v48 = vadd.f32 %v718_v13, %v717_v24  ;;  %v915_v23 = vadd.f32 %v914_v35, %v913_v17  ;;  %v724_v17 = vsel %vm650_vm3, %v2113_v47, 0.0 }
 0x126   :  { %v917_v57 = vadd.f32 %v916_v32, %v915_v23  ;;  %v721_v3 = vadd.f32 %v720_v45, %v719_v48  ;;  %v726_v48 = vsel %vm650_vm3, %v2095_v31, 0.0  ;;  %v924_v32 = vsel %vm650_vm3, %v823_v21, 0.0 }
 0x127   :  { %v728_v45 = vsel %vm650_vm3, %v2106_v43, 0.0  ;;  %v827_v21 = vmul.f32 %v2131_v4, %v2131_v4 }
 0x128   :  { %v723_v7 = vadd.f32 %v722_v16, %v721_v3  ;;  %v919_v24 = vadd.f32 %v918_v15, %v917_v57  ;;  %v825_v3 = vmul.f32 %v2140_v10, %v2140_v10 }
 0x12a   :  { %v921_v13 = vadd.f32 %v920_v26, %v919_v24  ;;  %v725_v35 = vadd.f32 %v724_v17, %v723_v7  ;;  %v730_v7 = vsel %vm650_vm3, %v2140_v10, 0.0  ;;  %v926_v26 = vsel %vm650_vm3, %v824_v37, 0.0 }
 0x12b   :  { %v928_v24 = vsel %vm650_vm3, %v825_v3, 0.0  ;;  %v828_v37 = vmul.f32 %v2142_v14, %v2142_v14  ;;  %v930_v3 = vsel %vm650_vm3, %v826_v8, 0.0  ;;  %v830_v8 = vmul.f32 %v2185_v5, %v2185_v5 }
 0x12c   :  { %v727_v15 = vadd.f32 %v726_v48, %v725_v35  ;;  %v923_v23 = vadd.f32 %v922_v18, %v921_v13  ;;  %v732_v13 = vsel %vm650_vm3, %v2149_v19, 0.0 }
 0x12e   :  { %v925_v16 = vadd.f32 %v924_v32, %v923_v23  ;;  %v729_v57 = vadd.f32 %v728_v45, %v727_v15  ;;  %v734_v15 = vsel %vm650_vm3, %v2131_v4, 0.0  ;;  %v829_v23 = vmul.f32 %v2176_v53, %v2176_v53 }
 0x130   :  { %v731_v17 = vadd.f32 %v730_v7, %v729_v57  ;;  %v927_v35 = vadd.f32 %v926_v26, %v925_v16  ;;  %v932_v7 = vsel %vm650_vm3, %v827_v21, 0.0  ;;  %v736_v16 = vsel %vm650_vm3, %v2142_v14, 0.0 }
 0x131   :  { %v738_v57 = vsel %vm650_vm3, %v2176_v53, 0.0  ;;  %v831_v21 = vmul.f32 %v2167_v46, %v2167_v46 }
 0x132   :  { %v929_v48 = vadd.f32 %v928_v24, %v927_v35  ;;  %v733_v18 = vadd.f32 %v732_v13, %v731_v17  ;;  %v934_v17 = vsel %vm650_vm3, %v828_v37, 0.0  ;;  %v936_v35 = vsel %vm650_vm3, %v829_v23, 0.0 }
 0x133   :  { %v832_v37 = vmul.f32 %v2178_v59, %v2178_v59  ;;  %v938_v23 = vsel %vm650_vm3, %v830_v8, 0.0  ;;  %v834_v8 = vmul.f32 %v2221_v0, %v2221_v0 }
 0x134   :  { %v735_v32 = vadd.f32 %v734_v15, %v733_v18  ;;  %v931_v45 = vadd.f32 %v930_v3, %v929_v48  ;;  %v740_v48 = vsel %vm650_vm3, %v2185_v5, 0.0 }
 0x136   :  { %v933_v26 = vadd.f32 %v932_v7, %v931_v45  ;;  %v737_v24 = vadd.f32 %v736_v16, %v735_v32  ;;  %v742_v32 = vsel %vm650_vm3, %v2167_v46, 0.0  ;;  %v833_v45 = vmul.f32 %v2212_v49, %v2212_v49 }
 0x138   :  { %v739_v13 = vadd.f32 %v738_v57, %v737_v24  ;;  %v935_v18 = vadd.f32 %v934_v17, %v933_v26  ;;  %v940_v57 = vsel %vm650_vm3, %v831_v21, 0.0  ;;  %v744_v26 = vsel %vm650_vm3, %v2178_v59, 0.0 }
 0x139   :  { %v746_v24 = vsel %vm650_vm3, %v2212_v49, 0.0  ;;  %v835_v21 = vmul.f32 %v2203_v34, %v2203_v34 }
 0x13a   :  { %v937_v15 = vadd.f32 %v936_v35, %v935_v18  ;;  %v741_v3 = vadd.f32 %v740_v48, %v739_v13  ;;  %v942_v13 = vsel %vm650_vm3, %v832_v37, 0.0  ;;  %v944_v18 = vsel %vm650_vm3, %v833_v45, 0.0 }
 0x13b   :  { %v836_v37 = vmul.f32 %v2214_v55, %v2214_v55  ;;  %v946_v45 = vsel %vm650_vm3, %v834_v8, 0.0  ;;  %v838_v8 = vmul.f32 %v2257_v28, %v2257_v28 }
 0x13c   :  { %v743_v7 = vadd.f32 %v742_v32, %v741_v3  ;;  %v939_v16 = vadd.f32 %v938_v23, %v937_v15  ;;  %v748_v15 = vsel %vm650_vm3, %v2221_v0, 0.0 }
 0x13e   :  { %v941_v17 = vadd.f32 %v940_v57, %v939_v16  ;;  %v745_v35 = vadd.f32 %v744_v26, %v743_v7  ;;  %v750_v7 = vsel %vm650_vm3, %v2203_v34, 0.0  ;;  %v837_v16 = vmul.f32 %v2248_v6, %v2248_v6 }
 0x140   :  { %v747_v48 = vadd.f32 %v746_v24, %v745_v35  ;;  %v943_v3 = vadd.f32 %v942_v13, %v941_v17  ;;  %v948_v24 = vsel %vm650_vm3, %v835_v21, 0.0  ;;  %v752_v17 = vsel %vm650_vm3, %v2214_v55, 0.0 }
 0x141   :  { %v754_v35 = vsel %vm650_vm3, %v2248_v6, 0.0  ;;  %v839_v21 = vmul.f32 %v2239_v50, %v2239_v50 }
 0x142   :  { %v945_v32 = vadd.f32 %v944_v18, %v943_v3  ;;  %v749_v23 = vadd.f32 %v748_v15, %v747_v48  ;;  %v950_v48 = vsel %vm650_vm3, %v836_v37, 0.0  ;;  %v952_v3 = vsel %vm650_vm3, %v837_v16, 0.0 }
 0x143   :  { %v840_v37 = vmul.f32 %v2250_v12, %v2250_v12  ;;  %v954_v16 = vsel %vm650_vm3, %v838_v8, 0.0  ;;  %v842_v8 = vmul.f32 %v2295_v33, %v2295_v33 }
 0x144   :  { %v751_v57 = vadd.f32 %v750_v7, %v749_v23  ;;  %v947_v26 = vadd.f32 %v946_v45, %v945_v32  ;;  %v756_v32 = vsel %vm650_vm3, %v2257_v28, 0.0 }
 0x146   :  { %v949_v13 = vadd.f32 %v948_v24, %v947_v26  ;;  %v753_v18 = vadd.f32 %v752_v17, %v751_v57  ;;  %v758_v57 = vsel %vm650_vm3, %v2239_v50, 0.0  ;;  %v841_v26 = vmul.f32 %v2284_v44, %v2284_v44 }
 0x148   :  { %v755_v15 = vadd.f32 %v754_v35, %v753_v18  ;;  %v951_v23 = vadd.f32 %v950_v48, %v949_v13  ;;  %v956_v35 = vsel %vm650_vm3, %v839_v21, 0.0  ;;  %v760_v13 = vsel %vm650_vm3, %v2250_v12, 0.0 }
 0x149   :  { %v762_v18 = vsel %vm650_vm3, %v2284_v44, 0.0  ;;  %v843_v21 = vmul.f32 %v2275_v40, %v2275_v40 }
 0x14a   :  { %v953_v7 = vadd.f32 %v952_v3, %v951_v23  ;;  %v757_v45 = vadd.f32 %v756_v32, %v755_v15  ;;  %v958_v15 = vsel %vm650_vm3, %v840_v37, 0.0  ;;  %v960_v23 = vsel %vm650_vm3, %v841_v26, 0.0 }
 0x14b   :  { %v844_v37 = vmul.f32 %v2286_v25, %v2286_v25  ;;  %v962_v26 = vsel %vm650_vm3, %v842_v8, 0.0  ;;  %v846_v8 = vmul.f32 %v2323_v51, %v2323_v51 }
 0x14c   :  { %v759_v24 = vadd.f32 %v758_v57, %v757_v45  ;;  %v955_v17 = vadd.f32 %v954_v16, %v953_v7  ;;  %v764_v7 = vsel %vm650_vm3, %v2295_v33, 0.0 }
 0x14e   :  { %v957_v48 = vadd.f32 %v956_v35, %v955_v17  ;;  %v761_v3 = vadd.f32 %v760_v13, %v759_v24  ;;  %v766_v24 = vsel %vm650_vm3, %v2275_v40, 0.0  ;;  %v845_v17 = vmul.f32 %v2312_v9, %v2312_v9 }
 0x150   :  { %v763_v32 = vadd.f32 %v762_v18, %v761_v3  ;;  %v959_v45 = vadd.f32 %v958_v15, %v957_v48  ;;  %v964_v18 = vsel %vm650_vm3, %v843_v21, 0.0  ;;  %v768_v48 = vsel %vm650_vm3, %v2286_v25, 0.0 }
 0x151   :  { %v770_v3 = vsel %vm650_vm3, %v2312_v9, 0.0  ;;  %v847_v21 = vmul.f32 %v2306_v60, %v2306_v60 }
 0x152   :  { %v961_v57 = vadd.f32 %v960_v23, %v959_v45  ;;  %v765_v16 = vadd.f32 %v764_v7, %v763_v32  ;;  %v966_v32 = vsel %vm650_vm3, %v844_v37, 0.0  ;;  %v968_v45 = vsel %vm650_vm3, %v845_v17, 0.0 }
 0x153   :  { %v848_v37 = vmul.f32 %v2314_v62, %v2314_v62  ;;  %v970_v17 = vsel %vm650_vm3, %v846_v8, 0.0 }
 0x154   :  { %v767_v35 = vadd.f32 %v766_v24, %v765_v16  ;;  %v963_v13 = vadd.f32 %v962_v26, %v961_v57  ;;  %v772_v57 = vsel %vm650_vm3, %v2323_v51, 0.0 }
 0x156   :  { %v965_v15 = vadd.f32 %v964_v18, %v963_v13  ;;  %v769_v23 = vadd.f32 %v768_v48, %v767_v35  ;;  %v774_v35 = vsel %vm650_vm3, %v2306_v60, 0.0  ;;  %v972_v48 = vsel %vm650_vm3, %v847_v21, 0.0 }
 0x158   :  { %v771_v7 = vadd.f32 %v770_v3, %v769_v23  ;;  %v967_v16 = vadd.f32 %v966_v32, %v965_v15  ;;  %v776_v3 = vsel %vm650_vm3, %v2314_v62, 0.0  ;;  %v974_v32 = vsel %vm650_vm3, %v848_v37, 0.0 }
 0x159   :  { %v994_v37 = vlaneseq }
 0x15a   :  { %v969_v24 = vadd.f32 %v968_v45, %v967_v16  ;;  %v773_v26 = vadd.f32 %v772_v57, %v771_v7 }
 0x15c   :  { %v775_v13 = vadd.f32 %v774_v35, %v773_v26  ;;  %v971_v18 = vadd.f32 %v970_v17, %v969_v24 }
 0x15e   :  { %v777_v15 = vadd.f32 %v776_v3, %v775_v13  ;;  %v973_v23 = vadd.f32 %v972_v48, %v971_v18  ;;  %v2467_v3 = vshrl.u32 %v994_v37, 7  ;;  %v3595_v37 = vld [vmem:[#allocation13_spill] sm:$0xff] }
 0x160   :  { %v778_v45 = vrot.slane %v777_v15, 4  ;;  %v975_v7 = vadd.f32 %v974_v32, %v973_v23  ;;  %v3604_v23 = vld [vmem:[#allocation16_spill] sm:$0xff] }
 0x162   :  { %v779_v16 = vadd.f32 %v778_v45, %v777_v15  ;;  %v976_v57 = vrot.slane %v975_v7, 4  ;;  %v3546_v15 = vsub.s32 0, %v2467_v3 }
 0x164   :  { %v780_v60 = vrot.slane %v779_v16, 2  ;;  %v977_v51 = vadd.f32 %v976_v57, %v975_v7 }
 0x166   :  { %v781_v9 = vadd.f32 %v780_v60, %v779_v16  ;;  %v978_v25 = vrot.slane %v977_v51, 2  ;;  %v986_v60 = vld [vmem:[%s3519_s2] sm:$0x1] }
 0x168   :  { %v782_v8 = vrot.slane %v781_v9, 1  ;;  %v979_v26 = vadd.f32 %v978_v25, %v977_v51  ;;  %v2476_v51 = vld [vmem:[%s3520_s3] sm:$0x1] }
 0x16a   :  { %v783_v24 = vadd.f32 %v782_v8, %v781_v9  ;;  %v980_v35 = vrot.slane %v979_v26, 1  ;;  %v3588_v8 = vld [vmem:[#allocation7_spill] sm:$0xff] }
 0x16c   :  { %v784_v21 = vmul.f32 0.001953125, %v783_v24  ;;  %v981_v17 = vadd.f32 %v980_v35, %v979_v26  ;;  %v3589_v26 = vld [vmem:[#allocation5_spill] sm:$0xff]  ;;  %v3590_v24 = vld [vmem:[#allocation6_spill] sm:$0xff] }
 0x16d   :  { %v3591_v35 = vld [vmem:[#allocation9_spill] sm:$0xff] }
 0x16e   :  { %v982_v40 = vmul.f32 0.001953125, %v981_v17  ;;  %v983_v62 = vmul.f32 %v784_v21, %v784_v21  ;;  %v3593_v17 = vld [vmem:[#allocation8_spill] sm:$0xff] }
 0x170   :  { %v984_v13 = vsub.f32 %v982_v40, %v983_v62 }
 0x172   :  { %v985_v18 = vmax.f32 %v984_v13, 0.0 }
 0x174   :  { %v987_v48 = vadd.f32 1e-05, %v985_v18  ;;  %v3594_v18 = vld [vmem:[#allocation10_spill] sm:$0xff] }
 0x176   :  { %1857 = vrsqrt.f32 %v987_v48 }
 0x180   :  { %v1858_v25 = vpop.eup %1857 }
 0x181   :  { %v989_v9 = vmul.f32 %v1858_v25, %v986_v60  ;;  %v3596_v25 = vld [vmem:[#allocation15_spill] sm:$0xff] }
 0x183   :  { %v2478_v40 = vmul.f32 %v989_v9, %v784_v21  ;;  %v2482_v62 = vrot.slane %v989_v9, %v3546_v15  ;;  %v3592_v21 = vld [vmem:[#allocation11_spill] sm:$0xff]  ;;  %v3605_v15 = vld [vmem:[#allocation18_spill] sm:$0xff] }
 0x185   :  { %v2488_v32 = vmul.f32 %v2482_v62, %v2021_v39  ;;  %v2492_v45 = vmul.f32 %v2482_v62, %v2027_v42  ;;  %v2496_v7 = vmul.f32 %v2019_v38, %v2482_v62  ;;  %v2500_v16 = vmul.f32 %v2025_v41, %v2482_v62 }
 0x186   :  { %v2504_v57 = vmul.f32 %v2482_v62, %v2048_v58  ;;  %v2508_v39 = vmul.f32 %v2482_v62, %v2057_v2  ;;  %v2512_v42 = vmul.f32 %v2046_v56, %v2482_v62  ;;  %v2516_v38 = vmul.f32 %v2055_v63, %v2482_v62 }
 0x187   :  { %v2520_v41 = vmul.f32 %v2482_v62, %v2084_v22  ;;  %v2524_v58 = vmul.f32 %v2482_v62, %v2093_v30  ;;  %v2528_v2 = vmul.f32 %v2082_v20, %v2482_v62  ;;  %v2532_v56 = vmul.f32 %v2091_v27, %v2482_v62 }
 0x188   :  { %v2536_v63 = vmul.f32 %v2482_v62, %v2120_v54  ;;  %v2540_v22 = vmul.f32 %v2482_v62, %v2129_v1  ;;  %v2544_v30 = vmul.f32 %v2118_v52, %v2482_v62  ;;  %v2548_v20 = vmul.f32 %v2127_v61, %v2482_v62 }
 0x189   :  { %v2552_v27 = vmul.f32 %v2482_v62, %v2156_v29  ;;  %v2556_v54 = vmul.f32 %v2482_v62, %v3588_v8  ;;  %v2560_v1 = vmul.f32 %v3589_v26, %v2482_v62  ;;  %v2564_v52 = vmul.f32 %v3590_v24, %v2482_v62  ;;  %v3597_v8 = vld [vmem:[#allocation12_spill] sm:$0xff]  ;;  %v3599_v24 = vld [vmem:[#allocation14_spill] sm:$0xff] }
 0x18a   :  { %v2568_v61 = vmul.f32 %v2482_v62, %v3591_v35  ;;  %v2572_v29 = vmul.f32 %v2482_v62, %v3592_v21  ;;  %v2576_v13 = vmul.f32 %v3593_v17, %v2482_v62  ;;  %v2580_v48 = vmul.f32 %v3594_v18, %v2482_v62  ;;  %v3601_v21 = vld [vmem:[#allocation17_spill] sm:$0xff]  ;;  %v3603_v18 = vld [vmem:[#allocation19_spill] sm:$0xff] }
 0x18b   :  { %v2584_v60 = vmul.f32 %v2482_v62, %v3595_v37  ;;  %v2588_v9 = vmul.f32 %v2482_v62, %v3596_v25  ;;  %v2592_v26 = vmul.f32 %v3597_v8, %v2482_v62  ;;  %v2596_v35 = vmul.f32 %v3599_v24, %v2482_v62 }
 0x18c   :  { %v2600_v17 = vmul.f32 %v2482_v62, %v3601_v21  ;;  %v2604_v37 = vmul.f32 %v2482_v62, %v3603_v18  ;;  %v2608_v25 = vmul.f32 %v3604_v23, %v2482_v62  ;;  %v2612_v8 = vmul.f32 %v3605_v15, %v2482_v62 }
 0x18d   :  { %3598 = vst [vmem:[#allocation7_spill] sm:$0xff] %v2592_v26  ;;  %3600 = vst [vmem:[#allocation5_spill] sm:$0xff] %v2596_v35  ;;  %v3606_v26 = vld [vmem:[#allocation3_spill] sm:$0xff]  ;;  %v3607_v35 = vld [vmem:[#allocation4_spill] sm:$0xff]  ;;  %v2628_v23 = vmul.f32 %v2070_v11, %v2482_v62  ;;  %v2632_v15 = vmul.f32 %v2482_v62, %v2104_v36  ;;  %v2648_v11 = vmul.f32 %v2482_v62, %v2140_v10 }
 0x18e   :  { %3602 = vst [vmem:[#allocation6_spill] sm:$0xff] %v2600_v17  ;;  %v2616_v24 = vmul.f32 %v2482_v62, %v3606_v26  ;;  %v2620_v21 = vmul.f32 %v2482_v62, %v3607_v35  ;;  %v3608_v17 = vld [vmem:[#allocation2_spill] sm:$0xff]  ;;  %v2636_v26 = vmul.f32 %v2482_v62, %v2113_v47  ;;  %v2640_v35 = vmul.f32 %v2095_v31, %v2482_v62 }
 0x18f   :  { %v2624_v18 = vmul.f32 %v3608_v17, %v2482_v62  ;;  %v2644_v17 = vmul.f32 %v2106_v43, %v2482_v62  ;;  %v2652_v36 = vmul.f32 %v2482_v62, %v2149_v19  ;;  %v2656_v47 = vmul.f32 %v2131_v4, %v2482_v62 }
 0x190   :  { %v2660_v31 = vmul.f32 %v2142_v14, %v2482_v62  ;;  %v2664_v43 = vmul.f32 %v2482_v62, %v2176_v53  ;;  %v2668_v10 = vmul.f32 %v2482_v62, %v2185_v5  ;;  %v2672_v19 = vmul.f32 %v2167_v46, %v2482_v62 }
 0x191   :  { %v2676_v4 = vmul.f32 %v2178_v59, %v2482_v62  ;;  %v2680_v14 = vmul.f32 %v2482_v62, %v2212_v49  ;;  %v2684_v53 = vmul.f32 %v2482_v62, %v2221_v0  ;;  %v2688_v5 = vmul.f32 %v2203_v34, %v2482_v62 }
 0x192   :  { %v2692_v46 = vmul.f32 %v2214_v55, %v2482_v62  ;;  %v2696_v59 = vmul.f32 %v2482_v62, %v2248_v6  ;;  %v2700_v49 = vmul.f32 %v2482_v62, %v2257_v28  ;;  %v2704_v0 = vmul.f32 %v2239_v50, %v2482_v62 }
 0x193   :  { %v2708_v34 = vmul.f32 %v2250_v12, %v2482_v62  ;;  %v2712_v55 = vmul.f32 %v2482_v62, %v2284_v44  ;;  %v2716_v6 = vmul.f32 %v2482_v62, %v2295_v33 }
 0x194   :  { %3609 = vst [vmem:[#allocation9_spill] sm:$0xff] %v2696_v59  ;;  %3610 = vst [vmem:[#allocation11_spill] sm:$0xff] %v2700_v49  ;;  %v3615_v59 = vld [vmem:[#allocation20_spill] sm:$0xff]  ;;  %v3617_v49 = vld [vmem:[#allocation21_spill] sm:$0xff] }
 0x195   :  { %3611 = vst [vmem:[#allocation8_spill] sm:$0xff] %v2704_v0  ;;  %3612 = vst [vmem:[#allocation10_spill] sm:$0xff] %v2708_v34  ;;  %v2720_v28 = vmul.f32 %v3615_v59, %v2482_v62  ;;  %v2724_v50 = vmul.f32 %v3617_v49, %v2482_v62  ;;  %v3619_v0 = vld [vmem:[#allocation23_spill] sm:$0xff]  ;;  %v3620_v34 = vld [vmem:[#allocation25_spill] sm:$0xff]  ;;  %v3624_v49 = vsub.f32 %v2476_v51, %v2478_v40 }
 0x196   :  { %3613 = vst [vmem:[#allocation13_spill] sm:$0xff] %v2712_v55  ;;  %3614 = vst [vmem:[#allocation15_spill] sm:$0xff] %v2716_v6  ;;  %v2728_v12 = vmul.f32 %v2482_v62, %v3619_v0  ;;  %v2732_v44 = vmul.f32 %v2482_v62, %v3620_v34  ;;  %v3621_v55 = vld [vmem:[#allocation22_spill] sm:$0xff]  ;;  %v3622_v6 = vld [vmem:[#allocation24_spill] sm:$0xff] }
 0x197   :  { %3616 = vst [vmem:[#allocation12_spill] sm:$0xff] %v2720_v28  ;;  %3618 = vst [vmem:[#allocation14_spill] sm:$0xff] %v2724_v50  ;;  %v2736_v33 = vmul.f32 %v3621_v55, %v2482_v62  ;;  %v2740_v59 = vmul.f32 %v3622_v6, %v2482_v62  ;;  %v3623_v28 = vsub.s32 0, %v2467_v3  ;;  %v3627_v6 = vld [vmem:[#allocation6_spill] sm:$0xff] }
 0x199   :  { %v2747_v50 = vrot.slane %v3624_v49, %v3623_v28 }
 0x19b   :  { %v2751_v0 = vadd.f32 %v2747_v50, %v2488_v32  ;;  %v2755_v34 = vadd.f32 %v2747_v50, %v2492_v45  ;;  %v2759_v55 = vadd.f32 %v2747_v50, %v2496_v7  ;;  %v2763_v3 = vadd.f32 %v2747_v50, %v2500_v16 }
 0x19c   :  { %v2767_v51 = vadd.f32 %v2747_v50, %v2504_v57  ;;  %v2771_v40 = vadd.f32 %v2747_v50, %v2508_v39  ;;  %v2775_v62 = vadd.f32 %v2747_v50, %v2512_v42  ;;  %v2779_v32 = vadd.f32 %v2747_v50, %v2516_v38 }
 0x19d   :  { %v2783_v45 = vadd.f32 %v2747_v50, %v2520_v41  ;;  %v2787_v7 = vadd.f32 %v2747_v50, %v2524_v58  ;;  %v2791_v16 = vadd.f32 %v2747_v50, %v2528_v2  ;;  %v2795_v57 = vadd.f32 %v2747_v50, %v2532_v56 }
 0x19e   :  { %v2799_v39 = vadd.f32 %v2747_v50, %v2536_v63  ;;  %v2803_v42 = vadd.f32 %v2747_v50, %v2540_v22  ;;  %v2807_v38 = vadd.f32 %v2747_v50, %v2544_v30  ;;  %v2811_v41 = vadd.f32 %v2747_v50, %v2548_v20 }
 0x19f   :  { %v2815_v58 = vadd.f32 %v2747_v50, %v2552_v27  ;;  %v2819_v2 = vadd.f32 %v2747_v50, %v2556_v54  ;;  %v2823_v56 = vadd.f32 %v2747_v50, %v2560_v1  ;;  %v2827_v63 = vadd.f32 %v2747_v50, %v2564_v52  ;;  %v3625_v52 = vld [vmem:[#allocation7_spill] sm:$0xff] }
 0x1a0   :  { %v2831_v22 = vadd.f32 %v2747_v50, %v2568_v61  ;;  %v2835_v30 = vadd.f32 %v2747_v50, %v2572_v29  ;;  %v2839_v20 = vadd.f32 %v2747_v50, %v2576_v13  ;;  %v2843_v27 = vadd.f32 %v2747_v50, %v2580_v48  ;;  %v3626_v29 = vld [vmem:[#allocation5_spill] sm:$0xff] }
 0x1a1   :  { %v2847_v54 = vadd.f32 %v2747_v50, %v2584_v60  ;;  %v2851_v1 = vadd.f32 %v2747_v50, %v2588_v9  ;;  %v2855_v61 = vadd.f32 %v2747_v50, %v3625_v52  ;;  %v2859_v13 = vadd.f32 %v2747_v50, %v3626_v29  ;;  %v3638_v29 = vld [vmem:[#allocation9_spill] sm:$0xff] }
 0x1a2   :  { %v2863_v48 = vadd.f32 %v2747_v50, %v3627_v6  ;;  %v2867_v60 = vadd.f32 %v2747_v50, %v2604_v37  ;;  %v2871_v9 = vadd.f32 %v2747_v50, %v2608_v25  ;;  %v2875_v28 = vadd.f32 %v2747_v50, %v2612_v8  ;;  %v3640_v6 = vld [vmem:[#allocation11_spill] sm:$0xff] }
 0x1a3   :  { %v2879_v49 = vadd.f32 %v2747_v50, %v2616_v24  ;;  %v2883_v52 = vadd.f32 %v2747_v50, %v2620_v21  ;;  %v2887_v37 = vadd.f32 %v2747_v50, %v2624_v18  ;;  %v2891_v25 = vadd.f32 %v2747_v50, %v2628_v23 }
 0x1a4   :  { %v2895_v8 = vadd.f32 %v2747_v50, %v2632_v15  ;;  %v2899_v24 = vadd.f32 %v2747_v50, %v2636_v26  ;;  %v2903_v21 = vadd.f32 %v2747_v50, %v2640_v35  ;;  %v2907_v18 = vadd.f32 %v2747_v50, %v2644_v17 }
 0x1a5   :  { %v2911_v23 = vadd.f32 %v2747_v50, %v2648_v11  ;;  %v2915_v15 = vadd.f32 %v2747_v50, %v2652_v36  ;;  %v2919_v26 = vadd.f32 %v2747_v50, %v2656_v47  ;;  %v2923_v35 = vadd.f32 %v2747_v50, %v2660_v31 }
 0x1a6   :  { %3628 = vst [vmem:[#allocation17_spill] sm:$0xff] %v2903_v21  ;;  %3629 = vst [vmem:[#allocation19_spill] sm:$0xff] %v2907_v18  ;;  %v2927_v17 = vadd.f32 %v2747_v50, %v2664_v43  ;;  %v2931_v11 = vadd.f32 %v2747_v50, %v2668_v10  ;;  %v2935_v36 = vadd.f32 %v2747_v50, %v2672_v19 }
 0x1a7   :  { %3630 = vst [vmem:[#allocation16_spill] sm:$0xff] %v2911_v23  ;;  %3631 = vst [vmem:[#allocation18_spill] sm:$0xff] %v2915_v15  ;;  %v2939_v47 = vadd.f32 %v2747_v50, %v2676_v4  ;;  %v2943_v31 = vadd.f32 %v2747_v50, %v2680_v14  ;;  %v2947_v43 = vadd.f32 %v2747_v50, %v2684_v53 }
 0x1a8   :  { %3632 = vst [vmem:[#allocation3_spill] sm:$0xff] %v2919_v26  ;;  %v2951_v10 = vadd.f32 %v2747_v50, %v2688_v5  ;;  %v2955_v19 = vadd.f32 %v2747_v50, %v2692_v46  ;;  %v2959_v4 = vadd.f32 %v2747_v50, %v3638_v29  ;;  %v2963_v14 = vadd.f32 %v2747_v50, %v3640_v6 }
 0x1a9   :  { %3633 = vst [vmem:[#allocation4_spill] sm:$0xff] %v2939_v47  ;;  %3634 = vst [vmem:[#allocation2_spill] sm:$0xff] %v2943_v31  ;;  %v3642_v31 = vld [vmem:[#allocation8_spill] sm:$0xff] }
 0x1aa   :  { %3635 = vst [vmem:[#allocation20_spill] sm:$0xff] %v2947_v43  ;;  %3636 = vst [vmem:[#allocation21_spill] sm:$0xff] %v2951_v10  ;;  %v2967_v53 = vadd.f32 %v2747_v50, %v3642_v31  ;;  %v3643_v43 = vld [vmem:[#allocation10_spill] sm:$0xff]  ;;  %v3644_v10 = vld [vmem:[#allocation13_spill] sm:$0xff] }
 0x1ab   :  { %3637 = vst [vmem:[#allocation23_spill] sm:$0xff] %v2955_v19  ;;  %3639 = vst [vmem:[#allocation25_spill] sm:$0xff] %v2959_v4  ;;  %v2971_v5 = vadd.f32 %v2747_v50, %v3643_v43  ;;  %v2975_v46 = vadd.f32 %v2747_v50, %v3644_v10  ;;  %v3645_v19 = vld [vmem:[#allocation15_spill] sm:$0xff]  ;;  %v3646_v4 = vld [vmem:[#allocation12_spill] sm:$0xff]  ;;  %v2991_v43 = vadd.f32 %v2747_v50, %v2728_v12 }
 0x1ac   :  { %3641 = vst [vmem:[#allocation22_spill] sm:$0xff] %v2963_v14  ;;  %v2979_v29 = vadd.f32 %v2747_v50, %v3645_v19  ;;  %v2983_v6 = vadd.f32 %v2747_v50, %v3646_v4  ;;  %v3648_v14 = vld [vmem:[#allocation14_spill] sm:$0xff]  ;;  %v2995_v10 = vadd.f32 %v2747_v50, %v2732_v44  ;;  %v2999_v19 = vadd.f32 %v2747_v50, %v2736_v33 }
 0x1ad   :  { %v2987_v31 = vadd.f32 %v2747_v50, %v3648_v14  ;;  %3650 = vst [vmem:[#allocation5_spill] sm:$0xff] %v2991_v43  ;;  %v3003_v4 = vadd.f32 %v2747_v50, %v2740_v59  ;;  %v3661_v21 = vmov %v2991_v43  ;;  %v3664_v43 = vmax.f32 %v2751_v0, 0.0 }
 0x1ae   :  { %3647 = vst [vmem:[#allocation24_spill] sm:$0xff] %v2983_v6  ;;  %3651 = vst [vmem:[#allocation6_spill] sm:$0xff] %v2995_v10  ;;  %v3662_v18 = vmov %v2995_v10  ;;  %v3663_v23 = vmov %v2999_v19  ;;  %v3665_v10 = vmax.f32 %v2755_v34, 0.0  ;;  %v3667_v59 = vmax.f32 %v2763_v3, 0.0 }
 0x1af   :  { %3649 = vst [vmem:[#allocation7_spill] sm:$0xff] %v2987_v31  ;;  %3652 = vst [vmem:[#allocation9_spill] sm:$0xff] %v2999_v19  ;;  %v3660_v6 = vmov %v2987_v31  ;;  %v1652_v44 = vpack.c.bf16 %v3664_v43, %v3664_v43  ;;  %v3666_v19 = vmax.f32 %v2759_v55, 0.0  ;;  %v3668_v31 = vmax.f32 %v2767_v51, 0.0 }
 0x1b0   :  { %v1653_v33 = vpack.c.bf16 %v3665_v10, %v3665_v10  ;;  %v1655_v14 = vpack.c.bf16 %v3667_v59, %v3667_v59  ;;  %v3669_v0 = vmax.f32 %v2771_v40, 0.0  ;;  %v3670_v34 = vmax.f32 %v2775_v62, 0.0 }
 0x1b1   :  { %v1654_v50 = vpack.c.bf16 %v3666_v19, %v3666_v19  ;;  %v1656_v12 = vpack.c.bf16 %v3668_v31, %v3668_v31  ;;  %v3671_v55 = vmax.f32 %v2779_v32, 0.0  ;;  %v3672_v3 = vmax.f32 %v2783_v45, 0.0  ;;  %1454 = vst.msk [vmem:[%s3521_s4] sm:$0xf] %vm1453_vm4, %v1652_v44 }
 0x1b2   :  { %v3657_v15 = vld [vmem:[#allocation25_spill] sm:$0xff]  ;;  %v1657_v43 = vpack.c.bf16 %v3669_v0, %v3669_v0  ;;  %v1658_v10 = vpack.c.bf16 %v3670_v34, %v3670_v34  ;;  %v3673_v51 = vmax.f32 %v2787_v7, 0.0  ;;  %v3674_v40 = vmax.f32 %v2791_v16, 0.0  ;;  %1455 = vst.msk [vmem:[%s3521_s4 + $0x4] sm:$0xf] %vm1453_vm4, %v1653_v33 }
 0x1b3   :  { %v3658_v26 = vld [vmem:[#allocation22_spill] sm:$0xff]  ;;  %v1659_v19 = vpack.c.bf16 %v3671_v55, %v3671_v55  ;;  %v1660_v59 = vpack.c.bf16 %v3672_v3, %v3672_v3  ;;  %v3675_v62 = vmax.f32 %v2795_v57, 0.0  ;;  %1456 = vst.msk [vmem:[%s3521_s4 + $0x8] sm:$0xf] %vm1453_vm4, %v1654_v50  ;;  %1457 = vst.msk [vmem:[%s3521_s4 + $0xc] sm:$0xf] %vm1453_vm4, %v1655_v14 }
 0x1b4   :  { %v1661_v31 = vpack.c.bf16 %v3673_v51, %v3673_v51  ;;  %v1662_v0 = vpack.c.bf16 %v3674_v40, %v3674_v40  ;;  %v3676_v32 = vmax.f32 %v2799_v39, 0.0  ;;  %v3677_v7 = vmax.f32 %v2803_v42, 0.0  ;;  %1458 = vst.msk [vmem:[%s3521_s4 + $0x10] sm:$0xf] %vm1453_vm4, %v1656_v12  ;;  %1459 = vst.msk [vmem:[%s3521_s4 + $0x14] sm:$0xf] %vm1453_vm4, %v1657_v43 }
 0x1b5   :  { %v3659_v47 = vld [vmem:[#allocation24_spill] sm:$0xff]  ;;  %v1663_v34 = vpack.c.bf16 %v3675_v62, %v3675_v62  ;;  %v3678_v57 = vmax.f32 %v2807_v38, 0.0  ;;  %v3679_v33 = vmax.f32 %v2811_v41, 0.0  ;;  %1460 = vst.msk [vmem:[%s3521_s4 + $0x18] sm:$0xf] %vm1453_vm4, %v1658_v10  ;;  %v3680_v39 = vmax.f32 %v2815_v58, 0.0 }
 0x1b6   :  { %v1664_v45 = vpack.c.bf16 %v3676_v32, %v3676_v32  ;;  %v1665_v16 = vpack.c.bf16 %v3677_v7, %v3677_v7  ;;  %1461 = vst.msk [vmem:[%s3521_s4 + $0x1c] sm:$0xf] %vm1453_vm4, %v1659_v19  ;;  %v3681_v38 = vmax.f32 %v2819_v2, 0.0  ;;  %v3682_v14 = vmax.f32 %v2823_v56, 0.0  ;;  %1462 = vst.msk [vmem:[%s3521_s4 + $0x20] sm:$0xf] %vm1453_vm4, %v1660_v59 }
 0x1b7   :  { %v1666_v44 = vpack.c.bf16 %v3678_v57, %v3678_v57  ;;  %v1667_v50 = vpack.c.bf16 %v3679_v33, %v3679_v33  ;;  %v1668_v42 = vpack.c.bf16 %v3680_v39, %v3680_v39  ;;  %v3683_v43 = vmax.f32 %v2827_v63, 0.0  ;;  %1463 = vst.msk [vmem:[%s3521_s4 + $0x24] sm:$0xf] %vm1453_vm4, %v1661_v31  ;;  %1464 = vst.msk [vmem:[%s3521_s4 + $0x28] sm:$0xf] %vm1453_vm4, %v1662_v0  ;;  %v3702_v33 = vld [vmem:[#allocation17_spill] sm:$0xff] }
 0x1b8   :  { %v1669_v41 = vpack.c.bf16 %v3681_v38, %v3681_v38  ;;  %v1670_v12 = vpack.c.bf16 %v3682_v14, %v3682_v14  ;;  %1465 = vst.msk [vmem:[%s3521_s4 + $0x2c] sm:$0xf] %vm1453_vm4, %v1663_v34  ;;  %v3684_v58 = vmax.f32 %v2831_v22, 0.0  ;;  %v3685_v56 = vmax.f32 %v2835_v30, 0.0  ;;  %1466 = vst.msk [vmem:[%s3521_s4 + $0x30] sm:$0xf] %vm1453_vm4, %v1664_v45 }
 0x1b9   :  { %v1671_v10 = vpack.c.bf16 %v3683_v43, %v3683_v43  ;;  %v3686_v55 = vmax.f32 %v2839_v20, 0.0  ;;  %v3687_v3 = vmax.f32 %v2843_v27, 0.0  ;;  %1467 = vst.msk [vmem:[%s3521_s4 + $0x34] sm:$0xf] %vm1453_vm4, %v1665_v16  ;;  %1468 = vst.msk [vmem:[%s3521_s4 + $0x38] sm:$0xf] %vm1453_vm4, %v1666_v44 }
 0x1ba   :  { %v1672_v2 = vpack.c.bf16 %v3684_v58, %v3684_v58  ;;  %v1673_v63 = vpack.c.bf16 %v3685_v56, %v3685_v56  ;;  %1469 = vst.msk [vmem:[%s3521_s4 + $0x3c] sm:$0xf] %vm1453_vm4, %v1667_v50  ;;  %v3688_v22 = vmax.f32 %v2847_v54, 0.0  ;;  %v3689_v20 = vmax.f32 %v2851_v1, 0.0  ;;  %1470 = vst.msk [vmem:[%s3521_s4 + $0x40] sm:$0xf] %vm1453_vm4, %v1668_v42 }
 0x1bb   :  { %v1674_v19 = vpack.c.bf16 %v3686_v55, %v3686_v55  ;;  %v1675_v59 = vpack.c.bf16 %v3687_v3, %v3687_v3  ;;  %v3690_v51 = vmax.f32 %v2855_v61, 0.0  ;;  %v3691_v40 = vmax.f32 %v2859_v13, 0.0  ;;  %1471 = vst.msk [vmem:[%s3521_s4 + $0x44] sm:$0xf] %vm1453_vm4, %v1669_v41  ;;  %1472 = vst.msk [vmem:[%s3521_s4 + $0x48] sm:$0xf] %vm1453_vm4, %v1670_v12 }
 0x1bc   :  { %v1676_v30 = vpack.c.bf16 %v3688_v22, %v3688_v22  ;;  %v1677_v27 = vpack.c.bf16 %v3689_v20, %v3689_v20  ;;  %1473 = vst.msk [vmem:[%s3521_s4 + $0x4c] sm:$0xf] %vm1453_vm4, %v1671_v10  ;;  %v3692_v54 = vmax.f32 %v2863_v48, 0.0  ;;  %v3693_v61 = vmax.f32 %v2867_v60, 0.0  ;;  %1474 = vst.msk [vmem:[%s3521_s4 + $0x50] sm:$0xf] %vm1453_vm4, %v1672_v2 }
 0x1bd   :  { %v1678_v31 = vpack.c.bf16 %v3690_v51, %v3690_v51  ;;  %v1679_v0 = vpack.c.bf16 %v3691_v40, %v3691_v40  ;;  %v3694_v62 = vmax.f32 %v2871_v9, 0.0  ;;  %v3695_v32 = vmax.f32 %v2875_v28, 0.0  ;;  %1475 = vst.msk [vmem:[%s3521_s4 + $0x54] sm:$0xf] %vm1453_vm4, %v1673_v63  ;;  %1476 = vst.msk [vmem:[%s3521_s4 + $0x58] sm:$0xf] %vm1453_vm4, %v1674_v19 }
 0x1be   :  { %v1680_v1 = vpack.c.bf16 %v3692_v54, %v3692_v54  ;;  %v1681_v13 = vpack.c.bf16 %v3693_v61, %v3693_v61  ;;  %1477 = vst.msk [vmem:[%s3521_s4 + $0x5c] sm:$0xf] %vm1453_vm4, %v1675_v59  ;;  %v3696_v48 = vmax.f32 %v2879_v49, 0.0  ;;  %v3697_v9 = vmax.f32 %v2883_v52, 0.0  ;;  %1478 = vst.msk [vmem:[%s3521_s4 + $0x60] sm:$0xf] %vm1453_vm4, %v1676_v30 }
 0x1bf   :  { %v1682_v34 = vpack.c.bf16 %v3694_v62, %v3694_v62  ;;  %v1683_v45 = vpack.c.bf16 %v3695_v32, %v3695_v32  ;;  %v3698_v7 = vmax.f32 %v2887_v37, 0.0  ;;  %v3699_v57 = vmax.f32 %v2891_v25, 0.0  ;;  %1479 = vst.msk [vmem:[%s3521_s4 + $0x64] sm:$0xf] %vm1453_vm4, %v1677_v27  ;;  %1480 = vst.msk [vmem:[%s3521_s4 + $0x68] sm:$0xf] %vm1453_vm4, %v1678_v31 }
 0x1c0   :  { %v1684_v60 = vpack.c.bf16 %v3696_v48, %v3696_v48  ;;  %v1685_v28 = vpack.c.bf16 %v3697_v9, %v3697_v9  ;;  %1481 = vst.msk [vmem:[%s3521_s4 + $0x6c] sm:$0xf] %vm1453_vm4, %v1679_v0  ;;  %v3700_v49 = vmax.f32 %v2895_v8, 0.0  ;;  %v3701_v37 = vmax.f32 %v2899_v24, 0.0  ;;  %v3704_v42 = vld [vmem:[#allocation19_spill] sm:$0xff]  ;;  %v3706_v8 = vld [vmem:[#allocation16_spill] sm:$0xff] }
 0x1c1   :  { %v1686_v16 = vpack.c.bf16 %v3698_v7, %v3698_v7  ;;  %v1687_v44 = vpack.c.bf16 %v3699_v57, %v3699_v57  ;;  %v3703_v50 = vmax.f32 %v3702_v33, 0.0  ;;  %v3705_v38 = vmax.f32 %v3704_v42, 0.0  ;;  %1482 = vst.msk [vmem:[%s3521_s4 + $0x70] sm:$0xf] %vm1453_vm4, %v1680_v1  ;;  %1483 = vst.msk [vmem:[%s3521_s4 + $0x74] sm:$0xf] %vm1453_vm4, %v1681_v13 }
 0x1c2   :  { %v1688_v52 = vpack.c.bf16 %v3700_v49, %v3700_v49  ;;  %v1689_v25 = vpack.c.bf16 %v3701_v37, %v3701_v37  ;;  %1484 = vst.msk [vmem:[%s3521_s4 + $0x78] sm:$0xf] %vm1453_vm4, %v1682_v34  ;;  %1485 = vst.msk [vmem:[%s3521_s4 + $0x7c] sm:$0xf] %vm1453_vm4, %v1683_v45  ;;  %v3707_v24 = vmax.f32 %v3706_v8, 0.0  ;;  %v3708_v12 = vld [vmem:[#allocation18_spill] sm:$0xff] }
 0x1c3   :  { %v1690_v39 = vpack.c.bf16 %v3703_v50, %v3703_v50  ;;  %v1691_v41 = vpack.c.bf16 %v3705_v38, %v3705_v38  ;;  %v3709_v43 = vmax.f32 %v3708_v12, 0.0  ;;  %v3710_v58 = vld [vmem:[#allocation3_spill] sm:$0xff]  ;;  %v3712_v63 = vmax.f32 %v2923_v35, 0.0  ;;  %1486 = vst.msk [vmem:[%s3521_s4 + $0x80] sm:$0xf] %vm1453_vm4, %v1684_v60  ;;  %v3716_v20 = vld [vmem:[#allocation4_spill] sm:$0xff] }
 0x1c4   :  { %v1692_v14 = vpack.c.bf16 %v3707_v24, %v3707_v24  ;;  %v3711_v2 = vmax.f32 %v3710_v58, 0.0  ;;  %1487 = vst.msk [vmem:[%s3521_s4 + $0x84] sm:$0xf] %vm1453_vm4, %v1685_v28  ;;  %1488 = vst.msk [vmem:[%s3521_s4 + $0x88] sm:$0xf] %vm1453_vm4, %v1686_v16  ;;  %v3713_v35 = vmax.f32 %v2927_v17, 0.0 }
 0x1c5   :  { %v1693_v10 = vpack.c.bf16 %v3709_v43, %v3709_v43  ;;  %v1695_v55 = vpack.c.bf16 %v3712_v63, %v3712_v63  ;;  %1489 = vst.msk [vmem:[%s3521_s4 + $0x8c] sm:$0xf] %vm1453_vm4, %v1687_v44  ;;  %v3714_v3 = vmax.f32 %v2931_v11, 0.0  ;;  %v3715_v22 = vmax.f32 %v2935_v36, 0.0  ;;  %1490 = vst.msk [vmem:[%s3521_s4 + $0x90] sm:$0xf] %vm1453_vm4, %v1688_v52 }
 0x1c6   :  { %v1694_v56 = vpack.c.bf16 %v3711_v2, %v3711_v2  ;;  %v1696_v19 = vpack.c.bf16 %v3713_v35, %v3713_v35  ;;  %v3717_v27 = vmax.f32 %v3716_v20, 0.0  ;;  %1491 = vst.msk [vmem:[%s3521_s4 + $0x94] sm:$0xf] %vm1453_vm4, %v1689_v25  ;;  %1492 = vst.msk [vmem:[%s3521_s4 + $0x98] sm:$0xf] %vm1453_vm4, %v1690_v39  ;;  %v3718_v17 = vld [vmem:[#allocation2_spill] sm:$0xff] }
 0x1c7   :  { %v1697_v59 = vpack.c.bf16 %v3714_v3, %v3714_v3  ;;  %v1698_v30 = vpack.c.bf16 %v3715_v22, %v3715_v22  ;;  %1493 = vst.msk [vmem:[%s3521_s4 + $0x9c] sm:$0xf] %vm1453_vm4, %v1691_v41  ;;  %v3719_v11 = vmax.f32 %v3718_v17, 0.0  ;;  %v3720_v31 = vld [vmem:[#allocation20_spill] sm:$0xff]  ;;  %v3722_v54 = vld [vmem:[#allocation21_spill] sm:$0xff]  ;;  %v3724_v13 = vld [vmem:[#allocation23_spill] sm:$0xff] }
 0x1c8   :  { %v1699_v51 = vpack.c.bf16 %v3717_v27, %v3717_v27  ;;  %v3721_v40 = vmax.f32 %v3720_v31, 0.0  ;;  %v3723_v1 = vmax.f32 %v3722_v54, 0.0  ;;  %v3725_v62 = vmax.f32 %v3724_v13, 0.0  ;;  %1494 = vst.msk [vmem:[%s3521_s4 + $0xa0] sm:$0xf] %vm1453_vm4, %v1692_v14 }
 0x1c9   :  { %v1700_v36 = vpack.c.bf16 %v3719_v11, %v3719_v11  ;;  %1495 = vst.msk [vmem:[%s3521_s4 + $0xa4] sm:$0xf] %vm1453_vm4, %v1693_v10  ;;  %1496 = vst.msk [vmem:[%s3521_s4 + $0xa8] sm:$0xf] %vm1453_vm4, %v1694_v56  ;;  %v3726_v32 = vmax.f32 %v3657_v15, 0.0  ;;  %v3727_v48 = vmax.f32 %v3658_v26, 0.0 }
 0x1ca   :  { %v1701_v0 = vpack.c.bf16 %v3721_v40, %v3721_v40  ;;  %v1702_v61 = vpack.c.bf16 %v3723_v1, %v3723_v1  ;;  %v1703_v34 = vpack.c.bf16 %v3725_v62, %v3725_v62  ;;  %1497 = vst.msk [vmem:[%s3521_s4 + $0xac] sm:$0xf] %vm1453_vm4, %v1695_v55  ;;  %v3728_v9 = vmax.f32 %v2967_v53, 0.0  ;;  %1498 = vst.msk [vmem:[%s3521_s4 + $0xb0] sm:$0xf] %vm1453_vm4, %v1696_v19 }
 0x1cb   :  { %v1704_v45 = vpack.c.bf16 %v3726_v32, %v3726_v32  ;;  %v1705_v60 = vpack.c.bf16 %v3727_v48, %v3727_v48  ;;  %v3729_v7 = vmax.f32 %v2971_v5, 0.0  ;;  %1499 = vst.msk [vmem:[%s3521_s4 + $0xb4] sm:$0xf] %vm1453_vm4, %v1697_v59  ;;  %1500 = vst.msk [vmem:[%s3521_s4 + $0xb8] sm:$0xf] %vm1453_vm4, %v1698_v30  ;;  %v3730_v15 = vmax.f32 %v2975_v46, 0.0 }
 0x1cc   :  { %v1706_v28 = vpack.c.bf16 %v3728_v9, %v3728_v9  ;;  %1501 = vst.msk [vmem:[%s3521_s4 + $0xbc] sm:$0xf] %vm1453_vm4, %v1699_v51  ;;  %v3731_v53 = vmax.f32 %v2979_v29, 0.0  ;;  %v3732_v57 = vmax.f32 %v3659_v47, 0.0  ;;  %v3733_v49 = vmax.f32 %v3660_v6, 0.0 }
 0x1cd   :  { %v1707_v16 = vpack.c.bf16 %v3729_v7, %v3729_v7  ;;  %v1708_v26 = vpack.c.bf16 %v3730_v15, %v3730_v15  ;;  %1502 = vst.msk [vmem:[%s3521_s4 + $0xc0] sm:$0xf] %vm1453_vm4, %v1700_v36  ;;  %1503 = vst.msk [vmem:[%s3521_s4 + $0xc4] sm:$0xf] %vm1453_vm4, %v1701_v0  ;;  %v3734_v47 = vmax.f32 %v3661_v21, 0.0  ;;  %v3735_v29 = vmax.f32 %v3662_v18, 0.0 }
 0x1ce   :  { %v1709_v5 = vpack.c.bf16 %v3731_v53, %v3731_v53  ;;  %v1710_v44 = vpack.c.bf16 %v3732_v57, %v3732_v57  ;;  %v1711_v52 = vpack.c.bf16 %v3733_v49, %v3733_v49  ;;  %1504 = vst.msk [vmem:[%s3521_s4 + $0xc8] sm:$0xf] %vm1453_vm4, %v1702_v61  ;;  %1505 = vst.msk [vmem:[%s3521_s4 + $0xcc] sm:$0xf] %vm1453_vm4, %v1703_v34  ;;  %v3736_v37 = vmax.f32 %v3663_v23, 0.0 }
 0x1cf   :  { %v1712_v46 = vpack.c.bf16 %v3734_v47, %v3734_v47  ;;  %v1713_v6 = vpack.c.bf16 %v3735_v29, %v3735_v29  ;;  %v3737_v33 = vmax.f32 %v3003_v4, 0.0  ;;  %1506 = vst.msk [vmem:[%s3521_s4 + $0xd0] sm:$0xf] %vm1453_vm4, %v1704_v45  ;;  %1507 = vst.msk [vmem:[%s3521_s4 + $0xd4] sm:$0xf] %vm1453_vm4, %v1705_v60 }
 0x1d0   :  { %v1714_v25 = vpack.c.bf16 %v3736_v37, %v3736_v37  ;;  %1508 = vst.msk [vmem:[%s3521_s4 + $0xd8] sm:$0xf] %vm1453_vm4, %v1706_v28  ;;  %1509 = vst.msk [vmem:[%s3521_s4 + $0xdc] sm:$0xf] %vm1453_vm4, %v1707_v16 }
 0x1d1   :  { %v1715_v50 = vpack.c.bf16 %v3737_v33, %v3737_v33  ;;  %1510 = vst.msk [vmem:[%s3521_s4 + $0xe0] sm:$0xf] %vm1453_vm4, %v1708_v26  ;;  %1511 = vst.msk [vmem:[%s3521_s4 + $0xe4] sm:$0xf] %vm1453_vm4, %v1709_v5 }
 0x1d2   :  { %1512 = vst.msk [vmem:[%s3521_s4 + $0xe8] sm:$0xf] %vm1453_vm4, %v1710_v44  ;;  %1513 = vst.msk [vmem:[%s3521_s4 + $0xec] sm:$0xf] %vm1453_vm4, %v1711_v52 }
 0x1d3   :  { %1514 = vst.msk [vmem:[%s3521_s4 + $0xf0] sm:$0xf] %vm1453_vm4, %v1712_v46  ;;  %1515 = vst.msk [vmem:[%s3521_s4 + $0xf4] sm:$0xf] %vm1453_vm4, %v1713_v6 }
 0x1d4   :  { %1516 = vst.msk [vmem:[%s3521_s4 + $0xf8] sm:$0xf] %vm1453_vm4, %v1714_v25  ;;  %1517 = vst.msk [vmem:[%s3521_s4 + $0xfc] sm:$0xf] %vm1453_vm4, %v1715_v50 }

// kernel: shared_layers_forward.76
= control target key start
LH: loop header
LB: loop body
LE: loop exit
PB: predicated region body
PF: predicated region fallthrough
CT: control target
= control target key end

     0   :  { %vm250_vm0 = vcmask 130048   ;;  %vm1438_vm1 = vcmask 125952   ;;  %s3490_s1 = inlined_call_operand.vmem [shape: bf16[16,16], index: 1, kind: input, shape index: {}]   ;;  %s3491_s0 = inlined_call_operand.vmem [shape: bf16[512,16], index: 0, kind: input, shape index: {}]   ;;  %s3492_s2 = inlined_call_operand.vmem [shape: f32[1,16], index: 2, kind: input, shape index: {}]   ;;  %s3493_s3 = inlined_call_operand.vmem [shape: f32[1,16], index: 3, kind: input, shape index: {}]   ;;  %s3494_s4 = inlined_call_operand.vmem [shape: bf16[512,16], index: 4, kind: output, shape index: {}]  }
   0x1   :  { %v1801_v0 = vld [vmem:[%s3490_s1] sm:$0xff]   ;;  %v1803_v2 = vld [vmem:[%s3491_s0 + $0x8] sm:$0xff]   ;;  %v1804_v3 = vld [vmem:[%s3491_s0 + $0x10] sm:$0xff]  }
   0x2   :  { %v1802_v1 = vld [vmem:[%s3491_s0] sm:$0xff]   ;;  %1733 = vmatprep.subr.bf16.mxu0 %v1801_v0  ;;  %1799 = vmatprep.subr.bf16.mxu1 %v1801_v0  ;;  %v1805_v4 = vld [vmem:[%s3491_s0 + $0x18] sm:$0xff]   ;;  %v1807_v6 = vld [vmem:[%s3491_s0 + $0x28] sm:$0xff]  }
   0x3   :  { %1734 = vmatpush3.bf16.msra.mxu0 %v1801_v0  ;;  %1735 = vmatprep.mubr.msk.bf16.mxu0 %vm250_vm0, %v1802_v1  ;;  %v1806_v5 = vld [vmem:[%s3491_s0 + $0x20] sm:$0xff]   ;;  %v1808_v7 = vld [vmem:[%s3491_s0 + $0x30] sm:$0xff]   ;;  %v1819_v9 = vld [vmem:[%s3491_s0 + $0x88] sm:$0xff]  }
   0x4   :  { %1800 = vmatpush3.bf16.msra.mxu1 %v1801_v0  ;;  %v1818_v8 = vld [vmem:[%s3491_s0 + $0x80] sm:$0xff]   ;;  %v1820_v10 = vld [vmem:[%s3491_s0 + $0x90] sm:$0xff]   ;;  %v1821_v11 = vld [vmem:[%s3491_s0 + $0x98] sm:$0xff]  }
   0x5   :  { %1767 = vmatprep.mubr.msk.bf16.mxu1 %vm250_vm0, %v1818_v8  ;;  %v1822_v12 = vld [vmem:[%s3491_s0 + $0xa0] sm:$0xff]   ;;  %v1809_v13 = vld [vmem:[%s3491_s0 + $0x38] sm:$0xff]   ;;  %v1823_v15 = vld [vmem:[%s3491_s0 + $0xa8] sm:$0xff]  }
   0x6   :  { %1736 = vmatmul.mubr.msk.bf16.vlgmr.msra.gmra.mrb[0].mxu0 %vm250_vm0, %v1803_v2  ;;  %v1810_v14 = vld [vmem:[%s3491_s0 + $0x40] sm:$0xff]   ;;  %v1824_v16 = vld [vmem:[%s3491_s0 + $0xb0] sm:$0xff]   ;;  %v1811_v17 = vld [vmem:[%s3491_s0 + $0x48] sm:$0xff]  }
   0x7   :  { %1739 = vmatprep.mubr.msk.bf16.mxu0 %vm250_vm0, %v1804_v3  ;;  %1768 = vmatmul.mubr.msk.bf16.vlgmr.msra.gmra.mrb[0].mxu1 %vm250_vm0, %v1819_v9  ;;  %v1812_v18 = vld [vmem:[%s3491_s0 + $0x50] sm:$0xff]   ;;  %v1825_v19 = vld [vmem:[%s3491_s0 + $0xb8] sm:$0xff]   ;;  %v1826_v20 = vld [vmem:[%s3491_s0 + $0xc0] sm:$0xff]  }
   0x8   :  { %1771 = vmatprep.mubr.msk.bf16.mxu1 %vm250_vm0, %v1820_v10  ;;  %v1813_v21 = vld [vmem:[%s3491_s0 + $0x58] sm:$0xff]   ;;  %v1814_v22 = vld [vmem:[%s3491_s0 + $0x60] sm:$0xff]   ;;  %v1827_v23 = vld [vmem:[%s3491_s0 + $0xc8] sm:$0xff]  }
   0x9   :  { %v1828_v24 = vld [vmem:[%s3491_s0 + $0xd0] sm:$0xff]   ;;  %v1815_v25 = vld [vmem:[%s3491_s0 + $0x68] sm:$0xff]   ;;  %v1829_v27 = vld [vmem:[%s3491_s0 + $0xd8] sm:$0xff]  }
   0xa   :  { %v1816_v26 = vld [vmem:[%s3491_s0 + $0x70] sm:$0xff]   ;;  %v1830_v28 = vld [vmem:[%s3491_s0 + $0xe0] sm:$0xff]   ;;  %v1817_v29 = vld [vmem:[%s3491_s0 + $0x78] sm:$0xff]  }
   0xb   :  { %v1831_v30 = vld [vmem:[%s3491_s0 + $0xe8] sm:$0xff]   ;;  %v1832_v31 = vld [vmem:[%s3491_s0 + $0xf0] sm:$0xff]   ;;  %v1833_v32 = vld [vmem:[%s3491_s0 + $0xf8] sm:$0xff]  }
   0xe   :  { %1740 = vmatmul.mubr.msk.bf16.gmra.mrb[4].mxu0 %vm250_vm0, %v1805_v4 }
   0xf   :  { %1743 = vmatprep.mubr.msk.bf16.mxu0 %vm250_vm0, %v1806_v5  ;;  %1772 = vmatmul.mubr.msk.bf16.gmra.mrb[4].mxu1 %vm250_vm0, %v1821_v11 }
  0x10   :  { %1775 = vmatprep.mubr.msk.bf16.mxu1 %vm250_vm0, %v1822_v12 }
  0x16   :  { %1744 = vmatmul.mubr.msk.bf16.gmra.mrb[8].mxu0 %vm250_vm0, %v1807_v6 }
  0x17   :  { %1747 = vmatprep.mubr.msk.bf16.mxu0 %vm250_vm0, %v1808_v7  ;;  %1776 = vmatmul.mubr.msk.bf16.gmra.mrb[8].mxu1 %vm250_vm0, %v1823_v15 }
  0x18   :  { %1779 = vmatprep.mubr.msk.bf16.mxu1 %vm250_vm0, %v1824_v16 }
  0x1e   :  { %1748 = vmatmul.mubr.msk.bf16.gmra.mrb[12].mxu0 %vm250_vm0, %v1809_v13 }
  0x1f   :  { %1751 = vmatprep.mubr.msk.bf16.mxu0 %vm250_vm0, %v1810_v14  ;;  %1780 = vmatmul.mubr.msk.bf16.gmra.mrb[12].mxu1 %vm250_vm0, %v1825_v19 }
  0x20   :  { %1783 = vmatprep.mubr.msk.bf16.mxu1 %vm250_vm0, %v1826_v20 }
  0x26   :  { %1752 = vmatmul.mubr.msk.bf16.gmra.mrb[16].mxu0 %vm250_vm0, %v1811_v17 }
  0x27   :  { %1755 = vmatprep.mubr.msk.bf16.mxu0 %vm250_vm0, %v1812_v18  ;;  %1784 = vmatmul.mubr.msk.bf16.gmra.mrb[16].mxu1 %vm250_vm0, %v1827_v23 }
  0x28   :  { %1787 = vmatprep.mubr.msk.bf16.mxu1 %vm250_vm0, %v1828_v24 }
  0x2e   :  { %1756 = vmatmul.mubr.msk.bf16.gmra.mrb[20].mxu0 %vm250_vm0, %v1813_v21 }
  0x2f   :  { %1759 = vmatprep.mubr.msk.bf16.mxu0 %vm250_vm0, %v1814_v22  ;;  %1788 = vmatmul.mubr.msk.bf16.gmra.mrb[20].mxu1 %vm250_vm0, %v1829_v27 }
  0x30   :  { %1791 = vmatprep.mubr.msk.bf16.mxu1 %vm250_vm0, %v1830_v28 }
  0x36   :  { %1760 = vmatmul.mubr.msk.bf16.gmra.mrb[24].mxu0 %vm250_vm0, %v1815_v25 }
  0x37   :  { %1763 = vmatprep.mubr.msk.bf16.mxu0 %vm250_vm0, %v1816_v26  ;;  %1792 = vmatmul.mubr.msk.bf16.gmra.mrb[24].mxu1 %vm250_vm0, %v1831_v30 }
  0x38   :  { %1795 = vmatprep.mubr.msk.bf16.mxu1 %vm250_vm0, %v1832_v31 }
  0x3e   :  { %1764 = vmatmul.mubr.msk.bf16.gmra.mrb[28].mxu0 %vm250_vm0, %v1817_v29 }
  0x3f   :  { %1796 = vmatmul.mubr.msk.bf16.gmra.mrb[28].mxu1 %vm250_vm0, %v1833_v32 }
  0xd9   :  { %v1992_v33 = vpop.f32.mrb[0].mxu0 }
  0xda   :  { %v1994_v34 = vpop.f32.mrb[1].mxu0  ;;  %v772_v38 = vmul.f32 %v1992_v33, %v1992_v33  ;;  %v639_v43 = vsel %vm250_vm0, %v1992_v33, 0.0  ;;  %v2044_v7 = vpop.f32.mrb[0].mxu1 }
  0xdb   :  { %v770_v35 = vmul.f32 %v1994_v34, %v1994_v34  ;;  %v1998_v36 = vpop.f32.mrb[2].mxu0  ;;  %v636_v39 = vsel %vm250_vm0, %v1994_v34, 0.0  ;;  %3537 = vst [vmem:[#allocation2_spill] sm:$0xff] %v2044_v7  ;;  %v2046_v10 = vpop.f32.mrb[1].mxu1 }
  0xdc   :  { %v2000_v37 = vpop.f32.mrb[3].mxu0  ;;  %v773_v45 = vmul.f32 %v1998_v36, %v1998_v36  ;;  %v837_v49 = vsel %vm250_vm0, %v772_v38, 0.0  ;;  %v641_v50 = vsel %vm250_vm0, %v1998_v36, 0.0  ;;  %3538 = vst [vmem:[#allocation3_spill] sm:$0xff] %v2046_v10  ;;  %v2053_v14 = vpop.f32.mrb[2].mxu1 }
  0xdd   :  { %v637_v40 = vsel %vm250_vm0, %v2000_v37, 0.0  ;;  %v771_v41 = vmul.f32 %v2000_v37, %v2000_v37  ;;  %v834_v44 = vsel %vm250_vm0, %v770_v35, 0.0  ;;  %3539 = vst [vmem:[#allocation4_spill] sm:$0xff] %v2053_v14  ;;  %v2057_v18 = vpop.f32.mrb[3].mxu1 }
  0xde   :  { %v638_v42 = vadd.f32 %v637_v40, %v636_v39  ;;  %v839_v55 = vsel %vm250_vm0, %v773_v45, 0.0  ;;  %3540 = vst [vmem:[#allocation5_spill] sm:$0xff] %v2057_v18 }
  0xdf   :  { %v835_v46 = vsel %vm250_vm0, %v771_v41, 0.0 }
  0xe0   :  { %v640_v47 = vadd.f32 %v639_v43, %v638_v42  ;;  %v836_v48 = vadd.f32 %v835_v46, %v834_v44 }
  0xe1   :  { %v2019_v51 = vpop.f32.mrb[4].mxu0 }
  0xe2   :  { %v838_v52 = vadd.f32 %v837_v49, %v836_v48  ;;  %v2021_v53 = vpop.f32.mrb[5].mxu0  ;;  %v642_v54 = vadd.f32 %v641_v50, %v640_v47  ;;  %v776_v62 = vmul.f32 %v2019_v51, %v2019_v51  ;;  %v647_v4 = vsel %vm250_vm0, %v2019_v51, 0.0  ;;  %v2080_v39 = vpop.f32.mrb[4].mxu1 }
  0xe3   :  { %v643_v56 = vsel %vm250_vm0, %v2021_v53, 0.0  ;;  %v774_v57 = vmul.f32 %v2021_v53, %v2021_v53  ;;  %v2028_v58 = vpop.f32.mrb[6].mxu0  ;;  %3541 = vst [vmem:[#allocation6_spill] sm:$0xff] %v2080_v39  ;;  %v2082_v42 = vpop.f32.mrb[5].mxu1 }
  0xe4   :  { %v644_v59 = vadd.f32 %v643_v56, %v642_v54  ;;  %v840_v60 = vadd.f32 %v839_v55, %v838_v52  ;;  %v2030_v61 = vpop.f32.mrb[7].mxu0  ;;  %v777_v5 = vmul.f32 %v2028_v58, %v2028_v58  ;;  %v845_v11 = vsel %vm250_vm0, %v776_v62, 0.0  ;;  %3542 = vst [vmem:[#allocation7_spill] sm:$0xff] %v2082_v42  ;;  %v2089_v46 = vpop.f32.mrb[6].mxu1 }
  0xe5   :  { %v841_v63 = vsel %vm250_vm0, %v774_v57, 0.0  ;;  %v645_v0 = vsel %vm250_vm0, %v2030_v61, 0.0  ;;  %v775_v1 = vmul.f32 %v2030_v61, %v2030_v61  ;;  %v649_v12 = vsel %vm250_vm0, %v2028_v58, 0.0  ;;  %v2093_v50 = vpop.f32.mrb[7].mxu1 }
  0xe6   :  { %v842_v2 = vadd.f32 %v841_v63, %v840_v60  ;;  %v646_v3 = vadd.f32 %v645_v0, %v644_v59  ;;  %v847_v19 = vsel %vm250_vm0, %v777_v5, 0.0 }
  0xe7   :  { %v843_v6 = vsel %vm250_vm0, %v775_v1, 0.0 }
  0xe8   :  { %v648_v8 = vadd.f32 %v647_v4, %v646_v3  ;;  %v844_v9 = vadd.f32 %v843_v6, %v842_v2 }
  0xe9   :  { %v2051_v13 = vpop.f32.mrb[8].mxu0 }
  0xea   :  { %v846_v15 = vadd.f32 %v845_v11, %v844_v9  ;;  %v2055_v16 = vpop.f32.mrb[9].mxu0  ;;  %v650_v17 = vadd.f32 %v649_v12, %v648_v8  ;;  %v780_v26 = vmul.f32 %v2051_v13, %v2051_v13  ;;  %v655_v32 = vsel %vm250_vm0, %v2051_v13, 0.0  ;;  %v2116_v8 = vpop.f32.mrb[8].mxu1 }
  0xeb   :  { %v651_v20 = vsel %vm250_vm0, %v2055_v16, 0.0  ;;  %v778_v21 = vmul.f32 %v2055_v16, %v2055_v16  ;;  %v2064_v22 = vpop.f32.mrb[10].mxu0  ;;  %v2118_v12 = vpop.f32.mrb[9].mxu1 }
  0xec   :  { %v652_v23 = vadd.f32 %v651_v20, %v650_v17  ;;  %v848_v24 = vadd.f32 %v847_v19, %v846_v15  ;;  %v2066_v25 = vpop.f32.mrb[11].mxu0  ;;  %v781_v35 = vmul.f32 %v2064_v22, %v2064_v22  ;;  %v853_v43 = vsel %vm250_vm0, %v780_v26, 0.0  ;;  %v2125_v20 = vpop.f32.mrb[10].mxu1 }
  0xed   :  { %v849_v27 = vsel %vm250_vm0, %v778_v21, 0.0  ;;  %v653_v28 = vsel %vm250_vm0, %v2066_v25, 0.0  ;;  %v779_v29 = vmul.f32 %v2066_v25, %v2066_v25  ;;  %v657_v44 = vsel %vm250_vm0, %v2064_v22, 0.0  ;;  %v2129_v26 = vpop.f32.mrb[11].mxu1 }
  0xee   :  { %v850_v30 = vadd.f32 %v849_v27, %v848_v24  ;;  %v654_v31 = vadd.f32 %v653_v28, %v652_v23  ;;  %v855_v52 = vsel %vm250_vm0, %v781_v35, 0.0 }
  0xef   :  { %v851_v38 = vsel %vm250_vm0, %v779_v29, 0.0 }
  0xf0   :  { %v656_v40 = vadd.f32 %v655_v32, %v654_v31  ;;  %v852_v41 = vadd.f32 %v851_v38, %v850_v30 }
  0xf1   :  { %v2087_v45 = vpop.f32.mrb[12].mxu0 }
  0xf2   :  { %v854_v47 = vadd.f32 %v853_v43, %v852_v41  ;;  %v2091_v48 = vpop.f32.mrb[13].mxu0  ;;  %v658_v49 = vadd.f32 %v657_v44, %v656_v40  ;;  %v784_v62 = vmul.f32 %v2087_v45, %v2087_v45  ;;  %v663_v4 = vsel %vm250_vm0, %v2087_v45, 0.0 }
  0xf3   :  { %v659_v54 = vsel %vm250_vm0, %v2091_v48, 0.0  ;;  %v782_v55 = vmul.f32 %v2091_v48, %v2091_v48  ;;  %v2100_v56 = vpop.f32.mrb[14].mxu0 }
  0xf4   :  { %v660_v57 = vadd.f32 %v659_v54, %v658_v49  ;;  %v856_v59 = vadd.f32 %v855_v52, %v854_v47  ;;  %v2102_v60 = vpop.f32.mrb[15].mxu0  ;;  %v785_v5 = vmul.f32 %v2100_v56, %v2100_v56  ;;  %v861_v15 = vsel %vm250_vm0, %v784_v62, 0.0 }
  0xf5   :  { %v857_v63 = vsel %vm250_vm0, %v782_v55, 0.0  ;;  %v661_v0 = vsel %vm250_vm0, %v2102_v60, 0.0  ;;  %v783_v1 = vmul.f32 %v2102_v60, %v2102_v60  ;;  %v665_v17 = vsel %vm250_vm0, %v2100_v56, 0.0  ;;  %v2152_v55 = vpop.f32.mrb[12].mxu1 }
  0xf6   :  { %v858_v2 = vadd.f32 %v857_v63, %v856_v59  ;;  %v662_v3 = vadd.f32 %v661_v0, %v660_v57  ;;  %v863_v27 = vsel %vm250_vm0, %v785_v5, 0.0  ;;  %v2154_v62 = vpop.f32.mrb[13].mxu1 }
  0xf7   :  { %v859_v6 = vsel %vm250_vm0, %v783_v1, 0.0 }
  0xf8   :  { %v664_v9 = vadd.f32 %v663_v4, %v662_v3  ;;  %v860_v11 = vadd.f32 %v859_v6, %v858_v2  ;;  %v2161_v2 = vpop.f32.mrb[14].mxu1 }
  0xf9   :  { %v2123_v19 = vpop.f32.mrb[16].mxu0  ;;  %v2165_v6 = vpop.f32.mrb[15].mxu1 }
  0xfa   :  { %v862_v21 = vadd.f32 %v861_v15, %v860_v11  ;;  %v2127_v23 = vpop.f32.mrb[17].mxu0  ;;  %v666_v24 = vadd.f32 %v665_v17, %v664_v9  ;;  %v788_v38 = vmul.f32 %v2123_v19, %v2123_v19  ;;  %v671_v49 = vsel %vm250_vm0, %v2123_v19, 0.0 }
  0xfb   :  { %v667_v28 = vsel %vm250_vm0, %v2127_v23, 0.0  ;;  %v786_v29 = vmul.f32 %v2127_v23, %v2127_v23  ;;  %v2136_v30 = vpop.f32.mrb[18].mxu0 }
  0xfc   :  { %v668_v31 = vadd.f32 %v667_v28, %v666_v24  ;;  %v864_v32 = vadd.f32 %v863_v27, %v862_v21  ;;  %v2138_v35 = vpop.f32.mrb[19].mxu0  ;;  %v789_v52 = vmul.f32 %v2136_v30, %v2136_v30  ;;  %v869_v63 = vsel %vm250_vm0, %v788_v38, 0.0 }
  0xfd   :  { %v865_v40 = vsel %vm250_vm0, %v786_v29, 0.0  ;;  %v669_v41 = vsel %vm250_vm0, %v2138_v35, 0.0  ;;  %v787_v43 = vmul.f32 %v2138_v35, %v2138_v35  ;;  %v673_v0 = vsel %vm250_vm0, %v2136_v30, 0.0 }
  0xfe   :  { %v866_v44 = vadd.f32 %v865_v40, %v864_v32  ;;  %v670_v47 = vadd.f32 %v669_v41, %v668_v31  ;;  %v871_v9 = vsel %vm250_vm0, %v789_v52, 0.0 }
  0xff   :  { %v867_v54 = vsel %vm250_vm0, %v787_v43, 0.0 }
 0x100   :  { %v672_v57 = vadd.f32 %v671_v49, %v670_v47  ;;  %v868_v59 = vadd.f32 %v867_v54, %v866_v44  ;;  %v2188_v47 = vpop.f32.mrb[16].mxu1 }
 0x101   :  { %v2159_v1 = vpop.f32.mrb[20].mxu0  ;;  %v2190_v54 = vpop.f32.mrb[17].mxu1 }
 0x102   :  { %3543 = vst [vmem:[#allocation8_spill] sm:$0xff] %v2159_v1  ;;  %v870_v3 = vadd.f32 %v869_v63, %v868_v59  ;;  %v2163_v4 = vpop.f32.mrb[21].mxu0  ;;  %v674_v5 = vadd.f32 %v673_v0, %v672_v57  ;;  %v792_v28 = vmul.f32 %v2159_v1, %v2159_v1  ;;  %v679_v41 = vsel %vm250_vm0, %v2159_v1, 0.0  ;;  %v2197_v0 = vpop.f32.mrb[18].mxu1 }
 0x103   :  { %3544 = vst [vmem:[#allocation9_spill] sm:$0xff] %v2163_v4  ;;  %v675_v11 = vsel %vm250_vm0, %v2163_v4, 0.0  ;;  %v790_v15 = vmul.f32 %v2163_v4, %v2163_v4  ;;  %v2172_v17 = vpop.f32.mrb[22].mxu0 }
 0x104   :  { %3545 = vst [vmem:[#allocation10_spill] sm:$0xff] %v2172_v17  ;;  %v676_v21 = vadd.f32 %v675_v11, %v674_v5  ;;  %v872_v24 = vadd.f32 %v871_v9, %v870_v3  ;;  %v2174_v27 = vpop.f32.mrb[23].mxu0  ;;  %v793_v43 = vmul.f32 %v2172_v17, %v2172_v17  ;;  %v877_v57 = vsel %vm250_vm0, %v792_v28, 0.0  ;;  %v2201_v11 = vpop.f32.mrb[19].mxu1 }
 0x105   :  { %3546 = vst [vmem:[#allocation11_spill] sm:$0xff] %v2174_v27  ;;  %v873_v29 = vsel %vm250_vm0, %v790_v15, 0.0  ;;  %v677_v31 = vsel %vm250_vm0, %v2174_v27, 0.0  ;;  %v791_v32 = vmul.f32 %v2174_v27, %v2174_v27  ;;  %v681_v59 = vsel %vm250_vm0, %v2172_v17, 0.0 }
 0x106   :  { %v874_v38 = vadd.f32 %v873_v29, %v872_v24  ;;  %v678_v40 = vadd.f32 %v677_v31, %v676_v21  ;;  %v879_v15 = vsel %vm250_vm0, %v793_v43, 0.0 }
 0x107   :  { %v875_v44 = vsel %vm250_vm0, %v791_v32, 0.0 }
 0x108   :  { %v680_v49 = vadd.f32 %v679_v41, %v678_v40  ;;  %v876_v52 = vadd.f32 %v875_v44, %v874_v38 }
 0x109   :  { %v2195_v63 = vpop.f32.mrb[24].mxu0 }
 0x10a   :  { %3547 = vst [vmem:[#allocation12_spill] sm:$0xff] %v2195_v63  ;;  %v878_v3 = vadd.f32 %v877_v57, %v876_v52  ;;  %v2199_v5 = vpop.f32.mrb[25].mxu0  ;;  %v682_v9 = vadd.f32 %v681_v59, %v680_v49  ;;  %v796_v38 = vmul.f32 %v2195_v63, %v2195_v63  ;;  %v687_v52 = vsel %vm250_vm0, %v2195_v63, 0.0 }
 0x10b   :  { %3548 = vst [vmem:[#allocation13_spill] sm:$0xff] %v2199_v5  ;;  %v683_v21 = vsel %vm250_vm0, %v2199_v5, 0.0  ;;  %v794_v24 = vmul.f32 %v2199_v5, %v2199_v5  ;;  %v2208_v28 = vpop.f32.mrb[26].mxu0 }
 0x10c   :  { %3549 = vst [vmem:[#allocation14_spill] sm:$0xff] %v2208_v28  ;;  %v684_v29 = vadd.f32 %v683_v21, %v682_v9  ;;  %v880_v31 = vadd.f32 %v879_v15, %v878_v3  ;;  %v2210_v32 = vpop.f32.mrb[27].mxu0  ;;  %v797_v57 = vmul.f32 %v2208_v28, %v2208_v28  ;;  %v2224_v3 = vpop.f32.mrb[20].mxu1 }
 0x10d   :  { %3550 = vst [vmem:[#allocation15_spill] sm:$0xff] %v2210_v32  ;;  %v881_v40 = vsel %vm250_vm0, %v794_v24, 0.0  ;;  %v685_v41 = vsel %vm250_vm0, %v2210_v32, 0.0  ;;  %v795_v43 = vmul.f32 %v2210_v32, %v2210_v32  ;;  %v2226_v21 = vpop.f32.mrb[21].mxu1  ;;  %v885_v24 = vsel %vm250_vm0, %v796_v38, 0.0 }
 0x10e   :  { %v882_v44 = vadd.f32 %v881_v40, %v880_v31  ;;  %v686_v49 = vadd.f32 %v685_v41, %v684_v29  ;;  %v689_v31 = vsel %vm250_vm0, %v2208_v28, 0.0  ;;  %v2233_v40 = vpop.f32.mrb[22].mxu1 }
 0x10f   :  { %v883_v59 = vsel %vm250_vm0, %v795_v43, 0.0  ;;  %v2237_v43 = vpop.f32.mrb[23].mxu1 }
 0x110   :  { %v688_v9 = vadd.f32 %v687_v52, %v686_v49  ;;  %v884_v15 = vadd.f32 %v883_v59, %v882_v44  ;;  %v887_v49 = vsel %vm250_vm0, %v797_v57, 0.0 }
 0x111   :  { %v2231_v29 = vpop.f32.mrb[28].mxu0 }
 0x112   :  { %3551 = vst [vmem:[#allocation16_spill] sm:$0xff] %v2231_v29  ;;  %v886_v41 = vadd.f32 %v885_v24, %v884_v15  ;;  %v2235_v63 = vpop.f32.mrb[29].mxu0  ;;  %v690_v32 = vadd.f32 %v689_v31, %v688_v9  ;;  %v800_v15 = vmul.f32 %v2231_v29, %v2231_v29 }
 0x113   :  { %3552 = vst [vmem:[#allocation17_spill] sm:$0xff] %v2235_v63  ;;  %v691_v44 = vsel %vm250_vm0, %v2235_v63, 0.0  ;;  %v798_v38 = vmul.f32 %v2235_v63, %v2235_v63  ;;  %v2244_v52 = vpop.f32.mrb[30].mxu0  ;;  %v695_v63 = vsel %vm250_vm0, %v2231_v29, 0.0 }
 0x114   :  { %3553 = vst [vmem:[#allocation18_spill] sm:$0xff] %v2244_v52  ;;  %v692_v59 = vadd.f32 %v691_v44, %v690_v32  ;;  %v888_v28 = vadd.f32 %v887_v49, %v886_v41  ;;  %v2246_v5 = vpop.f32.mrb[31].mxu0  ;;  %v801_v32 = vmul.f32 %v2244_v52, %v2244_v52  ;;  %v802_v49 = vmul.f32 %v2046_v10, %v2046_v10  ;;  %v2262_v44 = vpop.f32.mrb[24].mxu1 }
 0x115   :  { %3554 = vst [vmem:[#allocation19_spill] sm:$0xff] %v2246_v5  ;;  %v889_v9 = vsel %vm250_vm0, %v798_v38, 0.0  ;;  %v693_v57 = vsel %vm250_vm0, %v2246_v5, 0.0  ;;  %v799_v24 = vmul.f32 %v2246_v5, %v2246_v5  ;;  %3555 = vst [vmem:[#allocation20_spill] sm:$0xff] %v2262_v44  ;;  %v2264_v27 = vpop.f32.mrb[25].mxu1 }
 0x116   :  { %v890_v31 = vadd.f32 %v889_v9, %v888_v28  ;;  %v694_v17 = vadd.f32 %v693_v57, %v692_v59  ;;  %v893_v28 = vsel %vm250_vm0, %v800_v15, 0.0  ;;  %v697_v59 = vsel %vm250_vm0, %v2244_v52, 0.0  ;;  %v2271_v57 = vpop.f32.mrb[26].mxu1 }
 0x117   :  { %v891_v41 = vsel %vm250_vm0, %v799_v24, 0.0  ;;  %v699_v9 = vsel %vm250_vm0, %v2046_v10, 0.0  ;;  %3556 = vst [vmem:[#allocation21_spill] sm:$0xff] %v2271_v57  ;;  %v2273_v5 = vpop.f32.mrb[27].mxu1  ;;  %v895_v4 = vsel %vm250_vm0, %v801_v32, 0.0  ;;  %v701_v10 = vsel %vm250_vm0, %v2057_v18, 0.0 }
 0x118   :  { %v696_v38 = vadd.f32 %v695_v63, %v694_v17  ;;  %v892_v1 = vadd.f32 %v891_v41, %v890_v31  ;;  %v897_v17 = vsel %vm250_vm0, %v802_v49, 0.0  ;;  %v803_v63 = vmul.f32 %v2057_v18, %v2057_v18 }
 0x119   :  { %v804_v41 = vmul.f32 %v2044_v7, %v2044_v7  ;;  %v805_v32 = vmul.f32 %v2053_v14, %v2053_v14 }
 0x11a   :  { %v894_v24 = vadd.f32 %v893_v28, %v892_v1  ;;  %v698_v29 = vadd.f32 %v697_v59, %v696_v38  ;;  %v703_v38 = vsel %vm250_vm0, %v2044_v7, 0.0  ;;  %v899_v49 = vsel %vm250_vm0, %v803_v63, 0.0 }
 0x11b   :  { %v903_v18 = vsel %vm250_vm0, %v805_v32, 0.0  ;;  %v809_v32 = vmul.f32 %v2089_v46, %v2089_v46 }
 0x11c   :  { %v700_v15 = vadd.f32 %v699_v9, %v698_v29  ;;  %v896_v31 = vadd.f32 %v895_v4, %v894_v24  ;;  %v806_v29 = vmul.f32 %v2082_v42, %v2082_v42  ;;  %v2290_v4 = vpop.f32.mrb[28].mxu1  ;;  %v901_v24 = vsel %vm250_vm0, %v804_v41, 0.0 }
 0x11d   :  { %3557 = vst [vmem:[#allocation22_spill] sm:$0xff] %v2290_v4  ;;  %v2292_v9 = vpop.f32.mrb[29].mxu1 }
 0x11e   :  { %v898_v52 = vadd.f32 %v897_v17, %v896_v31  ;;  %v702_v1 = vadd.f32 %v701_v10, %v700_v15  ;;  %3558 = vst [vmem:[#allocation23_spill] sm:$0xff] %v2292_v9  ;;  %v705_v10 = vsel %vm250_vm0, %v2053_v14, 0.0  ;;  %v707_v17 = vsel %vm250_vm0, %v2082_v42, 0.0  ;;  %v2299_v15 = vpop.f32.mrb[30].mxu1 }
 0x11f   :  { %3559 = vst [vmem:[#allocation24_spill] sm:$0xff] %v2299_v15  ;;  %v2301_v7 = vpop.f32.mrb[31].mxu1  ;;  %v709_v42 = vsel %vm250_vm0, %v2093_v50, 0.0 }
 0x120   :  { %v704_v28 = vadd.f32 %v703_v38, %v702_v1  ;;  %v900_v59 = vadd.f32 %v899_v49, %v898_v52  ;;  %3560 = vst [vmem:[#allocation25_spill] sm:$0xff] %v2301_v7  ;;  %v905_v52 = vsel %vm250_vm0, %v806_v29, 0.0  ;;  %v807_v1 = vmul.f32 %v2093_v50, %v2093_v50 }
 0x121   :  { %v808_v49 = vmul.f32 %v2080_v39, %v2080_v39 }
 0x122   :  { %v902_v63 = vadd.f32 %v901_v24, %v900_v59  ;;  %v706_v31 = vadd.f32 %v705_v10, %v704_v28  ;;  %v711_v28 = vsel %vm250_vm0, %v2080_v39, 0.0  ;;  %v907_v29 = vsel %vm250_vm0, %v807_v1, 0.0 }
 0x123   :  { %v810_v24 = vmul.f32 %v2118_v12, %v2118_v12  ;;  %v811_v1 = vmul.f32 %v2129_v26, %v2129_v26 }
 0x124   :  { %v708_v41 = vadd.f32 %v707_v17, %v706_v31  ;;  %v904_v38 = vadd.f32 %v903_v18, %v902_v63  ;;  %v909_v17 = vsel %vm250_vm0, %v808_v49, 0.0  ;;  %v713_v63 = vsel %vm250_vm0, %v2089_v46, 0.0 }
 0x125   :  { %v717_v49 = vsel %vm250_vm0, %v2129_v26, 0.0 }
 0x126   :  { %v906_v14 = vadd.f32 %v905_v52, %v904_v38  ;;  %v710_v59 = vadd.f32 %v709_v42, %v708_v41  ;;  %v715_v42 = vsel %vm250_vm0, %v2118_v12, 0.0  ;;  %v911_v41 = vsel %vm250_vm0, %v809_v32, 0.0 }
 0x127   :  { %v913_v38 = vsel %vm250_vm0, %v810_v24, 0.0  ;;  %v813_v32 = vmul.f32 %v2125_v20, %v2125_v20  ;;  %v915_v24 = vsel %vm250_vm0, %v811_v1, 0.0  ;;  %v815_v1 = vmul.f32 %v2165_v6, %v2165_v6 }
 0x128   :  { %v712_v18 = vadd.f32 %v711_v28, %v710_v59  ;;  %v908_v10 = vadd.f32 %v907_v29, %v906_v14  ;;  %v812_v14 = vmul.f32 %v2116_v8, %v2116_v8 }
 0x12a   :  { %v910_v31 = vadd.f32 %v909_v17, %v908_v10  ;;  %v714_v52 = vadd.f32 %v713_v63, %v712_v18  ;;  %v719_v18 = vsel %vm250_vm0, %v2116_v8, 0.0  ;;  %v814_v10 = vmul.f32 %v2154_v62, %v2154_v62 }
 0x12c   :  { %v716_v39 = vadd.f32 %v715_v42, %v714_v52  ;;  %v912_v59 = vadd.f32 %v911_v41, %v910_v31  ;;  %v917_v42 = vsel %vm250_vm0, %v812_v14, 0.0  ;;  %v721_v31 = vsel %vm250_vm0, %v2125_v20, 0.0 }
 0x12d   :  { %v816_v14 = vmul.f32 %v2152_v55, %v2152_v55 }
 0x12e   :  { %v914_v28 = vadd.f32 %v913_v38, %v912_v59  ;;  %v718_v29 = vadd.f32 %v717_v49, %v716_v39  ;;  %v723_v39 = vsel %vm250_vm0, %v2154_v62, 0.0  ;;  %v919_v38 = vsel %vm250_vm0, %v813_v32, 0.0 }
 0x12f   :  { %v921_v59 = vsel %vm250_vm0, %v814_v10, 0.0  ;;  %v817_v32 = vmul.f32 %v2161_v2, %v2161_v2  ;;  %v923_v10 = vsel %vm250_vm0, %v815_v1, 0.0  ;;  %v819_v1 = vmul.f32 %v2201_v11, %v2201_v11 }
 0x130   :  { %v720_v17 = vadd.f32 %v719_v18, %v718_v29  ;;  %v916_v63 = vadd.f32 %v915_v24, %v914_v28  ;;  %v725_v28 = vsel %vm250_vm0, %v2165_v6, 0.0 }
 0x132   :  { %v918_v52 = vadd.f32 %v917_v42, %v916_v63  ;;  %v722_v41 = vadd.f32 %v721_v31, %v720_v17  ;;  %v727_v17 = vsel %vm250_vm0, %v2152_v55, 0.0  ;;  %v818_v63 = vmul.f32 %v2190_v54, %v2190_v54 }
 0x134   :  { %v724_v49 = vadd.f32 %v723_v39, %v722_v41  ;;  %v920_v29 = vadd.f32 %v919_v38, %v918_v52  ;;  %v925_v39 = vsel %vm250_vm0, %v816_v14, 0.0  ;;  %v729_v52 = vsel %vm250_vm0, %v2161_v2, 0.0 }
 0x135   :  { %v731_v41 = vsel %vm250_vm0, %v2190_v54, 0.0  ;;  %v820_v14 = vmul.f32 %v2188_v47, %v2188_v47 }
 0x136   :  { %v922_v18 = vadd.f32 %v921_v59, %v920_v29  ;;  %v726_v24 = vadd.f32 %v725_v28, %v724_v49  ;;  %v927_v49 = vsel %vm250_vm0, %v817_v32, 0.0  ;;  %v929_v29 = vsel %vm250_vm0, %v818_v63, 0.0 }
 0x137   :  { %v821_v32 = vmul.f32 %v2197_v0, %v2197_v0  ;;  %v931_v63 = vsel %vm250_vm0, %v819_v1, 0.0  ;;  %v823_v1 = vmul.f32 %v2237_v43, %v2237_v43 }
 0x138   :  { %v728_v42 = vadd.f32 %v727_v17, %v726_v24  ;;  %v924_v31 = vadd.f32 %v923_v10, %v922_v18  ;;  %v733_v18 = vsel %vm250_vm0, %v2201_v11, 0.0 }
 0x13a   :  { %v926_v38 = vadd.f32 %v925_v39, %v924_v31  ;;  %v730_v59 = vadd.f32 %v729_v52, %v728_v42  ;;  %v735_v42 = vsel %vm250_vm0, %v2188_v47, 0.0  ;;  %v822_v31 = vmul.f32 %v2226_v21, %v2226_v21 }
 0x13c   :  { %v732_v28 = vadd.f32 %v731_v41, %v730_v59  ;;  %v928_v24 = vadd.f32 %v927_v49, %v926_v38  ;;  %v933_v41 = vsel %vm250_vm0, %v820_v14, 0.0  ;;  %v737_v38 = vsel %vm250_vm0, %v2197_v0, 0.0 }
 0x13d   :  { %v739_v59 = vsel %vm250_vm0, %v2226_v21, 0.0  ;;  %v824_v14 = vmul.f32 %v2224_v3, %v2224_v3 }
 0x13e   :  { %v930_v17 = vadd.f32 %v929_v29, %v928_v24  ;;  %v734_v10 = vadd.f32 %v733_v18, %v732_v28  ;;  %v935_v28 = vsel %vm250_vm0, %v821_v32, 0.0  ;;  %v937_v24 = vsel %vm250_vm0, %v822_v31, 0.0 }
 0x13f   :  { %v825_v32 = vmul.f32 %v2233_v40, %v2233_v40  ;;  %v939_v31 = vsel %vm250_vm0, %v823_v1, 0.0  ;;  %v827_v1 = vmul.f32 %v2273_v5, %v2273_v5 }
 0x140   :  { %v736_v39 = vadd.f32 %v735_v42, %v734_v10  ;;  %v932_v52 = vadd.f32 %v931_v63, %v930_v17  ;;  %v741_v17 = vsel %vm250_vm0, %v2237_v43, 0.0 }
 0x142   :  { %v934_v49 = vadd.f32 %v933_v41, %v932_v52  ;;  %v738_v29 = vadd.f32 %v737_v38, %v736_v39  ;;  %v743_v39 = vsel %vm250_vm0, %v2224_v3, 0.0  ;;  %v826_v52 = vmul.f32 %v2264_v27, %v2264_v27 }
 0x144   :  { %v740_v18 = vadd.f32 %v739_v59, %v738_v29  ;;  %v936_v10 = vadd.f32 %v935_v28, %v934_v49  ;;  %v941_v59 = vsel %vm250_vm0, %v824_v14, 0.0  ;;  %v745_v49 = vsel %vm250_vm0, %v2233_v40, 0.0 }
 0x145   :  { %v747_v29 = vsel %vm250_vm0, %v2264_v27, 0.0  ;;  %v828_v14 = vmul.f32 %v2262_v44, %v2262_v44 }
 0x146   :  { %v938_v42 = vadd.f32 %v937_v24, %v936_v10  ;;  %v742_v63 = vadd.f32 %v741_v17, %v740_v18  ;;  %v943_v18 = vsel %vm250_vm0, %v825_v32, 0.0  ;;  %v945_v10 = vsel %vm250_vm0, %v826_v52, 0.0 }
 0x147   :  { %v829_v32 = vmul.f32 %v2271_v57, %v2271_v57  ;;  %v947_v52 = vsel %vm250_vm0, %v827_v1, 0.0  ;;  %v831_v1 = vmul.f32 %v2301_v7, %v2301_v7 }
 0x148   :  { %v744_v41 = vadd.f32 %v743_v39, %v742_v63  ;;  %v940_v38 = vadd.f32 %v939_v31, %v938_v42  ;;  %v749_v42 = vsel %vm250_vm0, %v2273_v5, 0.0 }
 0x14a   :  { %v942_v28 = vadd.f32 %v941_v59, %v940_v38  ;;  %v746_v24 = vadd.f32 %v745_v49, %v744_v41  ;;  %v751_v41 = vsel %vm250_vm0, %v2262_v44, 0.0  ;;  %v830_v38 = vmul.f32 %v2292_v9, %v2292_v9 }
 0x14c   :  { %v748_v17 = vadd.f32 %v747_v29, %v746_v24  ;;  %v944_v63 = vadd.f32 %v943_v18, %v942_v28  ;;  %v949_v29 = vsel %vm250_vm0, %v828_v14, 0.0  ;;  %v753_v28 = vsel %vm250_vm0, %v2271_v57, 0.0 }
 0x14d   :  { %v755_v24 = vsel %vm250_vm0, %v2292_v9, 0.0  ;;  %v832_v14 = vmul.f32 %v2290_v4, %v2290_v4 }
 0x14e   :  { %v946_v39 = vadd.f32 %v945_v10, %v944_v63  ;;  %v750_v31 = vadd.f32 %v749_v42, %v748_v17  ;;  %v951_v17 = vsel %vm250_vm0, %v829_v32, 0.0  ;;  %v953_v63 = vsel %vm250_vm0, %v830_v38, 0.0 }
 0x14f   :  { %v833_v32 = vmul.f32 %v2299_v15, %v2299_v15  ;;  %v955_v38 = vsel %vm250_vm0, %v831_v1, 0.0 }
 0x150   :  { %v752_v59 = vadd.f32 %v751_v41, %v750_v31  ;;  %v948_v49 = vadd.f32 %v947_v52, %v946_v39  ;;  %v757_v39 = vsel %vm250_vm0, %v2301_v7, 0.0 }
 0x152   :  { %v950_v18 = vadd.f32 %v949_v29, %v948_v49  ;;  %v754_v10 = vadd.f32 %v753_v28, %v752_v59  ;;  %v759_v59 = vsel %vm250_vm0, %v2290_v4, 0.0  ;;  %v957_v28 = vsel %vm250_vm0, %v832_v14, 0.0 }
 0x154   :  { %v756_v42 = vadd.f32 %v755_v24, %v754_v10  ;;  %v952_v31 = vadd.f32 %v951_v17, %v950_v18  ;;  %v761_v24 = vsel %vm250_vm0, %v2299_v15, 0.0  ;;  %v959_v17 = vsel %vm250_vm0, %v833_v32, 0.0 }
 0x155   :  { %v979_v32 = vlaneseq }
 0x156   :  { %v954_v41 = vadd.f32 %v953_v63, %v952_v31  ;;  %v758_v52 = vadd.f32 %v757_v39, %v756_v42 }
 0x158   :  { %v760_v49 = vadd.f32 %v759_v59, %v758_v52  ;;  %v956_v29 = vadd.f32 %v955_v38, %v954_v41 }
 0x15a   :  { %v762_v18 = vadd.f32 %v761_v24, %v760_v49  ;;  %v958_v10 = vadd.f32 %v957_v28, %v956_v29  ;;  %v2440_v24 = vshrl.u32 %v979_v32, 7  ;;  %v3568_v32 = vld [vmem:[#allocation14_spill] sm:$0xff] }
 0x15c   :  { %v763_v63 = vrot.slane %v762_v18, 4  ;;  %v960_v42 = vadd.f32 %v959_v17, %v958_v10  ;;  %v3577_v10 = vld [vmem:[#allocation5_spill] sm:$0xff] }
 0x15e   :  { %v764_v31 = vadd.f32 %v763_v63, %v762_v18  ;;  %v961_v39 = vrot.slane %v960_v42, 4  ;;  %v3519_v18 = vsub.s32 0, %v2440_v24 }
 0x160   :  { %v765_v4 = vrot.slane %v764_v31, 2  ;;  %v962_v7 = vadd.f32 %v961_v39, %v960_v42 }
 0x162   :  { %v766_v9 = vadd.f32 %v765_v4, %v764_v31  ;;  %v963_v57 = vrot.slane %v962_v7, 2  ;;  %v971_v4 = vld [vmem:[%s3492_s2] sm:$0x1] }
 0x164   :  { %v767_v1 = vrot.slane %v766_v9, 1  ;;  %v964_v52 = vadd.f32 %v963_v57, %v962_v7 }
 0x166   :  { %v768_v41 = vadd.f32 %v767_v1, %v766_v9  ;;  %v965_v59 = vrot.slane %v964_v52, 1  ;;  %v2449_v9 = vld [vmem:[%s3493_s3] sm:$0x1]  ;;  %v3561_v1 = vld [vmem:[#allocation9_spill] sm:$0xff] }
 0x168   :  { %v769_v14 = vmul.f32 0.001953125, %v768_v41  ;;  %v966_v38 = vadd.f32 %v965_v59, %v964_v52  ;;  %v3562_v52 = vld [vmem:[#allocation11_spill] sm:$0xff]  ;;  %v3563_v41 = vld [vmem:[#allocation8_spill] sm:$0xff]  ;;  %v3564_v59 = vld [vmem:[#allocation10_spill] sm:$0xff] }
 0x16a   :  { %v967_v44 = vmul.f32 0.001953125, %v966_v38  ;;  %v968_v15 = vmul.f32 %v769_v14, %v769_v14  ;;  %v3566_v38 = vld [vmem:[#allocation15_spill] sm:$0xff] }
 0x16c   :  { %v969_v49 = vsub.f32 %v967_v44, %v968_v15 }
 0x16e   :  { %v970_v29 = vmax.f32 %v969_v49, 0.0 }
 0x170   :  { %v972_v28 = vadd.f32 1e-05, %v970_v29  ;;  %v3567_v29 = vld [vmem:[#allocation12_spill] sm:$0xff] }
 0x172   :  { %1834 = vrsqrt.f32 %v972_v28 }
 0x17c   :  { %v1835_v7 = vpop.eup %1834 }
 0x17d   :  { %v974_v57 = vmul.f32 %v1835_v7, %v971_v4  ;;  %v3569_v7 = vld [vmem:[#allocation17_spill] sm:$0xff] }
 0x17f   :  { %v2451_v44 = vmul.f32 %v974_v57, %v769_v14  ;;  %v2455_v15 = vrot.slane %v974_v57, %v3519_v18  ;;  %v3565_v14 = vld [vmem:[#allocation13_spill] sm:$0xff]  ;;  %v3578_v18 = vld [vmem:[#allocation2_spill] sm:$0xff] }
 0x181   :  { %v2461_v17 = vmul.f32 %v2455_v15, %v1994_v34  ;;  %v2465_v63 = vmul.f32 %v2455_v15, %v2000_v37  ;;  %v2469_v42 = vmul.f32 %v1992_v33, %v2455_v15  ;;  %v2473_v31 = vmul.f32 %v1998_v36, %v2455_v15 }
 0x182   :  { %v2477_v39 = vmul.f32 %v2455_v15, %v2021_v53  ;;  %v2481_v34 = vmul.f32 %v2455_v15, %v2030_v61  ;;  %v2485_v37 = vmul.f32 %v2019_v51, %v2455_v15  ;;  %v2489_v33 = vmul.f32 %v2028_v58, %v2455_v15 }
 0x183   :  { %v2493_v36 = vmul.f32 %v2455_v15, %v2055_v16  ;;  %v2497_v53 = vmul.f32 %v2455_v15, %v2066_v25  ;;  %v2501_v61 = vmul.f32 %v2051_v13, %v2455_v15  ;;  %v2505_v51 = vmul.f32 %v2064_v22, %v2455_v15 }
 0x184   :  { %v2509_v58 = vmul.f32 %v2455_v15, %v2091_v48  ;;  %v2513_v16 = vmul.f32 %v2455_v15, %v2102_v60  ;;  %v2517_v25 = vmul.f32 %v2087_v45, %v2455_v15  ;;  %v2521_v13 = vmul.f32 %v2100_v56, %v2455_v15 }
 0x185   :  { %v2525_v22 = vmul.f32 %v2455_v15, %v2127_v23  ;;  %v2529_v48 = vmul.f32 %v2455_v15, %v2138_v35  ;;  %v2533_v60 = vmul.f32 %v2123_v19, %v2455_v15  ;;  %v2537_v45 = vmul.f32 %v2136_v30, %v2455_v15 }
 0x186   :  { %v2541_v56 = vmul.f32 %v2455_v15, %v3561_v1  ;;  %v2545_v23 = vmul.f32 %v2455_v15, %v3562_v52  ;;  %v2549_v35 = vmul.f32 %v3563_v41, %v2455_v15  ;;  %v2553_v19 = vmul.f32 %v3564_v59, %v2455_v15  ;;  %v3570_v1 = vld [vmem:[#allocation19_spill] sm:$0xff]  ;;  %v3572_v41 = vld [vmem:[#allocation16_spill] sm:$0xff] }
 0x187   :  { %v2557_v30 = vmul.f32 %v2455_v15, %v3565_v14  ;;  %v2561_v49 = vmul.f32 %v2455_v15, %v3566_v38  ;;  %v2565_v28 = vmul.f32 %v3567_v29, %v2455_v15  ;;  %v2569_v4 = vmul.f32 %v3568_v32, %v2455_v15  ;;  %v3574_v14 = vld [vmem:[#allocation18_spill] sm:$0xff]  ;;  %v3575_v29 = vld [vmem:[#allocation3_spill] sm:$0xff] }
 0x188   :  { %v2573_v57 = vmul.f32 %v2455_v15, %v3569_v7  ;;  %v2577_v52 = vmul.f32 %v2455_v15, %v3570_v1  ;;  %v2581_v59 = vmul.f32 %v3572_v41, %v2455_v15  ;;  %v2585_v38 = vmul.f32 %v3574_v14, %v2455_v15 }
 0x189   :  { %v2589_v32 = vmul.f32 %v2455_v15, %v3575_v29  ;;  %v2593_v7 = vmul.f32 %v2455_v15, %v3577_v10  ;;  %v2597_v1 = vmul.f32 %v3578_v18, %v2455_v15  ;;  %v2609_v29 = vmul.f32 %v2455_v15, %v2093_v50 }
 0x18a   :  { %3571 = vst [vmem:[#allocation9_spill] sm:$0xff] %v2577_v52  ;;  %3573 = vst [vmem:[#allocation11_spill] sm:$0xff] %v2581_v59  ;;  %v3579_v52 = vld [vmem:[#allocation4_spill] sm:$0xff]  ;;  %v3580_v59 = vld [vmem:[#allocation7_spill] sm:$0xff]  ;;  %v2617_v18 = vmul.f32 %v2089_v46, %v2455_v15  ;;  %v2629_v50 = vmul.f32 %v2116_v8, %v2455_v15  ;;  %v2637_v46 = vmul.f32 %v2455_v15, %v2154_v62 }
 0x18b   :  { %3576 = vst [vmem:[#allocation8_spill] sm:$0xff] %v2589_v32  ;;  %v2601_v41 = vmul.f32 %v3579_v52, %v2455_v15  ;;  %v2605_v14 = vmul.f32 %v2455_v15, %v3580_v59  ;;  %v3581_v32 = vld [vmem:[#allocation6_spill] sm:$0xff]  ;;  %v2621_v52 = vmul.f32 %v2455_v15, %v2118_v12  ;;  %v2625_v59 = vmul.f32 %v2455_v15, %v2129_v26 }
 0x18c   :  { %v2613_v10 = vmul.f32 %v3581_v32, %v2455_v15  ;;  %v2633_v32 = vmul.f32 %v2125_v20, %v2455_v15  ;;  %v2641_v12 = vmul.f32 %v2455_v15, %v2165_v6  ;;  %v2645_v26 = vmul.f32 %v2152_v55, %v2455_v15 }
 0x18d   :  { %v2649_v8 = vmul.f32 %v2161_v2, %v2455_v15  ;;  %v2653_v20 = vmul.f32 %v2455_v15, %v2190_v54  ;;  %v2657_v62 = vmul.f32 %v2455_v15, %v2201_v11  ;;  %v2661_v6 = vmul.f32 %v2188_v47, %v2455_v15 }
 0x18e   :  { %v2665_v55 = vmul.f32 %v2197_v0, %v2455_v15  ;;  %v2669_v2 = vmul.f32 %v2455_v15, %v2226_v21  ;;  %v2673_v54 = vmul.f32 %v2455_v15, %v2237_v43  ;;  %v2677_v11 = vmul.f32 %v2224_v3, %v2455_v15 }
 0x18f   :  { %v2681_v47 = vmul.f32 %v2233_v40, %v2455_v15  ;;  %v2685_v0 = vmul.f32 %v2455_v15, %v2264_v27  ;;  %v2689_v21 = vmul.f32 %v2455_v15, %v2273_v5 }
 0x190   :  { %3582 = vst [vmem:[#allocation10_spill] sm:$0xff] %v2669_v2  ;;  %3583 = vst [vmem:[#allocation13_spill] sm:$0xff] %v2673_v54  ;;  %v3588_v2 = vld [vmem:[#allocation20_spill] sm:$0xff]  ;;  %v3590_v54 = vld [vmem:[#allocation21_spill] sm:$0xff] }
 0x191   :  { %3584 = vst [vmem:[#allocation15_spill] sm:$0xff] %v2677_v11  ;;  %3585 = vst [vmem:[#allocation12_spill] sm:$0xff] %v2681_v47  ;;  %v2693_v43 = vmul.f32 %v3588_v2, %v2455_v15  ;;  %v2697_v3 = vmul.f32 %v3590_v54, %v2455_v15  ;;  %v3592_v11 = vld [vmem:[#allocation23_spill] sm:$0xff]  ;;  %v3593_v47 = vld [vmem:[#allocation25_spill] sm:$0xff]  ;;  %v3597_v54 = vsub.f32 %v2449_v9, %v2451_v44 }
 0x192   :  { %3586 = vst [vmem:[#allocation14_spill] sm:$0xff] %v2685_v0  ;;  %3587 = vst [vmem:[#allocation17_spill] sm:$0xff] %v2689_v21  ;;  %v2701_v40 = vmul.f32 %v2455_v15, %v3592_v11  ;;  %v2705_v27 = vmul.f32 %v2455_v15, %v3593_v47  ;;  %v3594_v0 = vld [vmem:[#allocation22_spill] sm:$0xff]  ;;  %v3595_v21 = vld [vmem:[#allocation24_spill] sm:$0xff] }
 0x193   :  { %3589 = vst [vmem:[#allocation19_spill] sm:$0xff] %v2693_v43  ;;  %3591 = vst [vmem:[#allocation16_spill] sm:$0xff] %v2697_v3  ;;  %v2709_v5 = vmul.f32 %v3594_v0, %v2455_v15  ;;  %v2713_v2 = vmul.f32 %v3595_v21, %v2455_v15  ;;  %v3596_v43 = vsub.s32 0, %v2440_v24  ;;  %v3600_v21 = vld [vmem:[#allocation8_spill] sm:$0xff] }
 0x195   :  { %v2720_v3 = vrot.slane %v3597_v54, %v3596_v43 }
 0x197   :  { %v2724_v11 = vadd.f32 %v2720_v3, %v2461_v17  ;;  %v2728_v47 = vadd.f32 %v2720_v3, %v2465_v63  ;;  %v2732_v0 = vadd.f32 %v2720_v3, %v2469_v42  ;;  %v2736_v24 = vadd.f32 %v2720_v3, %v2473_v31 }
 0x198   :  { %v2740_v9 = vadd.f32 %v2720_v3, %v2477_v39  ;;  %v2744_v44 = vadd.f32 %v2720_v3, %v2481_v34  ;;  %v2748_v15 = vadd.f32 %v2720_v3, %v2485_v37  ;;  %v2752_v17 = vadd.f32 %v2720_v3, %v2489_v33 }
 0x199   :  { %v2756_v63 = vadd.f32 %v2720_v3, %v2493_v36  ;;  %v2760_v42 = vadd.f32 %v2720_v3, %v2497_v53  ;;  %v2764_v31 = vadd.f32 %v2720_v3, %v2501_v61  ;;  %v2768_v39 = vadd.f32 %v2720_v3, %v2505_v51 }
 0x19a   :  { %v2772_v34 = vadd.f32 %v2720_v3, %v2509_v58  ;;  %v2776_v37 = vadd.f32 %v2720_v3, %v2513_v16  ;;  %v2780_v33 = vadd.f32 %v2720_v3, %v2517_v25  ;;  %v2784_v36 = vadd.f32 %v2720_v3, %v2521_v13 }
 0x19b   :  { %v2788_v53 = vadd.f32 %v2720_v3, %v2525_v22  ;;  %v2792_v61 = vadd.f32 %v2720_v3, %v2529_v48  ;;  %v2796_v51 = vadd.f32 %v2720_v3, %v2533_v60  ;;  %v2800_v58 = vadd.f32 %v2720_v3, %v2537_v45 }
 0x19c   :  { %v2804_v16 = vadd.f32 %v2720_v3, %v2541_v56  ;;  %v2808_v25 = vadd.f32 %v2720_v3, %v2545_v23  ;;  %v2812_v13 = vadd.f32 %v2720_v3, %v2549_v35  ;;  %v2816_v22 = vadd.f32 %v2720_v3, %v2553_v19  ;;  %v3598_v35 = vld [vmem:[#allocation9_spill] sm:$0xff] }
 0x19d   :  { %v2820_v48 = vadd.f32 %v2720_v3, %v2557_v30  ;;  %v2824_v60 = vadd.f32 %v2720_v3, %v2561_v49  ;;  %v2828_v45 = vadd.f32 %v2720_v3, %v2565_v28  ;;  %v2832_v56 = vadd.f32 %v2720_v3, %v2569_v4  ;;  %v3599_v30 = vld [vmem:[#allocation11_spill] sm:$0xff] }
 0x19e   :  { %v2836_v23 = vadd.f32 %v2720_v3, %v2573_v57  ;;  %v2840_v19 = vadd.f32 %v2720_v3, %v3598_v35  ;;  %v2844_v49 = vadd.f32 %v2720_v3, %v3599_v30  ;;  %v2848_v28 = vadd.f32 %v2720_v3, %v2585_v38  ;;  %v3611_v30 = vld [vmem:[#allocation10_spill] sm:$0xff] }
 0x19f   :  { %v2852_v4 = vadd.f32 %v2720_v3, %v3600_v21  ;;  %v2856_v57 = vadd.f32 %v2720_v3, %v2593_v7  ;;  %v2860_v43 = vadd.f32 %v2720_v3, %v2597_v1  ;;  %v2864_v54 = vadd.f32 %v2720_v3, %v2601_v41  ;;  %v3613_v21 = vld [vmem:[#allocation13_spill] sm:$0xff] }
 0x1a0   :  { %v2868_v38 = vadd.f32 %v2720_v3, %v2605_v14  ;;  %v2872_v35 = vadd.f32 %v2720_v3, %v2609_v29  ;;  %v2876_v7 = vadd.f32 %v2720_v3, %v2613_v10  ;;  %v2880_v1 = vadd.f32 %v2720_v3, %v2617_v18 }
 0x1a1   :  { %v2884_v41 = vadd.f32 %v2720_v3, %v2621_v52  ;;  %v2888_v14 = vadd.f32 %v2720_v3, %v2625_v59  ;;  %v2892_v29 = vadd.f32 %v2720_v3, %v2629_v50  ;;  %v2896_v10 = vadd.f32 %v2720_v3, %v2633_v32 }
 0x1a2   :  { %3601 = vst [vmem:[#allocation18_spill] sm:$0xff] %v2876_v7  ;;  %3602 = vst [vmem:[#allocation3_spill] sm:$0xff] %v2880_v1  ;;  %v2900_v18 = vadd.f32 %v2720_v3, %v2637_v46  ;;  %v2904_v52 = vadd.f32 %v2720_v3, %v2641_v12  ;;  %v2908_v59 = vadd.f32 %v2720_v3, %v2645_v26 }
 0x1a3   :  { %3603 = vst [vmem:[#allocation5_spill] sm:$0xff] %v2884_v41  ;;  %3604 = vst [vmem:[#allocation2_spill] sm:$0xff] %v2888_v14  ;;  %v2912_v50 = vadd.f32 %v2720_v3, %v2649_v8  ;;  %v2916_v32 = vadd.f32 %v2720_v3, %v2653_v20  ;;  %v2920_v46 = vadd.f32 %v2720_v3, %v2657_v62 }
 0x1a4   :  { %3605 = vst [vmem:[#allocation4_spill] sm:$0xff] %v2892_v29  ;;  %v2924_v12 = vadd.f32 %v2720_v3, %v2661_v6  ;;  %v2928_v26 = vadd.f32 %v2720_v3, %v2665_v55  ;;  %v2932_v8 = vadd.f32 %v2720_v3, %v3611_v30  ;;  %v2936_v20 = vadd.f32 %v2720_v3, %v3613_v21 }
 0x1a5   :  { %3606 = vst [vmem:[#allocation7_spill] sm:$0xff] %v2912_v50  ;;  %3607 = vst [vmem:[#allocation6_spill] sm:$0xff] %v2916_v32  ;;  %v3615_v32 = vld [vmem:[#allocation15_spill] sm:$0xff] }
 0x1a6   :  { %3608 = vst [vmem:[#allocation20_spill] sm:$0xff] %v2920_v46  ;;  %3609 = vst [vmem:[#allocation21_spill] sm:$0xff] %v2924_v12  ;;  %v2940_v62 = vadd.f32 %v2720_v3, %v3615_v32  ;;  %v3616_v46 = vld [vmem:[#allocation12_spill] sm:$0xff]  ;;  %v3617_v12 = vld [vmem:[#allocation14_spill] sm:$0xff] }
 0x1a7   :  { %3610 = vst [vmem:[#allocation23_spill] sm:$0xff] %v2928_v26  ;;  %3612 = vst [vmem:[#allocation25_spill] sm:$0xff] %v2932_v8  ;;  %v2944_v6 = vadd.f32 %v2720_v3, %v3616_v46  ;;  %v2948_v55 = vadd.f32 %v2720_v3, %v3617_v12  ;;  %v3618_v26 = vld [vmem:[#allocation17_spill] sm:$0xff]  ;;  %v3619_v8 = vld [vmem:[#allocation19_spill] sm:$0xff]  ;;  %v2964_v46 = vadd.f32 %v2720_v3, %v2701_v40 }
 0x1a8   :  { %3614 = vst [vmem:[#allocation22_spill] sm:$0xff] %v2936_v20  ;;  %v2952_v30 = vadd.f32 %v2720_v3, %v3618_v26  ;;  %v2956_v21 = vadd.f32 %v2720_v3, %v3619_v8  ;;  %v3621_v20 = vld [vmem:[#allocation16_spill] sm:$0xff]  ;;  %v2968_v12 = vadd.f32 %v2720_v3, %v2705_v27  ;;  %v2972_v26 = vadd.f32 %v2720_v3, %v2709_v5 }
 0x1a9   :  { %v2960_v32 = vadd.f32 %v2720_v3, %v3621_v20  ;;  %3623 = vst [vmem:[#allocation11_spill] sm:$0xff] %v2964_v46  ;;  %v2976_v8 = vadd.f32 %v2720_v3, %v2713_v2  ;;  %v3634_v7 = vmov %v2964_v46  ;;  %v3637_v46 = vmax.f32 %v2724_v11, 0.0 }
 0x1aa   :  { %3620 = vst [vmem:[#allocation24_spill] sm:$0xff] %v2956_v21  ;;  %3624 = vst [vmem:[#allocation8_spill] sm:$0xff] %v2968_v12  ;;  %v3635_v1 = vmov %v2968_v12  ;;  %v3636_v41 = vmov %v2972_v26  ;;  %v3638_v12 = vmax.f32 %v2728_v47, 0.0  ;;  %v3640_v2 = vmax.f32 %v2736_v24, 0.0 }
 0x1ab   :  { %3622 = vst [vmem:[#allocation9_spill] sm:$0xff] %v2960_v32  ;;  %3625 = vst [vmem:[#allocation10_spill] sm:$0xff] %v2972_v26  ;;  %v3633_v21 = vmov %v2960_v32  ;;  %v1636_v27 = vpack.c.bf16 %v3637_v46, %v3637_v46  ;;  %v3639_v26 = vmax.f32 %v2732_v0, 0.0  ;;  %v3641_v32 = vmax.f32 %v2740_v9, 0.0 }
 0x1ac   :  { %v1637_v5 = vpack.c.bf16 %v3638_v12, %v3638_v12  ;;  %v1639_v20 = vpack.c.bf16 %v3640_v2, %v3640_v2  ;;  %v3642_v11 = vmax.f32 %v2744_v44, 0.0  ;;  %v3643_v47 = vmax.f32 %v2748_v15, 0.0 }
 0x1ad   :  { %v1638_v3 = vpack.c.bf16 %v3639_v26, %v3639_v26  ;;  %v1640_v40 = vpack.c.bf16 %v3641_v32, %v3641_v32  ;;  %v3644_v0 = vmax.f32 %v2752_v17, 0.0  ;;  %v3645_v24 = vmax.f32 %v2756_v63, 0.0  ;;  %1439 = vst.msk [vmem:[%s3494_s4] sm:$0xf] %vm1438_vm1, %v1636_v27 }
 0x1ae   :  { %v3630_v14 = vld [vmem:[#allocation25_spill] sm:$0xff]  ;;  %v1641_v46 = vpack.c.bf16 %v3642_v11, %v3642_v11  ;;  %v1642_v12 = vpack.c.bf16 %v3643_v47, %v3643_v47  ;;  %v3646_v9 = vmax.f32 %v2760_v42, 0.0  ;;  %v3647_v44 = vmax.f32 %v2764_v31, 0.0  ;;  %1440 = vst.msk [vmem:[%s3494_s4 + $0x4] sm:$0xf] %vm1438_vm1, %v1637_v5 }
 0x1af   :  { %v3631_v29 = vld [vmem:[#allocation22_spill] sm:$0xff]  ;;  %v1643_v26 = vpack.c.bf16 %v3644_v0, %v3644_v0  ;;  %v1644_v2 = vpack.c.bf16 %v3645_v24, %v3645_v24  ;;  %v3648_v15 = vmax.f32 %v2768_v39, 0.0  ;;  %1441 = vst.msk [vmem:[%s3494_s4 + $0x8] sm:$0xf] %vm1438_vm1, %v1638_v3  ;;  %1442 = vst.msk [vmem:[%s3494_s4 + $0xc] sm:$0xf] %vm1438_vm1, %v1639_v20 }
 0x1b0   :  { %v1645_v32 = vpack.c.bf16 %v3646_v9, %v3646_v9  ;;  %v1646_v11 = vpack.c.bf16 %v3647_v44, %v3647_v44  ;;  %v3649_v17 = vmax.f32 %v2772_v34, 0.0  ;;  %v3650_v42 = vmax.f32 %v2776_v37, 0.0  ;;  %1443 = vst.msk [vmem:[%s3494_s4 + $0x10] sm:$0xf] %vm1438_vm1, %v1640_v40  ;;  %1444 = vst.msk [vmem:[%s3494_s4 + $0x14] sm:$0xf] %vm1438_vm1, %v1641_v46 }
 0x1b1   :  { %v3632_v50 = vld [vmem:[#allocation24_spill] sm:$0xff]  ;;  %v1647_v47 = vpack.c.bf16 %v3648_v15, %v3648_v15  ;;  %v3651_v39 = vmax.f32 %v2780_v33, 0.0  ;;  %v3652_v5 = vmax.f32 %v2784_v36, 0.0  ;;  %1445 = vst.msk [vmem:[%s3494_s4 + $0x18] sm:$0xf] %vm1438_vm1, %v1642_v12  ;;  %v3653_v34 = vmax.f32 %v2788_v53, 0.0 }
 0x1b2   :  { %v1648_v63 = vpack.c.bf16 %v3649_v17, %v3649_v17  ;;  %v1649_v31 = vpack.c.bf16 %v3650_v42, %v3650_v42  ;;  %1446 = vst.msk [vmem:[%s3494_s4 + $0x1c] sm:$0xf] %vm1438_vm1, %v1643_v26  ;;  %v3654_v33 = vmax.f32 %v2792_v61, 0.0  ;;  %v3655_v20 = vmax.f32 %v2796_v51, 0.0  ;;  %1447 = vst.msk [vmem:[%s3494_s4 + $0x20] sm:$0xf] %vm1438_vm1, %v1644_v2 }
 0x1b3   :  { %v1650_v27 = vpack.c.bf16 %v3651_v39, %v3651_v39  ;;  %v1651_v3 = vpack.c.bf16 %v3652_v5, %v3652_v5  ;;  %v1652_v37 = vpack.c.bf16 %v3653_v34, %v3653_v34  ;;  %v3656_v46 = vmax.f32 %v2800_v58, 0.0  ;;  %1448 = vst.msk [vmem:[%s3494_s4 + $0x24] sm:$0xf] %vm1438_vm1, %v1645_v32  ;;  %1449 = vst.msk [vmem:[%s3494_s4 + $0x28] sm:$0xf] %vm1438_vm1, %v1646_v11  ;;  %v3675_v5 = vld [vmem:[#allocation18_spill] sm:$0xff] }
 0x1b4   :  { %v1653_v36 = vpack.c.bf16 %v3654_v33, %v3654_v33  ;;  %v1654_v40 = vpack.c.bf16 %v3655_v20, %v3655_v20  ;;  %1450 = vst.msk [vmem:[%s3494_s4 + $0x2c] sm:$0xf] %vm1438_vm1, %v1647_v47  ;;  %v3657_v53 = vmax.f32 %v2804_v16, 0.0  ;;  %v3658_v51 = vmax.f32 %v2808_v25, 0.0  ;;  %1451 = vst.msk [vmem:[%s3494_s4 + $0x30] sm:$0xf] %vm1438_vm1, %v1648_v63 }
 0x1b5   :  { %v1655_v12 = vpack.c.bf16 %v3656_v46, %v3656_v46  ;;  %v3659_v0 = vmax.f32 %v2812_v13, 0.0  ;;  %v3660_v24 = vmax.f32 %v2816_v22, 0.0  ;;  %1452 = vst.msk [vmem:[%s3494_s4 + $0x34] sm:$0xf] %vm1438_vm1, %v1649_v31  ;;  %1453 = vst.msk [vmem:[%s3494_s4 + $0x38] sm:$0xf] %vm1438_vm1, %v1650_v27 }
 0x1b6   :  { %v1656_v61 = vpack.c.bf16 %v3657_v53, %v3657_v53  ;;  %v1657_v58 = vpack.c.bf16 %v3658_v51, %v3658_v51  ;;  %1454 = vst.msk [vmem:[%s3494_s4 + $0x3c] sm:$0xf] %vm1438_vm1, %v1651_v3  ;;  %v3661_v16 = vmax.f32 %v2820_v48, 0.0  ;;  %v3662_v13 = vmax.f32 %v2824_v60, 0.0  ;;  %1455 = vst.msk [vmem:[%s3494_s4 + $0x40] sm:$0xf] %vm1438_vm1, %v1652_v37 }
 0x1b7   :  { %v1658_v26 = vpack.c.bf16 %v3659_v0, %v3659_v0  ;;  %v1659_v2 = vpack.c.bf16 %v3660_v24, %v3660_v24  ;;  %v3663_v9 = vmax.f32 %v2828_v45, 0.0  ;;  %v3664_v44 = vmax.f32 %v2832_v56, 0.0  ;;  %1456 = vst.msk [vmem:[%s3494_s4 + $0x44] sm:$0xf] %vm1438_vm1, %v1653_v36  ;;  %1457 = vst.msk [vmem:[%s3494_s4 + $0x48] sm:$0xf] %vm1438_vm1, %v1654_v40 }
 0x1b8   :  { %v1660_v25 = vpack.c.bf16 %v3661_v16, %v3661_v16  ;;  %v1661_v22 = vpack.c.bf16 %v3662_v13, %v3662_v13  ;;  %1458 = vst.msk [vmem:[%s3494_s4 + $0x4c] sm:$0xf] %vm1438_vm1, %v1655_v12  ;;  %v3665_v48 = vmax.f32 %v2836_v23, 0.0  ;;  %v3666_v45 = vmax.f32 %v2840_v19, 0.0  ;;  %1459 = vst.msk [vmem:[%s3494_s4 + $0x50] sm:$0xf] %vm1438_vm1, %v1656_v61 }
 0x1b9   :  { %v1662_v32 = vpack.c.bf16 %v3663_v9, %v3663_v9  ;;  %v1663_v11 = vpack.c.bf16 %v3664_v44, %v3664_v44  ;;  %v3667_v15 = vmax.f32 %v2844_v49, 0.0  ;;  %v3668_v17 = vmax.f32 %v2848_v28, 0.0  ;;  %1460 = vst.msk [vmem:[%s3494_s4 + $0x54] sm:$0xf] %vm1438_vm1, %v1657_v58  ;;  %1461 = vst.msk [vmem:[%s3494_s4 + $0x58] sm:$0xf] %vm1438_vm1, %v1658_v26 }
 0x1ba   :  { %v1664_v60 = vpack.c.bf16 %v3665_v48, %v3665_v48  ;;  %v1665_v56 = vpack.c.bf16 %v3666_v45, %v3666_v45  ;;  %1462 = vst.msk [vmem:[%s3494_s4 + $0x5c] sm:$0xf] %vm1438_vm1, %v1659_v2  ;;  %v3669_v23 = vmax.f32 %v2852_v4, 0.0  ;;  %v3670_v49 = vmax.f32 %v2856_v57, 0.0  ;;  %1463 = vst.msk [vmem:[%s3494_s4 + $0x60] sm:$0xf] %vm1438_vm1, %v1660_v25 }
 0x1bb   :  { %v1666_v47 = vpack.c.bf16 %v3667_v15, %v3667_v15  ;;  %v1667_v63 = vpack.c.bf16 %v3668_v17, %v3668_v17  ;;  %v3671_v42 = vmax.f32 %v2860_v43, 0.0  ;;  %v3672_v39 = vmax.f32 %v2864_v54, 0.0  ;;  %1464 = vst.msk [vmem:[%s3494_s4 + $0x64] sm:$0xf] %vm1438_vm1, %v1661_v22  ;;  %1465 = vst.msk [vmem:[%s3494_s4 + $0x68] sm:$0xf] %vm1438_vm1, %v1662_v32 }
 0x1bc   :  { %v1668_v19 = vpack.c.bf16 %v3669_v23, %v3669_v23  ;;  %v1669_v28 = vpack.c.bf16 %v3670_v49, %v3670_v49  ;;  %1466 = vst.msk [vmem:[%s3494_s4 + $0x6c] sm:$0xf] %vm1438_vm1, %v1663_v11  ;;  %v3673_v4 = vmax.f32 %v2868_v38, 0.0  ;;  %v3674_v43 = vmax.f32 %v2872_v35, 0.0  ;;  %v3677_v37 = vld [vmem:[#allocation3_spill] sm:$0xff]  ;;  %v3679_v38 = vld [vmem:[#allocation5_spill] sm:$0xff] }
 0x1bd   :  { %v1670_v31 = vpack.c.bf16 %v3671_v42, %v3671_v42  ;;  %v1671_v27 = vpack.c.bf16 %v3672_v39, %v3672_v39  ;;  %v3676_v3 = vmax.f32 %v3675_v5, 0.0  ;;  %v3678_v33 = vmax.f32 %v3677_v37, 0.0  ;;  %1467 = vst.msk [vmem:[%s3494_s4 + $0x70] sm:$0xf] %vm1438_vm1, %v1664_v60  ;;  %1468 = vst.msk [vmem:[%s3494_s4 + $0x74] sm:$0xf] %vm1438_vm1, %v1665_v56 }
 0x1be   :  { %v1672_v57 = vpack.c.bf16 %v3673_v4, %v3673_v4  ;;  %v1673_v54 = vpack.c.bf16 %v3674_v43, %v3674_v43  ;;  %1469 = vst.msk [vmem:[%s3494_s4 + $0x78] sm:$0xf] %vm1438_vm1, %v1666_v47  ;;  %1470 = vst.msk [vmem:[%s3494_s4 + $0x7c] sm:$0xf] %vm1438_vm1, %v1667_v63  ;;  %v3680_v35 = vmax.f32 %v3679_v38, 0.0  ;;  %v3681_v40 = vld [vmem:[#allocation2_spill] sm:$0xff] }
 0x1bf   :  { %v1674_v34 = vpack.c.bf16 %v3676_v3, %v3676_v3  ;;  %v1675_v36 = vpack.c.bf16 %v3678_v33, %v3678_v33  ;;  %v3682_v46 = vmax.f32 %v3681_v40, 0.0  ;;  %v3683_v53 = vld [vmem:[#allocation4_spill] sm:$0xff]  ;;  %v3685_v58 = vmax.f32 %v2896_v10, 0.0  ;;  %1471 = vst.msk [vmem:[%s3494_s4 + $0x80] sm:$0xf] %vm1438_vm1, %v1668_v19  ;;  %v3689_v13 = vld [vmem:[#allocation7_spill] sm:$0xff] }
 0x1c0   :  { %v1676_v20 = vpack.c.bf16 %v3680_v35, %v3680_v35  ;;  %v3684_v61 = vmax.f32 %v3683_v53, 0.0  ;;  %1472 = vst.msk [vmem:[%s3494_s4 + $0x84] sm:$0xf] %vm1438_vm1, %v1669_v28  ;;  %1473 = vst.msk [vmem:[%s3494_s4 + $0x88] sm:$0xf] %vm1438_vm1, %v1670_v31  ;;  %v3686_v10 = vmax.f32 %v2900_v18, 0.0 }
 0x1c1   :  { %v1677_v12 = vpack.c.bf16 %v3682_v46, %v3682_v46  ;;  %v1679_v0 = vpack.c.bf16 %v3685_v58, %v3685_v58  ;;  %1474 = vst.msk [vmem:[%s3494_s4 + $0x8c] sm:$0xf] %vm1438_vm1, %v1671_v27  ;;  %v3687_v24 = vmax.f32 %v2904_v52, 0.0  ;;  %v3688_v16 = vmax.f32 %v2908_v59, 0.0  ;;  %1475 = vst.msk [vmem:[%s3494_s4 + $0x90] sm:$0xf] %vm1438_vm1, %v1672_v57 }
 0x1c2   :  { %v1678_v51 = vpack.c.bf16 %v3684_v61, %v3684_v61  ;;  %v1680_v26 = vpack.c.bf16 %v3686_v10, %v3686_v10  ;;  %v3690_v22 = vmax.f32 %v3689_v13, 0.0  ;;  %1476 = vst.msk [vmem:[%s3494_s4 + $0x94] sm:$0xf] %vm1438_vm1, %v1673_v54  ;;  %1477 = vst.msk [vmem:[%s3494_s4 + $0x98] sm:$0xf] %vm1438_vm1, %v1674_v34  ;;  %v3691_v18 = vld [vmem:[#allocation6_spill] sm:$0xff] }
 0x1c3   :  { %v1681_v2 = vpack.c.bf16 %v3687_v24, %v3687_v24  ;;  %v1682_v25 = vpack.c.bf16 %v3688_v16, %v3688_v16  ;;  %1478 = vst.msk [vmem:[%s3494_s4 + $0x9c] sm:$0xf] %vm1438_vm1, %v1675_v36  ;;  %v3692_v52 = vmax.f32 %v3691_v18, 0.0  ;;  %v3693_v32 = vld [vmem:[#allocation20_spill] sm:$0xff]  ;;  %v3695_v48 = vld [vmem:[#allocation21_spill] sm:$0xff]  ;;  %v3697_v56 = vld [vmem:[#allocation23_spill] sm:$0xff] }
 0x1c4   :  { %v1683_v9 = vpack.c.bf16 %v3690_v22, %v3690_v22  ;;  %v3694_v44 = vmax.f32 %v3693_v32, 0.0  ;;  %v3696_v60 = vmax.f32 %v3695_v48, 0.0  ;;  %v3698_v15 = vmax.f32 %v3697_v56, 0.0  ;;  %1479 = vst.msk [vmem:[%s3494_s4 + $0xa0] sm:$0xf] %vm1438_vm1, %v1676_v20 }
 0x1c5   :  { %v1684_v59 = vpack.c.bf16 %v3692_v52, %v3692_v52  ;;  %1480 = vst.msk [vmem:[%s3494_s4 + $0xa4] sm:$0xf] %vm1438_vm1, %v1677_v12  ;;  %1481 = vst.msk [vmem:[%s3494_s4 + $0xa8] sm:$0xf] %vm1438_vm1, %v1678_v51  ;;  %v3699_v17 = vmax.f32 %v3630_v14, 0.0  ;;  %v3700_v23 = vmax.f32 %v3631_v29, 0.0 }
 0x1c6   :  { %v1685_v11 = vpack.c.bf16 %v3694_v44, %v3694_v44  ;;  %v1686_v45 = vpack.c.bf16 %v3696_v60, %v3696_v60  ;;  %v1687_v47 = vpack.c.bf16 %v3698_v15, %v3698_v15  ;;  %1482 = vst.msk [vmem:[%s3494_s4 + $0xac] sm:$0xf] %vm1438_vm1, %v1679_v0  ;;  %v3701_v49 = vmax.f32 %v2940_v62, 0.0  ;;  %1483 = vst.msk [vmem:[%s3494_s4 + $0xb0] sm:$0xf] %vm1438_vm1, %v1680_v26 }
 0x1c7   :  { %v1688_v63 = vpack.c.bf16 %v3699_v17, %v3699_v17  ;;  %v1689_v19 = vpack.c.bf16 %v3700_v23, %v3700_v23  ;;  %v3702_v42 = vmax.f32 %v2944_v6, 0.0  ;;  %1484 = vst.msk [vmem:[%s3494_s4 + $0xb4] sm:$0xf] %vm1438_vm1, %v1681_v2  ;;  %1485 = vst.msk [vmem:[%s3494_s4 + $0xb8] sm:$0xf] %vm1438_vm1, %v1682_v25  ;;  %v3703_v14 = vmax.f32 %v2948_v55, 0.0 }
 0x1c8   :  { %v1690_v28 = vpack.c.bf16 %v3701_v49, %v3701_v49  ;;  %1486 = vst.msk [vmem:[%s3494_s4 + $0xbc] sm:$0xf] %vm1438_vm1, %v1683_v9  ;;  %v3704_v62 = vmax.f32 %v2952_v30, 0.0  ;;  %v3705_v39 = vmax.f32 %v3632_v50, 0.0  ;;  %v3706_v4 = vmax.f32 %v3633_v21, 0.0 }
 0x1c9   :  { %v1691_v31 = vpack.c.bf16 %v3702_v42, %v3702_v42  ;;  %v1692_v29 = vpack.c.bf16 %v3703_v14, %v3703_v14  ;;  %1487 = vst.msk [vmem:[%s3494_s4 + $0xc0] sm:$0xf] %vm1438_vm1, %v1684_v59  ;;  %1488 = vst.msk [vmem:[%s3494_s4 + $0xc4] sm:$0xf] %vm1438_vm1, %v1685_v11  ;;  %v3707_v50 = vmax.f32 %v3634_v7, 0.0  ;;  %v3708_v30 = vmax.f32 %v3635_v1, 0.0 }
 0x1ca   :  { %v1693_v6 = vpack.c.bf16 %v3704_v62, %v3704_v62  ;;  %v1694_v27 = vpack.c.bf16 %v3705_v39, %v3705_v39  ;;  %v1695_v57 = vpack.c.bf16 %v3706_v4, %v3706_v4  ;;  %1489 = vst.msk [vmem:[%s3494_s4 + $0xc8] sm:$0xf] %vm1438_vm1, %v1686_v45  ;;  %1490 = vst.msk [vmem:[%s3494_s4 + $0xcc] sm:$0xf] %vm1438_vm1, %v1687_v47  ;;  %v3709_v43 = vmax.f32 %v3636_v41, 0.0 }
 0x1cb   :  { %v1696_v55 = vpack.c.bf16 %v3707_v50, %v3707_v50  ;;  %v1697_v21 = vpack.c.bf16 %v3708_v30, %v3708_v30  ;;  %v3710_v5 = vmax.f32 %v2976_v8, 0.0  ;;  %1491 = vst.msk [vmem:[%s3494_s4 + $0xd0] sm:$0xf] %vm1438_vm1, %v1688_v63  ;;  %1492 = vst.msk [vmem:[%s3494_s4 + $0xd4] sm:$0xf] %vm1438_vm1, %v1689_v19 }
 0x1cc   :  { %v1698_v54 = vpack.c.bf16 %v3709_v43, %v3709_v43  ;;  %1493 = vst.msk [vmem:[%s3494_s4 + $0xd8] sm:$0xf] %vm1438_vm1, %v1690_v28  ;;  %1494 = vst.msk [vmem:[%s3494_s4 + $0xdc] sm:$0xf] %vm1438_vm1, %v1691_v31 }
 0x1cd   :  { %v1699_v3 = vpack.c.bf16 %v3710_v5, %v3710_v5  ;;  %1495 = vst.msk [vmem:[%s3494_s4 + $0xe0] sm:$0xf] %vm1438_vm1, %v1692_v29  ;;  %1496 = vst.msk [vmem:[%s3494_s4 + $0xe4] sm:$0xf] %vm1438_vm1, %v1693_v6 }
 0x1ce   :  { %1497 = vst.msk [vmem:[%s3494_s4 + $0xe8] sm:$0xf] %vm1438_vm1, %v1694_v27  ;;  %1498 = vst.msk [vmem:[%s3494_s4 + $0xec] sm:$0xf] %vm1438_vm1, %v1695_v57 }
 0x1cf   :  { %1499 = vst.msk [vmem:[%s3494_s4 + $0xf0] sm:$0xf] %vm1438_vm1, %v1696_v55  ;;  %1500 = vst.msk [vmem:[%s3494_s4 + $0xf4] sm:$0xf] %vm1438_vm1, %v1697_v21 }
 0x1d0   :  { %1501 = vst.msk [vmem:[%s3494_s4 + $0xf8] sm:$0xf] %vm1438_vm1, %v1698_v54  ;;  %1502 = vst.msk [vmem:[%s3494_s4 + $0xfc] sm:$0xf] %vm1438_vm1, %v1699_v3 }

// kernel: shared_layers_forward.78
= control target key start
LH: loop header
LB: loop body
LE: loop exit
PB: predicated region body
PF: predicated region fallthrough
CT: control target
= control target key end

     0   :  { %vm250_vm0 = vcmask 130048   ;;  %vm636_vm1 = vcmask 523264   ;;  %vm1375_vm2 = vcmask 519168   ;;  %s3299_s1 = inlined_call_operand.vmem [shape: bf16[16,64], index: 1, kind: input, shape index: {}]   ;;  %s3300_s0 = inlined_call_operand.vmem [shape: bf16[512,16], index: 0, kind: input, shape index: {}]   ;;  %s3301_s2 = inlined_call_operand.vmem [shape: f32[1,64], index: 2, kind: input, shape index: {}]   ;;  %s3302_s3 = inlined_call_operand.vmem [shape: f32[1,64], index: 3, kind: input, shape index: {}]   ;;  %s3303_s4 = inlined_call_operand.vmem [shape: bf16[512,64], index: 4, kind: output, shape index: {}]  }
   0x1   :  { %v1738_v0 = vld [vmem:[%s3299_s1] sm:$0xff]   ;;  %v1740_v2 = vld [vmem:[%s3300_s0 + $0x8] sm:$0xff]   ;;  %v1741_v3 = vld [vmem:[%s3300_s0 + $0x10] sm:$0xff]  }
   0x2   :  { %v1739_v1 = vld [vmem:[%s3300_s0] sm:$0xff]   ;;  %1670 = vmatprep.subr.bf16.mxu0 %v1738_v0  ;;  %1736 = vmatprep.subr.bf16.mxu1 %v1738_v0  ;;  %v1742_v4 = vld [vmem:[%s3300_s0 + $0x18] sm:$0xff]   ;;  %v1744_v6 = vld [vmem:[%s3300_s0 + $0x28] sm:$0xff]  }
   0x3   :  { %1671 = vmatpush3.bf16.msra.mxu0 %v1738_v0  ;;  %1672 = vmatprep.mubr.msk.bf16.mxu0 %vm250_vm0, %v1739_v1  ;;  %v1743_v5 = vld [vmem:[%s3300_s0 + $0x20] sm:$0xff]   ;;  %v1745_v7 = vld [vmem:[%s3300_s0 + $0x30] sm:$0xff]   ;;  %v1756_v9 = vld [vmem:[%s3300_s0 + $0x88] sm:$0xff]  }
   0x4   :  { %1737 = vmatpush3.bf16.msra.mxu1 %v1738_v0  ;;  %v1755_v8 = vld [vmem:[%s3300_s0 + $0x80] sm:$0xff]   ;;  %v1757_v10 = vld [vmem:[%s3300_s0 + $0x90] sm:$0xff]   ;;  %v1758_v11 = vld [vmem:[%s3300_s0 + $0x98] sm:$0xff]  }
   0x5   :  { %1704 = vmatprep.mubr.msk.bf16.mxu1 %vm250_vm0, %v1755_v8  ;;  %v1759_v12 = vld [vmem:[%s3300_s0 + $0xa0] sm:$0xff]   ;;  %v1746_v13 = vld [vmem:[%s3300_s0 + $0x38] sm:$0xff]   ;;  %v1760_v15 = vld [vmem:[%s3300_s0 + $0xa8] sm:$0xff]  }
   0x6   :  { %1673 = vmatmul.mubr.msk.bf16.vlgmr.msra.gmra.mrb[0].mxu0 %vm250_vm0, %v1740_v2  ;;  %v1747_v14 = vld [vmem:[%s3300_s0 + $0x40] sm:$0xff]   ;;  %v1761_v16 = vld [vmem:[%s3300_s0 + $0xb0] sm:$0xff]   ;;  %v1748_v17 = vld [vmem:[%s3300_s0 + $0x48] sm:$0xff]  }
   0x7   :  { %1676 = vmatprep.mubr.msk.bf16.mxu0 %vm250_vm0, %v1741_v3  ;;  %1705 = vmatmul.mubr.msk.bf16.vlgmr.msra.gmra.mrb[0].mxu1 %vm250_vm0, %v1756_v9  ;;  %v1749_v18 = vld [vmem:[%s3300_s0 + $0x50] sm:$0xff]   ;;  %v1762_v19 = vld [vmem:[%s3300_s0 + $0xb8] sm:$0xff]   ;;  %v1763_v20 = vld [vmem:[%s3300_s0 + $0xc0] sm:$0xff]  }
   0x8   :  { %1708 = vmatprep.mubr.msk.bf16.mxu1 %vm250_vm0, %v1757_v10  ;;  %v1750_v21 = vld [vmem:[%s3300_s0 + $0x58] sm:$0xff]   ;;  %v1751_v22 = vld [vmem:[%s3300_s0 + $0x60] sm:$0xff]   ;;  %v1764_v23 = vld [vmem:[%s3300_s0 + $0xc8] sm:$0xff]  }
   0x9   :  { %v1765_v24 = vld [vmem:[%s3300_s0 + $0xd0] sm:$0xff]   ;;  %v1752_v25 = vld [vmem:[%s3300_s0 + $0x68] sm:$0xff]   ;;  %v1766_v27 = vld [vmem:[%s3300_s0 + $0xd8] sm:$0xff]  }
   0xa   :  { %v1753_v26 = vld [vmem:[%s3300_s0 + $0x70] sm:$0xff]   ;;  %v1767_v28 = vld [vmem:[%s3300_s0 + $0xe0] sm:$0xff]   ;;  %v1754_v29 = vld [vmem:[%s3300_s0 + $0x78] sm:$0xff]  }
   0xb   :  { %v1768_v30 = vld [vmem:[%s3300_s0 + $0xe8] sm:$0xff]   ;;  %v1769_v31 = vld [vmem:[%s3300_s0 + $0xf0] sm:$0xff]   ;;  %v1770_v32 = vld [vmem:[%s3300_s0 + $0xf8] sm:$0xff]  }
   0xe   :  { %1677 = vmatmul.mubr.msk.bf16.gmra.mrb[4].mxu0 %vm250_vm0, %v1742_v4 }
   0xf   :  { %1680 = vmatprep.mubr.msk.bf16.mxu0 %vm250_vm0, %v1743_v5  ;;  %1709 = vmatmul.mubr.msk.bf16.gmra.mrb[4].mxu1 %vm250_vm0, %v1758_v11 }
  0x10   :  { %1712 = vmatprep.mubr.msk.bf16.mxu1 %vm250_vm0, %v1759_v12 }
  0x16   :  { %1681 = vmatmul.mubr.msk.bf16.gmra.mrb[8].mxu0 %vm250_vm0, %v1744_v6 }
  0x17   :  { %1684 = vmatprep.mubr.msk.bf16.mxu0 %vm250_vm0, %v1745_v7  ;;  %1713 = vmatmul.mubr.msk.bf16.gmra.mrb[8].mxu1 %vm250_vm0, %v1760_v15 }
  0x18   :  { %1716 = vmatprep.mubr.msk.bf16.mxu1 %vm250_vm0, %v1761_v16 }
  0x1e   :  { %1685 = vmatmul.mubr.msk.bf16.gmra.mrb[12].mxu0 %vm250_vm0, %v1746_v13 }
  0x1f   :  { %1688 = vmatprep.mubr.msk.bf16.mxu0 %vm250_vm0, %v1747_v14  ;;  %1717 = vmatmul.mubr.msk.bf16.gmra.mrb[12].mxu1 %vm250_vm0, %v1762_v19 }
  0x20   :  { %1720 = vmatprep.mubr.msk.bf16.mxu1 %vm250_vm0, %v1763_v20 }
  0x26   :  { %1689 = vmatmul.mubr.msk.bf16.gmra.mrb[16].mxu0 %vm250_vm0, %v1748_v17 }
  0x27   :  { %1692 = vmatprep.mubr.msk.bf16.mxu0 %vm250_vm0, %v1749_v18  ;;  %1721 = vmatmul.mubr.msk.bf16.gmra.mrb[16].mxu1 %vm250_vm0, %v1764_v23 }
  0x28   :  { %1724 = vmatprep.mubr.msk.bf16.mxu1 %vm250_vm0, %v1765_v24 }
  0x2e   :  { %1693 = vmatmul.mubr.msk.bf16.gmra.mrb[20].mxu0 %vm250_vm0, %v1750_v21 }
  0x2f   :  { %1696 = vmatprep.mubr.msk.bf16.mxu0 %vm250_vm0, %v1751_v22  ;;  %1725 = vmatmul.mubr.msk.bf16.gmra.mrb[20].mxu1 %vm250_vm0, %v1766_v27 }
  0x30   :  { %1728 = vmatprep.mubr.msk.bf16.mxu1 %vm250_vm0, %v1767_v28 }
  0x36   :  { %1697 = vmatmul.mubr.msk.bf16.gmra.mrb[24].mxu0 %vm250_vm0, %v1752_v25 }
  0x37   :  { %1700 = vmatprep.mubr.msk.bf16.mxu0 %vm250_vm0, %v1753_v26  ;;  %1729 = vmatmul.mubr.msk.bf16.gmra.mrb[24].mxu1 %vm250_vm0, %v1768_v30 }
  0x38   :  { %1732 = vmatprep.mubr.msk.bf16.mxu1 %vm250_vm0, %v1769_v31 }
  0x3e   :  { %1701 = vmatmul.mubr.msk.bf16.gmra.mrb[28].mxu0 %vm250_vm0, %v1754_v29 }
  0x3f   :  { %1733 = vmatmul.mubr.msk.bf16.gmra.mrb[28].mxu1 %vm250_vm0, %v1770_v32 }
  0xd9   :  { %v1929_v33 = vpop.f32.mrb[0].mxu0 }
  0xda   :  { %v1931_v34 = vpop.f32.mrb[1].mxu0  ;;  %v773_v38 = vmul.f32 %v1929_v33, %v1929_v33  ;;  %v640_v43 = vsel %vm636_vm1, %v1929_v33, 0.0  ;;  %v1981_v7 = vpop.f32.mrb[0].mxu1 }
  0xdb   :  { %v771_v35 = vmul.f32 %v1931_v34, %v1931_v34  ;;  %v1935_v36 = vpop.f32.mrb[2].mxu0  ;;  %v637_v39 = vsel %vm636_vm1, %v1931_v34, 0.0  ;;  %3329 = vst [vmem:[#allocation2_spill] sm:$0xff] %v1981_v7  ;;  %v1983_v10 = vpop.f32.mrb[1].mxu1 }
  0xdc   :  { %v1937_v37 = vpop.f32.mrb[3].mxu0  ;;  %v774_v45 = vmul.f32 %v1935_v36, %v1935_v36  ;;  %v838_v49 = vsel %vm636_vm1, %v773_v38, 0.0  ;;  %v642_v50 = vsel %vm636_vm1, %v1935_v36, 0.0  ;;  %3330 = vst [vmem:[#allocation3_spill] sm:$0xff] %v1983_v10  ;;  %v1990_v14 = vpop.f32.mrb[2].mxu1 }
  0xdd   :  { %v638_v40 = vsel %vm636_vm1, %v1937_v37, 0.0  ;;  %v772_v41 = vmul.f32 %v1937_v37, %v1937_v37  ;;  %v835_v44 = vsel %vm636_vm1, %v771_v35, 0.0  ;;  %3331 = vst [vmem:[#allocation4_spill] sm:$0xff] %v1990_v14  ;;  %v1994_v18 = vpop.f32.mrb[3].mxu1 }
  0xde   :  { %v639_v42 = vadd.f32 %v638_v40, %v637_v39  ;;  %v840_v55 = vsel %vm636_vm1, %v774_v45, 0.0  ;;  %3332 = vst [vmem:[#allocation5_spill] sm:$0xff] %v1994_v18 }
  0xdf   :  { %v836_v46 = vsel %vm636_vm1, %v772_v41, 0.0 }
  0xe0   :  { %v641_v47 = vadd.f32 %v640_v43, %v639_v42  ;;  %v837_v48 = vadd.f32 %v836_v46, %v835_v44 }
  0xe1   :  { %v1956_v51 = vpop.f32.mrb[4].mxu0 }
  0xe2   :  { %v839_v52 = vadd.f32 %v838_v49, %v837_v48  ;;  %v1958_v53 = vpop.f32.mrb[5].mxu0  ;;  %v643_v54 = vadd.f32 %v642_v50, %v641_v47  ;;  %v777_v62 = vmul.f32 %v1956_v51, %v1956_v51  ;;  %v648_v4 = vsel %vm636_vm1, %v1956_v51, 0.0  ;;  %v2017_v39 = vpop.f32.mrb[4].mxu1 }
  0xe3   :  { %v644_v56 = vsel %vm636_vm1, %v1958_v53, 0.0  ;;  %v775_v57 = vmul.f32 %v1958_v53, %v1958_v53  ;;  %v1965_v58 = vpop.f32.mrb[6].mxu0  ;;  %3333 = vst [vmem:[#allocation6_spill] sm:$0xff] %v2017_v39  ;;  %v2019_v42 = vpop.f32.mrb[5].mxu1 }
  0xe4   :  { %v645_v59 = vadd.f32 %v644_v56, %v643_v54  ;;  %v841_v60 = vadd.f32 %v840_v55, %v839_v52  ;;  %v1967_v61 = vpop.f32.mrb[7].mxu0  ;;  %v778_v5 = vmul.f32 %v1965_v58, %v1965_v58  ;;  %v846_v11 = vsel %vm636_vm1, %v777_v62, 0.0  ;;  %3334 = vst [vmem:[#allocation7_spill] sm:$0xff] %v2019_v42  ;;  %v2026_v46 = vpop.f32.mrb[6].mxu1 }
  0xe5   :  { %v842_v63 = vsel %vm636_vm1, %v775_v57, 0.0  ;;  %v646_v0 = vsel %vm636_vm1, %v1967_v61, 0.0  ;;  %v776_v1 = vmul.f32 %v1967_v61, %v1967_v61  ;;  %v650_v12 = vsel %vm636_vm1, %v1965_v58, 0.0  ;;  %v2030_v50 = vpop.f32.mrb[7].mxu1 }
  0xe6   :  { %v843_v2 = vadd.f32 %v842_v63, %v841_v60  ;;  %v647_v3 = vadd.f32 %v646_v0, %v645_v59  ;;  %v848_v19 = vsel %vm636_vm1, %v778_v5, 0.0 }
  0xe7   :  { %v844_v6 = vsel %vm636_vm1, %v776_v1, 0.0 }
  0xe8   :  { %v649_v8 = vadd.f32 %v648_v4, %v647_v3  ;;  %v845_v9 = vadd.f32 %v844_v6, %v843_v2 }
  0xe9   :  { %v1988_v13 = vpop.f32.mrb[8].mxu0 }
  0xea   :  { %v847_v15 = vadd.f32 %v846_v11, %v845_v9  ;;  %v1992_v16 = vpop.f32.mrb[9].mxu0  ;;  %v651_v17 = vadd.f32 %v650_v12, %v649_v8  ;;  %v781_v26 = vmul.f32 %v1988_v13, %v1988_v13  ;;  %v656_v32 = vsel %vm636_vm1, %v1988_v13, 0.0  ;;  %v2053_v8 = vpop.f32.mrb[8].mxu1 }
  0xeb   :  { %v652_v20 = vsel %vm636_vm1, %v1992_v16, 0.0  ;;  %v779_v21 = vmul.f32 %v1992_v16, %v1992_v16  ;;  %v2001_v22 = vpop.f32.mrb[10].mxu0  ;;  %v2055_v12 = vpop.f32.mrb[9].mxu1 }
  0xec   :  { %v653_v23 = vadd.f32 %v652_v20, %v651_v17  ;;  %v849_v24 = vadd.f32 %v848_v19, %v847_v15  ;;  %v2003_v25 = vpop.f32.mrb[11].mxu0  ;;  %v782_v35 = vmul.f32 %v2001_v22, %v2001_v22  ;;  %v854_v43 = vsel %vm636_vm1, %v781_v26, 0.0  ;;  %v2062_v20 = vpop.f32.mrb[10].mxu1 }
  0xed   :  { %v850_v27 = vsel %vm636_vm1, %v779_v21, 0.0  ;;  %v654_v28 = vsel %vm636_vm1, %v2003_v25, 0.0  ;;  %v780_v29 = vmul.f32 %v2003_v25, %v2003_v25  ;;  %v658_v44 = vsel %vm636_vm1, %v2001_v22, 0.0  ;;  %v2066_v26 = vpop.f32.mrb[11].mxu1 }
  0xee   :  { %v851_v30 = vadd.f32 %v850_v27, %v849_v24  ;;  %v655_v31 = vadd.f32 %v654_v28, %v653_v23  ;;  %v856_v52 = vsel %vm636_vm1, %v782_v35, 0.0 }
  0xef   :  { %v852_v38 = vsel %vm636_vm1, %v780_v29, 0.0 }
  0xf0   :  { %v657_v40 = vadd.f32 %v656_v32, %v655_v31  ;;  %v853_v41 = vadd.f32 %v852_v38, %v851_v30 }
  0xf1   :  { %v2024_v45 = vpop.f32.mrb[12].mxu0 }
  0xf2   :  { %v855_v47 = vadd.f32 %v854_v43, %v853_v41  ;;  %v2028_v48 = vpop.f32.mrb[13].mxu0  ;;  %v659_v49 = vadd.f32 %v658_v44, %v657_v40  ;;  %v785_v62 = vmul.f32 %v2024_v45, %v2024_v45  ;;  %v664_v4 = vsel %vm636_vm1, %v2024_v45, 0.0 }
  0xf3   :  { %v660_v54 = vsel %vm636_vm1, %v2028_v48, 0.0  ;;  %v783_v55 = vmul.f32 %v2028_v48, %v2028_v48  ;;  %v2037_v56 = vpop.f32.mrb[14].mxu0 }
  0xf4   :  { %v661_v57 = vadd.f32 %v660_v54, %v659_v49  ;;  %v857_v59 = vadd.f32 %v856_v52, %v855_v47  ;;  %v2039_v60 = vpop.f32.mrb[15].mxu0  ;;  %v786_v5 = vmul.f32 %v2037_v56, %v2037_v56  ;;  %v862_v15 = vsel %vm636_vm1, %v785_v62, 0.0 }
  0xf5   :  { %v858_v63 = vsel %vm636_vm1, %v783_v55, 0.0  ;;  %v662_v0 = vsel %vm636_vm1, %v2039_v60, 0.0  ;;  %v784_v1 = vmul.f32 %v2039_v60, %v2039_v60  ;;  %v666_v17 = vsel %vm636_vm1, %v2037_v56, 0.0  ;;  %v2089_v55 = vpop.f32.mrb[12].mxu1 }
  0xf6   :  { %v859_v2 = vadd.f32 %v858_v63, %v857_v59  ;;  %v663_v3 = vadd.f32 %v662_v0, %v661_v57  ;;  %v864_v27 = vsel %vm636_vm1, %v786_v5, 0.0  ;;  %v2091_v62 = vpop.f32.mrb[13].mxu1 }
  0xf7   :  { %v860_v6 = vsel %vm636_vm1, %v784_v1, 0.0 }
  0xf8   :  { %v665_v9 = vadd.f32 %v664_v4, %v663_v3  ;;  %v861_v11 = vadd.f32 %v860_v6, %v859_v2  ;;  %v2098_v2 = vpop.f32.mrb[14].mxu1 }
  0xf9   :  { %v2060_v19 = vpop.f32.mrb[16].mxu0  ;;  %v2102_v6 = vpop.f32.mrb[15].mxu1 }
  0xfa   :  { %v863_v21 = vadd.f32 %v862_v15, %v861_v11  ;;  %v2064_v23 = vpop.f32.mrb[17].mxu0  ;;  %v667_v24 = vadd.f32 %v666_v17, %v665_v9  ;;  %v789_v38 = vmul.f32 %v2060_v19, %v2060_v19  ;;  %v672_v49 = vsel %vm636_vm1, %v2060_v19, 0.0 }
  0xfb   :  { %v668_v28 = vsel %vm636_vm1, %v2064_v23, 0.0  ;;  %v787_v29 = vmul.f32 %v2064_v23, %v2064_v23  ;;  %v2073_v30 = vpop.f32.mrb[18].mxu0 }
  0xfc   :  { %v669_v31 = vadd.f32 %v668_v28, %v667_v24  ;;  %v865_v32 = vadd.f32 %v864_v27, %v863_v21  ;;  %v2075_v35 = vpop.f32.mrb[19].mxu0  ;;  %v790_v52 = vmul.f32 %v2073_v30, %v2073_v30  ;;  %v870_v63 = vsel %vm636_vm1, %v789_v38, 0.0 }
  0xfd   :  { %v866_v40 = vsel %vm636_vm1, %v787_v29, 0.0  ;;  %v670_v41 = vsel %vm636_vm1, %v2075_v35, 0.0  ;;  %v788_v43 = vmul.f32 %v2075_v35, %v2075_v35  ;;  %v674_v0 = vsel %vm636_vm1, %v2073_v30, 0.0 }
  0xfe   :  { %v867_v44 = vadd.f32 %v866_v40, %v865_v32  ;;  %v671_v47 = vadd.f32 %v670_v41, %v669_v31  ;;  %v872_v9 = vsel %vm636_vm1, %v790_v52, 0.0 }
  0xff   :  { %v868_v54 = vsel %vm636_vm1, %v788_v43, 0.0 }
 0x100   :  { %v673_v57 = vadd.f32 %v672_v49, %v671_v47  ;;  %v869_v59 = vadd.f32 %v868_v54, %v867_v44  ;;  %v2125_v47 = vpop.f32.mrb[16].mxu1 }
 0x101   :  { %v2096_v1 = vpop.f32.mrb[20].mxu0  ;;  %v2127_v54 = vpop.f32.mrb[17].mxu1 }
 0x102   :  { %3335 = vst [vmem:[#allocation8_spill] sm:$0xff] %v2096_v1  ;;  %v871_v3 = vadd.f32 %v870_v63, %v869_v59  ;;  %v2100_v4 = vpop.f32.mrb[21].mxu0  ;;  %v675_v5 = vadd.f32 %v674_v0, %v673_v57  ;;  %v793_v28 = vmul.f32 %v2096_v1, %v2096_v1  ;;  %v680_v41 = vsel %vm636_vm1, %v2096_v1, 0.0  ;;  %v2134_v0 = vpop.f32.mrb[18].mxu1 }
 0x103   :  { %3336 = vst [vmem:[#allocation9_spill] sm:$0xff] %v2100_v4  ;;  %v676_v11 = vsel %vm636_vm1, %v2100_v4, 0.0  ;;  %v791_v15 = vmul.f32 %v2100_v4, %v2100_v4  ;;  %v2109_v17 = vpop.f32.mrb[22].mxu0 }
 0x104   :  { %3337 = vst [vmem:[#allocation10_spill] sm:$0xff] %v2109_v17  ;;  %v677_v21 = vadd.f32 %v676_v11, %v675_v5  ;;  %v873_v24 = vadd.f32 %v872_v9, %v871_v3  ;;  %v2111_v27 = vpop.f32.mrb[23].mxu0  ;;  %v794_v43 = vmul.f32 %v2109_v17, %v2109_v17  ;;  %v878_v57 = vsel %vm636_vm1, %v793_v28, 0.0  ;;  %v2138_v11 = vpop.f32.mrb[19].mxu1 }
 0x105   :  { %3338 = vst [vmem:[#allocation11_spill] sm:$0xff] %v2111_v27  ;;  %v874_v29 = vsel %vm636_vm1, %v791_v15, 0.0  ;;  %v678_v31 = vsel %vm636_vm1, %v2111_v27, 0.0  ;;  %v792_v32 = vmul.f32 %v2111_v27, %v2111_v27  ;;  %v682_v59 = vsel %vm636_vm1, %v2109_v17, 0.0 }
 0x106   :  { %v875_v38 = vadd.f32 %v874_v29, %v873_v24  ;;  %v679_v40 = vadd.f32 %v678_v31, %v677_v21  ;;  %v880_v15 = vsel %vm636_vm1, %v794_v43, 0.0 }
 0x107   :  { %v876_v44 = vsel %vm636_vm1, %v792_v32, 0.0 }
 0x108   :  { %v681_v49 = vadd.f32 %v680_v41, %v679_v40  ;;  %v877_v52 = vadd.f32 %v876_v44, %v875_v38 }
 0x109   :  { %v2132_v63 = vpop.f32.mrb[24].mxu0 }
 0x10a   :  { %3339 = vst [vmem:[#allocation12_spill] sm:$0xff] %v2132_v63  ;;  %v879_v3 = vadd.f32 %v878_v57, %v877_v52  ;;  %v2136_v5 = vpop.f32.mrb[25].mxu0  ;;  %v683_v9 = vadd.f32 %v682_v59, %v681_v49  ;;  %v797_v38 = vmul.f32 %v2132_v63, %v2132_v63  ;;  %v688_v52 = vsel %vm636_vm1, %v2132_v63, 0.0 }
 0x10b   :  { %3340 = vst [vmem:[#allocation13_spill] sm:$0xff] %v2136_v5  ;;  %v684_v21 = vsel %vm636_vm1, %v2136_v5, 0.0  ;;  %v795_v24 = vmul.f32 %v2136_v5, %v2136_v5  ;;  %v2145_v28 = vpop.f32.mrb[26].mxu0 }
 0x10c   :  { %3341 = vst [vmem:[#allocation14_spill] sm:$0xff] %v2145_v28  ;;  %v685_v29 = vadd.f32 %v684_v21, %v683_v9  ;;  %v881_v31 = vadd.f32 %v880_v15, %v879_v3  ;;  %v2147_v32 = vpop.f32.mrb[27].mxu0  ;;  %v798_v57 = vmul.f32 %v2145_v28, %v2145_v28  ;;  %v2161_v3 = vpop.f32.mrb[20].mxu1 }
 0x10d   :  { %3342 = vst [vmem:[#allocation15_spill] sm:$0xff] %v2147_v32  ;;  %v882_v40 = vsel %vm636_vm1, %v795_v24, 0.0  ;;  %v686_v41 = vsel %vm636_vm1, %v2147_v32, 0.0  ;;  %v796_v43 = vmul.f32 %v2147_v32, %v2147_v32  ;;  %v2163_v21 = vpop.f32.mrb[21].mxu1  ;;  %v886_v24 = vsel %vm636_vm1, %v797_v38, 0.0 }
 0x10e   :  { %v883_v44 = vadd.f32 %v882_v40, %v881_v31  ;;  %v687_v49 = vadd.f32 %v686_v41, %v685_v29  ;;  %v690_v31 = vsel %vm636_vm1, %v2145_v28, 0.0  ;;  %v2170_v40 = vpop.f32.mrb[22].mxu1 }
 0x10f   :  { %v884_v59 = vsel %vm636_vm1, %v796_v43, 0.0  ;;  %v2174_v43 = vpop.f32.mrb[23].mxu1 }
 0x110   :  { %v689_v9 = vadd.f32 %v688_v52, %v687_v49  ;;  %v885_v15 = vadd.f32 %v884_v59, %v883_v44  ;;  %v888_v49 = vsel %vm636_vm1, %v798_v57, 0.0 }
 0x111   :  { %v2168_v29 = vpop.f32.mrb[28].mxu0 }
 0x112   :  { %3343 = vst [vmem:[#allocation16_spill] sm:$0xff] %v2168_v29  ;;  %v887_v41 = vadd.f32 %v886_v24, %v885_v15  ;;  %v2172_v63 = vpop.f32.mrb[29].mxu0  ;;  %v691_v32 = vadd.f32 %v690_v31, %v689_v9  ;;  %v801_v15 = vmul.f32 %v2168_v29, %v2168_v29 }
 0x113   :  { %3344 = vst [vmem:[#allocation17_spill] sm:$0xff] %v2172_v63  ;;  %v692_v44 = vsel %vm636_vm1, %v2172_v63, 0.0  ;;  %v799_v38 = vmul.f32 %v2172_v63, %v2172_v63  ;;  %v2181_v52 = vpop.f32.mrb[30].mxu0  ;;  %v696_v63 = vsel %vm636_vm1, %v2168_v29, 0.0 }
 0x114   :  { %3345 = vst [vmem:[#allocation18_spill] sm:$0xff] %v2181_v52  ;;  %v693_v59 = vadd.f32 %v692_v44, %v691_v32  ;;  %v889_v28 = vadd.f32 %v888_v49, %v887_v41  ;;  %v2183_v5 = vpop.f32.mrb[31].mxu0  ;;  %v802_v32 = vmul.f32 %v2181_v52, %v2181_v52  ;;  %v803_v49 = vmul.f32 %v1983_v10, %v1983_v10  ;;  %v2199_v44 = vpop.f32.mrb[24].mxu1 }
 0x115   :  { %3346 = vst [vmem:[#allocation19_spill] sm:$0xff] %v2183_v5  ;;  %v890_v9 = vsel %vm636_vm1, %v799_v38, 0.0  ;;  %v694_v57 = vsel %vm636_vm1, %v2183_v5, 0.0  ;;  %v800_v24 = vmul.f32 %v2183_v5, %v2183_v5  ;;  %3347 = vst [vmem:[#allocation20_spill] sm:$0xff] %v2199_v44  ;;  %v2201_v27 = vpop.f32.mrb[25].mxu1 }
 0x116   :  { %v891_v31 = vadd.f32 %v890_v9, %v889_v28  ;;  %v695_v17 = vadd.f32 %v694_v57, %v693_v59  ;;  %v894_v28 = vsel %vm636_vm1, %v801_v15, 0.0  ;;  %v698_v59 = vsel %vm636_vm1, %v2181_v52, 0.0  ;;  %v2208_v57 = vpop.f32.mrb[26].mxu1 }
 0x117   :  { %v892_v41 = vsel %vm636_vm1, %v800_v24, 0.0  ;;  %v700_v9 = vsel %vm636_vm1, %v1983_v10, 0.0  ;;  %3348 = vst [vmem:[#allocation21_spill] sm:$0xff] %v2208_v57  ;;  %v2210_v5 = vpop.f32.mrb[27].mxu1  ;;  %v896_v4 = vsel %vm636_vm1, %v802_v32, 0.0  ;;  %v702_v10 = vsel %vm636_vm1, %v1994_v18, 0.0 }
 0x118   :  { %v697_v38 = vadd.f32 %v696_v63, %v695_v17  ;;  %v893_v1 = vadd.f32 %v892_v41, %v891_v31  ;;  %v898_v17 = vsel %vm636_vm1, %v803_v49, 0.0  ;;  %v804_v63 = vmul.f32 %v1994_v18, %v1994_v18 }
 0x119   :  { %v805_v41 = vmul.f32 %v1981_v7, %v1981_v7  ;;  %v806_v32 = vmul.f32 %v1990_v14, %v1990_v14 }
 0x11a   :  { %v895_v24 = vadd.f32 %v894_v28, %v893_v1  ;;  %v699_v29 = vadd.f32 %v698_v59, %v697_v38  ;;  %v704_v38 = vsel %vm636_vm1, %v1981_v7, 0.0  ;;  %v900_v49 = vsel %vm636_vm1, %v804_v63, 0.0 }
 0x11b   :  { %v904_v18 = vsel %vm636_vm1, %v806_v32, 0.0  ;;  %v810_v32 = vmul.f32 %v2026_v46, %v2026_v46 }
 0x11c   :  { %v701_v15 = vadd.f32 %v700_v9, %v699_v29  ;;  %v897_v31 = vadd.f32 %v896_v4, %v895_v24  ;;  %v807_v29 = vmul.f32 %v2019_v42, %v2019_v42  ;;  %v2227_v4 = vpop.f32.mrb[28].mxu1  ;;  %v902_v24 = vsel %vm636_vm1, %v805_v41, 0.0 }
 0x11d   :  { %3349 = vst [vmem:[#allocation22_spill] sm:$0xff] %v2227_v4  ;;  %v2229_v9 = vpop.f32.mrb[29].mxu1 }
 0x11e   :  { %v899_v52 = vadd.f32 %v898_v17, %v897_v31  ;;  %v703_v1 = vadd.f32 %v702_v10, %v701_v15  ;;  %3350 = vst [vmem:[#allocation23_spill] sm:$0xff] %v2229_v9  ;;  %v706_v10 = vsel %vm636_vm1, %v1990_v14, 0.0  ;;  %v708_v17 = vsel %vm636_vm1, %v2019_v42, 0.0  ;;  %v2236_v15 = vpop.f32.mrb[30].mxu1 }
 0x11f   :  { %3351 = vst [vmem:[#allocation24_spill] sm:$0xff] %v2236_v15  ;;  %v2238_v7 = vpop.f32.mrb[31].mxu1  ;;  %v710_v42 = vsel %vm636_vm1, %v2030_v50, 0.0 }
 0x120   :  { %v705_v28 = vadd.f32 %v704_v38, %v703_v1  ;;  %v901_v59 = vadd.f32 %v900_v49, %v899_v52  ;;  %3352 = vst [vmem:[#allocation25_spill] sm:$0xff] %v2238_v7  ;;  %v906_v52 = vsel %vm636_vm1, %v807_v29, 0.0  ;;  %v808_v1 = vmul.f32 %v2030_v50, %v2030_v50 }
 0x121   :  { %v809_v49 = vmul.f32 %v2017_v39, %v2017_v39 }
 0x122   :  { %v903_v63 = vadd.f32 %v902_v24, %v901_v59  ;;  %v707_v31 = vadd.f32 %v706_v10, %v705_v28  ;;  %v712_v28 = vsel %vm636_vm1, %v2017_v39, 0.0  ;;  %v908_v29 = vsel %vm636_vm1, %v808_v1, 0.0 }
 0x123   :  { %v811_v24 = vmul.f32 %v2055_v12, %v2055_v12  ;;  %v812_v1 = vmul.f32 %v2066_v26, %v2066_v26 }
 0x124   :  { %v709_v41 = vadd.f32 %v708_v17, %v707_v31  ;;  %v905_v38 = vadd.f32 %v904_v18, %v903_v63  ;;  %v910_v17 = vsel %vm636_vm1, %v809_v49, 0.0  ;;  %v714_v63 = vsel %vm636_vm1, %v2026_v46, 0.0 }
 0x125   :  { %v718_v49 = vsel %vm636_vm1, %v2066_v26, 0.0 }
 0x126   :  { %v907_v14 = vadd.f32 %v906_v52, %v905_v38  ;;  %v711_v59 = vadd.f32 %v710_v42, %v709_v41  ;;  %v716_v42 = vsel %vm636_vm1, %v2055_v12, 0.0  ;;  %v912_v41 = vsel %vm636_vm1, %v810_v32, 0.0 }
 0x127   :  { %v914_v38 = vsel %vm636_vm1, %v811_v24, 0.0  ;;  %v814_v32 = vmul.f32 %v2062_v20, %v2062_v20  ;;  %v916_v24 = vsel %vm636_vm1, %v812_v1, 0.0  ;;  %v816_v1 = vmul.f32 %v2102_v6, %v2102_v6 }
 0x128   :  { %v713_v18 = vadd.f32 %v712_v28, %v711_v59  ;;  %v909_v10 = vadd.f32 %v908_v29, %v907_v14  ;;  %v813_v14 = vmul.f32 %v2053_v8, %v2053_v8 }
 0x12a   :  { %v911_v31 = vadd.f32 %v910_v17, %v909_v10  ;;  %v715_v52 = vadd.f32 %v714_v63, %v713_v18  ;;  %v720_v18 = vsel %vm636_vm1, %v2053_v8, 0.0  ;;  %v815_v10 = vmul.f32 %v2091_v62, %v2091_v62 }
 0x12c   :  { %v717_v39 = vadd.f32 %v716_v42, %v715_v52  ;;  %v913_v59 = vadd.f32 %v912_v41, %v911_v31  ;;  %v918_v42 = vsel %vm636_vm1, %v813_v14, 0.0  ;;  %v722_v31 = vsel %vm636_vm1, %v2062_v20, 0.0 }
 0x12d   :  { %v817_v14 = vmul.f32 %v2089_v55, %v2089_v55 }
 0x12e   :  { %v915_v28 = vadd.f32 %v914_v38, %v913_v59  ;;  %v719_v29 = vadd.f32 %v718_v49, %v717_v39  ;;  %v724_v39 = vsel %vm636_vm1, %v2091_v62, 0.0  ;;  %v920_v38 = vsel %vm636_vm1, %v814_v32, 0.0 }
 0x12f   :  { %v922_v59 = vsel %vm636_vm1, %v815_v10, 0.0  ;;  %v818_v32 = vmul.f32 %v2098_v2, %v2098_v2  ;;  %v924_v10 = vsel %vm636_vm1, %v816_v1, 0.0  ;;  %v820_v1 = vmul.f32 %v2138_v11, %v2138_v11 }
 0x130   :  { %v721_v17 = vadd.f32 %v720_v18, %v719_v29  ;;  %v917_v63 = vadd.f32 %v916_v24, %v915_v28  ;;  %v726_v28 = vsel %vm636_vm1, %v2102_v6, 0.0 }
 0x132   :  { %v919_v52 = vadd.f32 %v918_v42, %v917_v63  ;;  %v723_v41 = vadd.f32 %v722_v31, %v721_v17  ;;  %v728_v17 = vsel %vm636_vm1, %v2089_v55, 0.0  ;;  %v819_v63 = vmul.f32 %v2127_v54, %v2127_v54 }
 0x134   :  { %v725_v49 = vadd.f32 %v724_v39, %v723_v41  ;;  %v921_v29 = vadd.f32 %v920_v38, %v919_v52  ;;  %v926_v39 = vsel %vm636_vm1, %v817_v14, 0.0  ;;  %v730_v52 = vsel %vm636_vm1, %v2098_v2, 0.0 }
 0x135   :  { %v732_v41 = vsel %vm636_vm1, %v2127_v54, 0.0  ;;  %v821_v14 = vmul.f32 %v2125_v47, %v2125_v47 }
 0x136   :  { %v923_v18 = vadd.f32 %v922_v59, %v921_v29  ;;  %v727_v24 = vadd.f32 %v726_v28, %v725_v49  ;;  %v928_v49 = vsel %vm636_vm1, %v818_v32, 0.0  ;;  %v930_v29 = vsel %vm636_vm1, %v819_v63, 0.0 }
 0x137   :  { %v822_v32 = vmul.f32 %v2134_v0, %v2134_v0  ;;  %v932_v63 = vsel %vm636_vm1, %v820_v1, 0.0  ;;  %v824_v1 = vmul.f32 %v2174_v43, %v2174_v43 }
 0x138   :  { %v729_v42 = vadd.f32 %v728_v17, %v727_v24  ;;  %v925_v31 = vadd.f32 %v924_v10, %v923_v18  ;;  %v734_v18 = vsel %vm636_vm1, %v2138_v11, 0.0 }
 0x13a   :  { %v927_v38 = vadd.f32 %v926_v39, %v925_v31  ;;  %v731_v59 = vadd.f32 %v730_v52, %v729_v42  ;;  %v736_v42 = vsel %vm636_vm1, %v2125_v47, 0.0  ;;  %v823_v31 = vmul.f32 %v2163_v21, %v2163_v21 }
 0x13c   :  { %v733_v28 = vadd.f32 %v732_v41, %v731_v59  ;;  %v929_v24 = vadd.f32 %v928_v49, %v927_v38  ;;  %v934_v41 = vsel %vm636_vm1, %v821_v14, 0.0  ;;  %v738_v38 = vsel %vm636_vm1, %v2134_v0, 0.0 }
 0x13d   :  { %v740_v59 = vsel %vm636_vm1, %v2163_v21, 0.0  ;;  %v825_v14 = vmul.f32 %v2161_v3, %v2161_v3 }
 0x13e   :  { %v931_v17 = vadd.f32 %v930_v29, %v929_v24  ;;  %v735_v10 = vadd.f32 %v734_v18, %v733_v28  ;;  %v936_v28 = vsel %vm636_vm1, %v822_v32, 0.0  ;;  %v938_v24 = vsel %vm636_vm1, %v823_v31, 0.0 }
 0x13f   :  { %v826_v32 = vmul.f32 %v2170_v40, %v2170_v40  ;;  %v940_v31 = vsel %vm636_vm1, %v824_v1, 0.0  ;;  %v828_v1 = vmul.f32 %v2210_v5, %v2210_v5 }
 0x140   :  { %v737_v39 = vadd.f32 %v736_v42, %v735_v10  ;;  %v933_v52 = vadd.f32 %v932_v63, %v931_v17  ;;  %v742_v17 = vsel %vm636_vm1, %v2174_v43, 0.0 }
 0x142   :  { %v935_v49 = vadd.f32 %v934_v41, %v933_v52  ;;  %v739_v29 = vadd.f32 %v738_v38, %v737_v39  ;;  %v744_v39 = vsel %vm636_vm1, %v2161_v3, 0.0  ;;  %v827_v52 = vmul.f32 %v2201_v27, %v2201_v27 }
 0x144   :  { %v741_v18 = vadd.f32 %v740_v59, %v739_v29  ;;  %v937_v10 = vadd.f32 %v936_v28, %v935_v49  ;;  %v942_v59 = vsel %vm636_vm1, %v825_v14, 0.0  ;;  %v746_v49 = vsel %vm636_vm1, %v2170_v40, 0.0 }
 0x145   :  { %v748_v29 = vsel %vm636_vm1, %v2201_v27, 0.0  ;;  %v829_v14 = vmul.f32 %v2199_v44, %v2199_v44 }
 0x146   :  { %v939_v42 = vadd.f32 %v938_v24, %v937_v10  ;;  %v743_v63 = vadd.f32 %v742_v17, %v741_v18  ;;  %v944_v18 = vsel %vm636_vm1, %v826_v32, 0.0  ;;  %v946_v10 = vsel %vm636_vm1, %v827_v52, 0.0 }
 0x147   :  { %v830_v32 = vmul.f32 %v2208_v57, %v2208_v57  ;;  %v948_v52 = vsel %vm636_vm1, %v828_v1, 0.0  ;;  %v832_v1 = vmul.f32 %v2238_v7, %v2238_v7 }
 0x148   :  { %v745_v41 = vadd.f32 %v744_v39, %v743_v63  ;;  %v941_v38 = vadd.f32 %v940_v31, %v939_v42  ;;  %v750_v42 = vsel %vm636_vm1, %v2210_v5, 0.0 }
 0x14a   :  { %v943_v28 = vadd.f32 %v942_v59, %v941_v38  ;;  %v747_v24 = vadd.f32 %v746_v49, %v745_v41  ;;  %v752_v41 = vsel %vm636_vm1, %v2199_v44, 0.0  ;;  %v831_v38 = vmul.f32 %v2229_v9, %v2229_v9 }
 0x14c   :  { %v749_v17 = vadd.f32 %v748_v29, %v747_v24  ;;  %v945_v63 = vadd.f32 %v944_v18, %v943_v28  ;;  %v950_v29 = vsel %vm636_vm1, %v829_v14, 0.0  ;;  %v754_v28 = vsel %vm636_vm1, %v2208_v57, 0.0 }
 0x14d   :  { %v756_v24 = vsel %vm636_vm1, %v2229_v9, 0.0  ;;  %v833_v14 = vmul.f32 %v2227_v4, %v2227_v4 }
 0x14e   :  { %v947_v39 = vadd.f32 %v946_v10, %v945_v63  ;;  %v751_v31 = vadd.f32 %v750_v42, %v749_v17  ;;  %v952_v17 = vsel %vm636_vm1, %v830_v32, 0.0  ;;  %v954_v63 = vsel %vm636_vm1, %v831_v38, 0.0 }
 0x14f   :  { %v834_v32 = vmul.f32 %v2236_v15, %v2236_v15  ;;  %v956_v38 = vsel %vm636_vm1, %v832_v1, 0.0 }
 0x150   :  { %v753_v59 = vadd.f32 %v752_v41, %v751_v31  ;;  %v949_v49 = vadd.f32 %v948_v52, %v947_v39  ;;  %v758_v39 = vsel %vm636_vm1, %v2238_v7, 0.0 }
 0x152   :  { %v951_v18 = vadd.f32 %v950_v29, %v949_v49  ;;  %v755_v10 = vadd.f32 %v754_v28, %v753_v59  ;;  %v760_v59 = vsel %vm636_vm1, %v2227_v4, 0.0  ;;  %v958_v28 = vsel %vm636_vm1, %v833_v14, 0.0 }
 0x154   :  { %v757_v42 = vadd.f32 %v756_v24, %v755_v10  ;;  %v953_v31 = vadd.f32 %v952_v17, %v951_v18  ;;  %v762_v24 = vsel %vm636_vm1, %v2236_v15, 0.0  ;;  %v960_v17 = vsel %vm636_vm1, %v834_v32, 0.0 }
 0x155   :  { %v980_v32 = vlaneseq }
 0x156   :  { %v955_v41 = vadd.f32 %v954_v63, %v953_v31  ;;  %v759_v52 = vadd.f32 %v758_v39, %v757_v42 }
 0x158   :  { %v761_v49 = vadd.f32 %v760_v59, %v759_v52  ;;  %v957_v29 = vadd.f32 %v956_v38, %v955_v41 }
 0x15a   :  { %v763_v18 = vadd.f32 %v762_v24, %v761_v49  ;;  %v959_v10 = vadd.f32 %v958_v28, %v957_v29  ;;  %v2377_v24 = vshrl.u32 %v980_v32, 7  ;;  %v3360_v32 = vld [vmem:[#allocation14_spill] sm:$0xff] }
 0x15c   :  { %v764_v63 = vrot.slane %v763_v18, 4  ;;  %v961_v42 = vadd.f32 %v960_v17, %v959_v10  ;;  %v3369_v10 = vld [vmem:[#allocation5_spill] sm:$0xff] }
 0x15e   :  { %v765_v31 = vadd.f32 %v764_v63, %v763_v18  ;;  %v962_v39 = vrot.slane %v961_v42, 4  ;;  %v3328_v18 = vsub.s32 0, %v2377_v24 }
 0x160   :  { %v766_v4 = vrot.slane %v765_v31, 2  ;;  %v963_v7 = vadd.f32 %v962_v39, %v961_v42 }
 0x162   :  { %v767_v9 = vadd.f32 %v766_v4, %v765_v31  ;;  %v964_v57 = vrot.slane %v963_v7, 2  ;;  %v972_v4 = vld [vmem:[%s3301_s2] sm:$0x1] }
 0x164   :  { %v768_v1 = vrot.slane %v767_v9, 1  ;;  %v965_v52 = vadd.f32 %v964_v57, %v963_v7 }
 0x166   :  { %v769_v41 = vadd.f32 %v768_v1, %v767_v9  ;;  %v966_v59 = vrot.slane %v965_v52, 1  ;;  %v2386_v9 = vld [vmem:[%s3302_s3] sm:$0x1]  ;;  %v3353_v1 = vld [vmem:[#allocation9_spill] sm:$0xff] }
 0x168   :  { %v770_v14 = vmul.f32 0.001953125, %v769_v41  ;;  %v967_v38 = vadd.f32 %v966_v59, %v965_v52  ;;  %v3354_v52 = vld [vmem:[#allocation11_spill] sm:$0xff]  ;;  %v3355_v41 = vld [vmem:[#allocation8_spill] sm:$0xff]  ;;  %v3356_v59 = vld [vmem:[#allocation10_spill] sm:$0xff] }
 0x16a   :  { %v968_v44 = vmul.f32 0.001953125, %v967_v38  ;;  %v969_v15 = vmul.f32 %v770_v14, %v770_v14  ;;  %v3358_v38 = vld [vmem:[#allocation15_spill] sm:$0xff] }
 0x16c   :  { %v970_v49 = vsub.f32 %v968_v44, %v969_v15 }
 0x16e   :  { %v971_v29 = vmax.f32 %v970_v49, 0.0 }
 0x170   :  { %v973_v28 = vadd.f32 1e-05, %v971_v29  ;;  %v3359_v29 = vld [vmem:[#allocation12_spill] sm:$0xff] }
 0x172   :  { %1771 = vrsqrt.f32 %v973_v28 }
 0x17c   :  { %v1772_v7 = vpop.eup %1771 }
 0x17d   :  { %v975_v57 = vmul.f32 %v1772_v7, %v972_v4  ;;  %v3361_v7 = vld [vmem:[#allocation17_spill] sm:$0xff] }
 0x17f   :  { %v2388_v44 = vmul.f32 %v975_v57, %v770_v14  ;;  %v2392_v15 = vrot.slane %v975_v57, %v3328_v18  ;;  %v3357_v14 = vld [vmem:[#allocation13_spill] sm:$0xff]  ;;  %v3370_v18 = vld [vmem:[#allocation2_spill] sm:$0xff] }
 0x181   :  { %v2398_v17 = vmul.f32 %v2392_v15, %v1931_v34  ;;  %v2402_v63 = vmul.f32 %v2392_v15, %v1937_v37  ;;  %v2406_v42 = vmul.f32 %v1929_v33, %v2392_v15  ;;  %v2410_v31 = vmul.f32 %v1935_v36, %v2392_v15 }
 0x182   :  { %v2414_v39 = vmul.f32 %v2392_v15, %v1958_v53  ;;  %v2418_v34 = vmul.f32 %v2392_v15, %v1967_v61  ;;  %v2422_v37 = vmul.f32 %v1956_v51, %v2392_v15  ;;  %v2426_v33 = vmul.f32 %v1965_v58, %v2392_v15 }
 0x183   :  { %v2430_v36 = vmul.f32 %v2392_v15, %v1992_v16  ;;  %v2434_v53 = vmul.f32 %v2392_v15, %v2003_v25  ;;  %v2438_v61 = vmul.f32 %v1988_v13, %v2392_v15  ;;  %v2442_v51 = vmul.f32 %v2001_v22, %v2392_v15 }
 0x184   :  { %v2446_v58 = vmul.f32 %v2392_v15, %v2028_v48  ;;  %v2450_v16 = vmul.f32 %v2392_v15, %v2039_v60  ;;  %v2454_v25 = vmul.f32 %v2024_v45, %v2392_v15  ;;  %v2458_v13 = vmul.f32 %v2037_v56, %v2392_v15 }
 0x185   :  { %v2462_v22 = vmul.f32 %v2392_v15, %v2064_v23  ;;  %v2466_v48 = vmul.f32 %v2392_v15, %v2075_v35  ;;  %v2470_v60 = vmul.f32 %v2060_v19, %v2392_v15  ;;  %v2474_v45 = vmul.f32 %v2073_v30, %v2392_v15 }
 0x186   :  { %v2478_v56 = vmul.f32 %v2392_v15, %v3353_v1  ;;  %v2482_v23 = vmul.f32 %v2392_v15, %v3354_v52  ;;  %v2486_v35 = vmul.f32 %v3355_v41, %v2392_v15  ;;  %v2490_v19 = vmul.f32 %v3356_v59, %v2392_v15  ;;  %v3362_v1 = vld [vmem:[#allocation19_spill] sm:$0xff]  ;;  %v3364_v41 = vld [vmem:[#allocation16_spill] sm:$0xff] }
 0x187   :  { %v2494_v30 = vmul.f32 %v2392_v15, %v3357_v14  ;;  %v2498_v49 = vmul.f32 %v2392_v15, %v3358_v38  ;;  %v2502_v28 = vmul.f32 %v3359_v29, %v2392_v15  ;;  %v2506_v4 = vmul.f32 %v3360_v32, %v2392_v15  ;;  %v3366_v14 = vld [vmem:[#allocation18_spill] sm:$0xff]  ;;  %v3367_v29 = vld [vmem:[#allocation3_spill] sm:$0xff] }
 0x188   :  { %v2510_v57 = vmul.f32 %v2392_v15, %v3361_v7  ;;  %v2514_v52 = vmul.f32 %v2392_v15, %v3362_v1  ;;  %v2518_v59 = vmul.f32 %v3364_v41, %v2392_v15  ;;  %v2522_v38 = vmul.f32 %v3366_v14, %v2392_v15 }
 0x189   :  { %v2526_v32 = vmul.f32 %v2392_v15, %v3367_v29  ;;  %v2530_v7 = vmul.f32 %v2392_v15, %v3369_v10  ;;  %v2534_v1 = vmul.f32 %v3370_v18, %v2392_v15  ;;  %v2546_v29 = vmul.f32 %v2392_v15, %v2030_v50 }
 0x18a   :  { %3363 = vst [vmem:[#allocation9_spill] sm:$0xff] %v2514_v52  ;;  %3365 = vst [vmem:[#allocation11_spill] sm:$0xff] %v2518_v59  ;;  %v3371_v52 = vld [vmem:[#allocation4_spill] sm:$0xff]  ;;  %v3372_v59 = vld [vmem:[#allocation7_spill] sm:$0xff]  ;;  %v2554_v18 = vmul.f32 %v2026_v46, %v2392_v15  ;;  %v2566_v50 = vmul.f32 %v2053_v8, %v2392_v15  ;;  %v2574_v46 = vmul.f32 %v2392_v15, %v2091_v62 }
 0x18b   :  { %3368 = vst [vmem:[#allocation8_spill] sm:$0xff] %v2526_v32  ;;  %v2538_v41 = vmul.f32 %v3371_v52, %v2392_v15  ;;  %v2542_v14 = vmul.f32 %v2392_v15, %v3372_v59  ;;  %v3373_v32 = vld [vmem:[#allocation6_spill] sm:$0xff]  ;;  %v2558_v52 = vmul.f32 %v2392_v15, %v2055_v12  ;;  %v2562_v59 = vmul.f32 %v2392_v15, %v2066_v26 }
 0x18c   :  { %v2550_v10 = vmul.f32 %v3373_v32, %v2392_v15  ;;  %v2570_v32 = vmul.f32 %v2062_v20, %v2392_v15  ;;  %v2578_v12 = vmul.f32 %v2392_v15, %v2102_v6  ;;  %v2582_v26 = vmul.f32 %v2089_v55, %v2392_v15 }
 0x18d   :  { %v2586_v8 = vmul.f32 %v2098_v2, %v2392_v15  ;;  %v2590_v20 = vmul.f32 %v2392_v15, %v2127_v54  ;;  %v2594_v62 = vmul.f32 %v2392_v15, %v2138_v11  ;;  %v2598_v6 = vmul.f32 %v2125_v47, %v2392_v15 }
 0x18e   :  { %v2602_v55 = vmul.f32 %v2134_v0, %v2392_v15  ;;  %v2606_v2 = vmul.f32 %v2392_v15, %v2163_v21  ;;  %v2610_v54 = vmul.f32 %v2392_v15, %v2174_v43  ;;  %v2614_v11 = vmul.f32 %v2161_v3, %v2392_v15 }
 0x18f   :  { %v2618_v47 = vmul.f32 %v2170_v40, %v2392_v15  ;;  %v2622_v0 = vmul.f32 %v2392_v15, %v2201_v27  ;;  %v2626_v21 = vmul.f32 %v2392_v15, %v2210_v5 }
 0x190   :  { %3374 = vst [vmem:[#allocation10_spill] sm:$0xff] %v2606_v2  ;;  %3375 = vst [vmem:[#allocation13_spill] sm:$0xff] %v2610_v54  ;;  %v3380_v2 = vld [vmem:[#allocation20_spill] sm:$0xff]  ;;  %v3382_v54 = vld [vmem:[#allocation21_spill] sm:$0xff] }
 0x191   :  { %3376 = vst [vmem:[#allocation15_spill] sm:$0xff] %v2614_v11  ;;  %3377 = vst [vmem:[#allocation12_spill] sm:$0xff] %v2618_v47  ;;  %v2630_v43 = vmul.f32 %v3380_v2, %v2392_v15  ;;  %v2634_v3 = vmul.f32 %v3382_v54, %v2392_v15  ;;  %v3384_v11 = vld [vmem:[#allocation23_spill] sm:$0xff]  ;;  %v3385_v47 = vld [vmem:[#allocation25_spill] sm:$0xff]  ;;  %v3389_v54 = vsub.f32 %v2386_v9, %v2388_v44 }
 0x192   :  { %3378 = vst [vmem:[#allocation14_spill] sm:$0xff] %v2622_v0  ;;  %3379 = vst [vmem:[#allocation17_spill] sm:$0xff] %v2626_v21  ;;  %v2638_v40 = vmul.f32 %v2392_v15, %v3384_v11  ;;  %v2642_v27 = vmul.f32 %v2392_v15, %v3385_v47  ;;  %v3386_v0 = vld [vmem:[#allocation22_spill] sm:$0xff]  ;;  %v3387_v21 = vld [vmem:[#allocation24_spill] sm:$0xff] }
 0x193   :  { %3381 = vst [vmem:[#allocation19_spill] sm:$0xff] %v2630_v43  ;;  %3383 = vst [vmem:[#allocation16_spill] sm:$0xff] %v2634_v3  ;;  %v2646_v5 = vmul.f32 %v3386_v0, %v2392_v15  ;;  %v2650_v2 = vmul.f32 %v3387_v21, %v2392_v15  ;;  %v3388_v43 = vsub.s32 0, %v2377_v24  ;;  %v3392_v21 = vld [vmem:[#allocation8_spill] sm:$0xff] }
 0x195   :  { %v2657_v3 = vrot.slane %v3389_v54, %v3388_v43 }
 0x197   :  { %v2661_v11 = vadd.f32 %v2657_v3, %v2398_v17  ;;  %v2665_v47 = vadd.f32 %v2657_v3, %v2402_v63  ;;  %v2669_v0 = vadd.f32 %v2657_v3, %v2406_v42  ;;  %v2673_v24 = vadd.f32 %v2657_v3, %v2410_v31 }
 0x198   :  { %v2677_v9 = vadd.f32 %v2657_v3, %v2414_v39  ;;  %v2681_v44 = vadd.f32 %v2657_v3, %v2418_v34  ;;  %v2685_v15 = vadd.f32 %v2657_v3, %v2422_v37  ;;  %v2689_v17 = vadd.f32 %v2657_v3, %v2426_v33 }
 0x199   :  { %v2693_v63 = vadd.f32 %v2657_v3, %v2430_v36  ;;  %v2697_v42 = vadd.f32 %v2657_v3, %v2434_v53  ;;  %v2701_v31 = vadd.f32 %v2657_v3, %v2438_v61  ;;  %v2705_v39 = vadd.f32 %v2657_v3, %v2442_v51 }
 0x19a   :  { %v2709_v34 = vadd.f32 %v2657_v3, %v2446_v58  ;;  %v2713_v37 = vadd.f32 %v2657_v3, %v2450_v16  ;;  %v2717_v33 = vadd.f32 %v2657_v3, %v2454_v25  ;;  %v2721_v36 = vadd.f32 %v2657_v3, %v2458_v13 }
 0x19b   :  { %v2725_v53 = vadd.f32 %v2657_v3, %v2462_v22  ;;  %v2729_v61 = vadd.f32 %v2657_v3, %v2466_v48  ;;  %v2733_v51 = vadd.f32 %v2657_v3, %v2470_v60  ;;  %v2737_v58 = vadd.f32 %v2657_v3, %v2474_v45 }
 0x19c   :  { %v2741_v16 = vadd.f32 %v2657_v3, %v2478_v56  ;;  %v2745_v25 = vadd.f32 %v2657_v3, %v2482_v23  ;;  %v2749_v13 = vadd.f32 %v2657_v3, %v2486_v35  ;;  %v2753_v22 = vadd.f32 %v2657_v3, %v2490_v19  ;;  %v3390_v35 = vld [vmem:[#allocation9_spill] sm:$0xff] }
 0x19d   :  { %v2757_v48 = vadd.f32 %v2657_v3, %v2494_v30  ;;  %v2761_v60 = vadd.f32 %v2657_v3, %v2498_v49  ;;  %v2765_v45 = vadd.f32 %v2657_v3, %v2502_v28  ;;  %v2769_v56 = vadd.f32 %v2657_v3, %v2506_v4  ;;  %v3391_v30 = vld [vmem:[#allocation11_spill] sm:$0xff] }
 0x19e   :  { %v2773_v23 = vadd.f32 %v2657_v3, %v2510_v57  ;;  %v2777_v19 = vadd.f32 %v2657_v3, %v3390_v35  ;;  %v2781_v49 = vadd.f32 %v2657_v3, %v3391_v30  ;;  %v2785_v28 = vadd.f32 %v2657_v3, %v2522_v38  ;;  %v3397_v30 = vld [vmem:[#allocation10_spill] sm:$0xff] }
 0x19f   :  { %v2789_v4 = vadd.f32 %v2657_v3, %v3392_v21  ;;  %v2793_v57 = vadd.f32 %v2657_v3, %v2530_v7  ;;  %v2797_v43 = vadd.f32 %v2657_v3, %v2534_v1  ;;  %v2801_v54 = vadd.f32 %v2657_v3, %v2538_v41  ;;  %v3399_v21 = vld [vmem:[#allocation13_spill] sm:$0xff] }
 0x1a0   :  { %v2805_v38 = vadd.f32 %v2657_v3, %v2542_v14  ;;  %v2809_v35 = vadd.f32 %v2657_v3, %v2546_v29  ;;  %v2813_v7 = vadd.f32 %v2657_v3, %v2550_v10  ;;  %v2817_v1 = vadd.f32 %v2657_v3, %v2554_v18 }
 0x1a1   :  { %v2821_v41 = vadd.f32 %v2657_v3, %v2558_v52  ;;  %v2825_v14 = vadd.f32 %v2657_v3, %v2562_v59  ;;  %v2829_v29 = vadd.f32 %v2657_v3, %v2566_v50  ;;  %v2833_v10 = vadd.f32 %v2657_v3, %v2570_v32 }
 0x1a2   :  { %v2837_v18 = vadd.f32 %v2657_v3, %v2574_v46  ;;  %v2841_v52 = vadd.f32 %v2657_v3, %v2578_v12  ;;  %v2845_v59 = vadd.f32 %v2657_v3, %v2582_v26  ;;  %v2849_v50 = vadd.f32 %v2657_v3, %v2586_v8 }
 0x1a3   :  { %v2853_v32 = vadd.f32 %v2657_v3, %v2590_v20  ;;  %v2857_v46 = vadd.f32 %v2657_v3, %v2594_v62  ;;  %v2861_v12 = vadd.f32 %v2657_v3, %v2598_v6  ;;  %v2865_v26 = vadd.f32 %v2657_v3, %v2602_v55 }
 0x1a4   :  { %v2869_v8 = vadd.f32 %v2657_v3, %v3397_v30  ;;  %v2873_v20 = vadd.f32 %v2657_v3, %v3399_v21 }
 0x1a5   :  { %3393 = vst [vmem:[#allocation18_spill] sm:$0xff] %v2853_v32  ;;  %3394 = vst [vmem:[#allocation3_spill] sm:$0xff] %v2857_v46  ;;  %v3401_v32 = vld [vmem:[#allocation15_spill] sm:$0xff]  ;;  %v3402_v46 = vld [vmem:[#allocation12_spill] sm:$0xff] }
 0x1a6   :  { %3395 = vst [vmem:[#allocation5_spill] sm:$0xff] %v2861_v12  ;;  %3396 = vst [vmem:[#allocation2_spill] sm:$0xff] %v2865_v26  ;;  %v2877_v62 = vadd.f32 %v2657_v3, %v3401_v32  ;;  %v2881_v6 = vadd.f32 %v2657_v3, %v3402_v46  ;;  %v3403_v12 = vld [vmem:[#allocation14_spill] sm:$0xff]  ;;  %v3404_v26 = vld [vmem:[#allocation17_spill] sm:$0xff]  ;;  %v2901_v46 = vadd.f32 %v2657_v3, %v2638_v40 }
 0x1a7   :  { %3398 = vst [vmem:[#allocation4_spill] sm:$0xff] %v2869_v8  ;;  %3400 = vst [vmem:[#allocation7_spill] sm:$0xff] %v2873_v20  ;;  %v2885_v55 = vadd.f32 %v2657_v3, %v3403_v12  ;;  %v2889_v30 = vadd.f32 %v2657_v3, %v3404_v26  ;;  %v3405_v8 = vld [vmem:[#allocation19_spill] sm:$0xff]  ;;  %v3406_v20 = vld [vmem:[#allocation16_spill] sm:$0xff]  ;;  %v2905_v12 = vadd.f32 %v2657_v3, %v2642_v27 }
 0x1a8   :  { %v2893_v21 = vadd.f32 %v2657_v3, %v3405_v8  ;;  %v2897_v32 = vadd.f32 %v2657_v3, %v3406_v20  ;;  %v2909_v26 = vadd.f32 %v2657_v3, %v2646_v5  ;;  %v2913_v8 = vadd.f32 %v2657_v3, %v2650_v2 }
 0x1a9   :  { %v1573_v20 = vpack.c.bf16 %v2661_v11, %v2661_v11  ;;  %v1575_v40 = vpack.c.bf16 %v2669_v0, %v2669_v0  ;;  %v1576_v27 = vpack.c.bf16 %v2673_v24, %v2673_v24  ;;  %v1577_v5 = vpack.c.bf16 %v2677_v9, %v2677_v9 }
 0x1aa   :  { %3407 = vst [vmem:[#allocation6_spill] sm:$0xff] %v2897_v32  ;;  %3408 = vst [vmem:[#allocation20_spill] sm:$0xff] %v2909_v26  ;;  %v1574_v32 = vpack.c.bf16 %v2665_v47, %v2665_v47  ;;  %v1578_v26 = vpack.c.bf16 %v2681_v44, %v2681_v44  ;;  %v1579_v3 = vpack.c.bf16 %v2685_v15, %v2685_v15 }
 0x1ab   :  { %v1580_v2 = vpack.c.bf16 %v2689_v17, %v2689_v17  ;;  %v1581_v11 = vpack.c.bf16 %v2693_v63, %v2693_v63  ;;  %v1582_v47 = vpack.c.bf16 %v2697_v42, %v2697_v42  ;;  %v1583_v0 = vpack.c.bf16 %v2701_v31, %v2701_v31  ;;  %1376 = vst.msk [vmem:[%s3303_s4] sm:$0xf] %vm1375_vm2, %v1573_v20 }
 0x1ac   :  { %v1584_v24 = vpack.c.bf16 %v2705_v39, %v2705_v39  ;;  %1377 = vst.msk [vmem:[%s3303_s4 + $0x4] sm:$0xf] %vm1375_vm2, %v1574_v32  ;;  %1378 = vst.msk [vmem:[%s3303_s4 + $0x8] sm:$0xf] %vm1375_vm2, %v1575_v40  ;;  %v1585_v9 = vpack.c.bf16 %v2709_v34, %v2709_v34  ;;  %v1586_v44 = vpack.c.bf16 %v2713_v37, %v2713_v37 }
 0x1ad   :  { %1379 = vst.msk [vmem:[%s3303_s4 + $0xc] sm:$0xf] %vm1375_vm2, %v1576_v27  ;;  %v1587_v15 = vpack.c.bf16 %v2717_v33, %v2717_v33  ;;  %v1588_v17 = vpack.c.bf16 %v2721_v36, %v2721_v36  ;;  %1380 = vst.msk [vmem:[%s3303_s4 + $0x10] sm:$0xf] %vm1375_vm2, %v1577_v5  ;;  %v1589_v63 = vpack.c.bf16 %v2725_v53, %v2725_v53 }
 0x1ae   :  { %1381 = vst.msk [vmem:[%s3303_s4 + $0x14] sm:$0xf] %vm1375_vm2, %v1578_v26  ;;  %1382 = vst.msk [vmem:[%s3303_s4 + $0x18] sm:$0xf] %vm1375_vm2, %v1579_v3  ;;  %v1590_v42 = vpack.c.bf16 %v2729_v61, %v2729_v61  ;;  %v1591_v31 = vpack.c.bf16 %v2733_v51, %v2733_v51  ;;  %v1592_v39 = vpack.c.bf16 %v2737_v58, %v2737_v58  ;;  %v3413_v32 = vld [vmem:[#allocation4_spill] sm:$0xff]  ;;  %v3414_v20 = vld [vmem:[#allocation7_spill] sm:$0xff] }
 0x1af   :  { %1383 = vst.msk [vmem:[%s3303_s4 + $0x1c] sm:$0xf] %vm1375_vm2, %v1580_v2  ;;  %1384 = vst.msk [vmem:[%s3303_s4 + $0x20] sm:$0xf] %vm1375_vm2, %v1581_v11  ;;  %v1593_v34 = vpack.c.bf16 %v2741_v16, %v2741_v16  ;;  %v1594_v37 = vpack.c.bf16 %v2745_v25, %v2745_v25  ;;  %v1595_v33 = vpack.c.bf16 %v2749_v13, %v2749_v13 }
 0x1b0   :  { %1385 = vst.msk [vmem:[%s3303_s4 + $0x24] sm:$0xf] %vm1375_vm2, %v1582_v47  ;;  %1386 = vst.msk [vmem:[%s3303_s4 + $0x28] sm:$0xf] %vm1375_vm2, %v1583_v0  ;;  %v1596_v36 = vpack.c.bf16 %v2753_v22, %v2753_v22  ;;  %v1597_v53 = vpack.c.bf16 %v2757_v48, %v2757_v48  ;;  %v1598_v61 = vpack.c.bf16 %v2761_v60, %v2761_v60 }
 0x1b1   :  { %1387 = vst.msk [vmem:[%s3303_s4 + $0x2c] sm:$0xf] %vm1375_vm2, %v1584_v24  ;;  %1388 = vst.msk [vmem:[%s3303_s4 + $0x30] sm:$0xf] %vm1375_vm2, %v1585_v9  ;;  %v1599_v51 = vpack.c.bf16 %v2765_v45, %v2765_v45  ;;  %v1600_v58 = vpack.c.bf16 %v2769_v56, %v2769_v56  ;;  %v1601_v16 = vpack.c.bf16 %v2773_v23, %v2773_v23  ;;  %v3415_v2 = vld [vmem:[#allocation6_spill] sm:$0xff] }
 0x1b2   :  { %1389 = vst.msk [vmem:[%s3303_s4 + $0x34] sm:$0xf] %vm1375_vm2, %v1586_v44  ;;  %1390 = vst.msk [vmem:[%s3303_s4 + $0x38] sm:$0xf] %vm1375_vm2, %v1587_v15  ;;  %v1602_v25 = vpack.c.bf16 %v2777_v19, %v2777_v19  ;;  %v1603_v13 = vpack.c.bf16 %v2781_v49, %v2781_v49  ;;  %v1604_v22 = vpack.c.bf16 %v2785_v28, %v2785_v28 }
 0x1b3   :  { %1391 = vst.msk [vmem:[%s3303_s4 + $0x3c] sm:$0xf] %vm1375_vm2, %v1588_v17  ;;  %1392 = vst.msk [vmem:[%s3303_s4 + $0x40] sm:$0xf] %vm1375_vm2, %v1589_v63  ;;  %v1605_v48 = vpack.c.bf16 %v2789_v4, %v2789_v4  ;;  %v1606_v60 = vpack.c.bf16 %v2793_v57, %v2793_v57  ;;  %v1607_v45 = vpack.c.bf16 %v2797_v43, %v2797_v43 }
 0x1b4   :  { %1393 = vst.msk [vmem:[%s3303_s4 + $0x44] sm:$0xf] %vm1375_vm2, %v1590_v42  ;;  %1394 = vst.msk [vmem:[%s3303_s4 + $0x48] sm:$0xf] %vm1375_vm2, %v1591_v31  ;;  %v1608_v56 = vpack.c.bf16 %v2801_v54, %v2801_v54  ;;  %v1609_v23 = vpack.c.bf16 %v2805_v38, %v2805_v38  ;;  %v1610_v19 = vpack.c.bf16 %v2809_v35, %v2809_v35 }
 0x1b5   :  { %1395 = vst.msk [vmem:[%s3303_s4 + $0x4c] sm:$0xf] %vm1375_vm2, %v1592_v39  ;;  %1396 = vst.msk [vmem:[%s3303_s4 + $0x50] sm:$0xf] %vm1375_vm2, %v1593_v34  ;;  %v1611_v49 = vpack.c.bf16 %v2813_v7, %v2813_v7  ;;  %v1612_v28 = vpack.c.bf16 %v2817_v1, %v2817_v1  ;;  %v1613_v4 = vpack.c.bf16 %v2821_v41, %v2821_v41  ;;  %v3409_v41 = vld [vmem:[#allocation18_spill] sm:$0xff] }
 0x1b6   :  { %1397 = vst.msk [vmem:[%s3303_s4 + $0x54] sm:$0xf] %vm1375_vm2, %v1594_v37  ;;  %1398 = vst.msk [vmem:[%s3303_s4 + $0x58] sm:$0xf] %vm1375_vm2, %v1595_v33  ;;  %v1614_v57 = vpack.c.bf16 %v2825_v14, %v2825_v14  ;;  %v1615_v43 = vpack.c.bf16 %v2829_v29, %v2829_v29  ;;  %v1616_v54 = vpack.c.bf16 %v2833_v10, %v2833_v10  ;;  %v3410_v29 = vld [vmem:[#allocation3_spill] sm:$0xff] }
 0x1b7   :  { %1399 = vst.msk [vmem:[%s3303_s4 + $0x5c] sm:$0xf] %vm1375_vm2, %v1596_v36  ;;  %1400 = vst.msk [vmem:[%s3303_s4 + $0x60] sm:$0xf] %vm1375_vm2, %v1597_v53  ;;  %v1617_v38 = vpack.c.bf16 %v2837_v18, %v2837_v18  ;;  %v1618_v35 = vpack.c.bf16 %v2841_v52, %v2841_v52  ;;  %v1619_v7 = vpack.c.bf16 %v2845_v59, %v2845_v59  ;;  %v3411_v18 = vld [vmem:[#allocation5_spill] sm:$0xff]  ;;  %v3412_v59 = vld [vmem:[#allocation2_spill] sm:$0xff] }
 0x1b8   :  { %1401 = vst.msk [vmem:[%s3303_s4 + $0x64] sm:$0xf] %vm1375_vm2, %v1598_v61  ;;  %1402 = vst.msk [vmem:[%s3303_s4 + $0x68] sm:$0xf] %vm1375_vm2, %v1599_v51  ;;  %v1620_v1 = vpack.c.bf16 %v2849_v50, %v2849_v50  ;;  %v1621_v14 = vpack.c.bf16 %v3409_v41, %v3409_v41  ;;  %v1622_v10 = vpack.c.bf16 %v3410_v29, %v3410_v29 }
 0x1b9   :  { %1403 = vst.msk [vmem:[%s3303_s4 + $0x6c] sm:$0xf] %vm1375_vm2, %v1600_v58  ;;  %1404 = vst.msk [vmem:[%s3303_s4 + $0x70] sm:$0xf] %vm1375_vm2, %v1601_v16  ;;  %v1623_v52 = vpack.c.bf16 %v3411_v18, %v3411_v18  ;;  %v1624_v50 = vpack.c.bf16 %v3412_v59, %v3412_v59  ;;  %v1625_v26 = vpack.c.bf16 %v3413_v32, %v3413_v32 }
 0x1ba   :  { %1405 = vst.msk [vmem:[%s3303_s4 + $0x74] sm:$0xf] %vm1375_vm2, %v1602_v25  ;;  %1406 = vst.msk [vmem:[%s3303_s4 + $0x78] sm:$0xf] %vm1375_vm2, %v1603_v13  ;;  %v1626_v40 = vpack.c.bf16 %v3414_v20, %v3414_v20  ;;  %v1627_v27 = vpack.c.bf16 %v2877_v62, %v2877_v62  ;;  %v1628_v5 = vpack.c.bf16 %v2881_v6, %v2881_v6 }
 0x1bb   :  { %1407 = vst.msk [vmem:[%s3303_s4 + $0x7c] sm:$0xf] %vm1375_vm2, %v1604_v22  ;;  %1408 = vst.msk [vmem:[%s3303_s4 + $0x80] sm:$0xf] %vm1375_vm2, %v1605_v48  ;;  %v1629_v62 = vpack.c.bf16 %v2885_v55, %v2885_v55  ;;  %v1630_v6 = vpack.c.bf16 %v2889_v30, %v2889_v30  ;;  %v1631_v3 = vpack.c.bf16 %v2893_v21, %v2893_v21  ;;  %v3416_v21 = vld [vmem:[#allocation20_spill] sm:$0xff] }
 0x1bc   :  { %1409 = vst.msk [vmem:[%s3303_s4 + $0x84] sm:$0xf] %vm1375_vm2, %v1606_v60  ;;  %1410 = vst.msk [vmem:[%s3303_s4 + $0x88] sm:$0xf] %vm1375_vm2, %v1607_v45  ;;  %v1632_v11 = vpack.c.bf16 %v3415_v2, %v3415_v2  ;;  %v1633_v55 = vpack.c.bf16 %v2901_v46, %v2901_v46  ;;  %v1634_v30 = vpack.c.bf16 %v2905_v12, %v2905_v12 }
 0x1bd   :  { %1411 = vst.msk [vmem:[%s3303_s4 + $0x8c] sm:$0xf] %vm1375_vm2, %v1608_v56  ;;  %1412 = vst.msk [vmem:[%s3303_s4 + $0x90] sm:$0xf] %vm1375_vm2, %v1609_v23  ;;  %v1635_v47 = vpack.c.bf16 %v3416_v21, %v3416_v21  ;;  %v1636_v0 = vpack.c.bf16 %v2913_v8, %v2913_v8 }
 0x1be   :  { %1413 = vst.msk [vmem:[%s3303_s4 + $0x94] sm:$0xf] %vm1375_vm2, %v1610_v19  ;;  %1414 = vst.msk [vmem:[%s3303_s4 + $0x98] sm:$0xf] %vm1375_vm2, %v1611_v49 }
 0x1bf   :  { %1415 = vst.msk [vmem:[%s3303_s4 + $0x9c] sm:$0xf] %vm1375_vm2, %v1612_v28  ;;  %1416 = vst.msk [vmem:[%s3303_s4 + $0xa0] sm:$0xf] %vm1375_vm2, %v1613_v4 }
 0x1c0   :  { %1417 = vst.msk [vmem:[%s3303_s4 + $0xa4] sm:$0xf] %vm1375_vm2, %v1614_v57  ;;  %1418 = vst.msk [vmem:[%s3303_s4 + $0xa8] sm:$0xf] %vm1375_vm2, %v1615_v43 }
 0x1c1   :  { %1419 = vst.msk [vmem:[%s3303_s4 + $0xac] sm:$0xf] %vm1375_vm2, %v1616_v54  ;;  %1420 = vst.msk [vmem:[%s3303_s4 + $0xb0] sm:$0xf] %vm1375_vm2, %v1617_v38 }
 0x1c2   :  { %1421 = vst.msk [vmem:[%s3303_s4 + $0xb4] sm:$0xf] %vm1375_vm2, %v1618_v35  ;;  %1422 = vst.msk [vmem:[%s3303_s4 + $0xb8] sm:$0xf] %vm1375_vm2, %v1619_v7 }
 0x1c3   :  { %1423 = vst.msk [vmem:[%s3303_s4 + $0xbc] sm:$0xf] %vm1375_vm2, %v1620_v1  ;;  %1424 = vst.msk [vmem:[%s3303_s4 + $0xc0] sm:$0xf] %vm1375_vm2, %v1621_v14 }
 0x1c4   :  { %1425 = vst.msk [vmem:[%s3303_s4 + $0xc4] sm:$0xf] %vm1375_vm2, %v1622_v10  ;;  %1426 = vst.msk [vmem:[%s3303_s4 + $0xc8] sm:$0xf] %vm1375_vm2, %v1623_v52 }
 0x1c5   :  { %1427 = vst.msk [vmem:[%s3303_s4 + $0xcc] sm:$0xf] %vm1375_vm2, %v1624_v50  ;;  %1428 = vst.msk [vmem:[%s3303_s4 + $0xd0] sm:$0xf] %vm1375_vm2, %v1625_v26 }
 0x1c6   :  { %1429 = vst.msk [vmem:[%s3303_s4 + $0xd4] sm:$0xf] %vm1375_vm2, %v1626_v40  ;;  %1430 = vst.msk [vmem:[%s3303_s4 + $0xd8] sm:$0xf] %vm1375_vm2, %v1627_v27 }
 0x1c7   :  { %1431 = vst.msk [vmem:[%s3303_s4 + $0xdc] sm:$0xf] %vm1375_vm2, %v1628_v5  ;;  %1432 = vst.msk [vmem:[%s3303_s4 + $0xe0] sm:$0xf] %vm1375_vm2, %v1629_v62 }
 0x1c8   :  { %1433 = vst.msk [vmem:[%s3303_s4 + $0xe4] sm:$0xf] %vm1375_vm2, %v1630_v6  ;;  %1434 = vst.msk [vmem:[%s3303_s4 + $0xe8] sm:$0xf] %vm1375_vm2, %v1631_v3 }
 0x1c9   :  { %1435 = vst.msk [vmem:[%s3303_s4 + $0xec] sm:$0xf] %vm1375_vm2, %v1632_v11  ;;  %1436 = vst.msk [vmem:[%s3303_s4 + $0xf0] sm:$0xf] %vm1375_vm2, %v1633_v55 }
 0x1ca   :  { %1437 = vst.msk [vmem:[%s3303_s4 + $0xf4] sm:$0xf] %vm1375_vm2, %v1634_v30  ;;  %1438 = vst.msk [vmem:[%s3303_s4 + $0xf8] sm:$0xf] %vm1375_vm2, %v1635_v47 }
 0x1cb   :  { %1439 = vst.msk [vmem:[%s3303_s4 + $0xfc] sm:$0xf] %vm1375_vm2, %v1636_v0 }

// kernel: shared_layers_forward.77
= control target key start
LH: loop header
LB: loop body
LE: loop exit
PB: predicated region body
PF: predicated region fallthrough
CT: control target
= control target key end

     0   :  { %v2058_v0 = vmov 0   ;;  %vm442_vm0 = vcmask 130048   ;;  %vm1630_vm1 = vcmask 125952   ;;  %s3833_s1 = inlined_call_operand.vmem [shape: bf16[144,16], index: 1, kind: input, shape index: {}]   ;;  %s3834_s0 = inlined_call_operand.vmem [shape: bf16[512,144], index: 0, kind: input, shape index: {}]   ;;  %s3835_s2 = inlined_call_operand.vmem [shape: f32[1,16], index: 2, kind: input, shape index: {}]   ;;  %s3836_s3 = inlined_call_operand.vmem [shape: f32[1,16], index: 3, kind: input, shape index: {}]   ;;  %s3837_s4 = inlined_call_operand.vmem [shape: bf16[512,16], index: 4, kind: output, shape index: {}]  }
   0x1   :  { %539 = vmatprep.subr.bf16.mxu0 %v2058_v0  ;;  %v1951_v1 = vld [vmem:[%s3833_s1] sm:$0xff]   ;;  %1932 = vmatprep.subr.bf16.mxu1 %v2058_v0  ;;  %v1952_v2 = vld [vmem:[%s3833_s1 + $0x8] sm:$0xff]   ;;  %v1953_v3 = vld [vmem:[%s3833_s1 + $0x10] sm:$0xff]  }
   0x2   :  { %540 = vmatpush1.bf16.msra.mxu0 %v1951_v1  ;;  %1941 = vmatpush1.bf16.msra.mxu1 %v1951_v1  ;;  %v1954_v4 = vld [vmem:[%s3833_s1 + $0x18] sm:$0xff]   ;;  %v1962_v5 = vld [vmem:[%s3834_s0 + $0x4] ss:$8 sps:$4 sm:$0xff]   ;;  %v1957_v9 = vld [vmem:[%s3833_s1 + $0x30] sm:$0xff]  }
   0x3   :  { %541 = vmatprep.subr.bf16.mxu0 %v2058_v0  ;;  %1933 = vmatprep.subr.bf16.mxu1 %v2058_v0  ;;  %v1955_v6 = vld [vmem:[%s3833_s1 + $0x20] sm:$0xff]   ;;  %v1956_v7 = vld [vmem:[%s3833_s1 + $0x28] sm:$0xff]   ;;  %v1958_v10 = vld [vmem:[%s3833_s1 + $0x38] sm:$0xff]  }
   0x4   :  { %1772 = vmatprep.mubr.msk.bf16.mxu0 %vm442_vm0, %v1962_v5  ;;  %v1986_v8 = vld [vmem:[%s3834_s0 + $0x104] ss:$8 sps:$4 sm:$0xff]   ;;  %v1960_v12 = vld [vmem:[%s3834_s0] ss:$8 sps:$4 sm:$0xff]   ;;  %v1963_v13 = vld [vmem:[%s3834_s0 + $0x14] ss:$8 sps:$4 sm:$0xff]  }
   0x5   :  { %1788 = vmatprep.mubr.msk.bf16.mxu1 %vm442_vm0, %v1986_v8  ;;  %v1959_v11 = vld [vmem:[%s3833_s1 + $0x40] sm:$0xff]   ;;  %v1990_v15 = vld [vmem:[%s3834_s0 + $0x114] ss:$8 sps:$4 sm:$0xff]   ;;  %v1965_v16 = vld [vmem:[%s3834_s0 + $0x10] ss:$8 sps:$4 sm:$0xff]  }
   0x6   :  { %542 = vmatpush1.bf16.msra.mxu0 %v1952_v2  ;;  %1942 = vmatpush1.bf16.msra.mxu1 %v1952_v2  ;;  %v1984_v14 = vld [vmem:[%s3834_s0 + $0x100] ss:$8 sps:$4 sm:$0xff]   ;;  %v1966_v17 = vld [vmem:[%s3834_s0 + $0x24] ss:$8 sps:$4 sm:$0xff]   ;;  %v1992_v18 = vld [vmem:[%s3834_s0 + $0x110] ss:$8 sps:$4 sm:$0xff]  }
   0x7   :  { %543 = vmatprep.subr.bf16.mxu0 %v2058_v0  ;;  %1934 = vmatprep.subr.bf16.mxu1 %v2058_v0  ;;  %v1996_v19 = vld [vmem:[%s3834_s0 + $0x124] ss:$8 sps:$4 sm:$0xff]   ;;  %v1968_v20 = vld [vmem:[%s3834_s0 + $0x20] ss:$8 sps:$4 sm:$0xff]   ;;  %v1969_v21 = vld [vmem:[%s3834_s0 + $0x34] ss:$8 sps:$4 sm:$0xff]  }
   0x8   :  { %v1998_v22 = vld [vmem:[%s3834_s0 + $0x120] ss:$8 sps:$4 sm:$0xff]   ;;  %v2002_v23 = vld [vmem:[%s3834_s0 + $0x134] ss:$8 sps:$4 sm:$0xff]   ;;  %v1971_v24 = vld [vmem:[%s3834_s0 + $0x30] ss:$8 sps:$4 sm:$0xff]  }
   0x9   :  { %v2004_v25 = vld [vmem:[%s3834_s0 + $0x130] ss:$8 sps:$4 sm:$0xff]   ;;  %v1972_v26 = vld [vmem:[%s3834_s0 + $0x44] ss:$8 sps:$4 sm:$0xff]   ;;  %v1974_v28 = vld [vmem:[%s3834_s0 + $0x40] ss:$8 sps:$4 sm:$0xff]  }
   0xa   :  { %544 = vmatpush1.bf16.msra.mxu0 %v1953_v3  ;;  %1943 = vmatpush1.bf16.msra.mxu1 %v1953_v3  ;;  %v2008_v27 = vld [vmem:[%s3834_s0 + $0x144] ss:$8 sps:$4 sm:$0xff]   ;;  %v2010_v29 = vld [vmem:[%s3834_s0 + $0x140] ss:$8 sps:$4 sm:$0xff]   ;;  %v1975_v30 = vld [vmem:[%s3834_s0 + $0x54] ss:$8 sps:$4 sm:$0xff]  }
   0xb   :  { %545 = vmatprep.subr.bf16.mxu0 %v2058_v0  ;;  %1935 = vmatprep.subr.bf16.mxu1 %v2058_v0  ;;  %v2014_v31 = vld [vmem:[%s3834_s0 + $0x154] ss:$8 sps:$4 sm:$0xff]   ;;  %v1977_v32 = vld [vmem:[%s3834_s0 + $0x50] ss:$8 sps:$4 sm:$0xff]   ;;  %v1978_v34 = vld [vmem:[%s3834_s0 + $0x64] ss:$8 sps:$4 sm:$0xff]  }
   0xc   :  { %v2016_v33 = vld [vmem:[%s3834_s0 + $0x150] ss:$8 sps:$4 sm:$0xff]   ;;  %v2020_v35 = vld [vmem:[%s3834_s0 + $0x164] ss:$8 sps:$4 sm:$0xff]   ;;  %v1980_v36 = vld [vmem:[%s3834_s0 + $0x60] ss:$8 sps:$4 sm:$0xff]  }
   0xd   :  { %v2022_v37 = vld [vmem:[%s3834_s0 + $0x160] ss:$8 sps:$4 sm:$0xff]   ;;  %v1981_v38 = vld [vmem:[%s3834_s0 + $0x74] ss:$8 sps:$4 sm:$0xff]   ;;  %v1983_v40 = vld [vmem:[%s3834_s0 + $0x70] ss:$8 sps:$4 sm:$0xff]  }
   0xe   :  { %546 = vmatpush1.bf16.msra.mxu0 %v1954_v4  ;;  %1944 = vmatpush1.bf16.msra.mxu1 %v1954_v4  ;;  %v2026_v39 = vld [vmem:[%s3834_s0 + $0x174] ss:$8 sps:$4 sm:$0xff]   ;;  %v2028_v41 = vld [vmem:[%s3834_s0 + $0x170] ss:$8 sps:$4 sm:$0xff]   ;;  %v1987_v42 = vld [vmem:[%s3834_s0 + $0x84] ss:$8 sps:$4 sm:$0xff]  }
   0xf   :  { %547 = vmatprep.subr.bf16.mxu0 %v2058_v0  ;;  %1936 = vmatprep.subr.bf16.mxu1 %v2058_v0  ;;  %v2032_v43 = vld [vmem:[%s3834_s0 + $0x184] ss:$8 sps:$4 sm:$0xff]   ;;  %v1989_v44 = vld [vmem:[%s3834_s0 + $0x80] ss:$8 sps:$4 sm:$0xff]   ;;  %v1993_v46 = vld [vmem:[%s3834_s0 + $0x94] ss:$8 sps:$4 sm:$0xff]  }
  0x10   :  { %v2034_v45 = vld [vmem:[%s3834_s0 + $0x180] ss:$8 sps:$4 sm:$0xff]   ;;  %v2035_v47 = vld [vmem:[%s3834_s0 + $0x194] ss:$8 sps:$4 sm:$0xff]   ;;  %v1995_v48 = vld [vmem:[%s3834_s0 + $0x90] ss:$8 sps:$4 sm:$0xff]  }
  0x11   :  { %v2037_v49 = vld [vmem:[%s3834_s0 + $0x190] ss:$8 sps:$4 sm:$0xff]   ;;  %v1999_v50 = vld [vmem:[%s3834_s0 + $0xa4] ss:$8 sps:$4 sm:$0xff]   ;;  %v2001_v52 = vld [vmem:[%s3834_s0 + $0xa0] ss:$8 sps:$4 sm:$0xff]  }
  0x12   :  { %548 = vmatpush1.bf16.msra.mxu0 %v1955_v6  ;;  %1945 = vmatpush1.bf16.msra.mxu1 %v1955_v6  ;;  %v2038_v51 = vld [vmem:[%s3834_s0 + $0x1a4] ss:$8 sps:$4 sm:$0xff]   ;;  %v2040_v53 = vld [vmem:[%s3834_s0 + $0x1a0] ss:$8 sps:$4 sm:$0xff]   ;;  %v2005_v54 = vld [vmem:[%s3834_s0 + $0xb4] ss:$8 sps:$4 sm:$0xff]  }
  0x13   :  { %549 = vmatprep.subr.bf16.mxu0 %v2058_v0  ;;  %1937 = vmatprep.subr.bf16.mxu1 %v2058_v0  ;;  %v2041_v55 = vld [vmem:[%s3834_s0 + $0x1b4] ss:$8 sps:$4 sm:$0xff]   ;;  %v2007_v56 = vld [vmem:[%s3834_s0 + $0xb0] ss:$8 sps:$4 sm:$0xff]   ;;  %v2011_v58 = vld [vmem:[%s3834_s0 + $0xc4] ss:$8 sps:$4 sm:$0xff]  }
  0x14   :  { %v2043_v57 = vld [vmem:[%s3834_s0 + $0x1b0] ss:$8 sps:$4 sm:$0xff]   ;;  %v2044_v59 = vld [vmem:[%s3834_s0 + $0x1c4] ss:$8 sps:$4 sm:$0xff]   ;;  %v2013_v60 = vld [vmem:[%s3834_s0 + $0xc0] ss:$8 sps:$4 sm:$0xff]  }
  0x15   :  { %v2046_v61 = vld [vmem:[%s3834_s0 + $0x1c0] ss:$8 sps:$4 sm:$0xff]   ;;  %v2017_v62 = vld [vmem:[%s3834_s0 + $0xd4] ss:$8 sps:$4 sm:$0xff]   ;;  %v2049_v1 = vld [vmem:[%s3834_s0 + $0x1d0] ss:$8 sps:$4 sm:$0xff]  }
  0x16   :  { %550 = vmatpush1.bf16.msra.mxu0 %v1956_v7  ;;  %1946 = vmatpush1.bf16.msra.mxu1 %v1956_v7  ;;  %v2047_v63 = vld [vmem:[%s3834_s0 + $0x1d4] ss:$8 sps:$4 sm:$0xff]   ;;  %v2023_v2 = vld [vmem:[%s3834_s0 + $0xe4] ss:$8 sps:$4 sm:$0xff]   ;;  %v2025_v4 = vld [vmem:[%s3834_s0 + $0xe0] ss:$8 sps:$4 sm:$0xff]  }
  0x17   :  { %551 = vmatprep.subr.bf16.mxu0 %v2058_v0  ;;  %1938 = vmatprep.subr.bf16.mxu1 %v2058_v0  ;;  %v2050_v3 = vld [vmem:[%s3834_s0 + $0x1e4] ss:$8 sps:$4 sm:$0xff]   ;;  %v2052_v5 = vld [vmem:[%s3834_s0 + $0x1e0] ss:$8 sps:$4 sm:$0xff]   ;;  %v2029_v6 = vld [vmem:[%s3834_s0 + $0xf4] ss:$8 sps:$4 sm:$0xff]  }
  0x18   :  { %v2053_v7 = vld [vmem:[%s3834_s0 + $0x1f4] ss:$8 sps:$4 sm:$0xff]   ;;  %v2031_v8 = vld [vmem:[%s3834_s0 + $0xf0] ss:$8 sps:$4 sm:$0xff]  }
  0x1a   :  { %552 = vmatpush1.bf16.msra.mxu0 %v1957_v9  ;;  %1947 = vmatpush1.bf16.msra.mxu1 %v1957_v9  ;;  %v2055_v9 = vld [vmem:[%s3834_s0 + $0x1f0] ss:$8 sps:$4 sm:$0xff]  }
  0x1b   :  { %553 = vmatprep.subr.bf16.mxu0 %v2058_v0  ;;  %1939 = vmatprep.subr.bf16.mxu1 %v2058_v0 }
  0x1e   :  { %554 = vmatpush1.bf16.msra.mxu0 %v1958_v10  ;;  %1948 = vmatpush1.bf16.msra.mxu1 %v1958_v10 }
  0x1f   :  { %555 = vmatprep.subr.bf16.mxu0 %v2058_v0  ;;  %1940 = vmatprep.subr.bf16.mxu1 %v2058_v0  ;;  %v2019_v0 = vld [vmem:[%s3834_s0 + $0xd0] ss:$8 sps:$4 sm:$0xff]  }
  0x22   :  { %556 = vmatpush1.bf16.msra.mxu0 %v1959_v11  ;;  %1949 = vmatpush1.bf16.msra.mxu1 %v1959_v11 }
  0x25   :  { %572 = vmatmul.mubr.bf16.vlgmr.msra.gmra.mrb[0].mxu0 %v1960_v12  ;;  %700 = vmatmul.mubr.bf16.vlgmr.msra.gmra.mrb[0].mxu1 %v1984_v14 }
  0x26   :  { %1773 = vmatprep.mubr.msk.bf16.mxu0 %vm442_vm0, %v1963_v13  ;;  %1789 = vmatprep.mubr.msk.bf16.mxu1 %vm442_vm0, %v1990_v15 }
  0x2d   :  { %580 = vmatmul.mubr.bf16.gmra.mrb[4].mxu0 %v1965_v16  ;;  %708 = vmatmul.mubr.bf16.gmra.mrb[4].mxu1 %v1992_v18 }
  0x2e   :  { %1774 = vmatprep.mubr.msk.bf16.mxu0 %vm442_vm0, %v1966_v17  ;;  %1790 = vmatprep.mubr.msk.bf16.mxu1 %vm442_vm0, %v1996_v19 }
  0x35   :  { %588 = vmatmul.mubr.bf16.gmra.mrb[8].mxu0 %v1968_v20  ;;  %716 = vmatmul.mubr.bf16.gmra.mrb[8].mxu1 %v1998_v22 }
  0x36   :  { %1775 = vmatprep.mubr.msk.bf16.mxu0 %vm442_vm0, %v1969_v21  ;;  %1791 = vmatprep.mubr.msk.bf16.mxu1 %vm442_vm0, %v2002_v23 }
  0x3d   :  { %596 = vmatmul.mubr.bf16.gmra.mrb[12].mxu0 %v1971_v24  ;;  %724 = vmatmul.mubr.bf16.gmra.mrb[12].mxu1 %v2004_v25 }
  0x3e   :  { %1776 = vmatprep.mubr.msk.bf16.mxu0 %vm442_vm0, %v1972_v26  ;;  %1792 = vmatprep.mubr.msk.bf16.mxu1 %vm442_vm0, %v2008_v27 }
  0x45   :  { %604 = vmatmul.mubr.bf16.gmra.mrb[16].mxu0 %v1974_v28  ;;  %732 = vmatmul.mubr.bf16.gmra.mrb[16].mxu1 %v2010_v29 }
  0x46   :  { %1777 = vmatprep.mubr.msk.bf16.mxu0 %vm442_vm0, %v1975_v30  ;;  %1793 = vmatprep.mubr.msk.bf16.mxu1 %vm442_vm0, %v2014_v31 }
  0x4d   :  { %612 = vmatmul.mubr.bf16.gmra.mrb[20].mxu0 %v1977_v32  ;;  %740 = vmatmul.mubr.bf16.gmra.mrb[20].mxu1 %v2016_v33 }
  0x4e   :  { %1778 = vmatprep.mubr.msk.bf16.mxu0 %vm442_vm0, %v1978_v34  ;;  %1794 = vmatprep.mubr.msk.bf16.mxu1 %vm442_vm0, %v2020_v35 }
  0x55   :  { %620 = vmatmul.mubr.bf16.gmra.mrb[24].mxu0 %v1980_v36  ;;  %748 = vmatmul.mubr.bf16.gmra.mrb[24].mxu1 %v2022_v37 }
  0x56   :  { %1779 = vmatprep.mubr.msk.bf16.mxu0 %vm442_vm0, %v1981_v38  ;;  %1795 = vmatprep.mubr.msk.bf16.mxu1 %vm442_vm0, %v2026_v39 }
  0x5d   :  { %628 = vmatmul.mubr.bf16.gmra.mrb[28].mxu0 %v1983_v40  ;;  %756 = vmatmul.mubr.bf16.gmra.mrb[28].mxu1 %v2028_v41 }
  0x5e   :  { %1780 = vmatprep.mubr.msk.bf16.mxu0 %vm442_vm0, %v1987_v42  ;;  %1796 = vmatprep.mubr.msk.bf16.mxu1 %vm442_vm0, %v2032_v43 }
  0x65   :  { %636 = vmatmul.mubr.bf16.gmra.mrb[32].mxu0 %v1989_v44  ;;  %764 = vmatmul.mubr.bf16.gmra.mrb[32].mxu1 %v2034_v45 }
  0x66   :  { %1781 = vmatprep.mubr.msk.bf16.mxu0 %vm442_vm0, %v1993_v46  ;;  %1797 = vmatprep.mubr.msk.bf16.mxu1 %vm442_vm0, %v2035_v47 }
  0x6d   :  { %644 = vmatmul.mubr.bf16.gmra.mrb[36].mxu0 %v1995_v48  ;;  %772 = vmatmul.mubr.bf16.gmra.mrb[36].mxu1 %v2037_v49 }
  0x6e   :  { %1782 = vmatprep.mubr.msk.bf16.mxu0 %vm442_vm0, %v1999_v50  ;;  %1798 = vmatprep.mubr.msk.bf16.mxu1 %vm442_vm0, %v2038_v51 }
  0x75   :  { %652 = vmatmul.mubr.bf16.gmra.mrb[40].mxu0 %v2001_v52  ;;  %780 = vmatmul.mubr.bf16.gmra.mrb[40].mxu1 %v2040_v53 }
  0x76   :  { %1783 = vmatprep.mubr.msk.bf16.mxu0 %vm442_vm0, %v2005_v54  ;;  %1799 = vmatprep.mubr.msk.bf16.mxu1 %vm442_vm0, %v2041_v55 }
  0x7d   :  { %660 = vmatmul.mubr.bf16.gmra.mrb[44].mxu0 %v2007_v56  ;;  %788 = vmatmul.mubr.bf16.gmra.mrb[44].mxu1 %v2043_v57 }
  0x7e   :  { %1784 = vmatprep.mubr.msk.bf16.mxu0 %vm442_vm0, %v2011_v58  ;;  %1800 = vmatprep.mubr.msk.bf16.mxu1 %vm442_vm0, %v2044_v59 }
  0x85   :  { %668 = vmatmul.mubr.bf16.gmra.mrb[48].mxu0 %v2013_v60  ;;  %796 = vmatmul.mubr.bf16.gmra.mrb[48].mxu1 %v2046_v61 }
  0x86   :  { %1785 = vmatprep.mubr.msk.bf16.mxu0 %vm442_vm0, %v2017_v62  ;;  %1801 = vmatprep.mubr.msk.bf16.mxu1 %vm442_vm0, %v2047_v63 }
  0x8d   :  { %676 = vmatmul.mubr.bf16.gmra.mrb[52].mxu0 %v2019_v0  ;;  %804 = vmatmul.mubr.bf16.gmra.mrb[52].mxu1 %v2049_v1 }
  0x8e   :  { %1786 = vmatprep.mubr.msk.bf16.mxu0 %vm442_vm0, %v2023_v2  ;;  %1802 = vmatprep.mubr.msk.bf16.mxu1 %vm442_vm0, %v2050_v3 }
  0x95   :  { %684 = vmatmul.mubr.bf16.gmra.mrb[56].mxu0 %v2025_v4  ;;  %812 = vmatmul.mubr.bf16.gmra.mrb[56].mxu1 %v2052_v5 }
  0x96   :  { %1787 = vmatprep.mubr.msk.bf16.mxu0 %vm442_vm0, %v2029_v6  ;;  %1803 = vmatprep.mubr.msk.bf16.mxu1 %vm442_vm0, %v2053_v7 }
  0x9d   :  { %692 = vmatmul.mubr.bf16.gmra.mrb[60].mxu0 %v2031_v8  ;;  %820 = vmatmul.mubr.bf16.gmra.mrb[60].mxu1 %v2055_v9 }
  0xf8   :  { %v2335_v10 = vpop.f32.mrb[0].mxu0  ;;  %v2337_v11 = vpop.f32.mrb[0].mxu1 }
  0xf9   :  { %v962_v12 = vmul.f32 %v2335_v10, %v2335_v10  ;;  %v575_v13 = vpop.f32.mrb[1].mxu0  ;;  %v703_v14 = vpop.f32.mrb[1].mxu1  ;;  %v828_v17 = vsel %vm442_vm0, %v2335_v10, 0.0 }
  0xfa   :  { %v2341_v15 = vpop.f32.mrb[2].mxu0  ;;  %v2343_v16 = vpop.f32.mrb[2].mxu1 }
  0xfb   :  { %v829_v18 = vsel %vm442_vm0, %v2341_v15, 0.0  ;;  %v963_v19 = vmul.f32 %v2341_v15, %v2341_v15  ;;  %v578_v20 = vpop.f32.mrb[3].mxu0  ;;  %v706_v21 = vpop.f32.mrb[3].mxu1  ;;  %v1026_v23 = vsel %vm442_vm0, %v962_v12, 0.0 }
  0xfc   :  { %v830_v22 = vadd.f32 %v829_v18, %v828_v17 }
  0xfd   :  { %v1027_v24 = vsel %vm442_vm0, %v963_v19, 0.0 }
  0xfe   :  { %v1028_v25 = vadd.f32 %v1027_v24, %v1026_v23 }
 0x100   :  { %v2353_v26 = vpop.f32.mrb[4].mxu0  ;;  %v2355_v27 = vpop.f32.mrb[4].mxu1 }
 0x101   :  { %v831_v28 = vsel %vm442_vm0, %v2353_v26, 0.0  ;;  %v964_v29 = vmul.f32 %v2353_v26, %v2353_v26  ;;  %v583_v30 = vpop.f32.mrb[5].mxu0  ;;  %v711_v31 = vpop.f32.mrb[5].mxu1 }
 0x102   :  { %v832_v32 = vadd.f32 %v831_v28, %v830_v22  ;;  %v2361_v33 = vpop.f32.mrb[6].mxu0  ;;  %v2363_v34 = vpop.f32.mrb[6].mxu1 }
 0x103   :  { %v1029_v35 = vsel %vm442_vm0, %v964_v29, 0.0  ;;  %v833_v36 = vsel %vm442_vm0, %v2361_v33, 0.0  ;;  %v965_v37 = vmul.f32 %v2361_v33, %v2361_v33  ;;  %v586_v38 = vpop.f32.mrb[7].mxu0  ;;  %v714_v39 = vpop.f32.mrb[7].mxu1 }
 0x104   :  { %v1030_v40 = vadd.f32 %v1029_v35, %v1028_v25  ;;  %v834_v41 = vadd.f32 %v833_v36, %v832_v32 }
 0x105   :  { %v1031_v42 = vsel %vm442_vm0, %v965_v37, 0.0 }
 0x106   :  { %v1032_v43 = vadd.f32 %v1031_v42, %v1030_v40 }
 0x108   :  { %v2371_v44 = vpop.f32.mrb[8].mxu0  ;;  %v2373_v45 = vpop.f32.mrb[8].mxu1 }
 0x109   :  { %v835_v46 = vsel %vm442_vm0, %v2371_v44, 0.0  ;;  %v966_v47 = vmul.f32 %v2371_v44, %v2371_v44  ;;  %v591_v48 = vpop.f32.mrb[9].mxu0  ;;  %v719_v49 = vpop.f32.mrb[9].mxu1 }
 0x10a   :  { %v836_v50 = vadd.f32 %v835_v46, %v834_v41  ;;  %v2379_v51 = vpop.f32.mrb[10].mxu0  ;;  %v2381_v52 = vpop.f32.mrb[10].mxu1 }
 0x10b   :  { %v1033_v53 = vsel %vm442_vm0, %v966_v47, 0.0  ;;  %v837_v54 = vsel %vm442_vm0, %v2379_v51, 0.0  ;;  %v967_v55 = vmul.f32 %v2379_v51, %v2379_v51  ;;  %v594_v56 = vpop.f32.mrb[11].mxu0  ;;  %v722_v57 = vpop.f32.mrb[11].mxu1 }
 0x10c   :  { %v1034_v58 = vadd.f32 %v1033_v53, %v1032_v43  ;;  %v838_v59 = vadd.f32 %v837_v54, %v836_v50 }
 0x10d   :  { %v1035_v60 = vsel %vm442_vm0, %v967_v55, 0.0 }
 0x10e   :  { %v1036_v61 = vadd.f32 %v1035_v60, %v1034_v58 }
 0x110   :  { %v2389_v62 = vpop.f32.mrb[12].mxu0  ;;  %v2391_v63 = vpop.f32.mrb[12].mxu1 }
 0x111   :  { %v839_v0 = vsel %vm442_vm0, %v2389_v62, 0.0  ;;  %v968_v1 = vmul.f32 %v2389_v62, %v2389_v62  ;;  %v599_v2 = vpop.f32.mrb[13].mxu0  ;;  %v727_v3 = vpop.f32.mrb[13].mxu1 }
 0x112   :  { %v840_v4 = vadd.f32 %v839_v0, %v838_v59  ;;  %v2397_v5 = vpop.f32.mrb[14].mxu0  ;;  %v2399_v6 = vpop.f32.mrb[14].mxu1 }
 0x113   :  { %v1037_v7 = vsel %vm442_vm0, %v968_v1, 0.0  ;;  %v841_v8 = vsel %vm442_vm0, %v2397_v5, 0.0  ;;  %v969_v9 = vmul.f32 %v2397_v5, %v2397_v5  ;;  %v602_v12 = vpop.f32.mrb[15].mxu0  ;;  %v730_v13 = vpop.f32.mrb[15].mxu1 }
 0x114   :  { %v1038_v14 = vadd.f32 %v1037_v7, %v1036_v61  ;;  %v842_v17 = vadd.f32 %v841_v8, %v840_v4 }
 0x115   :  { %v1039_v18 = vsel %vm442_vm0, %v969_v9, 0.0 }
 0x116   :  { %v1040_v19 = vadd.f32 %v1039_v18, %v1038_v14 }
 0x118   :  { %v2407_v20 = vpop.f32.mrb[16].mxu0  ;;  %v2409_v21 = vpop.f32.mrb[16].mxu1 }
 0x119   :  { %v843_v22 = vsel %vm442_vm0, %v2407_v20, 0.0  ;;  %v970_v23 = vmul.f32 %v2407_v20, %v2407_v20  ;;  %v607_v24 = vpop.f32.mrb[17].mxu0  ;;  %v735_v25 = vpop.f32.mrb[17].mxu1 }
 0x11a   :  { %v844_v28 = vadd.f32 %v843_v22, %v842_v17  ;;  %v2415_v29 = vpop.f32.mrb[18].mxu0  ;;  %v2417_v30 = vpop.f32.mrb[18].mxu1 }
 0x11b   :  { %v1041_v31 = vsel %vm442_vm0, %v970_v23, 0.0  ;;  %v845_v32 = vsel %vm442_vm0, %v2415_v29, 0.0  ;;  %v971_v35 = vmul.f32 %v2415_v29, %v2415_v29  ;;  %v610_v36 = vpop.f32.mrb[19].mxu0  ;;  %v738_v37 = vpop.f32.mrb[19].mxu1 }
 0x11c   :  { %v1042_v38 = vadd.f32 %v1041_v31, %v1040_v19  ;;  %v846_v39 = vadd.f32 %v845_v32, %v844_v28 }
 0x11d   :  { %v1043_v40 = vsel %vm442_vm0, %v971_v35, 0.0 }
 0x11e   :  { %v1044_v41 = vadd.f32 %v1043_v40, %v1042_v38 }
 0x120   :  { %v2425_v42 = vpop.f32.mrb[20].mxu0  ;;  %v2427_v43 = vpop.f32.mrb[20].mxu1 }
 0x121   :  { %v847_v46 = vsel %vm442_vm0, %v2425_v42, 0.0  ;;  %v972_v47 = vmul.f32 %v2425_v42, %v2425_v42  ;;  %v615_v48 = vpop.f32.mrb[21].mxu0  ;;  %v743_v49 = vpop.f32.mrb[21].mxu1 }
 0x122   :  { %v848_v50 = vadd.f32 %v847_v46, %v846_v39  ;;  %v2433_v53 = vpop.f32.mrb[22].mxu0  ;;  %v2435_v54 = vpop.f32.mrb[22].mxu1 }
 0x123   :  { %v1045_v55 = vsel %vm442_vm0, %v972_v47, 0.0  ;;  %v849_v56 = vsel %vm442_vm0, %v2433_v53, 0.0  ;;  %v973_v57 = vmul.f32 %v2433_v53, %v2433_v53  ;;  %v618_v58 = vpop.f32.mrb[23].mxu0  ;;  %v746_v59 = vpop.f32.mrb[23].mxu1 }
 0x124   :  { %v1046_v60 = vadd.f32 %v1045_v55, %v1044_v41  ;;  %v850_v61 = vadd.f32 %v849_v56, %v848_v50 }
 0x125   :  { %v1047_v0 = vsel %vm442_vm0, %v973_v57, 0.0 }
 0x126   :  { %v1048_v1 = vadd.f32 %v1047_v0, %v1046_v60 }
 0x128   :  { %v2443_v2 = vpop.f32.mrb[24].mxu0  ;;  %v2445_v3 = vpop.f32.mrb[24].mxu1 }
 0x129   :  { %v851_v4 = vsel %vm442_vm0, %v2443_v2, 0.0  ;;  %v974_v7 = vmul.f32 %v2443_v2, %v2443_v2  ;;  %v623_v8 = vpop.f32.mrb[25].mxu0  ;;  %v751_v9 = vpop.f32.mrb[25].mxu1 }
 0x12a   :  { %v852_v12 = vadd.f32 %v851_v4, %v850_v61  ;;  %v2451_v13 = vpop.f32.mrb[26].mxu0  ;;  %v2453_v14 = vpop.f32.mrb[26].mxu1 }
 0x12b   :  { %v1049_v17 = vsel %vm442_vm0, %v974_v7, 0.0  ;;  %v853_v18 = vsel %vm442_vm0, %v2451_v13, 0.0  ;;  %v975_v19 = vmul.f32 %v2451_v13, %v2451_v13  ;;  %v626_v22 = vpop.f32.mrb[27].mxu0  ;;  %v754_v23 = vpop.f32.mrb[27].mxu1 }
 0x12c   :  { %v1050_v24 = vadd.f32 %v1049_v17, %v1048_v1  ;;  %v854_v25 = vadd.f32 %v853_v18, %v852_v12 }
 0x12d   :  { %v1051_v28 = vsel %vm442_vm0, %v975_v19, 0.0 }
 0x12e   :  { %v1052_v31 = vadd.f32 %v1051_v28, %v1050_v24 }
 0x130   :  { %v2461_v32 = vpop.f32.mrb[28].mxu0  ;;  %v2463_v35 = vpop.f32.mrb[28].mxu1 }
 0x131   :  { %3880 = vst [vmem:[#allocation2_spill] sm:$0xff] %v2461_v32  ;;  %v855_v36 = vsel %vm442_vm0, %v2461_v32, 0.0  ;;  %v976_v37 = vmul.f32 %v2461_v32, %v2461_v32  ;;  %v631_v38 = vpop.f32.mrb[29].mxu0  ;;  %v759_v39 = vpop.f32.mrb[29].mxu1  ;;  %v893_v32 = vsel %vm442_vm0, %v2343_v16, 0.0 }
 0x132   :  { %v856_v40 = vadd.f32 %v855_v36, %v854_v25  ;;  %v2469_v41 = vpop.f32.mrb[30].mxu0  ;;  %v2471_v46 = vpop.f32.mrb[30].mxu1 }
 0x133   :  { %3881 = vst [vmem:[#allocation3_spill] sm:$0xff] %v2469_v41  ;;  %v1053_v47 = vsel %vm442_vm0, %v976_v37, 0.0  ;;  %v857_v48 = vsel %vm442_vm0, %v2469_v41, 0.0  ;;  %v977_v49 = vmul.f32 %v2469_v41, %v2469_v41  ;;  %v634_v50 = vpop.f32.mrb[31].mxu0  ;;  %v762_v55 = vpop.f32.mrb[31].mxu1 }
 0x134   :  { %v1054_v56 = vadd.f32 %v1053_v47, %v1052_v31  ;;  %v858_v57 = vadd.f32 %v857_v48, %v856_v40 }
 0x135   :  { %v1055_v58 = vsel %vm442_vm0, %v977_v49, 0.0 }
 0x136   :  { %v1056_v59 = vadd.f32 %v1055_v58, %v1054_v56 }
 0x138   :  { %v2479_v60 = vpop.f32.mrb[32].mxu0  ;;  %v2481_v61 = vpop.f32.mrb[32].mxu1 }
 0x139   :  { %3882 = vst [vmem:[#allocation4_spill] sm:$0xff] %v2479_v60  ;;  %v859_v0 = vsel %vm442_vm0, %v2479_v60, 0.0  ;;  %v978_v1 = vmul.f32 %v2479_v60, %v2479_v60  ;;  %v639_v4 = vpop.f32.mrb[33].mxu0  ;;  %v767_v7 = vpop.f32.mrb[33].mxu1 }
 0x13a   :  { %v860_v8 = vadd.f32 %v859_v0, %v858_v57  ;;  %v2487_v9 = vpop.f32.mrb[34].mxu0  ;;  %v2489_v12 = vpop.f32.mrb[34].mxu1 }
 0x13b   :  { %3883 = vst [vmem:[#allocation5_spill] sm:$0xff] %v2487_v9  ;;  %v1057_v17 = vsel %vm442_vm0, %v978_v1, 0.0  ;;  %v861_v18 = vsel %vm442_vm0, %v2487_v9, 0.0  ;;  %v979_v19 = vmul.f32 %v2487_v9, %v2487_v9  ;;  %v642_v22 = vpop.f32.mrb[35].mxu0  ;;  %v770_v23 = vpop.f32.mrb[35].mxu1 }
 0x13c   :  { %v1058_v24 = vadd.f32 %v1057_v17, %v1056_v59  ;;  %v862_v25 = vadd.f32 %v861_v18, %v860_v8 }
 0x13d   :  { %v1059_v28 = vsel %vm442_vm0, %v979_v19, 0.0 }
 0x13e   :  { %v1060_v31 = vadd.f32 %v1059_v28, %v1058_v24 }
 0x140   :  { %v2497_v36 = vpop.f32.mrb[36].mxu0  ;;  %v2499_v37 = vpop.f32.mrb[36].mxu1 }
 0x141   :  { %3884 = vst [vmem:[#allocation6_spill] sm:$0xff] %v2497_v36  ;;  %v863_v38 = vsel %vm442_vm0, %v2497_v36, 0.0  ;;  %v980_v39 = vmul.f32 %v2497_v36, %v2497_v36  ;;  %v647_v40 = vpop.f32.mrb[37].mxu0  ;;  %v775_v47 = vpop.f32.mrb[37].mxu1 }
 0x142   :  { %v864_v48 = vadd.f32 %v863_v38, %v862_v25  ;;  %v2505_v49 = vpop.f32.mrb[38].mxu0  ;;  %v2507_v50 = vpop.f32.mrb[38].mxu1 }
 0x143   :  { %3885 = vst [vmem:[#allocation7_spill] sm:$0xff] %v2505_v49  ;;  %v1061_v55 = vsel %vm442_vm0, %v980_v39, 0.0  ;;  %v865_v56 = vsel %vm442_vm0, %v2505_v49, 0.0  ;;  %v981_v57 = vmul.f32 %v2505_v49, %v2505_v49  ;;  %v650_v58 = vpop.f32.mrb[39].mxu0  ;;  %v778_v59 = vpop.f32.mrb[39].mxu1 }
 0x144   :  { %v1062_v0 = vadd.f32 %v1061_v55, %v1060_v31  ;;  %v866_v1 = vadd.f32 %v865_v56, %v864_v48 }
 0x145   :  { %v1063_v4 = vsel %vm442_vm0, %v981_v57, 0.0 }
 0x146   :  { %v1064_v7 = vadd.f32 %v1063_v4, %v1062_v0 }
 0x148   :  { %v2515_v8 = vpop.f32.mrb[40].mxu0  ;;  %v2517_v17 = vpop.f32.mrb[40].mxu1 }
 0x149   :  { %3886 = vst [vmem:[#allocation8_spill] sm:$0xff] %v2515_v8  ;;  %v867_v18 = vsel %vm442_vm0, %v2515_v8, 0.0  ;;  %v982_v19 = vmul.f32 %v2515_v8, %v2515_v8  ;;  %v655_v22 = vpop.f32.mrb[41].mxu0  ;;  %v783_v23 = vpop.f32.mrb[41].mxu1 }
 0x14a   :  { %v868_v24 = vadd.f32 %v867_v18, %v866_v1  ;;  %v2523_v25 = vpop.f32.mrb[42].mxu0  ;;  %v2525_v28 = vpop.f32.mrb[42].mxu1 }
 0x14b   :  { %3887 = vst [vmem:[#allocation9_spill] sm:$0xff] %v2523_v25  ;;  %v1065_v31 = vsel %vm442_vm0, %v982_v19, 0.0  ;;  %v869_v38 = vsel %vm442_vm0, %v2523_v25, 0.0  ;;  %v983_v39 = vmul.f32 %v2523_v25, %v2523_v25  ;;  %v658_v40 = vpop.f32.mrb[43].mxu0  ;;  %v786_v47 = vpop.f32.mrb[43].mxu1 }
 0x14c   :  { %v1066_v48 = vadd.f32 %v1065_v31, %v1064_v7  ;;  %v870_v55 = vadd.f32 %v869_v38, %v868_v24 }
 0x14d   :  { %v1067_v56 = vsel %vm442_vm0, %v983_v39, 0.0 }
 0x14e   :  { %v1068_v57 = vadd.f32 %v1067_v56, %v1066_v48 }
 0x150   :  { %v2533_v58 = vpop.f32.mrb[44].mxu0  ;;  %v2535_v59 = vpop.f32.mrb[44].mxu1 }
 0x151   :  { %3888 = vst [vmem:[#allocation10_spill] sm:$0xff] %v2533_v58  ;;  %v871_v0 = vsel %vm442_vm0, %v2533_v58, 0.0  ;;  %v984_v1 = vmul.f32 %v2533_v58, %v2533_v58  ;;  %v663_v4 = vpop.f32.mrb[45].mxu0  ;;  %v791_v18 = vpop.f32.mrb[45].mxu1 }
 0x152   :  { %v872_v19 = vadd.f32 %v871_v0, %v870_v55  ;;  %v2541_v22 = vpop.f32.mrb[46].mxu0  ;;  %v2543_v7 = vpop.f32.mrb[46].mxu1 }
 0x153   :  { %3889 = vst [vmem:[#allocation11_spill] sm:$0xff] %v2541_v22  ;;  %v1069_v23 = vsel %vm442_vm0, %v984_v1, 0.0  ;;  %v873_v24 = vsel %vm442_vm0, %v2541_v22, 0.0  ;;  %v985_v31 = vmul.f32 %v2541_v22, %v2541_v22  ;;  %v666_v38 = vpop.f32.mrb[47].mxu0  ;;  %v794_v39 = vpop.f32.mrb[47].mxu1 }
 0x154   :  { %v1070_v40 = vadd.f32 %v1069_v23, %v1068_v57  ;;  %v874_v47 = vadd.f32 %v873_v24, %v872_v19 }
 0x155   :  { %v1071_v48 = vsel %vm442_vm0, %v985_v31, 0.0 }
 0x156   :  { %v1072_v56 = vadd.f32 %v1071_v48, %v1070_v40 }
 0x158   :  { %v2551_v55 = vpop.f32.mrb[48].mxu0  ;;  %v2553_v0 = vpop.f32.mrb[48].mxu1 }
 0x159   :  { %3890 = vst [vmem:[#allocation12_spill] sm:$0xff] %v2551_v55  ;;  %v875_v1 = vsel %vm442_vm0, %v2551_v55, 0.0  ;;  %v986_v4 = vmul.f32 %v2551_v55, %v2551_v55  ;;  %v671_v18 = vpop.f32.mrb[49].mxu0  ;;  %v799_v58 = vpop.f32.mrb[49].mxu1 }
 0x15a   :  { %v876_v22 = vadd.f32 %v875_v1, %v874_v47  ;;  %v2559_v38 = vpop.f32.mrb[50].mxu0  ;;  %v2561_v57 = vpop.f32.mrb[50].mxu1 }
 0x15b   :  { %3891 = vst [vmem:[#allocation13_spill] sm:$0xff] %v2559_v38  ;;  %3892 = vst [vmem:[#allocation14_spill] sm:$0xff] %v2561_v57  ;;  %v1073_v19 = vsel %vm442_vm0, %v986_v4, 0.0  ;;  %v877_v23 = vsel %vm442_vm0, %v2559_v38, 0.0  ;;  %v987_v24 = vmul.f32 %v2559_v38, %v2559_v38  ;;  %v674_v31 = vpop.f32.mrb[51].mxu0  ;;  %v802_v39 = vpop.f32.mrb[51].mxu1 }
 0x15c   :  { %v1074_v40 = vadd.f32 %v1073_v19, %v1072_v56  ;;  %v878_v48 = vadd.f32 %v877_v23, %v876_v22 }
 0x15d   :  { %v1075_v18 = vsel %vm442_vm0, %v987_v24, 0.0 }
 0x15e   :  { %v1076_v58 = vadd.f32 %v1075_v18, %v1074_v40 }
 0x160   :  { %v2569_v47 = vpop.f32.mrb[52].mxu0  ;;  %v2571_v1 = vpop.f32.mrb[52].mxu1 }
 0x161   :  { %3893 = vst [vmem:[#allocation15_spill] sm:$0xff] %v2569_v47  ;;  %3894 = vst [vmem:[#allocation16_spill] sm:$0xff] %v2571_v1  ;;  %v879_v4 = vsel %vm442_vm0, %v2569_v47, 0.0  ;;  %v988_v55 = vmul.f32 %v2569_v47, %v2569_v47  ;;  %v679_v25 = vpop.f32.mrb[53].mxu0  ;;  %v807_v8 = vpop.f32.mrb[53].mxu1 }
 0x162   :  { %v880_v38 = vadd.f32 %v879_v4, %v878_v48  ;;  %v2577_v31 = vpop.f32.mrb[54].mxu0  ;;  %v2579_v56 = vpop.f32.mrb[54].mxu1 }
 0x163   :  { %3895 = vst [vmem:[#allocation17_spill] sm:$0xff] %v2577_v31  ;;  %3896 = vst [vmem:[#allocation18_spill] sm:$0xff] %v2579_v56  ;;  %v1077_v22 = vsel %vm442_vm0, %v988_v55, 0.0  ;;  %v881_v19 = vsel %vm442_vm0, %v2577_v31, 0.0  ;;  %v989_v23 = vmul.f32 %v2577_v31, %v2577_v31  ;;  %v682_v24 = vpop.f32.mrb[55].mxu0  ;;  %v810_v39 = vpop.f32.mrb[55].mxu1 }
 0x164   :  { %v1078_v40 = vadd.f32 %v1077_v22, %v1076_v58  ;;  %v882_v18 = vadd.f32 %v881_v19, %v880_v38 }
 0x165   :  { %v1079_v25 = vsel %vm442_vm0, %v989_v23, 0.0 }
 0x166   :  { %v1080_v8 = vadd.f32 %v1079_v25, %v1078_v40 }
 0x168   :  { %v2587_v48 = vpop.f32.mrb[56].mxu0  ;;  %v2589_v4 = vpop.f32.mrb[56].mxu1 }
 0x169   :  { %3897 = vst [vmem:[#allocation19_spill] sm:$0xff] %v2587_v48  ;;  %3898 = vst [vmem:[#allocation20_spill] sm:$0xff] %v2589_v4  ;;  %v883_v55 = vsel %vm442_vm0, %v2587_v48, 0.0  ;;  %v990_v47 = vmul.f32 %v2587_v48, %v2587_v48  ;;  %v687_v49 = vpop.f32.mrb[57].mxu0  ;;  %v815_v36 = vpop.f32.mrb[57].mxu1 }
 0x16a   :  { %v884_v31 = vadd.f32 %v883_v55, %v882_v18  ;;  %v2595_v24 = vpop.f32.mrb[58].mxu0  ;;  %v2597_v58 = vpop.f32.mrb[58].mxu1 }
 0x16b   :  { %3899 = vst [vmem:[#allocation21_spill] sm:$0xff] %v2595_v24  ;;  %3900 = vst [vmem:[#allocation22_spill] sm:$0xff] %v2597_v58  ;;  %v1081_v38 = vsel %vm442_vm0, %v990_v47, 0.0  ;;  %v885_v22 = vsel %vm442_vm0, %v2595_v24, 0.0  ;;  %v991_v19 = vmul.f32 %v2595_v24, %v2595_v24  ;;  %v690_v23 = vpop.f32.mrb[59].mxu0  ;;  %v818_v39 = vpop.f32.mrb[59].mxu1 }
 0x16c   :  { %v1082_v40 = vadd.f32 %v1081_v38, %v1080_v8  ;;  %v886_v25 = vadd.f32 %v885_v22, %v884_v31  ;;  %v994_v31 = vmul.f32 %v2337_v11, %v2337_v11 }
 0x16d   :  { %v1083_v49 = vsel %vm442_vm0, %v991_v19, 0.0 }
 0x16e   :  { %v1084_v36 = vadd.f32 %v1083_v49, %v1082_v40  ;;  %v995_v49 = vmul.f32 %v2343_v16, %v2343_v16  ;;  %v1089_v41 = vsel %vm442_vm0, %v994_v31, 0.0 }
 0x170   :  { %v2605_v18 = vpop.f32.mrb[60].mxu0  ;;  %v2607_v55 = vpop.f32.mrb[60].mxu1 }
 0x171   :  { %3901 = vst [vmem:[#allocation23_spill] sm:$0xff] %v2605_v18  ;;  %3902 = vst [vmem:[#allocation24_spill] sm:$0xff] %v2607_v55  ;;  %v887_v47 = vsel %vm442_vm0, %v2605_v18, 0.0  ;;  %v992_v48 = vmul.f32 %v2605_v18, %v2605_v18  ;;  %v695_v9 = vpop.f32.mrb[61].mxu0  ;;  %v823_v60 = vpop.f32.mrb[61].mxu1 }
 0x172   :  { %v888_v24 = vadd.f32 %v887_v47, %v886_v25  ;;  %v2613_v23 = vpop.f32.mrb[62].mxu0  ;;  %v2615_v8 = vpop.f32.mrb[62].mxu1  ;;  %v891_v25 = vsel %vm442_vm0, %v2337_v11, 0.0 }
 0x173   :  { %3903 = vst [vmem:[#allocation25_spill] sm:$0xff] %v2615_v8  ;;  %v1085_v38 = vsel %vm442_vm0, %v992_v48, 0.0  ;;  %v889_v22 = vsel %vm442_vm0, %v2613_v23, 0.0  ;;  %v993_v19 = vmul.f32 %v2613_v23, %v2613_v23  ;;  %v698_v39 = vpop.f32.mrb[63].mxu0  ;;  %v826_v40 = vpop.f32.mrb[63].mxu1 }
 0x174   :  { %v1086_v9 = vadd.f32 %v1085_v38, %v1084_v36  ;;  %v890_v60 = vadd.f32 %v889_v22, %v888_v24  ;;  %v996_v39 = vmul.f32 %v2355_v27, %v2355_v27  ;;  %v1091_v38 = vsel %vm442_vm0, %v995_v49, 0.0 }
 0x175   :  { %v1087_v47 = vsel %vm442_vm0, %v993_v19, 0.0  ;;  %v895_v22 = vsel %vm442_vm0, %v2355_v27, 0.0  ;;  %v997_v19 = vmul.f32 %v2363_v34, %v2363_v34  ;;  %v899_v49 = vsel %vm442_vm0, %v2373_v45, 0.0 }
 0x176   :  { %v892_v18 = vadd.f32 %v891_v25, %v890_v60  ;;  %v1088_v48 = vadd.f32 %v1087_v47, %v1086_v9  ;;  %v1093_v31 = vsel %vm442_vm0, %v996_v39, 0.0  ;;  %v897_v60 = vsel %vm442_vm0, %v2363_v34, 0.0 }
 0x177   :  { %v998_v25 = vmul.f32 %v2373_v45, %v2373_v45  ;;  %v999_v47 = vmul.f32 %v2381_v52, %v2381_v52 }
 0x178   :  { %v894_v36 = vadd.f32 %v893_v32, %v892_v18  ;;  %v1090_v24 = vadd.f32 %v1089_v41, %v1088_v48  ;;  %v1095_v18 = vsel %vm442_vm0, %v997_v19, 0.0 }
 0x179   :  { %v1097_v39 = vsel %vm442_vm0, %v998_v25, 0.0  ;;  %v1099_v19 = vsel %vm442_vm0, %v999_v47, 0.0 }
 0x17a   :  { %v896_v40 = vadd.f32 %v895_v22, %v894_v36  ;;  %v1092_v9 = vadd.f32 %v1091_v38, %v1090_v24  ;;  %v901_v24 = vsel %vm442_vm0, %v2381_v52, 0.0  ;;  %v1000_v38 = vmul.f32 %v2391_v63, %v2391_v63 }
 0x17c   :  { %v898_v32 = vadd.f32 %v897_v60, %v896_v40  ;;  %v1094_v41 = vadd.f32 %v1093_v31, %v1092_v9  ;;  %v903_v9 = vsel %vm442_vm0, %v2391_v63, 0.0  ;;  %v1001_v31 = vmul.f32 %v2399_v6, %v2399_v6 }
 0x17d   :  { %v1101_v25 = vsel %vm442_vm0, %v1000_v38, 0.0 }
 0x17e   :  { %v900_v48 = vadd.f32 %v899_v49, %v898_v32  ;;  %v1096_v36 = vadd.f32 %v1095_v18, %v1094_v41  ;;  %v905_v41 = vsel %vm442_vm0, %v2399_v6, 0.0  ;;  %v1002_v18 = vmul.f32 %v2409_v21, %v2409_v21 }
 0x17f   :  { %v1103_v47 = vsel %vm442_vm0, %v1001_v31, 0.0 }
 0x180   :  { %v902_v22 = vadd.f32 %v901_v24, %v900_v48  ;;  %v1098_v40 = vadd.f32 %v1097_v39, %v1096_v36  ;;  %v907_v36 = vsel %vm442_vm0, %v2409_v21, 0.0  ;;  %v1003_v39 = vmul.f32 %v2417_v30, %v2417_v30 }
 0x181   :  { %v1105_v38 = vsel %vm442_vm0, %v1002_v18, 0.0 }
 0x182   :  { %v904_v60 = vadd.f32 %v903_v9, %v902_v22  ;;  %v1100_v32 = vadd.f32 %v1099_v19, %v1098_v40  ;;  %v909_v40 = vsel %vm442_vm0, %v2417_v30, 0.0  ;;  %v1004_v19 = vmul.f32 %v2427_v43, %v2427_v43 }
 0x183   :  { %v1107_v31 = vsel %vm442_vm0, %v1003_v39, 0.0 }
 0x184   :  { %v906_v49 = vadd.f32 %v905_v41, %v904_v60  ;;  %v1102_v48 = vadd.f32 %v1101_v25, %v1100_v32  ;;  %v911_v32 = vsel %vm442_vm0, %v2427_v43, 0.0  ;;  %v1005_v25 = vmul.f32 %v2435_v54, %v2435_v54 }
 0x185   :  { %v1109_v18 = vsel %vm442_vm0, %v1004_v19, 0.0 }
 0x186   :  { %v1104_v24 = vadd.f32 %v1103_v47, %v1102_v48  ;;  %v908_v22 = vadd.f32 %v907_v36, %v906_v49  ;;  %v913_v48 = vsel %vm442_vm0, %v2435_v54, 0.0  ;;  %v1006_v47 = vmul.f32 %v2445_v3, %v2445_v3 }
 0x187   :  { %v1111_v39 = vsel %vm442_vm0, %v1005_v25, 0.0 }
 0x188   :  { %v910_v9 = vadd.f32 %v909_v40, %v908_v22  ;;  %v1106_v60 = vadd.f32 %v1105_v38, %v1104_v24  ;;  %v915_v22 = vsel %vm442_vm0, %v2445_v3, 0.0  ;;  %v1007_v38 = vmul.f32 %v2453_v14, %v2453_v14 }
 0x189   :  { %v1113_v19 = vsel %vm442_vm0, %v1006_v47, 0.0 }
 0x18a   :  { %v912_v41 = vadd.f32 %v911_v32, %v910_v9  ;;  %v1108_v49 = vadd.f32 %v1107_v31, %v1106_v60  ;;  %v917_v60 = vsel %vm442_vm0, %v2453_v14, 0.0  ;;  %v1008_v31 = vmul.f32 %v2463_v35, %v2463_v35 }
 0x18b   :  { %v1115_v25 = vsel %vm442_vm0, %v1007_v38, 0.0 }
 0x18c   :  { %v914_v36 = vadd.f32 %v913_v48, %v912_v41  ;;  %v1110_v24 = vadd.f32 %v1109_v18, %v1108_v49  ;;  %v919_v49 = vsel %vm442_vm0, %v2463_v35, 0.0  ;;  %v1009_v18 = vmul.f32 %v2471_v46, %v2471_v46 }
 0x18d   :  { %v1117_v47 = vsel %vm442_vm0, %v1008_v31, 0.0 }
 0x18e   :  { %v916_v40 = vadd.f32 %v915_v22, %v914_v36  ;;  %v1112_v9 = vadd.f32 %v1111_v39, %v1110_v24  ;;  %v921_v24 = vsel %vm442_vm0, %v2471_v46, 0.0  ;;  %v1010_v39 = vmul.f32 %v2481_v61, %v2481_v61 }
 0x18f   :  { %v1119_v38 = vsel %vm442_vm0, %v1009_v18, 0.0 }
 0x190   :  { %v918_v32 = vadd.f32 %v917_v60, %v916_v40  ;;  %v1114_v41 = vadd.f32 %v1113_v19, %v1112_v9  ;;  %v923_v9 = vsel %vm442_vm0, %v2481_v61, 0.0  ;;  %v1011_v19 = vmul.f32 %v2489_v12, %v2489_v12 }
 0x191   :  { %v1121_v31 = vsel %vm442_vm0, %v1010_v39, 0.0 }
 0x192   :  { %v920_v48 = vadd.f32 %v919_v49, %v918_v32  ;;  %v1116_v36 = vadd.f32 %v1115_v25, %v1114_v41  ;;  %v925_v41 = vsel %vm442_vm0, %v2489_v12, 0.0  ;;  %v1012_v25 = vmul.f32 %v2499_v37, %v2499_v37 }
 0x193   :  { %v1123_v18 = vsel %vm442_vm0, %v1011_v19, 0.0 }
 0x194   :  { %v922_v22 = vadd.f32 %v921_v24, %v920_v48  ;;  %v1118_v40 = vadd.f32 %v1117_v47, %v1116_v36  ;;  %v927_v36 = vsel %vm442_vm0, %v2499_v37, 0.0  ;;  %v1013_v47 = vmul.f32 %v2507_v50, %v2507_v50 }
 0x195   :  { %v1125_v39 = vsel %vm442_vm0, %v1012_v25, 0.0 }
 0x196   :  { %v924_v60 = vadd.f32 %v923_v9, %v922_v22  ;;  %v1120_v32 = vadd.f32 %v1119_v38, %v1118_v40  ;;  %v929_v40 = vsel %vm442_vm0, %v2507_v50, 0.0  ;;  %v1014_v38 = vmul.f32 %v2517_v17, %v2517_v17 }
 0x197   :  { %v1127_v19 = vsel %vm442_vm0, %v1013_v47, 0.0 }
 0x198   :  { %v1122_v49 = vadd.f32 %v1121_v31, %v1120_v32  ;;  %v926_v48 = vadd.f32 %v925_v41, %v924_v60  ;;  %v931_v32 = vsel %vm442_vm0, %v2517_v17, 0.0  ;;  %v1015_v31 = vmul.f32 %v2525_v28, %v2525_v28 }
 0x199   :  { %v1129_v25 = vsel %vm442_vm0, %v1014_v38, 0.0 }
 0x19a   :  { %v1124_v24 = vadd.f32 %v1123_v18, %v1122_v49  ;;  %v928_v22 = vadd.f32 %v927_v36, %v926_v48  ;;  %v933_v48 = vsel %vm442_vm0, %v2525_v28, 0.0  ;;  %v1016_v18 = vmul.f32 %v2535_v59, %v2535_v59 }
 0x19b   :  { %v1131_v47 = vsel %vm442_vm0, %v1015_v31, 0.0 }
 0x19c   :  { %v1126_v9 = vadd.f32 %v1125_v39, %v1124_v24  ;;  %v930_v60 = vadd.f32 %v929_v40, %v928_v22  ;;  %v935_v22 = vsel %vm442_vm0, %v2535_v59, 0.0  ;;  %v1017_v39 = vmul.f32 %v2543_v7, %v2543_v7 }
 0x19d   :  { %v1133_v38 = vsel %vm442_vm0, %v1016_v18, 0.0 }
 0x19e   :  { %v1128_v41 = vadd.f32 %v1127_v19, %v1126_v9  ;;  %v932_v49 = vadd.f32 %v931_v32, %v930_v60  ;;  %v937_v60 = vsel %vm442_vm0, %v2543_v7, 0.0  ;;  %v1018_v19 = vmul.f32 %v2553_v0, %v2553_v0 }
 0x19f   :  { %v1135_v31 = vsel %vm442_vm0, %v1017_v39, 0.0 }
 0x1a0   :  { %v1130_v36 = vadd.f32 %v1129_v25, %v1128_v41  ;;  %v934_v24 = vadd.f32 %v933_v48, %v932_v49  ;;  %v939_v49 = vsel %vm442_vm0, %v2553_v0, 0.0  ;;  %v1019_v25 = vmul.f32 %v2561_v57, %v2561_v57 }
 0x1a1   :  { %v1137_v18 = vsel %vm442_vm0, %v1018_v19, 0.0 }
 0x1a2   :  { %v1132_v40 = vadd.f32 %v1131_v47, %v1130_v36  ;;  %v936_v9 = vadd.f32 %v935_v22, %v934_v24  ;;  %v941_v24 = vsel %vm442_vm0, %v2561_v57, 0.0  ;;  %v1020_v47 = vmul.f32 %v2571_v1, %v2571_v1 }
 0x1a3   :  { %v1139_v39 = vsel %vm442_vm0, %v1019_v25, 0.0 }
 0x1a4   :  { %v1134_v32 = vadd.f32 %v1133_v38, %v1132_v40  ;;  %v938_v41 = vadd.f32 %v937_v60, %v936_v9  ;;  %v943_v9 = vsel %vm442_vm0, %v2571_v1, 0.0  ;;  %v1021_v38 = vmul.f32 %v2579_v56, %v2579_v56 }
 0x1a5   :  { %v1141_v19 = vsel %vm442_vm0, %v1020_v47, 0.0 }
 0x1a6   :  { %v1136_v48 = vadd.f32 %v1135_v31, %v1134_v32  ;;  %v940_v36 = vadd.f32 %v939_v49, %v938_v41  ;;  %v945_v41 = vsel %vm442_vm0, %v2579_v56, 0.0  ;;  %v1022_v31 = vmul.f32 %v2589_v4, %v2589_v4 }
 0x1a7   :  { %v1143_v25 = vsel %vm442_vm0, %v1021_v38, 0.0 }
 0x1a8   :  { %v1138_v22 = vadd.f32 %v1137_v18, %v1136_v48  ;;  %v942_v40 = vadd.f32 %v941_v24, %v940_v36  ;;  %v947_v36 = vsel %vm442_vm0, %v2589_v4, 0.0  ;;  %v1023_v18 = vmul.f32 %v2597_v58, %v2597_v58 }
 0x1a9   :  { %v1024_v24 = vmul.f32 %v2607_v55, %v2607_v55 }
 0x1aa   :  { %v1140_v60 = vadd.f32 %v1139_v39, %v1138_v22  ;;  %v944_v32 = vadd.f32 %v943_v9, %v942_v40  ;;  %v1145_v40 = vsel %vm442_vm0, %v1022_v31, 0.0  ;;  %v949_v39 = vsel %vm442_vm0, %v2597_v58, 0.0 }
 0x1ab   :  { %v951_v9 = vsel %vm442_vm0, %v2607_v55, 0.0  ;;  %v953_v31 = vsel %vm442_vm0, %v2615_v8, 0.0 }
 0x1ac   :  { %v1142_v49 = vadd.f32 %v1141_v19, %v1140_v60  ;;  %v946_v48 = vadd.f32 %v945_v41, %v944_v32  ;;  %v1147_v32 = vsel %vm442_vm0, %v1023_v18, 0.0  ;;  %v1149_v19 = vsel %vm442_vm0, %v1024_v24, 0.0 }
 0x1ad   :  { %v1025_v41 = vmul.f32 %v2615_v8, %v2615_v8 }
 0x1ae   :  { %v1144_v47 = vadd.f32 %v1143_v25, %v1142_v49  ;;  %v948_v22 = vadd.f32 %v947_v36, %v946_v48 }
 0x1af   :  { %v1151_v36 = vsel %vm442_vm0, %v1025_v41, 0.0  ;;  %v1171_v41 = vlaneseq }
 0x1b0   :  { %v1146_v38 = vadd.f32 %v1145_v40, %v1144_v47  ;;  %v950_v60 = vadd.f32 %v949_v39, %v948_v22 }
 0x1b2   :  { %v1148_v4 = vadd.f32 %v1147_v32, %v1146_v38  ;;  %v952_v49 = vadd.f32 %v951_v9, %v950_v60 }
 0x1b4   :  { %v1150_v48 = vadd.f32 %v1149_v19, %v1148_v4  ;;  %v954_v25 = vadd.f32 %v953_v31, %v952_v49  ;;  %v2783_v31 = vshrl.u32 %v1171_v41, 7  ;;  %v3911_v41 = vld [vmem:[#allocation9_spill] sm:$0xff] }
 0x1b6   :  { %v955_v58 = vrot.slane %v954_v25, 4  ;;  %v1152_v55 = vadd.f32 %v1151_v36, %v1150_v48 }
 0x1b8   :  { %v956_v47 = vadd.f32 %v955_v58, %v954_v25  ;;  %v1153_v22 = vrot.slane %v1152_v55, 4  ;;  %v1163_v58 = vld [vmem:[%s3835_s2] sm:$0x1]  ;;  %v3919_v25 = vld [vmem:[#allocation17_spill] sm:$0xff] }
 0x1ba   :  { %v957_v40 = vrot.slane %v956_v47, 2  ;;  %v1154_v18 = vadd.f32 %v1153_v22, %v1152_v55  ;;  %v3862_v55 = vsub.s32 0, %v2783_v31 }
 0x1bc   :  { %v958_v39 = vadd.f32 %v957_v40, %v956_v47  ;;  %v1155_v24 = vrot.slane %v1154_v18, 2 }
 0x1be   :  { %v959_v56 = vrot.slane %v958_v39, 1  ;;  %v1156_v1 = vadd.f32 %v1155_v24, %v1154_v18  ;;  %v3905_v24 = vld [vmem:[#allocation3_spill] sm:$0xff] }
 0x1c0   :  { %v960_v57 = vadd.f32 %v959_v56, %v958_v39  ;;  %v1157_v38 = vrot.slane %v1156_v1, 1  ;;  %v3904_v39 = vld [vmem:[#allocation2_spill] sm:$0xff] }
 0x1c2   :  { %v961_v9 = vmul.f32 0.001953125, %v960_v57  ;;  %v1158_v60 = vadd.f32 %v1157_v38, %v1156_v1  ;;  %v2792_v57 = vld [vmem:[%s3836_s3] sm:$0x1]  ;;  %v3906_v38 = vld [vmem:[#allocation4_spill] sm:$0xff] }
 0x1c4   :  { %v1159_v32 = vmul.f32 0.001953125, %v1158_v60  ;;  %v1160_v8 = vmul.f32 %v961_v9, %v961_v9  ;;  %v3908_v60 = vld [vmem:[#allocation6_spill] sm:$0xff] }
 0x1c6   :  { %v1161_v4 = vsub.f32 %v1159_v32, %v1160_v8  ;;  %v3909_v32 = vld [vmem:[#allocation7_spill] sm:$0xff] }
 0x1c8   :  { %v1162_v19 = vmax.f32 %v1161_v4, 0.0 }
 0x1ca   :  { %v1164_v49 = vadd.f32 1e-05, %v1162_v19  ;;  %v3910_v19 = vld [vmem:[#allocation8_spill] sm:$0xff] }
 0x1cc   :  { %2056 = vrsqrt.f32 %v1164_v49 }
 0x1d6   :  { %v2057_v48 = vpop.eup %2056 }
 0x1d7   :  { %v1166_v56 = vmul.f32 %v2057_v48, %v1163_v58  ;;  %v3912_v48 = vld [vmem:[#allocation10_spill] sm:$0xff] }
 0x1d9   :  { %v2794_v1 = vmul.f32 %v1166_v56, %v961_v9  ;;  %v2798_v8 = vrot.slane %v1166_v56, %v3862_v55  ;;  %v3907_v9 = vld [vmem:[#allocation5_spill] sm:$0xff]  ;;  %v3920_v55 = vld [vmem:[#allocation19_spill] sm:$0xff] }
 0x1db   :  { %v2804_v36 = vmul.f32 %v2798_v8, %v2335_v10  ;;  %v2808_v47 = vmul.f32 %v2798_v8, %v2341_v15  ;;  %v2812_v22 = vmul.f32 %v2798_v8, %v2353_v26  ;;  %v2816_v40 = vmul.f32 %v2798_v8, %v2361_v33 }
 0x1dc   :  { %v2820_v18 = vmul.f32 %v2798_v8, %v2371_v44  ;;  %v2824_v10 = vmul.f32 %v2798_v8, %v2379_v51  ;;  %v2828_v15 = vmul.f32 %v2798_v8, %v2389_v62  ;;  %v2832_v26 = vmul.f32 %v2798_v8, %v2397_v5 }
 0x1dd   :  { %v2836_v33 = vmul.f32 %v2798_v8, %v2407_v20  ;;  %v2840_v44 = vmul.f32 %v2798_v8, %v2415_v29  ;;  %v2844_v51 = vmul.f32 %v2798_v8, %v2425_v42  ;;  %v2848_v62 = vmul.f32 %v2798_v8, %v2433_v53 }
 0x1de   :  { %v2852_v5 = vmul.f32 %v2798_v8, %v2443_v2  ;;  %v2856_v20 = vmul.f32 %v2798_v8, %v2451_v13  ;;  %v2860_v29 = vmul.f32 %v2798_v8, %v3904_v39  ;;  %v2864_v42 = vmul.f32 %v2798_v8, %v3905_v24  ;;  %v3913_v39 = vld [vmem:[#allocation11_spill] sm:$0xff] }
 0x1df   :  { %v2868_v53 = vmul.f32 %v2798_v8, %v3906_v38  ;;  %v2872_v2 = vmul.f32 %v2798_v8, %v3907_v9  ;;  %v2876_v13 = vmul.f32 %v2798_v8, %v3908_v60  ;;  %v2880_v4 = vmul.f32 %v2798_v8, %v3909_v32  ;;  %v3915_v38 = vld [vmem:[#allocation12_spill] sm:$0xff]  ;;  %v3917_v60 = vld [vmem:[#allocation13_spill] sm:$0xff] }
 0x1e0   :  { %v2884_v49 = vmul.f32 %v2798_v8, %v3910_v19  ;;  %v2888_v58 = vmul.f32 %v2798_v8, %v3911_v41  ;;  %v2892_v56 = vmul.f32 %v2798_v8, %v3912_v48  ;;  %v2896_v24 = vmul.f32 %v2798_v8, %v3913_v39  ;;  %v3918_v19 = vld [vmem:[#allocation15_spill] sm:$0xff] }
 0x1e1   :  { %v2900_v9 = vmul.f32 %v2798_v8, %v3915_v38  ;;  %v2904_v32 = vmul.f32 %v2798_v8, %v3917_v60  ;;  %v2908_v41 = vmul.f32 %v2798_v8, %v3918_v19  ;;  %v2912_v48 = vmul.f32 %v2798_v8, %v3919_v25 }
 0x1e2   :  { %3914 = vst [vmem:[#allocation2_spill] sm:$0xff] %v2896_v24  ;;  %v2916_v39 = vmul.f32 %v2798_v8, %v3920_v55  ;;  %v3921_v24 = vld [vmem:[#allocation21_spill] sm:$0xff]  ;;  %v2928_v19 = vmul.f32 %v2798_v8, %v2613_v23  ;;  %v2932_v25 = vmul.f32 %v2798_v8, %v2337_v11  ;;  %v2936_v55 = vmul.f32 %v2798_v8, %v2343_v16 }
 0x1e3   :  { %3916 = vst [vmem:[#allocation3_spill] sm:$0xff] %v2900_v9  ;;  %v2920_v38 = vmul.f32 %v2798_v8, %v3921_v24  ;;  %v3922_v9 = vld [vmem:[#allocation23_spill] sm:$0xff]  ;;  %v2940_v24 = vmul.f32 %v2798_v8, %v2355_v27  ;;  %v2948_v23 = vmul.f32 %v2798_v8, %v2373_v45  ;;  %v2952_v11 = vmul.f32 %v2798_v8, %v2381_v52 }
 0x1e4   :  { %v2924_v60 = vmul.f32 %v2798_v8, %v3922_v9  ;;  %v2944_v9 = vmul.f32 %v2798_v8, %v2363_v34  ;;  %v2956_v16 = vmul.f32 %v2798_v8, %v2391_v63  ;;  %v2960_v27 = vmul.f32 %v2798_v8, %v2399_v6 }
 0x1e5   :  { %v2964_v34 = vmul.f32 %v2798_v8, %v2409_v21  ;;  %v2968_v45 = vmul.f32 %v2798_v8, %v2417_v30  ;;  %v2972_v52 = vmul.f32 %v2798_v8, %v2427_v43  ;;  %v2976_v63 = vmul.f32 %v2798_v8, %v2435_v54 }
 0x1e6   :  { %v2980_v6 = vmul.f32 %v2798_v8, %v2445_v3  ;;  %v2984_v21 = vmul.f32 %v2798_v8, %v2453_v14  ;;  %v2988_v30 = vmul.f32 %v2798_v8, %v2463_v35  ;;  %v2992_v43 = vmul.f32 %v2798_v8, %v2471_v46 }
 0x1e7   :  { %v2996_v54 = vmul.f32 %v2798_v8, %v2481_v61  ;;  %v3000_v3 = vmul.f32 %v2798_v8, %v2489_v12  ;;  %v3004_v14 = vmul.f32 %v2798_v8, %v2499_v37  ;;  %v3008_v35 = vmul.f32 %v2798_v8, %v2507_v50 }
 0x1e8   :  { %v3012_v46 = vmul.f32 %v2798_v8, %v2517_v17  ;;  %v3016_v61 = vmul.f32 %v2798_v8, %v2525_v28  ;;  %v3020_v12 = vmul.f32 %v2798_v8, %v2535_v59  ;;  %v3024_v37 = vmul.f32 %v2798_v8, %v2543_v7 }
 0x1e9   :  { %3923 = vst [vmem:[#allocation4_spill] sm:$0xff] %v3008_v35  ;;  %v3028_v50 = vmul.f32 %v2798_v8, %v2553_v0  ;;  %v3929_v35 = vld [vmem:[#allocation14_spill] sm:$0xff] }
 0x1ea   :  { %3924 = vst [vmem:[#allocation5_spill] sm:$0xff] %v3012_v46  ;;  %3925 = vst [vmem:[#allocation6_spill] sm:$0xff] %v3016_v61  ;;  %v3032_v17 = vmul.f32 %v2798_v8, %v3929_v35  ;;  %v3931_v46 = vld [vmem:[#allocation16_spill] sm:$0xff]  ;;  %v3933_v61 = vld [vmem:[#allocation18_spill] sm:$0xff] }
 0x1eb   :  { %3926 = vst [vmem:[#allocation7_spill] sm:$0xff] %v3020_v12  ;;  %3927 = vst [vmem:[#allocation8_spill] sm:$0xff] %v3024_v37  ;;  %v3036_v28 = vmul.f32 %v2798_v8, %v3931_v46  ;;  %v3040_v59 = vmul.f32 %v2798_v8, %v3933_v61  ;;  %v3935_v12 = vld [vmem:[#allocation20_spill] sm:$0xff]  ;;  %v3936_v37 = vld [vmem:[#allocation22_spill] sm:$0xff]  ;;  %v3940_v61 = vsub.f32 %v2792_v57, %v2794_v1 }
 0x1ec   :  { %3928 = vst [vmem:[#allocation9_spill] sm:$0xff] %v3028_v50  ;;  %3930 = vst [vmem:[#allocation10_spill] sm:$0xff] %v3032_v17  ;;  %v3044_v7 = vmul.f32 %v2798_v8, %v3935_v12  ;;  %v3048_v0 = vmul.f32 %v2798_v8, %v3936_v37  ;;  %v3937_v50 = vld [vmem:[#allocation24_spill] sm:$0xff]  ;;  %v3938_v17 = vld [vmem:[#allocation25_spill] sm:$0xff] }
 0x1ed   :  { %3932 = vst [vmem:[#allocation11_spill] sm:$0xff] %v3036_v28  ;;  %3934 = vst [vmem:[#allocation12_spill] sm:$0xff] %v3040_v59  ;;  %v3052_v35 = vmul.f32 %v2798_v8, %v3937_v50  ;;  %v3056_v46 = vmul.f32 %v2798_v8, %v3938_v17  ;;  %v3939_v28 = vsub.s32 0, %v2783_v31 }
 0x1ef   :  { %v3063_v59 = vrot.slane %v3940_v61, %v3939_v28 }
 0x1f0   :  { %v3952_v61 = vld [vmem:[#allocation4_spill] sm:$0xff] }
 0x1f1   :  { %v3067_v12 = vadd.f32 %v3063_v59, %v2804_v36  ;;  %v3071_v37 = vadd.f32 %v3063_v59, %v2808_v47  ;;  %v3075_v50 = vadd.f32 %v3063_v59, %v2812_v22  ;;  %v3079_v31 = vadd.f32 %v3063_v59, %v2816_v40 }
 0x1f2   :  { %v3083_v57 = vadd.f32 %v3063_v59, %v2820_v18  ;;  %v3087_v1 = vadd.f32 %v3063_v59, %v2824_v10  ;;  %v3091_v8 = vadd.f32 %v3063_v59, %v2828_v15  ;;  %v3095_v36 = vadd.f32 %v3063_v59, %v2832_v26 }
 0x1f3   :  { %v3099_v47 = vadd.f32 %v3063_v59, %v2836_v33  ;;  %v3103_v22 = vadd.f32 %v3063_v59, %v2840_v44  ;;  %v3107_v40 = vadd.f32 %v3063_v59, %v2844_v51  ;;  %v3111_v18 = vadd.f32 %v3063_v59, %v2848_v62 }
 0x1f4   :  { %v3115_v10 = vadd.f32 %v3063_v59, %v2852_v5  ;;  %v3119_v15 = vadd.f32 %v3063_v59, %v2856_v20  ;;  %v3123_v26 = vadd.f32 %v3063_v59, %v2860_v29  ;;  %v3127_v33 = vadd.f32 %v3063_v59, %v2864_v42 }
 0x1f5   :  { %v3131_v44 = vadd.f32 %v3063_v59, %v2868_v53  ;;  %v3135_v51 = vadd.f32 %v3063_v59, %v2872_v2  ;;  %v3139_v62 = vadd.f32 %v3063_v59, %v2876_v13  ;;  %v3143_v5 = vadd.f32 %v3063_v59, %v2880_v4  ;;  %v3941_v53 = vld [vmem:[#allocation2_spill] sm:$0xff]  ;;  %v3942_v13 = vld [vmem:[#allocation3_spill] sm:$0xff] }
 0x1f6   :  { %v3147_v20 = vadd.f32 %v3063_v59, %v2884_v49  ;;  %v3151_v29 = vadd.f32 %v3063_v59, %v2888_v58  ;;  %v3155_v42 = vadd.f32 %v3063_v59, %v2892_v56  ;;  %v3159_v2 = vadd.f32 %v3063_v59, %v3941_v53  ;;  %v3954_v53 = vld [vmem:[#allocation5_spill] sm:$0xff] }
 0x1f7   :  { %v3163_v4 = vadd.f32 %v3063_v59, %v3942_v13  ;;  %v3167_v49 = vadd.f32 %v3063_v59, %v2904_v32  ;;  %v3171_v58 = vadd.f32 %v3063_v59, %v2908_v41  ;;  %v3175_v56 = vadd.f32 %v3063_v59, %v2912_v48  ;;  %v3956_v13 = vld [vmem:[#allocation6_spill] sm:$0xff] }
 0x1f8   :  { %v3179_v17 = vadd.f32 %v3063_v59, %v2916_v39  ;;  %v3183_v28 = vadd.f32 %v3063_v59, %v2920_v38  ;;  %v3187_v32 = vadd.f32 %v3063_v59, %v2924_v60  ;;  %v3191_v41 = vadd.f32 %v3063_v59, %v2928_v19 }
 0x1f9   :  { %v3195_v48 = vadd.f32 %v3063_v59, %v2932_v25  ;;  %v3199_v39 = vadd.f32 %v3063_v59, %v2936_v55  ;;  %v3203_v38 = vadd.f32 %v3063_v59, %v2940_v24  ;;  %v3207_v60 = vadd.f32 %v3063_v59, %v2944_v9 }
 0x1fa   :  { %v3211_v19 = vadd.f32 %v3063_v59, %v2948_v23  ;;  %v3215_v25 = vadd.f32 %v3063_v59, %v2952_v11  ;;  %v3219_v55 = vadd.f32 %v3063_v59, %v2956_v16  ;;  %v3223_v24 = vadd.f32 %v3063_v59, %v2960_v27 }
 0x1fb   :  { %v3227_v9 = vadd.f32 %v3063_v59, %v2964_v34  ;;  %v3231_v23 = vadd.f32 %v3063_v59, %v2968_v45  ;;  %v3235_v11 = vadd.f32 %v3063_v59, %v2972_v52  ;;  %v3239_v16 = vadd.f32 %v3063_v59, %v2976_v63 }
 0x1fc   :  { %3943 = vst [vmem:[#allocation13_spill] sm:$0xff] %v3219_v55  ;;  %3944 = vst [vmem:[#allocation15_spill] sm:$0xff] %v3223_v24  ;;  %v3243_v27 = vadd.f32 %v3063_v59, %v2980_v6  ;;  %v3247_v34 = vadd.f32 %v3063_v59, %v2984_v21  ;;  %v3251_v45 = vadd.f32 %v3063_v59, %v2988_v30 }
 0x1fd   :  { %3945 = vst [vmem:[#allocation17_spill] sm:$0xff] %v3227_v9  ;;  %3946 = vst [vmem:[#allocation19_spill] sm:$0xff] %v3231_v23  ;;  %v3255_v52 = vadd.f32 %v3063_v59, %v2992_v43  ;;  %v3259_v63 = vadd.f32 %v3063_v59, %v2996_v54  ;;  %v3263_v6 = vadd.f32 %v3063_v59, %v3000_v3 }
 0x1fe   :  { %3947 = vst [vmem:[#allocation21_spill] sm:$0xff] %v3235_v11  ;;  %v3267_v21 = vadd.f32 %v3063_v59, %v3004_v14  ;;  %v3271_v30 = vadd.f32 %v3063_v59, %v3952_v61  ;;  %v3275_v43 = vadd.f32 %v3063_v59, %v3954_v53  ;;  %v3279_v54 = vadd.f32 %v3063_v59, %v3956_v13 }
 0x1ff   :  { %3948 = vst [vmem:[#allocation23_spill] sm:$0xff] %v3255_v52  ;;  %3949 = vst [vmem:[#allocation14_spill] sm:$0xff] %v3259_v63  ;;  %v3958_v63 = vld [vmem:[#allocation7_spill] sm:$0xff] }
 0x200   :  { %3950 = vst [vmem:[#allocation16_spill] sm:$0xff] %v3263_v6  ;;  %3951 = vst [vmem:[#allocation18_spill] sm:$0xff] %v3267_v21  ;;  %v3283_v3 = vadd.f32 %v3063_v59, %v3958_v63  ;;  %v3959_v6 = vld [vmem:[#allocation8_spill] sm:$0xff]  ;;  %v3960_v21 = vld [vmem:[#allocation9_spill] sm:$0xff] }
 0x201   :  { %3953 = vst [vmem:[#allocation20_spill] sm:$0xff] %v3271_v30  ;;  %3955 = vst [vmem:[#allocation22_spill] sm:$0xff] %v3275_v43  ;;  %v3287_v14 = vadd.f32 %v3063_v59, %v3959_v6  ;;  %v3291_v61 = vadd.f32 %v3063_v59, %v3960_v21  ;;  %v3961_v30 = vld [vmem:[#allocation10_spill] sm:$0xff]  ;;  %v3962_v43 = vld [vmem:[#allocation11_spill] sm:$0xff]  ;;  %v3307_v6 = vadd.f32 %v3063_v59, %v3044_v7 }
 0x202   :  { %3957 = vst [vmem:[#allocation24_spill] sm:$0xff] %v3279_v54  ;;  %v3295_v53 = vadd.f32 %v3063_v59, %v3961_v30  ;;  %v3299_v13 = vadd.f32 %v3063_v59, %v3962_v43  ;;  %v3964_v54 = vld [vmem:[#allocation12_spill] sm:$0xff]  ;;  %v3311_v21 = vadd.f32 %v3063_v59, %v3048_v0  ;;  %v3315_v30 = vadd.f32 %v3063_v59, %v3052_v35 }
 0x203   :  { %v3303_v63 = vadd.f32 %v3063_v59, %v3964_v54  ;;  %3966 = vst [vmem:[#allocation3_spill] sm:$0xff] %v3307_v6  ;;  %v3319_v43 = vadd.f32 %v3063_v59, %v3056_v46  ;;  %v3977_v55 = vmov %v3307_v6  ;;  %v3980_v6 = vmax.f32 %v3067_v12, 0.0 }
 0x204   :  { %3963 = vst [vmem:[#allocation25_spill] sm:$0xff] %v3299_v13  ;;  %3967 = vst [vmem:[#allocation4_spill] sm:$0xff] %v3311_v21  ;;  %v3978_v24 = vmov %v3311_v21  ;;  %v3979_v9 = vmov %v3315_v30  ;;  %v3981_v21 = vmax.f32 %v3071_v37, 0.0  ;;  %v3983_v46 = vmax.f32 %v3079_v31, 0.0 }
 0x205   :  { %3965 = vst [vmem:[#allocation2_spill] sm:$0xff] %v3303_v63  ;;  %3968 = vst [vmem:[#allocation5_spill] sm:$0xff] %v3315_v30  ;;  %v3976_v13 = vmov %v3303_v63  ;;  %v1868_v0 = vpack.c.bf16 %v3980_v6, %v3980_v6  ;;  %v3982_v30 = vmax.f32 %v3075_v50, 0.0  ;;  %v3984_v63 = vmax.f32 %v3083_v57, 0.0 }
 0x206   :  { %v1869_v35 = vpack.c.bf16 %v3981_v21, %v3981_v21  ;;  %v1871_v54 = vpack.c.bf16 %v3983_v46, %v3983_v46  ;;  %v3985_v12 = vmax.f32 %v3087_v1, 0.0  ;;  %v3986_v37 = vmax.f32 %v3091_v8, 0.0 }
 0x207   :  { %v1870_v59 = vpack.c.bf16 %v3982_v30, %v3982_v30  ;;  %v1872_v7 = vpack.c.bf16 %v3984_v63, %v3984_v63  ;;  %v3987_v50 = vmax.f32 %v3095_v36, 0.0  ;;  %v3988_v31 = vmax.f32 %v3099_v47, 0.0  ;;  %1631 = vst.msk [vmem:[%s3837_s4] sm:$0xf] %vm1630_vm1, %v1868_v0 }
 0x208   :  { %v3973_v23 = vld [vmem:[#allocation22_spill] sm:$0xff]  ;;  %v1873_v6 = vpack.c.bf16 %v3985_v12, %v3985_v12  ;;  %v1874_v21 = vpack.c.bf16 %v3986_v37, %v3986_v37  ;;  %v3989_v57 = vmax.f32 %v3103_v22, 0.0  ;;  %v3990_v1 = vmax.f32 %v3107_v40, 0.0  ;;  %1632 = vst.msk [vmem:[%s3837_s4 + $0x4] sm:$0xf] %vm1630_vm1, %v1869_v35 }
 0x209   :  { %v3974_v11 = vld [vmem:[#allocation24_spill] sm:$0xff]  ;;  %v1875_v30 = vpack.c.bf16 %v3987_v50, %v3987_v50  ;;  %v1876_v46 = vpack.c.bf16 %v3988_v31, %v3988_v31  ;;  %v3991_v8 = vmax.f32 %v3111_v18, 0.0  ;;  %1633 = vst.msk [vmem:[%s3837_s4 + $0x8] sm:$0xf] %vm1630_vm1, %v1870_v59  ;;  %1634 = vst.msk [vmem:[%s3837_s4 + $0xc] sm:$0xf] %vm1630_vm1, %v1871_v54 }
 0x20a   :  { %v1877_v63 = vpack.c.bf16 %v3989_v57, %v3989_v57  ;;  %v1878_v12 = vpack.c.bf16 %v3990_v1, %v3990_v1  ;;  %v3992_v36 = vmax.f32 %v3115_v10, 0.0  ;;  %v3993_v22 = vmax.f32 %v3119_v15, 0.0  ;;  %1635 = vst.msk [vmem:[%s3837_s4 + $0x10] sm:$0xf] %vm1630_vm1, %v1872_v7  ;;  %1636 = vst.msk [vmem:[%s3837_s4 + $0x14] sm:$0xf] %vm1630_vm1, %v1873_v6 }
 0x20b   :  { %v3975_v52 = vld [vmem:[#allocation25_spill] sm:$0xff]  ;;  %v1879_v37 = vpack.c.bf16 %v3991_v8, %v3991_v8  ;;  %v3994_v18 = vmax.f32 %v3123_v26, 0.0  ;;  %v3995_v35 = vmax.f32 %v3127_v33, 0.0  ;;  %1637 = vst.msk [vmem:[%s3837_s4 + $0x18] sm:$0xf] %vm1630_vm1, %v1874_v21  ;;  %v3996_v10 = vmax.f32 %v3131_v44, 0.0 }
 0x20c   :  { %v1880_v47 = vpack.c.bf16 %v3992_v36, %v3992_v36  ;;  %v1881_v40 = vpack.c.bf16 %v3993_v22, %v3993_v22  ;;  %1638 = vst.msk [vmem:[%s3837_s4 + $0x1c] sm:$0xf] %vm1630_vm1, %v1875_v30  ;;  %v3997_v26 = vmax.f32 %v3135_v51, 0.0  ;;  %v3998_v54 = vmax.f32 %v3139_v62, 0.0  ;;  %1639 = vst.msk [vmem:[%s3837_s4 + $0x20] sm:$0xf] %vm1630_vm1, %v1876_v46 }
 0x20d   :  { %v1882_v0 = vpack.c.bf16 %v3994_v18, %v3994_v18  ;;  %v1883_v59 = vpack.c.bf16 %v3995_v35, %v3995_v35  ;;  %v1884_v15 = vpack.c.bf16 %v3996_v10, %v3996_v10  ;;  %v3999_v6 = vmax.f32 %v3143_v5, 0.0  ;;  %1640 = vst.msk [vmem:[%s3837_s4 + $0x24] sm:$0xf] %vm1630_vm1, %v1877_v63  ;;  %1641 = vst.msk [vmem:[%s3837_s4 + $0x28] sm:$0xf] %vm1630_vm1, %v1878_v12  ;;  %v4018_v35 = vld [vmem:[#allocation13_spill] sm:$0xff] }
 0x20e   :  { %v1885_v33 = vpack.c.bf16 %v3997_v26, %v3997_v26  ;;  %v1886_v7 = vpack.c.bf16 %v3998_v54, %v3998_v54  ;;  %1642 = vst.msk [vmem:[%s3837_s4 + $0x2c] sm:$0xf] %vm1630_vm1, %v1879_v37  ;;  %v4000_v44 = vmax.f32 %v3147_v20, 0.0  ;;  %v4001_v62 = vmax.f32 %v3151_v29, 0.0  ;;  %1643 = vst.msk [vmem:[%s3837_s4 + $0x30] sm:$0xf] %vm1630_vm1, %v1880_v47 }
 0x20f   :  { %v1887_v21 = vpack.c.bf16 %v3999_v6, %v3999_v6  ;;  %v4002_v50 = vmax.f32 %v3155_v42, 0.0  ;;  %v4003_v31 = vmax.f32 %v3159_v2, 0.0  ;;  %1644 = vst.msk [vmem:[%s3837_s4 + $0x34] sm:$0xf] %vm1630_vm1, %v1881_v40  ;;  %1645 = vst.msk [vmem:[%s3837_s4 + $0x38] sm:$0xf] %vm1630_vm1, %v1882_v0 }
 0x210   :  { %v1888_v51 = vpack.c.bf16 %v4000_v44, %v4000_v44  ;;  %v1889_v5 = vpack.c.bf16 %v4001_v62, %v4001_v62  ;;  %1646 = vst.msk [vmem:[%s3837_s4 + $0x3c] sm:$0xf] %vm1630_vm1, %v1883_v59  ;;  %v4004_v20 = vmax.f32 %v3163_v4, 0.0  ;;  %v4005_v42 = vmax.f32 %v3167_v49, 0.0  ;;  %1647 = vst.msk [vmem:[%s3837_s4 + $0x40] sm:$0xf] %vm1630_vm1, %v1884_v15 }
 0x211   :  { %v1890_v30 = vpack.c.bf16 %v4002_v50, %v4002_v50  ;;  %v1891_v46 = vpack.c.bf16 %v4003_v31, %v4003_v31  ;;  %v4006_v57 = vmax.f32 %v3171_v58, 0.0  ;;  %v4007_v1 = vmax.f32 %v3175_v56, 0.0  ;;  %1648 = vst.msk [vmem:[%s3837_s4 + $0x44] sm:$0xf] %vm1630_vm1, %v1885_v33  ;;  %1649 = vst.msk [vmem:[%s3837_s4 + $0x48] sm:$0xf] %vm1630_vm1, %v1886_v7 }
 0x212   :  { %v1892_v29 = vpack.c.bf16 %v4004_v20, %v4004_v20  ;;  %v1893_v2 = vpack.c.bf16 %v4005_v42, %v4005_v42  ;;  %1650 = vst.msk [vmem:[%s3837_s4 + $0x4c] sm:$0xf] %vm1630_vm1, %v1887_v21  ;;  %v4008_v4 = vmax.f32 %v3179_v17, 0.0  ;;  %v4009_v58 = vmax.f32 %v3183_v28, 0.0  ;;  %1651 = vst.msk [vmem:[%s3837_s4 + $0x50] sm:$0xf] %vm1630_vm1, %v1888_v51 }
 0x213   :  { %v1894_v63 = vpack.c.bf16 %v4006_v57, %v4006_v57  ;;  %v1895_v12 = vpack.c.bf16 %v4007_v1, %v4007_v1  ;;  %v4010_v8 = vmax.f32 %v3187_v32, 0.0  ;;  %v4011_v36 = vmax.f32 %v3191_v41, 0.0  ;;  %1652 = vst.msk [vmem:[%s3837_s4 + $0x54] sm:$0xf] %vm1630_vm1, %v1889_v5  ;;  %1653 = vst.msk [vmem:[%s3837_s4 + $0x58] sm:$0xf] %vm1630_vm1, %v1890_v30 }
 0x214   :  { %v1896_v49 = vpack.c.bf16 %v4008_v4, %v4008_v4  ;;  %v1897_v56 = vpack.c.bf16 %v4009_v58, %v4009_v58  ;;  %1654 = vst.msk [vmem:[%s3837_s4 + $0x5c] sm:$0xf] %vm1630_vm1, %v1891_v46  ;;  %v4012_v17 = vmax.f32 %v3195_v48, 0.0  ;;  %v4013_v32 = vmax.f32 %v3199_v39, 0.0  ;;  %1655 = vst.msk [vmem:[%s3837_s4 + $0x60] sm:$0xf] %vm1630_vm1, %v1892_v29 }
 0x215   :  { %v1898_v37 = vpack.c.bf16 %v4010_v8, %v4010_v8  ;;  %v1899_v47 = vpack.c.bf16 %v4011_v36, %v4011_v36  ;;  %v4014_v22 = vmax.f32 %v3203_v38, 0.0  ;;  %v4015_v18 = vmax.f32 %v3207_v60, 0.0  ;;  %1656 = vst.msk [vmem:[%s3837_s4 + $0x64] sm:$0xf] %vm1630_vm1, %v1893_v2  ;;  %1657 = vst.msk [vmem:[%s3837_s4 + $0x68] sm:$0xf] %vm1630_vm1, %v1894_v63 }
 0x216   :  { %v1900_v28 = vpack.c.bf16 %v4012_v17, %v4012_v17  ;;  %v1901_v41 = vpack.c.bf16 %v4013_v32, %v4013_v32  ;;  %1658 = vst.msk [vmem:[%s3837_s4 + $0x6c] sm:$0xf] %vm1630_vm1, %v1895_v12  ;;  %v4016_v48 = vmax.f32 %v3211_v19, 0.0  ;;  %v4017_v38 = vmax.f32 %v3215_v25, 0.0  ;;  %v4020_v15 = vld [vmem:[#allocation15_spill] sm:$0xff]  ;;  %v4022_v19 = vld [vmem:[#allocation17_spill] sm:$0xff] }
 0x217   :  { %v1902_v40 = vpack.c.bf16 %v4014_v22, %v4014_v22  ;;  %v1903_v0 = vpack.c.bf16 %v4015_v18, %v4015_v18  ;;  %v4019_v59 = vmax.f32 %v4018_v35, 0.0  ;;  %v4021_v26 = vmax.f32 %v4020_v15, 0.0  ;;  %1659 = vst.msk [vmem:[%s3837_s4 + $0x70] sm:$0xf] %vm1630_vm1, %v1896_v49  ;;  %1660 = vst.msk [vmem:[%s3837_s4 + $0x74] sm:$0xf] %vm1630_vm1, %v1897_v56 }
 0x218   :  { %v1904_v39 = vpack.c.bf16 %v4016_v48, %v4016_v48  ;;  %v1905_v60 = vpack.c.bf16 %v4017_v38, %v4017_v38  ;;  %1661 = vst.msk [vmem:[%s3837_s4 + $0x78] sm:$0xf] %vm1630_vm1, %v1898_v37  ;;  %1662 = vst.msk [vmem:[%s3837_s4 + $0x7c] sm:$0xf] %vm1630_vm1, %v1899_v47  ;;  %v4023_v25 = vmax.f32 %v4022_v19, 0.0  ;;  %v4024_v7 = vld [vmem:[#allocation19_spill] sm:$0xff] }
 0x219   :  { %v1906_v10 = vpack.c.bf16 %v4019_v59, %v4019_v59  ;;  %v1907_v33 = vpack.c.bf16 %v4021_v26, %v4021_v26  ;;  %v4025_v6 = vmax.f32 %v4024_v7, 0.0  ;;  %v4026_v44 = vld [vmem:[#allocation21_spill] sm:$0xff]  ;;  %v4028_v5 = vmax.f32 %v3239_v16, 0.0  ;;  %1663 = vst.msk [vmem:[%s3837_s4 + $0x80] sm:$0xf] %vm1630_vm1, %v1900_v28  ;;  %v4032_v42 = vld [vmem:[#allocation23_spill] sm:$0xff] }
 0x21a   :  { %v1908_v54 = vpack.c.bf16 %v4023_v25, %v4023_v25  ;;  %v4027_v51 = vmax.f32 %v4026_v44, 0.0  ;;  %1664 = vst.msk [vmem:[%s3837_s4 + $0x84] sm:$0xf] %vm1630_vm1, %v1901_v41  ;;  %1665 = vst.msk [vmem:[%s3837_s4 + $0x88] sm:$0xf] %vm1630_vm1, %v1902_v40  ;;  %v4029_v16 = vmax.f32 %v3243_v27, 0.0 }
 0x21b   :  { %v1909_v21 = vpack.c.bf16 %v4025_v6, %v4025_v6  ;;  %v1911_v50 = vpack.c.bf16 %v4028_v5, %v4028_v5  ;;  %1666 = vst.msk [vmem:[%s3837_s4 + $0x8c] sm:$0xf] %vm1630_vm1, %v1903_v0  ;;  %v4030_v31 = vmax.f32 %v3247_v34, 0.0  ;;  %v4031_v20 = vmax.f32 %v3251_v45, 0.0  ;;  %1667 = vst.msk [vmem:[%s3837_s4 + $0x90] sm:$0xf] %vm1630_vm1, %v1904_v39 }
 0x21c   :  { %v1910_v62 = vpack.c.bf16 %v4027_v51, %v4027_v51  ;;  %v1912_v30 = vpack.c.bf16 %v4029_v16, %v4029_v16  ;;  %v4033_v2 = vmax.f32 %v4032_v42, 0.0  ;;  %1668 = vst.msk [vmem:[%s3837_s4 + $0x94] sm:$0xf] %vm1630_vm1, %v1905_v60  ;;  %1669 = vst.msk [vmem:[%s3837_s4 + $0x98] sm:$0xf] %vm1630_vm1, %v1906_v10  ;;  %v4034_v27 = vld [vmem:[#allocation14_spill] sm:$0xff] }
 0x21d   :  { %v1913_v46 = vpack.c.bf16 %v4030_v31, %v4030_v31  ;;  %v1914_v29 = vpack.c.bf16 %v4031_v20, %v4031_v20  ;;  %1670 = vst.msk [vmem:[%s3837_s4 + $0x9c] sm:$0xf] %vm1630_vm1, %v1907_v33  ;;  %v4035_v34 = vmax.f32 %v4034_v27, 0.0  ;;  %v4036_v63 = vld [vmem:[#allocation16_spill] sm:$0xff]  ;;  %v4038_v4 = vld [vmem:[#allocation18_spill] sm:$0xff]  ;;  %v4042_v36 = vmax.f32 %v3973_v23, 0.0 }
 0x21e   :  { %v1915_v57 = vpack.c.bf16 %v4033_v2, %v4033_v2  ;;  %v4037_v1 = vmax.f32 %v4036_v63, 0.0  ;;  %v4039_v49 = vmax.f32 %v4038_v4, 0.0  ;;  %v4040_v56 = vld [vmem:[#allocation20_spill] sm:$0xff]  ;;  %1671 = vst.msk [vmem:[%s3837_s4 + $0xa0] sm:$0xf] %vm1630_vm1, %v1908_v54  ;;  %v4043_v17 = vmax.f32 %v3974_v11, 0.0 }
 0x21f   :  { %v1916_v45 = vpack.c.bf16 %v4035_v34, %v4035_v34  ;;  %v4041_v8 = vmax.f32 %v4040_v56, 0.0  ;;  %1672 = vst.msk [vmem:[%s3837_s4 + $0xa4] sm:$0xf] %vm1630_vm1, %v1909_v21  ;;  %1673 = vst.msk [vmem:[%s3837_s4 + $0xa8] sm:$0xf] %vm1630_vm1, %v1910_v62  ;;  %v1920_v47 = vpack.c.bf16 %v4042_v36, %v4042_v36  ;;  %v4044_v32 = vmax.f32 %v3283_v3, 0.0 }
 0x220   :  { %v1917_v12 = vpack.c.bf16 %v4037_v1, %v4037_v1  ;;  %v1918_v58 = vpack.c.bf16 %v4039_v49, %v4039_v49  ;;  %1674 = vst.msk [vmem:[%s3837_s4 + $0xac] sm:$0xf] %vm1630_vm1, %v1911_v50  ;;  %v1921_v28 = vpack.c.bf16 %v4043_v17, %v4043_v17  ;;  %v4045_v22 = vmax.f32 %v3287_v14, 0.0  ;;  %1675 = vst.msk [vmem:[%s3837_s4 + $0xb0] sm:$0xf] %vm1630_vm1, %v1912_v30 }
 0x221   :  { %v1919_v37 = vpack.c.bf16 %v4041_v8, %v4041_v8  ;;  %v1922_v41 = vpack.c.bf16 %v4044_v32, %v4044_v32  ;;  %1676 = vst.msk [vmem:[%s3837_s4 + $0xb4] sm:$0xf] %vm1630_vm1, %v1913_v46  ;;  %1677 = vst.msk [vmem:[%s3837_s4 + $0xb8] sm:$0xf] %vm1630_vm1, %v1914_v29  ;;  %v4046_v23 = vmax.f32 %v3291_v61, 0.0  ;;  %v4047_v3 = vmax.f32 %v3295_v53, 0.0 }
 0x222   :  { %v1923_v40 = vpack.c.bf16 %v4045_v22, %v4045_v22  ;;  %1678 = vst.msk [vmem:[%s3837_s4 + $0xbc] sm:$0xf] %vm1630_vm1, %v1915_v57  ;;  %v4048_v18 = vmax.f32 %v3975_v52, 0.0  ;;  %v4049_v48 = vmax.f32 %v3976_v13, 0.0  ;;  %1679 = vst.msk [vmem:[%s3837_s4 + $0xc0] sm:$0xf] %vm1630_vm1, %v1916_v45 }
 0x223   :  { %v1924_v11 = vpack.c.bf16 %v4046_v23, %v4046_v23  ;;  %v1925_v14 = vpack.c.bf16 %v4047_v3, %v4047_v3  ;;  %1680 = vst.msk [vmem:[%s3837_s4 + $0xc4] sm:$0xf] %vm1630_vm1, %v1917_v12  ;;  %1681 = vst.msk [vmem:[%s3837_s4 + $0xc8] sm:$0xf] %vm1630_vm1, %v1918_v58  ;;  %v4050_v52 = vmax.f32 %v3977_v55, 0.0  ;;  %v4051_v53 = vmax.f32 %v3978_v24, 0.0 }
 0x224   :  { %v1926_v0 = vpack.c.bf16 %v4048_v18, %v4048_v18  ;;  %v1927_v39 = vpack.c.bf16 %v4049_v48, %v4049_v48  ;;  %1682 = vst.msk [vmem:[%s3837_s4 + $0xcc] sm:$0xf] %vm1630_vm1, %v1919_v37  ;;  %v4052_v38 = vmax.f32 %v3979_v9, 0.0  ;;  %v4053_v35 = vmax.f32 %v3319_v43, 0.0  ;;  %1683 = vst.msk [vmem:[%s3837_s4 + $0xd0] sm:$0xf] %vm1630_vm1, %v1920_v47 }
 0x225   :  { %v1928_v61 = vpack.c.bf16 %v4050_v52, %v4050_v52  ;;  %v1929_v13 = vpack.c.bf16 %v4051_v53, %v4051_v53  ;;  %1684 = vst.msk [vmem:[%s3837_s4 + $0xd4] sm:$0xf] %vm1630_vm1, %v1921_v28  ;;  %1685 = vst.msk [vmem:[%s3837_s4 + $0xd8] sm:$0xf] %vm1630_vm1, %v1922_v41 }
 0x226   :  { %v1930_v60 = vpack.c.bf16 %v4052_v38, %v4052_v38  ;;  %v1931_v59 = vpack.c.bf16 %v4053_v35, %v4053_v35  ;;  %1686 = vst.msk [vmem:[%s3837_s4 + $0xdc] sm:$0xf] %vm1630_vm1, %v1923_v40  ;;  %1687 = vst.msk [vmem:[%s3837_s4 + $0xe0] sm:$0xf] %vm1630_vm1, %v1924_v11 }
 0x227   :  { %1688 = vst.msk [vmem:[%s3837_s4 + $0xe4] sm:$0xf] %vm1630_vm1, %v1925_v14  ;;  %1689 = vst.msk [vmem:[%s3837_s4 + $0xe8] sm:$0xf] %vm1630_vm1, %v1926_v0 }
 0x228   :  { %1690 = vst.msk [vmem:[%s3837_s4 + $0xec] sm:$0xf] %vm1630_vm1, %v1927_v39  ;;  %1691 = vst.msk [vmem:[%s3837_s4 + $0xf0] sm:$0xf] %vm1630_vm1, %v1928_v61 }
 0x229   :  { %1692 = vst.msk [vmem:[%s3837_s4 + $0xf4] sm:$0xf] %vm1630_vm1, %v1929_v13  ;;  %1693 = vst.msk [vmem:[%s3837_s4 + $0xf8] sm:$0xf] %vm1630_vm1, %v1930_v60 }
 0x22a   :  { %1694 = vst.msk [vmem:[%s3837_s4 + $0xfc] sm:$0xf] %vm1630_vm1, %v1931_v59 }

// kernel: shared_layers_forward.79
= control target key start
LH: loop header
LB: loop body
LE: loop exit
PB: predicated region body
PF: predicated region fallthrough
CT: control target
= control target key end

     0   :  { %vm253_vm0 = vcmask 130048   ;;  %vm639_vm1 = vcmask 523264   ;;  %vm1634_vm2 = vcmask 519168   ;;  %s4399_s1 = inlined_call_operand.vmem [shape: bf16[16,64], index: 1, kind: input, shape index: {}]   ;;  %s4400_s0 = inlined_call_operand.vmem [shape: bf16[512,16], index: 0, kind: input, shape index: {}]   ;;  %s4401_s2 = inlined_call_operand.vmem [shape: bf16[512,64], index: 2, kind: input, shape index: {}]   ;;  %s4402_s3 = inlined_call_operand.vmem [shape: f32[1,64], index: 3, kind: input, shape index: {}]   ;;  %s4403_s4 = inlined_call_operand.vmem [shape: f32[1,64], index: 4, kind: input, shape index: {}]   ;;  %s4404_s5 = inlined_call_operand.vmem [shape: bf16[512,64], index: 5, kind: output, shape index: {}]  }
   0x1   :  { %v2156_v0 = vld [vmem:[%s4399_s1] sm:$0xff]   ;;  %v2158_v2 = vld [vmem:[%s4400_s0 + $0x8] sm:$0xff]   ;;  %v2159_v3 = vld [vmem:[%s4400_s0 + $0x10] sm:$0xff]  }
   0x2   :  { %v2157_v1 = vld [vmem:[%s4400_s0] sm:$0xff]   ;;  %2088 = vmatprep.subr.bf16.mxu0 %v2156_v0  ;;  %2154 = vmatprep.subr.bf16.mxu1 %v2156_v0  ;;  %v2160_v4 = vld [vmem:[%s4400_s0 + $0x18] sm:$0xff]   ;;  %v2162_v6 = vld [vmem:[%s4400_s0 + $0x28] sm:$0xff]  }
   0x3   :  { %2089 = vmatpush3.bf16.msra.mxu0 %v2156_v0  ;;  %2090 = vmatprep.mubr.msk.bf16.mxu0 %vm253_vm0, %v2157_v1  ;;  %v2161_v5 = vld [vmem:[%s4400_s0 + $0x20] sm:$0xff]   ;;  %v2163_v7 = vld [vmem:[%s4400_s0 + $0x30] sm:$0xff]   ;;  %v2174_v9 = vld [vmem:[%s4400_s0 + $0x88] sm:$0xff]  }
   0x4   :  { %2155 = vmatpush3.bf16.msra.mxu1 %v2156_v0  ;;  %v2173_v8 = vld [vmem:[%s4400_s0 + $0x80] sm:$0xff]   ;;  %v2175_v10 = vld [vmem:[%s4400_s0 + $0x90] sm:$0xff]   ;;  %v2176_v11 = vld [vmem:[%s4400_s0 + $0x98] sm:$0xff]  }
   0x5   :  { %2122 = vmatprep.mubr.msk.bf16.mxu1 %vm253_vm0, %v2173_v8  ;;  %v2177_v12 = vld [vmem:[%s4400_s0 + $0xa0] sm:$0xff]   ;;  %v2164_v13 = vld [vmem:[%s4400_s0 + $0x38] sm:$0xff]   ;;  %v2178_v15 = vld [vmem:[%s4400_s0 + $0xa8] sm:$0xff]  }
   0x6   :  { %2091 = vmatmul.mubr.msk.bf16.vlgmr.msra.gmra.mrb[0].mxu0 %vm253_vm0, %v2158_v2  ;;  %v2165_v14 = vld [vmem:[%s4400_s0 + $0x40] sm:$0xff]   ;;  %v2179_v16 = vld [vmem:[%s4400_s0 + $0xb0] sm:$0xff]   ;;  %v2166_v17 = vld [vmem:[%s4400_s0 + $0x48] sm:$0xff]  }
   0x7   :  { %2094 = vmatprep.mubr.msk.bf16.mxu0 %vm253_vm0, %v2159_v3  ;;  %2123 = vmatmul.mubr.msk.bf16.vlgmr.msra.gmra.mrb[0].mxu1 %vm253_vm0, %v2174_v9  ;;  %v2167_v18 = vld [vmem:[%s4400_s0 + $0x50] sm:$0xff]   ;;  %v2180_v19 = vld [vmem:[%s4400_s0 + $0xb8] sm:$0xff]   ;;  %v2181_v20 = vld [vmem:[%s4400_s0 + $0xc0] sm:$0xff]  }
   0x8   :  { %2126 = vmatprep.mubr.msk.bf16.mxu1 %vm253_vm0, %v2175_v10  ;;  %v2168_v21 = vld [vmem:[%s4400_s0 + $0x58] sm:$0xff]   ;;  %v2169_v22 = vld [vmem:[%s4400_s0 + $0x60] sm:$0xff]   ;;  %v2182_v23 = vld [vmem:[%s4400_s0 + $0xc8] sm:$0xff]  }
   0x9   :  { %v2183_v24 = vld [vmem:[%s4400_s0 + $0xd0] sm:$0xff]   ;;  %v2170_v25 = vld [vmem:[%s4400_s0 + $0x68] sm:$0xff]   ;;  %v2184_v27 = vld [vmem:[%s4400_s0 + $0xd8] sm:$0xff]  }
   0xa   :  { %v2171_v26 = vld [vmem:[%s4400_s0 + $0x70] sm:$0xff]   ;;  %v2185_v28 = vld [vmem:[%s4400_s0 + $0xe0] sm:$0xff]   ;;  %v2172_v29 = vld [vmem:[%s4400_s0 + $0x78] sm:$0xff]  }
   0xb   :  { %v2186_v30 = vld [vmem:[%s4400_s0 + $0xe8] sm:$0xff]   ;;  %v2187_v31 = vld [vmem:[%s4400_s0 + $0xf0] sm:$0xff]   ;;  %v2188_v32 = vld [vmem:[%s4400_s0 + $0xf8] sm:$0xff]  }
   0xe   :  { %2095 = vmatmul.mubr.msk.bf16.gmra.mrb[4].mxu0 %vm253_vm0, %v2160_v4 }
   0xf   :  { %2098 = vmatprep.mubr.msk.bf16.mxu0 %vm253_vm0, %v2161_v5  ;;  %2127 = vmatmul.mubr.msk.bf16.gmra.mrb[4].mxu1 %vm253_vm0, %v2176_v11 }
  0x10   :  { %2130 = vmatprep.mubr.msk.bf16.mxu1 %vm253_vm0, %v2177_v12 }
  0x16   :  { %2099 = vmatmul.mubr.msk.bf16.gmra.mrb[8].mxu0 %vm253_vm0, %v2162_v6 }
  0x17   :  { %2102 = vmatprep.mubr.msk.bf16.mxu0 %vm253_vm0, %v2163_v7  ;;  %2131 = vmatmul.mubr.msk.bf16.gmra.mrb[8].mxu1 %vm253_vm0, %v2178_v15 }
  0x18   :  { %2134 = vmatprep.mubr.msk.bf16.mxu1 %vm253_vm0, %v2179_v16 }
  0x1e   :  { %2103 = vmatmul.mubr.msk.bf16.gmra.mrb[12].mxu0 %vm253_vm0, %v2164_v13 }
  0x1f   :  { %2106 = vmatprep.mubr.msk.bf16.mxu0 %vm253_vm0, %v2165_v14  ;;  %2135 = vmatmul.mubr.msk.bf16.gmra.mrb[12].mxu1 %vm253_vm0, %v2180_v19 }
  0x20   :  { %2138 = vmatprep.mubr.msk.bf16.mxu1 %vm253_vm0, %v2181_v20 }
  0x26   :  { %2107 = vmatmul.mubr.msk.bf16.gmra.mrb[16].mxu0 %vm253_vm0, %v2166_v17 }
  0x27   :  { %2110 = vmatprep.mubr.msk.bf16.mxu0 %vm253_vm0, %v2167_v18  ;;  %2139 = vmatmul.mubr.msk.bf16.gmra.mrb[16].mxu1 %vm253_vm0, %v2182_v23 }
  0x28   :  { %2142 = vmatprep.mubr.msk.bf16.mxu1 %vm253_vm0, %v2183_v24 }
  0x2e   :  { %2111 = vmatmul.mubr.msk.bf16.gmra.mrb[20].mxu0 %vm253_vm0, %v2168_v21 }
  0x2f   :  { %2114 = vmatprep.mubr.msk.bf16.mxu0 %vm253_vm0, %v2169_v22  ;;  %2143 = vmatmul.mubr.msk.bf16.gmra.mrb[20].mxu1 %vm253_vm0, %v2184_v27 }
  0x30   :  { %2146 = vmatprep.mubr.msk.bf16.mxu1 %vm253_vm0, %v2185_v28 }
  0x36   :  { %2115 = vmatmul.mubr.msk.bf16.gmra.mrb[24].mxu0 %vm253_vm0, %v2170_v25 }
  0x37   :  { %2118 = vmatprep.mubr.msk.bf16.mxu0 %vm253_vm0, %v2171_v26  ;;  %2147 = vmatmul.mubr.msk.bf16.gmra.mrb[24].mxu1 %vm253_vm0, %v2186_v30 }
  0x38   :  { %2150 = vmatprep.mubr.msk.bf16.mxu1 %vm253_vm0, %v2187_v31 }
  0x3e   :  { %2119 = vmatmul.mubr.msk.bf16.gmra.mrb[28].mxu0 %vm253_vm0, %v2172_v29 }
  0x3f   :  { %2151 = vmatmul.mubr.msk.bf16.gmra.mrb[28].mxu1 %vm253_vm0, %v2188_v32 }
  0xd9   :  { %v2352_v33 = vpop.f32.mrb[0].mxu0 }
  0xda   :  { %v2354_v34 = vpop.f32.mrb[1].mxu0  ;;  %v776_v38 = vmul.f32 %v2352_v33, %v2352_v33  ;;  %v643_v43 = vsel %vm639_vm1, %v2352_v33, 0.0  ;;  %v2404_v7 = vpop.f32.mrb[0].mxu1 }
  0xdb   :  { %v774_v35 = vmul.f32 %v2354_v34, %v2354_v34  ;;  %v2358_v36 = vpop.f32.mrb[2].mxu0  ;;  %v640_v39 = vsel %vm639_vm1, %v2354_v34, 0.0  ;;  %4512 = vst [vmem:[#allocation2_spill] sm:$0xff] %v2404_v7  ;;  %v2406_v10 = vpop.f32.mrb[1].mxu1 }
  0xdc   :  { %v2360_v37 = vpop.f32.mrb[3].mxu0  ;;  %v777_v45 = vmul.f32 %v2358_v36, %v2358_v36  ;;  %v841_v49 = vsel %vm639_vm1, %v776_v38, 0.0  ;;  %v645_v50 = vsel %vm639_vm1, %v2358_v36, 0.0  ;;  %4513 = vst [vmem:[#allocation3_spill] sm:$0xff] %v2406_v10  ;;  %v2413_v14 = vpop.f32.mrb[2].mxu1 }
  0xdd   :  { %v641_v40 = vsel %vm639_vm1, %v2360_v37, 0.0  ;;  %v775_v41 = vmul.f32 %v2360_v37, %v2360_v37  ;;  %v838_v44 = vsel %vm639_vm1, %v774_v35, 0.0  ;;  %4514 = vst [vmem:[#allocation4_spill] sm:$0xff] %v2413_v14  ;;  %v2417_v18 = vpop.f32.mrb[3].mxu1 }
  0xde   :  { %v642_v42 = vadd.f32 %v641_v40, %v640_v39  ;;  %v843_v55 = vsel %vm639_vm1, %v777_v45, 0.0  ;;  %4515 = vst [vmem:[#allocation5_spill] sm:$0xff] %v2417_v18 }
  0xdf   :  { %v839_v46 = vsel %vm639_vm1, %v775_v41, 0.0 }
  0xe0   :  { %v644_v47 = vadd.f32 %v643_v43, %v642_v42  ;;  %v840_v48 = vadd.f32 %v839_v46, %v838_v44 }
  0xe1   :  { %v2379_v51 = vpop.f32.mrb[4].mxu0 }
  0xe2   :  { %v842_v52 = vadd.f32 %v841_v49, %v840_v48  ;;  %v2381_v53 = vpop.f32.mrb[5].mxu0  ;;  %v646_v54 = vadd.f32 %v645_v50, %v644_v47  ;;  %v780_v62 = vmul.f32 %v2379_v51, %v2379_v51  ;;  %v651_v4 = vsel %vm639_vm1, %v2379_v51, 0.0  ;;  %v2440_v39 = vpop.f32.mrb[4].mxu1 }
  0xe3   :  { %v647_v56 = vsel %vm639_vm1, %v2381_v53, 0.0  ;;  %v778_v57 = vmul.f32 %v2381_v53, %v2381_v53  ;;  %v2388_v58 = vpop.f32.mrb[6].mxu0  ;;  %4516 = vst [vmem:[#allocation6_spill] sm:$0xff] %v2440_v39  ;;  %v2442_v42 = vpop.f32.mrb[5].mxu1 }
  0xe4   :  { %v648_v59 = vadd.f32 %v647_v56, %v646_v54  ;;  %v844_v60 = vadd.f32 %v843_v55, %v842_v52  ;;  %v2390_v61 = vpop.f32.mrb[7].mxu0  ;;  %v781_v5 = vmul.f32 %v2388_v58, %v2388_v58  ;;  %v849_v11 = vsel %vm639_vm1, %v780_v62, 0.0  ;;  %4517 = vst [vmem:[#allocation7_spill] sm:$0xff] %v2442_v42  ;;  %v2449_v46 = vpop.f32.mrb[6].mxu1 }
  0xe5   :  { %v845_v63 = vsel %vm639_vm1, %v778_v57, 0.0  ;;  %v649_v0 = vsel %vm639_vm1, %v2390_v61, 0.0  ;;  %v779_v1 = vmul.f32 %v2390_v61, %v2390_v61  ;;  %v653_v12 = vsel %vm639_vm1, %v2388_v58, 0.0  ;;  %v2453_v50 = vpop.f32.mrb[7].mxu1 }
  0xe6   :  { %v846_v2 = vadd.f32 %v845_v63, %v844_v60  ;;  %v650_v3 = vadd.f32 %v649_v0, %v648_v59  ;;  %v851_v19 = vsel %vm639_vm1, %v781_v5, 0.0 }
  0xe7   :  { %v847_v6 = vsel %vm639_vm1, %v779_v1, 0.0 }
  0xe8   :  { %v652_v8 = vadd.f32 %v651_v4, %v650_v3  ;;  %v848_v9 = vadd.f32 %v847_v6, %v846_v2 }
  0xe9   :  { %v2411_v13 = vpop.f32.mrb[8].mxu0 }
  0xea   :  { %v850_v15 = vadd.f32 %v849_v11, %v848_v9  ;;  %v2415_v16 = vpop.f32.mrb[9].mxu0  ;;  %v654_v17 = vadd.f32 %v653_v12, %v652_v8  ;;  %v784_v26 = vmul.f32 %v2411_v13, %v2411_v13  ;;  %v659_v32 = vsel %vm639_vm1, %v2411_v13, 0.0  ;;  %v2476_v8 = vpop.f32.mrb[8].mxu1 }
  0xeb   :  { %v655_v20 = vsel %vm639_vm1, %v2415_v16, 0.0  ;;  %v782_v21 = vmul.f32 %v2415_v16, %v2415_v16  ;;  %v2424_v22 = vpop.f32.mrb[10].mxu0  ;;  %v2478_v12 = vpop.f32.mrb[9].mxu1 }
  0xec   :  { %v656_v23 = vadd.f32 %v655_v20, %v654_v17  ;;  %v852_v24 = vadd.f32 %v851_v19, %v850_v15  ;;  %v2426_v25 = vpop.f32.mrb[11].mxu0  ;;  %v785_v35 = vmul.f32 %v2424_v22, %v2424_v22  ;;  %v857_v43 = vsel %vm639_vm1, %v784_v26, 0.0  ;;  %v2485_v20 = vpop.f32.mrb[10].mxu1 }
  0xed   :  { %v853_v27 = vsel %vm639_vm1, %v782_v21, 0.0  ;;  %v657_v28 = vsel %vm639_vm1, %v2426_v25, 0.0  ;;  %v783_v29 = vmul.f32 %v2426_v25, %v2426_v25  ;;  %v661_v44 = vsel %vm639_vm1, %v2424_v22, 0.0  ;;  %v2489_v26 = vpop.f32.mrb[11].mxu1 }
  0xee   :  { %v854_v30 = vadd.f32 %v853_v27, %v852_v24  ;;  %v658_v31 = vadd.f32 %v657_v28, %v656_v23  ;;  %v859_v52 = vsel %vm639_vm1, %v785_v35, 0.0 }
  0xef   :  { %v855_v38 = vsel %vm639_vm1, %v783_v29, 0.0 }
  0xf0   :  { %v660_v40 = vadd.f32 %v659_v32, %v658_v31  ;;  %v856_v41 = vadd.f32 %v855_v38, %v854_v30 }
  0xf1   :  { %v2447_v45 = vpop.f32.mrb[12].mxu0 }
  0xf2   :  { %v858_v47 = vadd.f32 %v857_v43, %v856_v41  ;;  %v2451_v48 = vpop.f32.mrb[13].mxu0  ;;  %v662_v49 = vadd.f32 %v661_v44, %v660_v40  ;;  %v788_v62 = vmul.f32 %v2447_v45, %v2447_v45  ;;  %v667_v4 = vsel %vm639_vm1, %v2447_v45, 0.0 }
  0xf3   :  { %v663_v54 = vsel %vm639_vm1, %v2451_v48, 0.0  ;;  %v786_v55 = vmul.f32 %v2451_v48, %v2451_v48  ;;  %v2460_v56 = vpop.f32.mrb[14].mxu0 }
  0xf4   :  { %v664_v57 = vadd.f32 %v663_v54, %v662_v49  ;;  %v860_v59 = vadd.f32 %v859_v52, %v858_v47  ;;  %v2462_v60 = vpop.f32.mrb[15].mxu0  ;;  %v789_v5 = vmul.f32 %v2460_v56, %v2460_v56  ;;  %v865_v15 = vsel %vm639_vm1, %v788_v62, 0.0 }
  0xf5   :  { %v861_v63 = vsel %vm639_vm1, %v786_v55, 0.0  ;;  %v665_v0 = vsel %vm639_vm1, %v2462_v60, 0.0  ;;  %v787_v1 = vmul.f32 %v2462_v60, %v2462_v60  ;;  %v669_v17 = vsel %vm639_vm1, %v2460_v56, 0.0  ;;  %v2512_v55 = vpop.f32.mrb[12].mxu1 }
  0xf6   :  { %v862_v2 = vadd.f32 %v861_v63, %v860_v59  ;;  %v666_v3 = vadd.f32 %v665_v0, %v664_v57  ;;  %v867_v27 = vsel %vm639_vm1, %v789_v5, 0.0  ;;  %v2514_v62 = vpop.f32.mrb[13].mxu1 }
  0xf7   :  { %v863_v6 = vsel %vm639_vm1, %v787_v1, 0.0 }
  0xf8   :  { %v668_v9 = vadd.f32 %v667_v4, %v666_v3  ;;  %v864_v11 = vadd.f32 %v863_v6, %v862_v2  ;;  %v2521_v2 = vpop.f32.mrb[14].mxu1 }
  0xf9   :  { %v2483_v19 = vpop.f32.mrb[16].mxu0  ;;  %v2525_v6 = vpop.f32.mrb[15].mxu1 }
  0xfa   :  { %v866_v21 = vadd.f32 %v865_v15, %v864_v11  ;;  %v2487_v23 = vpop.f32.mrb[17].mxu0  ;;  %v670_v24 = vadd.f32 %v669_v17, %v668_v9  ;;  %v792_v38 = vmul.f32 %v2483_v19, %v2483_v19  ;;  %v675_v49 = vsel %vm639_vm1, %v2483_v19, 0.0 }
  0xfb   :  { %v671_v28 = vsel %vm639_vm1, %v2487_v23, 0.0  ;;  %v790_v29 = vmul.f32 %v2487_v23, %v2487_v23  ;;  %v2496_v30 = vpop.f32.mrb[18].mxu0 }
  0xfc   :  { %v672_v31 = vadd.f32 %v671_v28, %v670_v24  ;;  %v868_v32 = vadd.f32 %v867_v27, %v866_v21  ;;  %v2498_v35 = vpop.f32.mrb[19].mxu0  ;;  %v793_v52 = vmul.f32 %v2496_v30, %v2496_v30  ;;  %v873_v63 = vsel %vm639_vm1, %v792_v38, 0.0 }
  0xfd   :  { %v869_v40 = vsel %vm639_vm1, %v790_v29, 0.0  ;;  %v673_v41 = vsel %vm639_vm1, %v2498_v35, 0.0  ;;  %v791_v43 = vmul.f32 %v2498_v35, %v2498_v35  ;;  %v677_v0 = vsel %vm639_vm1, %v2496_v30, 0.0 }
  0xfe   :  { %v870_v44 = vadd.f32 %v869_v40, %v868_v32  ;;  %v674_v47 = vadd.f32 %v673_v41, %v672_v31  ;;  %v875_v9 = vsel %vm639_vm1, %v793_v52, 0.0 }
  0xff   :  { %v871_v54 = vsel %vm639_vm1, %v791_v43, 0.0 }
 0x100   :  { %v676_v57 = vadd.f32 %v675_v49, %v674_v47  ;;  %v872_v59 = vadd.f32 %v871_v54, %v870_v44  ;;  %v2548_v47 = vpop.f32.mrb[16].mxu1 }
 0x101   :  { %v2519_v1 = vpop.f32.mrb[20].mxu0  ;;  %v2550_v54 = vpop.f32.mrb[17].mxu1 }
 0x102   :  { %4518 = vst [vmem:[#allocation8_spill] sm:$0xff] %v2519_v1  ;;  %v874_v3 = vadd.f32 %v873_v63, %v872_v59  ;;  %v2523_v4 = vpop.f32.mrb[21].mxu0  ;;  %v678_v5 = vadd.f32 %v677_v0, %v676_v57  ;;  %v796_v28 = vmul.f32 %v2519_v1, %v2519_v1  ;;  %v683_v41 = vsel %vm639_vm1, %v2519_v1, 0.0  ;;  %v2557_v0 = vpop.f32.mrb[18].mxu1 }
 0x103   :  { %4519 = vst [vmem:[#allocation9_spill] sm:$0xff] %v2523_v4  ;;  %v679_v11 = vsel %vm639_vm1, %v2523_v4, 0.0  ;;  %v794_v15 = vmul.f32 %v2523_v4, %v2523_v4  ;;  %v2532_v17 = vpop.f32.mrb[22].mxu0 }
 0x104   :  { %4520 = vst [vmem:[#allocation10_spill] sm:$0xff] %v2532_v17  ;;  %v680_v21 = vadd.f32 %v679_v11, %v678_v5  ;;  %v876_v24 = vadd.f32 %v875_v9, %v874_v3  ;;  %v2534_v27 = vpop.f32.mrb[23].mxu0  ;;  %v797_v43 = vmul.f32 %v2532_v17, %v2532_v17  ;;  %v881_v57 = vsel %vm639_vm1, %v796_v28, 0.0  ;;  %v2561_v11 = vpop.f32.mrb[19].mxu1 }
 0x105   :  { %4521 = vst [vmem:[#allocation11_spill] sm:$0xff] %v2534_v27  ;;  %v877_v29 = vsel %vm639_vm1, %v794_v15, 0.0  ;;  %v681_v31 = vsel %vm639_vm1, %v2534_v27, 0.0  ;;  %v795_v32 = vmul.f32 %v2534_v27, %v2534_v27  ;;  %v685_v59 = vsel %vm639_vm1, %v2532_v17, 0.0 }
 0x106   :  { %v878_v38 = vadd.f32 %v877_v29, %v876_v24  ;;  %v682_v40 = vadd.f32 %v681_v31, %v680_v21  ;;  %v883_v15 = vsel %vm639_vm1, %v797_v43, 0.0 }
 0x107   :  { %v879_v44 = vsel %vm639_vm1, %v795_v32, 0.0 }
 0x108   :  { %v684_v49 = vadd.f32 %v683_v41, %v682_v40  ;;  %v880_v52 = vadd.f32 %v879_v44, %v878_v38 }
 0x109   :  { %v2555_v63 = vpop.f32.mrb[24].mxu0 }
 0x10a   :  { %4522 = vst [vmem:[#allocation12_spill] sm:$0xff] %v2555_v63  ;;  %v882_v3 = vadd.f32 %v881_v57, %v880_v52  ;;  %v2559_v5 = vpop.f32.mrb[25].mxu0  ;;  %v686_v9 = vadd.f32 %v685_v59, %v684_v49  ;;  %v800_v38 = vmul.f32 %v2555_v63, %v2555_v63  ;;  %v691_v52 = vsel %vm639_vm1, %v2555_v63, 0.0 }
 0x10b   :  { %4523 = vst [vmem:[#allocation13_spill] sm:$0xff] %v2559_v5  ;;  %v687_v21 = vsel %vm639_vm1, %v2559_v5, 0.0  ;;  %v798_v24 = vmul.f32 %v2559_v5, %v2559_v5  ;;  %v2568_v28 = vpop.f32.mrb[26].mxu0 }
 0x10c   :  { %4524 = vst [vmem:[#allocation14_spill] sm:$0xff] %v2568_v28  ;;  %v688_v29 = vadd.f32 %v687_v21, %v686_v9  ;;  %v884_v31 = vadd.f32 %v883_v15, %v882_v3  ;;  %v2570_v32 = vpop.f32.mrb[27].mxu0  ;;  %v801_v57 = vmul.f32 %v2568_v28, %v2568_v28  ;;  %v2584_v3 = vpop.f32.mrb[20].mxu1 }
 0x10d   :  { %4525 = vst [vmem:[#allocation15_spill] sm:$0xff] %v2570_v32  ;;  %v885_v40 = vsel %vm639_vm1, %v798_v24, 0.0  ;;  %v689_v41 = vsel %vm639_vm1, %v2570_v32, 0.0  ;;  %v799_v43 = vmul.f32 %v2570_v32, %v2570_v32  ;;  %v2586_v21 = vpop.f32.mrb[21].mxu1  ;;  %v889_v24 = vsel %vm639_vm1, %v800_v38, 0.0 }
 0x10e   :  { %v886_v44 = vadd.f32 %v885_v40, %v884_v31  ;;  %v690_v49 = vadd.f32 %v689_v41, %v688_v29  ;;  %v693_v31 = vsel %vm639_vm1, %v2568_v28, 0.0  ;;  %v2593_v40 = vpop.f32.mrb[22].mxu1 }
 0x10f   :  { %v887_v59 = vsel %vm639_vm1, %v799_v43, 0.0  ;;  %v2597_v43 = vpop.f32.mrb[23].mxu1 }
 0x110   :  { %v692_v9 = vadd.f32 %v691_v52, %v690_v49  ;;  %v888_v15 = vadd.f32 %v887_v59, %v886_v44  ;;  %v891_v49 = vsel %vm639_vm1, %v801_v57, 0.0 }
 0x111   :  { %v2591_v29 = vpop.f32.mrb[28].mxu0 }
 0x112   :  { %4526 = vst [vmem:[#allocation16_spill] sm:$0xff] %v2591_v29  ;;  %v890_v41 = vadd.f32 %v889_v24, %v888_v15  ;;  %v2595_v63 = vpop.f32.mrb[29].mxu0  ;;  %v694_v32 = vadd.f32 %v693_v31, %v692_v9  ;;  %v804_v15 = vmul.f32 %v2591_v29, %v2591_v29 }
 0x113   :  { %4527 = vst [vmem:[#allocation17_spill] sm:$0xff] %v2595_v63  ;;  %v695_v44 = vsel %vm639_vm1, %v2595_v63, 0.0  ;;  %v802_v38 = vmul.f32 %v2595_v63, %v2595_v63  ;;  %v2604_v52 = vpop.f32.mrb[30].mxu0  ;;  %v699_v63 = vsel %vm639_vm1, %v2591_v29, 0.0 }
 0x114   :  { %4528 = vst [vmem:[#allocation18_spill] sm:$0xff] %v2604_v52  ;;  %v696_v59 = vadd.f32 %v695_v44, %v694_v32  ;;  %v892_v28 = vadd.f32 %v891_v49, %v890_v41  ;;  %v2606_v5 = vpop.f32.mrb[31].mxu0  ;;  %v805_v32 = vmul.f32 %v2604_v52, %v2604_v52  ;;  %v806_v49 = vmul.f32 %v2406_v10, %v2406_v10  ;;  %v2622_v44 = vpop.f32.mrb[24].mxu1 }
 0x115   :  { %4529 = vst [vmem:[#allocation19_spill] sm:$0xff] %v2606_v5  ;;  %v893_v9 = vsel %vm639_vm1, %v802_v38, 0.0  ;;  %v697_v57 = vsel %vm639_vm1, %v2606_v5, 0.0  ;;  %v803_v24 = vmul.f32 %v2606_v5, %v2606_v5  ;;  %v2624_v27 = vpop.f32.mrb[25].mxu1 }
 0x116   :  { %v894_v31 = vadd.f32 %v893_v9, %v892_v28  ;;  %v698_v17 = vadd.f32 %v697_v57, %v696_v59  ;;  %v897_v28 = vsel %vm639_vm1, %v804_v15, 0.0  ;;  %v701_v59 = vsel %vm639_vm1, %v2604_v52, 0.0  ;;  %v2631_v57 = vpop.f32.mrb[26].mxu1 }
 0x117   :  { %v895_v41 = vsel %vm639_vm1, %v803_v24, 0.0  ;;  %v703_v9 = vsel %vm639_vm1, %v2406_v10, 0.0  ;;  %4530 = vst [vmem:[#allocation20_spill] sm:$0xff] %v2631_v57  ;;  %v2633_v5 = vpop.f32.mrb[27].mxu1  ;;  %v899_v4 = vsel %vm639_vm1, %v805_v32, 0.0  ;;  %v705_v10 = vsel %vm639_vm1, %v2417_v18, 0.0 }
 0x118   :  { %v700_v38 = vadd.f32 %v699_v63, %v698_v17  ;;  %v896_v1 = vadd.f32 %v895_v41, %v894_v31  ;;  %v901_v17 = vsel %vm639_vm1, %v806_v49, 0.0  ;;  %v807_v63 = vmul.f32 %v2417_v18, %v2417_v18 }
 0x119   :  { %v808_v41 = vmul.f32 %v2404_v7, %v2404_v7  ;;  %v809_v32 = vmul.f32 %v2413_v14, %v2413_v14 }
 0x11a   :  { %v898_v24 = vadd.f32 %v897_v28, %v896_v1  ;;  %v702_v29 = vadd.f32 %v701_v59, %v700_v38  ;;  %v707_v38 = vsel %vm639_vm1, %v2404_v7, 0.0  ;;  %v903_v49 = vsel %vm639_vm1, %v807_v63, 0.0 }
 0x11b   :  { %v907_v18 = vsel %vm639_vm1, %v809_v32, 0.0  ;;  %v813_v32 = vmul.f32 %v2449_v46, %v2449_v46 }
 0x11c   :  { %v704_v15 = vadd.f32 %v703_v9, %v702_v29  ;;  %v900_v31 = vadd.f32 %v899_v4, %v898_v24  ;;  %v810_v29 = vmul.f32 %v2442_v42, %v2442_v42  ;;  %v2650_v4 = vpop.f32.mrb[28].mxu1  ;;  %v905_v24 = vsel %vm639_vm1, %v808_v41, 0.0 }
 0x11d   :  { %4531 = vst [vmem:[#allocation21_spill] sm:$0xff] %v2650_v4  ;;  %v2652_v9 = vpop.f32.mrb[29].mxu1 }
 0x11e   :  { %v902_v52 = vadd.f32 %v901_v17, %v900_v31  ;;  %v706_v1 = vadd.f32 %v705_v10, %v704_v15  ;;  %4532 = vst [vmem:[#allocation22_spill] sm:$0xff] %v2652_v9  ;;  %v709_v10 = vsel %vm639_vm1, %v2413_v14, 0.0  ;;  %v711_v17 = vsel %vm639_vm1, %v2442_v42, 0.0  ;;  %v2659_v15 = vpop.f32.mrb[30].mxu1 }
 0x11f   :  { %4533 = vst [vmem:[#allocation23_spill] sm:$0xff] %v2659_v15  ;;  %v2661_v7 = vpop.f32.mrb[31].mxu1  ;;  %v713_v42 = vsel %vm639_vm1, %v2453_v50, 0.0 }
 0x120   :  { %v708_v28 = vadd.f32 %v707_v38, %v706_v1  ;;  %v904_v59 = vadd.f32 %v903_v49, %v902_v52  ;;  %4534 = vst [vmem:[#allocation24_spill] sm:$0xff] %v2661_v7  ;;  %v909_v52 = vsel %vm639_vm1, %v810_v29, 0.0  ;;  %v811_v1 = vmul.f32 %v2453_v50, %v2453_v50 }
 0x121   :  { %v812_v49 = vmul.f32 %v2440_v39, %v2440_v39 }
 0x122   :  { %v906_v63 = vadd.f32 %v905_v24, %v904_v59  ;;  %v710_v31 = vadd.f32 %v709_v10, %v708_v28  ;;  %v715_v28 = vsel %vm639_vm1, %v2440_v39, 0.0  ;;  %v911_v29 = vsel %vm639_vm1, %v811_v1, 0.0 }
 0x123   :  { %v814_v24 = vmul.f32 %v2478_v12, %v2478_v12  ;;  %v815_v1 = vmul.f32 %v2489_v26, %v2489_v26 }
 0x124   :  { %v712_v41 = vadd.f32 %v711_v17, %v710_v31  ;;  %v908_v38 = vadd.f32 %v907_v18, %v906_v63  ;;  %v913_v17 = vsel %vm639_vm1, %v812_v49, 0.0  ;;  %v717_v63 = vsel %vm639_vm1, %v2449_v46, 0.0 }
 0x125   :  { %v721_v49 = vsel %vm639_vm1, %v2489_v26, 0.0 }
 0x126   :  { %v910_v14 = vadd.f32 %v909_v52, %v908_v38  ;;  %v714_v59 = vadd.f32 %v713_v42, %v712_v41  ;;  %v719_v42 = vsel %vm639_vm1, %v2478_v12, 0.0  ;;  %v915_v41 = vsel %vm639_vm1, %v813_v32, 0.0 }
 0x127   :  { %v917_v38 = vsel %vm639_vm1, %v814_v24, 0.0  ;;  %v817_v32 = vmul.f32 %v2485_v20, %v2485_v20  ;;  %v919_v24 = vsel %vm639_vm1, %v815_v1, 0.0  ;;  %v819_v1 = vmul.f32 %v2525_v6, %v2525_v6 }
 0x128   :  { %v716_v18 = vadd.f32 %v715_v28, %v714_v59  ;;  %v912_v10 = vadd.f32 %v911_v29, %v910_v14  ;;  %v816_v14 = vmul.f32 %v2476_v8, %v2476_v8 }
 0x12a   :  { %v914_v31 = vadd.f32 %v913_v17, %v912_v10  ;;  %v718_v52 = vadd.f32 %v717_v63, %v716_v18  ;;  %v723_v18 = vsel %vm639_vm1, %v2476_v8, 0.0  ;;  %v818_v10 = vmul.f32 %v2514_v62, %v2514_v62 }
 0x12c   :  { %v720_v39 = vadd.f32 %v719_v42, %v718_v52  ;;  %v916_v59 = vadd.f32 %v915_v41, %v914_v31  ;;  %v921_v42 = vsel %vm639_vm1, %v816_v14, 0.0  ;;  %v725_v31 = vsel %vm639_vm1, %v2485_v20, 0.0 }
 0x12d   :  { %v820_v14 = vmul.f32 %v2512_v55, %v2512_v55 }
 0x12e   :  { %v918_v28 = vadd.f32 %v917_v38, %v916_v59  ;;  %v722_v29 = vadd.f32 %v721_v49, %v720_v39  ;;  %v727_v39 = vsel %vm639_vm1, %v2514_v62, 0.0  ;;  %v923_v38 = vsel %vm639_vm1, %v817_v32, 0.0 }
 0x12f   :  { %v925_v59 = vsel %vm639_vm1, %v818_v10, 0.0  ;;  %v821_v32 = vmul.f32 %v2521_v2, %v2521_v2  ;;  %v927_v10 = vsel %vm639_vm1, %v819_v1, 0.0  ;;  %v823_v1 = vmul.f32 %v2561_v11, %v2561_v11 }
 0x130   :  { %v724_v17 = vadd.f32 %v723_v18, %v722_v29  ;;  %v920_v63 = vadd.f32 %v919_v24, %v918_v28  ;;  %v729_v28 = vsel %vm639_vm1, %v2525_v6, 0.0 }
 0x132   :  { %v922_v52 = vadd.f32 %v921_v42, %v920_v63  ;;  %v726_v41 = vadd.f32 %v725_v31, %v724_v17  ;;  %v731_v17 = vsel %vm639_vm1, %v2512_v55, 0.0  ;;  %v822_v63 = vmul.f32 %v2550_v54, %v2550_v54 }
 0x134   :  { %v728_v49 = vadd.f32 %v727_v39, %v726_v41  ;;  %v924_v29 = vadd.f32 %v923_v38, %v922_v52  ;;  %v929_v39 = vsel %vm639_vm1, %v820_v14, 0.0  ;;  %v733_v52 = vsel %vm639_vm1, %v2521_v2, 0.0 }
 0x135   :  { %v735_v41 = vsel %vm639_vm1, %v2550_v54, 0.0  ;;  %v824_v14 = vmul.f32 %v2548_v47, %v2548_v47 }
 0x136   :  { %v926_v18 = vadd.f32 %v925_v59, %v924_v29  ;;  %v730_v24 = vadd.f32 %v729_v28, %v728_v49  ;;  %v931_v49 = vsel %vm639_vm1, %v821_v32, 0.0  ;;  %v933_v29 = vsel %vm639_vm1, %v822_v63, 0.0 }
 0x137   :  { %v825_v32 = vmul.f32 %v2557_v0, %v2557_v0  ;;  %v935_v63 = vsel %vm639_vm1, %v823_v1, 0.0  ;;  %v827_v1 = vmul.f32 %v2597_v43, %v2597_v43 }
 0x138   :  { %v732_v42 = vadd.f32 %v731_v17, %v730_v24  ;;  %v928_v31 = vadd.f32 %v927_v10, %v926_v18  ;;  %v737_v18 = vsel %vm639_vm1, %v2561_v11, 0.0 }
 0x13a   :  { %v930_v38 = vadd.f32 %v929_v39, %v928_v31  ;;  %v734_v59 = vadd.f32 %v733_v52, %v732_v42  ;;  %v739_v42 = vsel %vm639_vm1, %v2548_v47, 0.0  ;;  %v826_v31 = vmul.f32 %v2586_v21, %v2586_v21 }
 0x13c   :  { %v736_v28 = vadd.f32 %v735_v41, %v734_v59  ;;  %v932_v24 = vadd.f32 %v931_v49, %v930_v38  ;;  %v937_v41 = vsel %vm639_vm1, %v824_v14, 0.0  ;;  %v741_v38 = vsel %vm639_vm1, %v2557_v0, 0.0 }
 0x13d   :  { %v743_v59 = vsel %vm639_vm1, %v2586_v21, 0.0  ;;  %v828_v14 = vmul.f32 %v2584_v3, %v2584_v3 }
 0x13e   :  { %v934_v17 = vadd.f32 %v933_v29, %v932_v24  ;;  %v738_v10 = vadd.f32 %v737_v18, %v736_v28  ;;  %v939_v28 = vsel %vm639_vm1, %v825_v32, 0.0  ;;  %v941_v24 = vsel %vm639_vm1, %v826_v31, 0.0 }
 0x13f   :  { %v829_v32 = vmul.f32 %v2593_v40, %v2593_v40  ;;  %v943_v31 = vsel %vm639_vm1, %v827_v1, 0.0  ;;  %v831_v1 = vmul.f32 %v2633_v5, %v2633_v5 }
 0x140   :  { %v740_v39 = vadd.f32 %v739_v42, %v738_v10  ;;  %v936_v52 = vadd.f32 %v935_v63, %v934_v17  ;;  %v745_v17 = vsel %vm639_vm1, %v2597_v43, 0.0 }
 0x142   :  { %v938_v49 = vadd.f32 %v937_v41, %v936_v52  ;;  %v742_v29 = vadd.f32 %v741_v38, %v740_v39  ;;  %v747_v39 = vsel %vm639_vm1, %v2584_v3, 0.0  ;;  %v830_v52 = vmul.f32 %v2624_v27, %v2624_v27 }
 0x144   :  { %v744_v18 = vadd.f32 %v743_v59, %v742_v29  ;;  %v940_v10 = vadd.f32 %v939_v28, %v938_v49  ;;  %v945_v59 = vsel %vm639_vm1, %v828_v14, 0.0  ;;  %v749_v49 = vsel %vm639_vm1, %v2593_v40, 0.0 }
 0x145   :  { %v751_v29 = vsel %vm639_vm1, %v2624_v27, 0.0  ;;  %v832_v14 = vmul.f32 %v2622_v44, %v2622_v44 }
 0x146   :  { %v942_v42 = vadd.f32 %v941_v24, %v940_v10  ;;  %v746_v63 = vadd.f32 %v745_v17, %v744_v18  ;;  %v947_v18 = vsel %vm639_vm1, %v829_v32, 0.0  ;;  %v949_v10 = vsel %vm639_vm1, %v830_v52, 0.0 }
 0x147   :  { %v833_v32 = vmul.f32 %v2631_v57, %v2631_v57  ;;  %v951_v52 = vsel %vm639_vm1, %v831_v1, 0.0  ;;  %v835_v1 = vmul.f32 %v2661_v7, %v2661_v7 }
 0x148   :  { %v748_v41 = vadd.f32 %v747_v39, %v746_v63  ;;  %v944_v38 = vadd.f32 %v943_v31, %v942_v42  ;;  %v753_v42 = vsel %vm639_vm1, %v2633_v5, 0.0 }
 0x14a   :  { %v946_v28 = vadd.f32 %v945_v59, %v944_v38  ;;  %v750_v24 = vadd.f32 %v749_v49, %v748_v41  ;;  %v755_v41 = vsel %vm639_vm1, %v2622_v44, 0.0  ;;  %v834_v38 = vmul.f32 %v2652_v9, %v2652_v9 }
 0x14c   :  { %v752_v17 = vadd.f32 %v751_v29, %v750_v24  ;;  %v948_v63 = vadd.f32 %v947_v18, %v946_v28  ;;  %v953_v29 = vsel %vm639_vm1, %v832_v14, 0.0  ;;  %v757_v28 = vsel %vm639_vm1, %v2631_v57, 0.0 }
 0x14d   :  { %v759_v24 = vsel %vm639_vm1, %v2652_v9, 0.0  ;;  %v836_v14 = vmul.f32 %v2650_v4, %v2650_v4 }
 0x14e   :  { %v950_v39 = vadd.f32 %v949_v10, %v948_v63  ;;  %v754_v31 = vadd.f32 %v753_v42, %v752_v17  ;;  %v955_v17 = vsel %vm639_vm1, %v833_v32, 0.0  ;;  %v957_v63 = vsel %vm639_vm1, %v834_v38, 0.0 }
 0x14f   :  { %v837_v32 = vmul.f32 %v2659_v15, %v2659_v15  ;;  %v959_v38 = vsel %vm639_vm1, %v835_v1, 0.0 }
 0x150   :  { %v756_v59 = vadd.f32 %v755_v41, %v754_v31  ;;  %v952_v49 = vadd.f32 %v951_v52, %v950_v39  ;;  %v761_v39 = vsel %vm639_vm1, %v2661_v7, 0.0 }
 0x152   :  { %v954_v18 = vadd.f32 %v953_v29, %v952_v49  ;;  %v758_v10 = vadd.f32 %v757_v28, %v756_v59  ;;  %v763_v59 = vsel %vm639_vm1, %v2650_v4, 0.0  ;;  %v961_v28 = vsel %vm639_vm1, %v836_v14, 0.0 }
 0x154   :  { %v760_v42 = vadd.f32 %v759_v24, %v758_v10  ;;  %v956_v31 = vadd.f32 %v955_v17, %v954_v18  ;;  %v765_v24 = vsel %vm639_vm1, %v2659_v15, 0.0  ;;  %v963_v17 = vsel %vm639_vm1, %v837_v32, 0.0 }
 0x155   :  { %v983_v15 = vlaneseq }
 0x156   :  { %v958_v41 = vadd.f32 %v957_v63, %v956_v31  ;;  %v762_v52 = vadd.f32 %v761_v39, %v760_v42 }
 0x158   :  { %v764_v49 = vadd.f32 %v763_v59, %v762_v52  ;;  %v960_v29 = vadd.f32 %v959_v38, %v958_v41 }
 0x15a   :  { %v766_v18 = vadd.f32 %v765_v24, %v764_v49  ;;  %v962_v10 = vadd.f32 %v961_v28, %v960_v29  ;;  %v2804_v28 = vshrl.u32 %v983_v15, 7  ;;  %v2824_v15 = vld [vmem:[%s4401_s2 + $0x18] sm:$0xff]  }
 0x15b   :  { %4538 = vst [vmem:[#allocation28_spill] sm:$0xff] %v2824_v15  ;;  %v4577_v15 = vld [vmem:[#allocation16_spill] sm:$0xff] }
 0x15c   :  { %v767_v63 = vrot.slane %v766_v18, 4  ;;  %v964_v42 = vadd.f32 %v963_v17, %v962_v10  ;;  %v2911_v10 = vld [vmem:[%s4401_s2 + $0x80] sm:$0xff]  }
 0x15d   :  { %4551 = vst [vmem:[#allocation41_spill] sm:$0xff] %v2911_v10 }
 0x15e   :  { %v768_v31 = vadd.f32 %v767_v63, %v766_v18  ;;  %v965_v39 = vrot.slane %v964_v42, 4  ;;  %v2829_v18 = vld [vmem:[%s4401_s2 + $0x20] sm:$0xff]   ;;  %v2897_v63 = vld [vmem:[%s4401_s2 + $0x70] sm:$0xff]  }
 0x15f   :  { %4539 = vst [vmem:[#allocation29_spill] sm:$0xff] %v2829_v18  ;;  %4549 = vst [vmem:[#allocation39_spill] sm:$0xff] %v2897_v63  ;;  %v2965_v63 = vld [vmem:[%s4401_s2 + $0xb8] sm:$0xff]   ;;  %v2988_v18 = vld [vmem:[%s4401_s2 + $0xd0] sm:$0xff]  }
 0x160   :  { %v769_v4 = vrot.slane %v768_v31, 2  ;;  %v966_v7 = vadd.f32 %v965_v39, %v964_v42  ;;  %v2837_v42 = vld [vmem:[%s4401_s2 + $0x28] sm:$0xff]   ;;  %4558 = vst [vmem:[#allocation48_spill] sm:$0xff] %v2965_v63  ;;  %4561 = vst [vmem:[#allocation51_spill] sm:$0xff] %v2988_v18  ;;  %v4572_v18 = vld [vmem:[#allocation14_spill] sm:$0xff] }
 0x161   :  { %4540 = vst [vmem:[#allocation30_spill] sm:$0xff] %v2837_v42  ;;  %v2948_v39 = vld [vmem:[%s4401_s2 + $0xa8] sm:$0xff]   ;;  %v3001_v42 = vld [vmem:[%s4401_s2 + $0xe0] sm:$0xff]  }
 0x162   :  { %v770_v9 = vadd.f32 %v769_v4, %v768_v31  ;;  %v967_v57 = vrot.slane %v966_v7, 2  ;;  %v2809_v4 = vld [vmem:[%s4401_s2] sm:$0xff]   ;;  %v2842_v31 = vld [vmem:[%s4401_s2 + $0x30] sm:$0xff]   ;;  %4556 = vst [vmem:[#allocation46_spill] sm:$0xff] %v2948_v39  ;;  %4563 = vst [vmem:[#allocation53_spill] sm:$0xff] %v3001_v42 }
 0x163   :  { %4535 = vst [vmem:[#allocation25_spill] sm:$0xff] %v2809_v4  ;;  %4541 = vst [vmem:[#allocation31_spill] sm:$0xff] %v2842_v31  ;;  %v4567_v39 = vld [vmem:[#allocation8_spill] sm:$0xff]  ;;  %v4570_v42 = vld [vmem:[#allocation15_spill] sm:$0xff] }
 0x164   :  { %v771_v1 = vrot.slane %v770_v9, 1  ;;  %v968_v52 = vadd.f32 %v967_v57, %v966_v7  ;;  %v2814_v7 = vld [vmem:[%s4401_s2 + $0x8] sm:$0xff]   ;;  %v2819_v57 = vld [vmem:[%s4401_s2 + $0x10] sm:$0xff]   ;;  %v4582_v4 = vld [vmem:[#allocation5_spill] sm:$0xff] }
 0x165   :  { %4536 = vst [vmem:[#allocation26_spill] sm:$0xff] %v2814_v7  ;;  %4537 = vst [vmem:[#allocation27_spill] sm:$0xff] %v2819_v57  ;;  %v4579_v57 = vld [vmem:[#allocation18_spill] sm:$0xff]  ;;  %v4580_v7 = vld [vmem:[#allocation3_spill] sm:$0xff] }
 0x166   :  { %v772_v41 = vadd.f32 %v771_v1, %v770_v9  ;;  %v969_v59 = vrot.slane %v968_v52, 1  ;;  %v2883_v1 = vld [vmem:[%s4401_s2 + $0x60] sm:$0xff]  }
 0x167   :  { %4547 = vst [vmem:[#allocation37_spill] sm:$0xff] %v2883_v1  ;;  %v2996_v1 = vld [vmem:[%s4401_s2 + $0xd8] sm:$0xff]  }
 0x168   :  { %v2800_v14 = vmul.f32 0.001953125, %v772_v41  ;;  %v970_v38 = vadd.f32 %v969_v59, %v968_v52  ;;  %v2850_v41 = vld [vmem:[%s4401_s2 + $0x38] sm:$0xff]   ;;  %v2855_v59 = vld [vmem:[%s4401_s2 + $0x40] sm:$0xff]   ;;  %4562 = vst [vmem:[#allocation52_spill] sm:$0xff] %v2996_v1  ;;  %v4571_v1 = vld [vmem:[#allocation12_spill] sm:$0xff] }
 0x169   :  { %4542 = vst [vmem:[#allocation32_spill] sm:$0xff] %v2850_v41  ;;  %4543 = vst [vmem:[#allocation33_spill] sm:$0xff] %v2855_v59  ;;  %v2934_v52 = vld [vmem:[%s4401_s2 + $0x98] sm:$0xff]   ;;  %v2974_v41 = vld [vmem:[%s4401_s2 + $0xc0] sm:$0xff]   ;;  %v4564_v59 = vsub.s32 0, %v2804_v28 }
 0x16a   :  { %v971_v49 = vmul.f32 0.001953125, %v970_v38  ;;  %v972_v32 = vmul.f32 %v2800_v14, %v2800_v14  ;;  %v2920_v38 = vld [vmem:[%s4401_s2 + $0x88] sm:$0xff]   ;;  %4554 = vst [vmem:[#allocation44_spill] sm:$0xff] %v2934_v52  ;;  %4559 = vst [vmem:[#allocation49_spill] sm:$0xff] %v2974_v41 }
 0x16b   :  { %4552 = vst [vmem:[#allocation42_spill] sm:$0xff] %v2920_v38  ;;  %v4575_v41 = vld [vmem:[#allocation19_spill] sm:$0xff] }
 0x16c   :  { %v973_v29 = vsub.f32 %v971_v49, %v972_v32  ;;  %v2892_v32 = vld [vmem:[%s4401_s2 + $0x68] sm:$0xff]   ;;  %v2906_v49 = vld [vmem:[%s4401_s2 + $0x78] sm:$0xff]  }
 0x16d   :  { %4548 = vst [vmem:[#allocation38_spill] sm:$0xff] %v2892_v32  ;;  %4550 = vst [vmem:[#allocation40_spill] sm:$0xff] %v2906_v49  ;;  %v2953_v32 = vld [vmem:[%s4401_s2 + $0xb0] sm:$0xff]   ;;  %v2979_v49 = vld [vmem:[%s4401_s2 + $0xc8] sm:$0xff]  }
 0x16e   :  { %v974_v24 = vmax.f32 %v973_v29, 0.0  ;;  %v2878_v29 = vld [vmem:[%s4401_s2 + $0x58] sm:$0xff]   ;;  %4557 = vst [vmem:[#allocation47_spill] sm:$0xff] %v2953_v32  ;;  %4560 = vst [vmem:[#allocation50_spill] sm:$0xff] %v2979_v49  ;;  %v4568_v32 = vld [vmem:[#allocation10_spill] sm:$0xff] }
 0x16f   :  { %4546 = vst [vmem:[#allocation36_spill] sm:$0xff] %v2878_v29  ;;  %v2939_v29 = vld [vmem:[%s4401_s2 + $0xa0] sm:$0xff]   ;;  %v4573_v49 = vld [vmem:[#allocation17_spill] sm:$0xff] }
 0x170   :  { %v976_v9 = vadd.f32 1e-05, %v974_v24  ;;  %v2864_v24 = vld [vmem:[%s4401_s2 + $0x48] sm:$0xff]   ;;  %4555 = vst [vmem:[#allocation45_spill] sm:$0xff] %v2939_v29 }
 0x171   :  { %4544 = vst [vmem:[#allocation34_spill] sm:$0xff] %v2864_v24  ;;  %v2925_v24 = vld [vmem:[%s4401_s2 + $0x90] sm:$0xff]   ;;  %v4566_v29 = vld [vmem:[#allocation11_spill] sm:$0xff] }
 0x172   :  { %2189 = vrsqrt.f32 %v976_v9  ;;  %v2869_v9 = vld [vmem:[%s4401_s2 + $0x50] sm:$0xff]   ;;  %4553 = vst [vmem:[#allocation43_spill] sm:$0xff] %v2925_v24 }
 0x173   :  { %4545 = vst [vmem:[#allocation35_spill] sm:$0xff] %v2869_v9  ;;  %v975_v9 = vld [vmem:[%s4402_s3] sm:$0x1] }
 0x17c   :  { %v2190_v17 = vpop.eup %2189 }
 0x17d   :  { %v978_v52 = vmul.f32 %v2190_v17, %v975_v9  ;;  %v3006_v17 = vld [vmem:[%s4403_s4] sm:$0x1]  ;;  %v4565_v9 = vld [vmem:[#allocation9_spill] sm:$0xff] }
 0x17f   :  { %v3013_v31 = vmul.f32 %v978_v52, %v2800_v14  ;;  %v3017_v63 = vrot.slane %v978_v52, %v4564_v59  ;;  %v4569_v14 = vld [vmem:[#allocation13_spill] sm:$0xff] }
 0x181   :  { %v3029_v24 = vmul.f32 %v3017_v63, %v2354_v34  ;;  %v3033_v52 = vmul.f32 %v3017_v63, %v2360_v37  ;;  %v3037_v59 = vmul.f32 %v2352_v33, %v3017_v63  ;;  %v3041_v38 = vmul.f32 %v2358_v36, %v3017_v63 }
 0x182   :  { %v3045_v10 = vmul.f32 %v3017_v63, %v2381_v53  ;;  %v3049_v34 = vmul.f32 %v3017_v63, %v2390_v61  ;;  %v3053_v37 = vmul.f32 %v2379_v51, %v3017_v63  ;;  %v3057_v33 = vmul.f32 %v2388_v58, %v3017_v63 }
 0x183   :  { %v3061_v36 = vmul.f32 %v3017_v63, %v2415_v16  ;;  %v3065_v53 = vmul.f32 %v3017_v63, %v2426_v25  ;;  %v3069_v61 = vmul.f32 %v2411_v13, %v3017_v63  ;;  %v3073_v51 = vmul.f32 %v2424_v22, %v3017_v63 }
 0x184   :  { %v3077_v58 = vmul.f32 %v3017_v63, %v2451_v48  ;;  %v3081_v16 = vmul.f32 %v3017_v63, %v2462_v60  ;;  %v3085_v25 = vmul.f32 %v2447_v45, %v3017_v63  ;;  %v3089_v13 = vmul.f32 %v2460_v56, %v3017_v63 }
 0x185   :  { %v3093_v22 = vmul.f32 %v3017_v63, %v2487_v23  ;;  %v3097_v48 = vmul.f32 %v3017_v63, %v2498_v35  ;;  %v3101_v60 = vmul.f32 %v2483_v19, %v3017_v63  ;;  %v3105_v45 = vmul.f32 %v2496_v30, %v3017_v63 }
 0x186   :  { %v3109_v56 = vmul.f32 %v3017_v63, %v4565_v9  ;;  %v3113_v23 = vmul.f32 %v3017_v63, %v4566_v29  ;;  %v3117_v35 = vmul.f32 %v4567_v39, %v3017_v63  ;;  %v3121_v19 = vmul.f32 %v4568_v32, %v3017_v63 }
 0x187   :  { %v3125_v30 = vmul.f32 %v3017_v63, %v4569_v14  ;;  %v3129_v9 = vmul.f32 %v3017_v63, %v4570_v42  ;;  %v3133_v29 = vmul.f32 %v4571_v1, %v3017_v63  ;;  %v3137_v39 = vmul.f32 %v4572_v18, %v3017_v63 }
 0x188   :  { %v3141_v32 = vmul.f32 %v3017_v63, %v4573_v49  ;;  %v3145_v14 = vmul.f32 %v3017_v63, %v4575_v41  ;;  %v3149_v42 = vmul.f32 %v4577_v15, %v3017_v63  ;;  %v3153_v1 = vmul.f32 %v4579_v57, %v3017_v63 }
 0x189   :  { %v3157_v18 = vmul.f32 %v3017_v63, %v4580_v7  ;;  %v3161_v49 = vmul.f32 %v3017_v63, %v4582_v4  ;;  %v3177_v7 = vmul.f32 %v3017_v63, %v2453_v50  ;;  %v3197_v50 = vmul.f32 %v2476_v8, %v3017_v63 }
 0x18a   :  { %4574 = vst [vmem:[#allocation9_spill] sm:$0xff] %v3141_v32  ;;  %4576 = vst [vmem:[#allocation11_spill] sm:$0xff] %v3145_v14  ;;  %v4583_v32 = vld [vmem:[#allocation2_spill] sm:$0xff]  ;;  %v4584_v14 = vld [vmem:[#allocation4_spill] sm:$0xff]  ;;  %v3217_v8 = vmul.f32 %v2521_v2, %v3017_v63  ;;  %v3237_v2 = vmul.f32 %v3017_v63, %v2586_v21  ;;  %v3258_v21 = vmul.f32 %v3017_v63, %v2624_v27 }
 0x18b   :  { %4578 = vst [vmem:[#allocation8_spill] sm:$0xff] %v3149_v42  ;;  %4581 = vst [vmem:[#allocation10_spill] sm:$0xff] %v3157_v18  ;;  %v3165_v41 = vmul.f32 %v4583_v32, %v3017_v63  ;;  %v3169_v15 = vmul.f32 %v4584_v14, %v3017_v63  ;;  %v4585_v42 = vld [vmem:[#allocation7_spill] sm:$0xff]  ;;  %v4586_v18 = vld [vmem:[#allocation6_spill] sm:$0xff]  ;;  %v3185_v32 = vmul.f32 %v2449_v46, %v3017_v63 }
 0x18c   :  { %v3173_v57 = vmul.f32 %v3017_v63, %v4585_v42  ;;  %v3181_v4 = vmul.f32 %v4586_v18, %v3017_v63  ;;  %v3189_v14 = vmul.f32 %v3017_v63, %v2478_v12  ;;  %v3193_v42 = vmul.f32 %v3017_v63, %v2489_v26  ;;  %4589 = vst [vmem:[#allocation12_spill] sm:$0xff] %v3237_v2  ;;  %v4599_v27 = vld [vmem:[#allocation20_spill] sm:$0xff]  ;;  %v4606_v2 = vld [vmem:[#allocation23_spill] sm:$0xff] }
 0x18d   :  { %v3201_v18 = vmul.f32 %v2485_v20, %v3017_v63  ;;  %v3205_v46 = vmul.f32 %v3017_v63, %v2514_v62  ;;  %v3209_v12 = vmul.f32 %v3017_v63, %v2525_v6  ;;  %v3213_v26 = vmul.f32 %v2512_v55, %v3017_v63  ;;  %4594 = vst [vmem:[#allocation18_spill] sm:$0xff] %v3258_v21 }
 0x18e   :  { %v3221_v20 = vmul.f32 %v3017_v63, %v2550_v54  ;;  %v3225_v62 = vmul.f32 %v3017_v63, %v2561_v11  ;;  %v3229_v6 = vmul.f32 %v2548_v47, %v3017_v63  ;;  %v3233_v55 = vmul.f32 %v2557_v0, %v3017_v63  ;;  %v3250_v47 = vld [vmem:[%s4401_s2 + $0xe8] sm:$0xff]  }
 0x18f   :  { %v3241_v54 = vmul.f32 %v3017_v63, %v2597_v43  ;;  %v3245_v11 = vmul.f32 %v2584_v3, %v3017_v63  ;;  %4592 = vst [vmem:[#allocation19_spill] sm:$0xff] %v3250_v47  ;;  %v3254_v0 = vmul.f32 %v2593_v40, %v3017_v63  ;;  %v3262_v43 = vmul.f32 %v3017_v63, %v2633_v5  ;;  %v3276_v40 = vld [vmem:[%s4401_s2 + $0xf8] sm:$0xff]   ;;  %v4601_v5 = vld [vmem:[#allocation22_spill] sm:$0xff] }
 0x190   :  { %4587 = vst [vmem:[#allocation13_spill] sm:$0xff] %v3229_v6  ;;  %4588 = vst [vmem:[#allocation15_spill] sm:$0xff] %v3233_v55  ;;  %v3266_v3 = vmul.f32 %v2622_v44, %v3017_v63  ;;  %v3280_v21 = vmul.f32 %v4599_v27, %v3017_v63  ;;  %v4602_v44 = vld [vmem:[#allocation24_spill] sm:$0xff]  ;;  %v3296_v55 = vmul.f32 %v4606_v2, %v3017_v63  ;;  %v4607_v6 = vsub.s32 0, %v2804_v28 }
 0x191   :  { %4590 = vst [vmem:[#allocation14_spill] sm:$0xff] %v3241_v54  ;;  %4591 = vst [vmem:[#allocation17_spill] sm:$0xff] %v3245_v11  ;;  %v3271_v11 = vld [vmem:[%s4401_s2 + $0xf0] sm:$0xff]   ;;  %v4608_v27 = vsub.f32 %v3006_v17, %v3013_v31 }
 0x192   :  { %4593 = vst [vmem:[#allocation16_spill] sm:$0xff] %v3254_v0  ;;  %4595 = vst [vmem:[#allocation3_spill] sm:$0xff] %v3262_v43  ;;  %v3284_v43 = vmul.f32 %v3017_v63, %v4601_v5  ;;  %v4604_v0 = vld [vmem:[#allocation21_spill] sm:$0xff] }
 0x193   :  { %4596 = vst [vmem:[#allocation5_spill] sm:$0xff] %v3266_v3  ;;  %4597 = vst [vmem:[#allocation2_spill] sm:$0xff] %v3271_v11  ;;  %v3288_v3 = vmul.f32 %v3017_v63, %v4602_v44  ;;  %v3292_v54 = vmul.f32 %v4604_v0, %v3017_v63  ;;  %v4610_v63 = vld [vmem:[#allocation11_spill] sm:$0xff]  ;;  %v4612_v0 = vld [vmem:[#allocation10_spill] sm:$0xff] }
 0x194   :  { %4598 = vst [vmem:[#allocation4_spill] sm:$0xff] %v3276_v40  ;;  %4600 = vst [vmem:[#allocation7_spill] sm:$0xff] %v3280_v21  ;;  %v3303_v21 = vrot.slane %v4608_v27, %v4607_v6  ;;  %v4609_v27 = vld [vmem:[#allocation9_spill] sm:$0xff]  ;;  %v4617_v5 = vld [vmem:[#allocation12_spill] sm:$0xff] }
 0x195   :  { %4603 = vst [vmem:[#allocation6_spill] sm:$0xff] %v3288_v3  ;;  %4605 = vst [vmem:[#allocation20_spill] sm:$0xff] %v3292_v54  ;;  %v4611_v54 = vld [vmem:[#allocation8_spill] sm:$0xff] }
 0x196   :  { %v3313_v28 = vadd.f32 %v3303_v21, %v3029_v24  ;;  %v3317_v31 = vadd.f32 %v3303_v21, %v3033_v52  ;;  %v3321_v17 = vadd.f32 %v3303_v21, %v3037_v59  ;;  %v3325_v6 = vadd.f32 %v3303_v21, %v3041_v38 }
 0x197   :  { %v3329_v2 = vadd.f32 %v3303_v21, %v3045_v10  ;;  %v3333_v24 = vadd.f32 %v3303_v21, %v3049_v34  ;;  %v3337_v52 = vadd.f32 %v3303_v21, %v3053_v37  ;;  %v3341_v59 = vadd.f32 %v3303_v21, %v3057_v33  ;;  %v4613_v3 = vld [vmem:[#allocation13_spill] sm:$0xff]  ;;  %v4615_v44 = vld [vmem:[#allocation15_spill] sm:$0xff] }
 0x198   :  { %v3345_v38 = vadd.f32 %v3303_v21, %v3061_v36  ;;  %v3349_v10 = vadd.f32 %v3303_v21, %v3065_v53  ;;  %v3353_v34 = vadd.f32 %v3303_v21, %v3069_v61  ;;  %v3357_v37 = vadd.f32 %v3303_v21, %v3073_v51  ;;  %v4619_v40 = vld [vmem:[#allocation14_spill] sm:$0xff]  ;;  %v4621_v11 = vld [vmem:[#allocation17_spill] sm:$0xff] }
 0x199   :  { %v3361_v33 = vadd.f32 %v3303_v21, %v3077_v58  ;;  %v3365_v36 = vadd.f32 %v3303_v21, %v3081_v16  ;;  %v3369_v53 = vadd.f32 %v3303_v21, %v3085_v25  ;;  %v3373_v61 = vadd.f32 %v3303_v21, %v3089_v13  ;;  %v4622_v47 = vld [vmem:[#allocation16_spill] sm:$0xff] }
 0x19a   :  { %v3377_v51 = vadd.f32 %v3303_v21, %v3093_v22  ;;  %v3381_v58 = vadd.f32 %v3303_v21, %v3097_v48  ;;  %v3385_v16 = vadd.f32 %v3303_v21, %v3101_v60  ;;  %v3389_v25 = vadd.f32 %v3303_v21, %v3105_v45 }
 0x19b   :  { %v3393_v13 = vadd.f32 %v3303_v21, %v3109_v56  ;;  %v3397_v22 = vadd.f32 %v3303_v21, %v3113_v23  ;;  %v3401_v48 = vadd.f32 %v3303_v21, %v3117_v35  ;;  %v3405_v60 = vadd.f32 %v3303_v21, %v3121_v19 }
 0x19c   :  { %v3409_v45 = vadd.f32 %v3303_v21, %v3125_v30  ;;  %v3413_v56 = vadd.f32 %v3303_v21, %v3129_v9  ;;  %v3417_v23 = vadd.f32 %v3303_v21, %v3133_v29  ;;  %v3421_v35 = vadd.f32 %v3303_v21, %v3137_v39 }
 0x19d   :  { %v3425_v19 = vadd.f32 %v3303_v21, %v4609_v27  ;;  %v3429_v30 = vadd.f32 %v3303_v21, %v4610_v63  ;;  %v3433_v9 = vadd.f32 %v3303_v21, %v4611_v54  ;;  %v3437_v29 = vadd.f32 %v3303_v21, %v3153_v1 }
 0x19e   :  { %v3441_v39 = vadd.f32 %v3303_v21, %v4612_v0  ;;  %v3445_v27 = vadd.f32 %v3303_v21, %v3161_v49  ;;  %v3449_v63 = vadd.f32 %v3303_v21, %v3165_v41  ;;  %v3453_v54 = vadd.f32 %v3303_v21, %v3169_v15 }
 0x19f   :  { %v3457_v1 = vadd.f32 %v3303_v21, %v3173_v57  ;;  %v3461_v0 = vadd.f32 %v3303_v21, %v3177_v7  ;;  %v3465_v49 = vadd.f32 %v3303_v21, %v3181_v4  ;;  %v3469_v41 = vadd.f32 %v3303_v21, %v3185_v32 }
 0x1a0   :  { %v3473_v15 = vadd.f32 %v3303_v21, %v3189_v14  ;;  %v3477_v57 = vadd.f32 %v3303_v21, %v3193_v42  ;;  %v3481_v7 = vadd.f32 %v3303_v21, %v3197_v50  ;;  %v3485_v4 = vadd.f32 %v3303_v21, %v3201_v18 }
 0x1a1   :  { %v3489_v32 = vadd.f32 %v3303_v21, %v3205_v46  ;;  %v3493_v14 = vadd.f32 %v3303_v21, %v3209_v12  ;;  %v3497_v42 = vadd.f32 %v3303_v21, %v3213_v26  ;;  %v3501_v50 = vadd.f32 %v3303_v21, %v3217_v8 }
 0x1a2   :  { %v3505_v18 = vadd.f32 %v3303_v21, %v3221_v20  ;;  %v3509_v46 = vadd.f32 %v3303_v21, %v3225_v62  ;;  %v3513_v12 = vadd.f32 %v3303_v21, %v4613_v3  ;;  %v3517_v26 = vadd.f32 %v3303_v21, %v4615_v44 }
 0x1a3   :  { %v3521_v8 = vadd.f32 %v3303_v21, %v4617_v5  ;;  %v3525_v20 = vadd.f32 %v3303_v21, %v4619_v40  ;;  %v3529_v62 = vadd.f32 %v3303_v21, %v4621_v11  ;;  %v3533_v3 = vadd.f32 %v3303_v21, %v4622_v47 }
 0x1a4   :  { %4614 = vst [vmem:[#allocation22_spill] sm:$0xff] %v3513_v12  ;;  %4616 = vst [vmem:[#allocation24_spill] sm:$0xff] %v3517_v26  ;;  %v4624_v12 = vld [vmem:[#allocation18_spill] sm:$0xff]  ;;  %v4626_v26 = vld [vmem:[#allocation3_spill] sm:$0xff]  ;;  %v3553_v47 = vadd.f32 %v3303_v21, %v3284_v43 }
 0x1a5   :  { %4618 = vst [vmem:[#allocation21_spill] sm:$0xff] %v3521_v8  ;;  %4620 = vst [vmem:[#allocation23_spill] sm:$0xff] %v3525_v20  ;;  %v3537_v44 = vadd.f32 %v3303_v21, %v4624_v12  ;;  %v3541_v5 = vadd.f32 %v3303_v21, %v4626_v26  ;;  %v4628_v8 = vld [vmem:[#allocation5_spill] sm:$0xff]  ;;  %v4630_v20 = vld [vmem:[#allocation7_spill] sm:$0xff] }
 0x1a6   :  { %4623 = vst [vmem:[#allocation9_spill] sm:$0xff] %v3533_v3  ;;  %v3545_v40 = vadd.f32 %v3303_v21, %v4628_v8  ;;  %v3549_v11 = vadd.f32 %v3303_v21, %v4630_v20  ;;  %4632 = vst [vmem:[#allocation15_spill] sm:$0xff] %v3553_v47  ;;  %v4633_v3 = vld [vmem:[#allocation6_spill] sm:$0xff]  ;;  %v3565_v8 = vadd.f32 %v3303_v21, %v3296_v55 }
 0x1a7   :  { %4625 = vst [vmem:[#allocation11_spill] sm:$0xff] %v3537_v44  ;;  %4627 = vst [vmem:[#allocation8_spill] sm:$0xff] %v3541_v5  ;;  %v3557_v12 = vadd.f32 %v3303_v21, %v4633_v3  ;;  %v4635_v44 = vld [vmem:[#allocation20_spill] sm:$0xff]  ;;  %v4640_v3 = vld [vmem:[#allocation26_spill] sm:$0xff] }
 0x1a8   :  { %4629 = vst [vmem:[#allocation10_spill] sm:$0xff] %v3545_v40  ;;  %4631 = vst [vmem:[#allocation13_spill] sm:$0xff] %v3549_v11  ;;  %v3561_v26 = vadd.f32 %v3303_v21, %v4635_v44  ;;  %v4637_v40 = vld [vmem:[#allocation25_spill] sm:$0xff]  ;;  %v4642_v44 = vunpack.c.h.bf16 %v4640_v3  ;;  %v4643_v21 = vld [vmem:[#allocation27_spill] sm:$0xff] }
 0x1a9   :  { %4634 = vst [vmem:[#allocation12_spill] sm:$0xff] %v3557_v12  ;;  %4636 = vst [vmem:[#allocation14_spill] sm:$0xff] %v3565_v8  ;;  %v4638_v20 = vunpack.c.l.bf16 %v4637_v40  ;;  %v4639_v43 = vunpack.c.h.bf16 %v4637_v40  ;;  %v4641_v12 = vunpack.c.l.bf16 %v4640_v3  ;;  %v4644_v8 = vunpack.c.l.bf16 %v4643_v21  ;;  %v4649_v3 = vld [vmem:[#allocation29_spill] sm:$0xff] }
 0x1aa   :  { %v3585_v55 = vadd.f32 %v4642_v44, %v3325_v6  ;;  %v4645_v40 = vunpack.c.h.bf16 %v4643_v21  ;;  %v4650_v44 = vunpack.c.l.bf16 %v4649_v3  ;;  %v4652_v21 = vld [vmem:[#allocation30_spill] sm:$0xff] }
 0x1ab   :  { %v3570_v11 = vadd.f32 %v4638_v20, %v3313_v28  ;;  %v3575_v47 = vadd.f32 %v4639_v43, %v3317_v31  ;;  %v3580_v5 = vadd.f32 %v4641_v12, %v3321_v17  ;;  %v3590_v28 = vadd.f32 %v4644_v8, %v3329_v2  ;;  %v4646_v20 = vld [vmem:[#allocation28_spill] sm:$0xff] }
 0x1ac   :  { %v3595_v31 = vadd.f32 %v4645_v40, %v3333_v24  ;;  %v4647_v43 = vunpack.c.l.bf16 %v4646_v20  ;;  %v4648_v12 = vunpack.c.h.bf16 %v4646_v20  ;;  %v3610_v2 = vadd.f32 %v4650_v44, %v3345_v38  ;;  %v4658_v44 = vld [vmem:[#allocation32_spill] sm:$0xff] }
 0x1ad   :  { %v4651_v8 = vunpack.c.h.bf16 %v4649_v3  ;;  %v4653_v40 = vunpack.c.l.bf16 %v4652_v21  ;;  %v4654_v20 = vunpack.c.h.bf16 %v4652_v21  ;;  %v4660_v21 = vunpack.c.h.bf16 %v4658_v44 }
 0x1ae   :  { %v3600_v17 = vadd.f32 %v4647_v43, %v3337_v52  ;;  %v3605_v6 = vadd.f32 %v4648_v12, %v3341_v59  ;;  %v4655_v43 = vld [vmem:[#allocation31_spill] sm:$0xff] }
 0x1af   :  { %v3615_v24 = vadd.f32 %v4651_v8, %v3349_v10  ;;  %v3620_v52 = vadd.f32 %v4653_v40, %v3353_v34  ;;  %v3625_v59 = vadd.f32 %v4654_v20, %v3357_v37  ;;  %v4656_v12 = vunpack.c.l.bf16 %v4655_v43  ;;  %v4661_v40 = vld [vmem:[#allocation33_spill] sm:$0xff] }
 0x1b0   :  { %v4657_v3 = vunpack.c.h.bf16 %v4655_v43  ;;  %v4659_v8 = vunpack.c.l.bf16 %v4658_v44  ;;  %v3645_v37 = vadd.f32 %v4660_v21, %v3373_v61  ;;  %v4662_v20 = vunpack.c.l.bf16 %v4661_v40 }
 0x1b1   :  { %v3630_v38 = vadd.f32 %v4656_v12, %v3361_v33  ;;  %v4663_v43 = vunpack.c.h.bf16 %v4661_v40  ;;  %v4664_v12 = vld [vmem:[#allocation34_spill] sm:$0xff] }
 0x1b2   :  { %v3635_v10 = vadd.f32 %v4657_v3, %v3365_v36  ;;  %v3640_v34 = vadd.f32 %v4659_v8, %v3369_v53  ;;  %v3650_v33 = vadd.f32 %v4662_v20, %v3377_v51  ;;  %v4665_v3 = vunpack.c.l.bf16 %v4664_v12  ;;  %v4667_v8 = vld [vmem:[#allocation35_spill] sm:$0xff]  ;;  %v4670_v20 = vld [vmem:[#allocation36_spill] sm:$0xff] }
 0x1b3   :  { %v3655_v36 = vadd.f32 %v4663_v43, %v3381_v58  ;;  %v4666_v44 = vunpack.c.h.bf16 %v4664_v12  ;;  %v4668_v21 = vunpack.c.l.bf16 %v4667_v8  ;;  %v4669_v40 = vunpack.c.h.bf16 %v4667_v8 }
 0x1b4   :  { %v3660_v53 = vadd.f32 %v4665_v3, %v3385_v16  ;;  %v4671_v43 = vunpack.c.l.bf16 %v4670_v20  ;;  %v4672_v12 = vunpack.c.h.bf16 %v4670_v20  ;;  %v4673_v3 = vld [vmem:[#allocation37_spill] sm:$0xff] }
 0x1b5   :  { %v3665_v61 = vadd.f32 %v4666_v44, %v3389_v25  ;;  %v3670_v51 = vadd.f32 %v4668_v21, %v3393_v13  ;;  %v3675_v58 = vadd.f32 %v4669_v40, %v3397_v22  ;;  %v4674_v44 = vunpack.c.l.bf16 %v4673_v3  ;;  %v4676_v21 = vld [vmem:[#allocation38_spill] sm:$0xff] }
 0x1b6   :  { %v3680_v16 = vadd.f32 %v4671_v43, %v3401_v48  ;;  %v3685_v25 = vadd.f32 %v4672_v12, %v3405_v60  ;;  %v4675_v8 = vunpack.c.h.bf16 %v4673_v3  ;;  %v4677_v40 = vunpack.c.l.bf16 %v4676_v21  ;;  %v4679_v43 = vld [vmem:[#allocation39_spill] sm:$0xff] }
 0x1b7   :  { %v3690_v13 = vadd.f32 %v4674_v44, %v3409_v45  ;;  %v4678_v20 = vunpack.c.h.bf16 %v4676_v21  ;;  %v4680_v12 = vunpack.c.l.bf16 %v4679_v43  ;;  %v4681_v3 = vunpack.c.h.bf16 %v4679_v43  ;;  %v4682_v44 = vld [vmem:[#allocation40_spill] sm:$0xff] }
 0x1b8   :  { %v3695_v22 = vadd.f32 %v4675_v8, %v3413_v56  ;;  %v3700_v48 = vadd.f32 %v4677_v40, %v3417_v23  ;;  %v4683_v8 = vunpack.c.l.bf16 %v4682_v44  ;;  %v4684_v21 = vunpack.c.h.bf16 %v4682_v44  ;;  %v4685_v40 = vld [vmem:[#allocation41_spill] sm:$0xff] }
 0x1b9   :  { %v3705_v60 = vadd.f32 %v4678_v20, %v3421_v35  ;;  %v3710_v45 = vadd.f32 %v4680_v12, %v3425_v19  ;;  %v3715_v56 = vadd.f32 %v4681_v3, %v3429_v30  ;;  %v4686_v20 = vunpack.c.l.bf16 %v4685_v40  ;;  %v4688_v12 = vld [vmem:[#allocation42_spill] sm:$0xff] }
 0x1ba   :  { %v3720_v23 = vadd.f32 %v4683_v8, %v3433_v9  ;;  %v3725_v35 = vadd.f32 %v4684_v21, %v3437_v29  ;;  %v4687_v43 = vunpack.c.h.bf16 %v4685_v40  ;;  %v4689_v3 = vunpack.c.l.bf16 %v4688_v12  ;;  %v4692_v8 = vld [vmem:[#allocation43_spill] sm:$0xff] }
 0x1bb   :  { %v3730_v19 = vadd.f32 %v4686_v20, %v3441_v39  ;;  %v4690_v44 = vunpack.c.h.bf16 %v4688_v12  ;;  %v4693_v21 = vunpack.c.l.bf16 %v4692_v8  ;;  %v4695_v40 = vunpack.c.h.bf16 %v4692_v8  ;;  %v4696_v20 = vld [vmem:[#allocation44_spill] sm:$0xff] }
 0x1bc   :  { %v3735_v30 = vadd.f32 %v4687_v43, %v3445_v27  ;;  %v3740_v9 = vadd.f32 %v4689_v3, %v3449_v63  ;;  %v4697_v43 = vunpack.c.l.bf16 %v4696_v20  ;;  %v4699_v12 = vunpack.c.h.bf16 %v4696_v20  ;;  %v4701_v3 = vld [vmem:[#allocation45_spill] sm:$0xff] }
 0x1bd   :  { %v3745_v29 = vadd.f32 %v4690_v44, %v3453_v54  ;;  %v3750_v39 = vadd.f32 %v4693_v21, %v3457_v1  ;;  %v3755_v27 = vadd.f32 %v4695_v40, %v3461_v0  ;;  %v4702_v44 = vunpack.c.l.bf16 %v4701_v3  ;;  %v4706_v21 = vld [vmem:[#allocation46_spill] sm:$0xff] }
 0x1be   :  { %v3760_v63 = vadd.f32 %v4697_v43, %v3465_v49  ;;  %v3765_v54 = vadd.f32 %v4699_v12, %v3469_v41  ;;  %v4704_v8 = vunpack.c.h.bf16 %v4701_v3  ;;  %v4707_v40 = vunpack.c.l.bf16 %v4706_v21  ;;  %v4711_v43 = vld [vmem:[#allocation47_spill] sm:$0xff] }
 0x1bf   :  { %4691 = vst [vmem:[#allocation17_spill] sm:$0xff] %v3745_v29  ;;  %4694 = vst [vmem:[#allocation16_spill] sm:$0xff] %v3750_v39  ;;  %v3770_v1 = vadd.f32 %v4702_v44, %v3473_v15  ;;  %v4709_v20 = vunpack.c.h.bf16 %v4706_v21  ;;  %v4712_v12 = vunpack.c.l.bf16 %v4711_v43  ;;  %v4714_v3 = vunpack.c.h.bf16 %v4711_v43  ;;  %v4716_v44 = vld [vmem:[#allocation48_spill] sm:$0xff] }
 0x1c0   :  { %4698 = vst [vmem:[#allocation18_spill] sm:$0xff] %v3760_v63  ;;  %4700 = vst [vmem:[#allocation3_spill] sm:$0xff] %v3765_v54  ;;  %v3775_v0 = vadd.f32 %v4704_v8, %v3477_v57  ;;  %v3780_v49 = vadd.f32 %v4707_v40, %v3481_v7  ;;  %v4717_v8 = vunpack.c.l.bf16 %v4716_v44  ;;  %v4719_v21 = vunpack.c.h.bf16 %v4716_v44  ;;  %v4721_v40 = vld [vmem:[#allocation49_spill] sm:$0xff] }
 0x1c1   :  { %4703 = vst [vmem:[#allocation5_spill] sm:$0xff] %v3770_v1  ;;  %v3785_v41 = vadd.f32 %v4709_v20, %v3485_v4  ;;  %v3790_v15 = vadd.f32 %v4712_v12, %v3489_v32  ;;  %v3795_v57 = vadd.f32 %v4714_v3, %v3493_v14  ;;  %v4722_v20 = vunpack.c.l.bf16 %v4721_v40  ;;  %v4725_v12 = vld [vmem:[#allocation22_spill] sm:$0xff] }
 0x1c2   :  { %4705 = vst [vmem:[#allocation7_spill] sm:$0xff] %v3775_v0  ;;  %4708 = vst [vmem:[#allocation6_spill] sm:$0xff] %v3780_v49  ;;  %v3800_v7 = vadd.f32 %v4717_v8, %v3497_v42  ;;  %v3805_v4 = vadd.f32 %v4719_v21, %v3501_v50  ;;  %v4723_v43 = vunpack.c.h.bf16 %v4721_v40  ;;  %v4726_v3 = vld [vmem:[#allocation50_spill] sm:$0xff]  ;;  %v4729_v8 = vld [vmem:[#allocation24_spill] sm:$0xff] }
 0x1c3   :  { %4710 = vst [vmem:[#allocation20_spill] sm:$0xff] %v3785_v41  ;;  %4713 = vst [vmem:[#allocation25_spill] sm:$0xff] %v3790_v15  ;;  %v3810_v32 = vadd.f32 %v4722_v20, %v3505_v18  ;;  %v4730_v44 = vunpack.c.h.bf16 %v4726_v3  ;;  %v4732_v21 = vld [vmem:[#allocation21_spill] sm:$0xff]  ;;  %v4736_v20 = vld [vmem:[#allocation23_spill] sm:$0xff] }
 0x1c4   :  { %4715 = vst [vmem:[#allocation26_spill] sm:$0xff] %v3795_v57  ;;  %4718 = vst [vmem:[#allocation27_spill] sm:$0xff] %v3800_v7  ;;  %v3815_v14 = vadd.f32 %v4723_v43, %v3509_v46  ;;  %v4727_v57 = vunpack.c.l.bf16 %v4726_v3  ;;  %v4739_v43 = vld [vmem:[#allocation52_spill] sm:$0xff] }
 0x1c5   :  { %4720 = vst [vmem:[#allocation28_spill] sm:$0xff] %v3805_v4  ;;  %v3825_v50 = vadd.f32 %v4730_v44, %v4729_v8  ;;  %v4733_v4 = vld [vmem:[#allocation51_spill] sm:$0xff]  ;;  %v4743_v3 = vunpack.c.h.bf16 %v4739_v43 }
 0x1c6   :  { %4724 = vst [vmem:[#allocation29_spill] sm:$0xff] %v3815_v14  ;;  %v3820_v42 = vadd.f32 %v4727_v57, %v4725_v12  ;;  %v4734_v7 = vunpack.c.l.bf16 %v4733_v4  ;;  %v4737_v40 = vunpack.c.h.bf16 %v4733_v4  ;;  %v4740_v14 = vunpack.c.l.bf16 %v4739_v43  ;;  %v4742_v12 = vld [vmem:[#allocation9_spill] sm:$0xff]  ;;  %v4745_v44 = vld [vmem:[#allocation11_spill] sm:$0xff] }
 0x1c7   :  { %4731 = vst [vmem:[#allocation31_spill] sm:$0xff] %v3825_v50  ;;  %v3845_v8 = vadd.f32 %v4743_v3, %v4742_v12  ;;  %v4746_v50 = vld [vmem:[#allocation53_spill] sm:$0xff]  ;;  %v4756_v3 = vld [vmem:[#allocation15_spill] sm:$0xff] }
 0x1c8   :  { %4728 = vst [vmem:[#allocation30_spill] sm:$0xff] %v3820_v42  ;;  %v3830_v18 = vadd.f32 %v4734_v7, %v4732_v21  ;;  %v3835_v46 = vadd.f32 %v4737_v40, %v4736_v20  ;;  %v3840_v57 = vadd.f32 %v4740_v14, %v3529_v62  ;;  %v4747_v42 = vunpack.c.l.bf16 %v4746_v50  ;;  %v4748_v21 = vld [vmem:[#allocation8_spill] sm:$0xff]  ;;  %v4751_v40 = vld [vmem:[#allocation10_spill] sm:$0xff]  ;;  %v4754_v14 = vld [vmem:[#allocation13_spill] sm:$0xff] }
 0x1c9   :  { %4744 = vst [vmem:[#allocation35_spill] sm:$0xff] %v3845_v8  ;;  %v4749_v4 = vunpack.c.h.bf16 %v4746_v50  ;;  %v4757_v8 = vld [vmem:[#allocation2_spill] sm:$0xff] }
 0x1ca   :  { %4735 = vst [vmem:[#allocation32_spill] sm:$0xff] %v3830_v18  ;;  %4738 = vst [vmem:[#allocation33_spill] sm:$0xff] %v3835_v46  ;;  %v3850_v7 = vadd.f32 %v4747_v42, %v4745_v44  ;;  %v4752_v46 = vld [vmem:[#allocation19_spill] sm:$0xff]  ;;  %v4759_v44 = vld [vmem:[#allocation12_spill] sm:$0xff]  ;;  %v4760_v50 = vunpack.c.h.bf16 %v4757_v8 }
 0x1cb   :  { %4741 = vst [vmem:[#allocation34_spill] sm:$0xff] %v3840_v57  ;;  %v3855_v20 = vadd.f32 %v4749_v4, %v4748_v21  ;;  %v4753_v18 = vunpack.c.l.bf16 %v4752_v46  ;;  %v4755_v43 = vunpack.c.h.bf16 %v4752_v46  ;;  %v4758_v57 = vunpack.c.l.bf16 %v4757_v8  ;;  %v4761_v4 = vld [vmem:[#allocation4_spill] sm:$0xff] }
 0x1cc   :  { %v3875_v21 = vadd.f32 %v4760_v50, %v4759_v44  ;;  %v4764_v46 = vunpack.c.h.bf16 %v4761_v4  ;;  %v4767_v39 = vld [vmem:[#allocation28_spill] sm:$0xff]  ;;  %v4776_v44 = vmax.f32 %v3570_v11, 0.0  ;;  %v4781_v11 = vmax.f32 %v3595_v31, 0.0 }
 0x1cd   :  { %4750 = vst [vmem:[#allocation36_spill] sm:$0xff] %v3855_v20  ;;  %v3860_v62 = vadd.f32 %v4753_v18, %v4751_v40  ;;  %v3865_v12 = vadd.f32 %v4755_v43, %v4754_v14  ;;  %v3870_v42 = vadd.f32 %v4758_v57, %v4756_v3  ;;  %v4762_v20 = vunpack.c.l.bf16 %v4761_v4  ;;  %v4763_v40 = vld [vmem:[#allocation14_spill] sm:$0xff]  ;;  %v4768_v63 = vld [vmem:[#allocation29_spill] sm:$0xff] }
 0x1ce   :  { %v3885_v14 = vadd.f32 %v4764_v46, %v4763_v40  ;;  %v4765_v43 = vld [vmem:[#allocation26_spill] sm:$0xff]  ;;  %v4770_v1 = vld [vmem:[#allocation31_spill] sm:$0xff]  ;;  %v1832_v50 = vpack.c.bf16 %v4776_v44, %v4776_v44  ;;  %v4778_v4 = vmax.f32 %v3580_v5, 0.0  ;;  %v4779_v46 = vmax.f32 %v3585_v55, 0.0 }
 0x1cf   :  { %v3880_v18 = vadd.f32 %v4762_v20, %v3561_v26  ;;  %v4769_v54 = vld [vmem:[#allocation30_spill] sm:$0xff]  ;;  %v4777_v26 = vmax.f32 %v3575_v47, 0.0  ;;  %v4780_v3 = vmax.f32 %v3590_v28, 0.0  ;;  %v1837_v44 = vpack.c.bf16 %v4781_v11, %v4781_v11 }
 0x1d0   :  { %v4774_v15 = vld [vmem:[#allocation35_spill] sm:$0xff]  ;;  %v1834_v40 = vpack.c.bf16 %v4778_v4, %v4778_v4  ;;  %v1835_v57 = vpack.c.bf16 %v4779_v46, %v4779_v46  ;;  %v4782_v47 = vmax.f32 %v3600_v17, 0.0  ;;  %v4783_v5 = vmax.f32 %v3605_v6, 0.0  ;;  %1635 = vst.msk [vmem:[%s4404_s5] sm:$0xf] %vm1634_vm2, %v1832_v50 }
 0x1d1   :  { %v4771_v0 = vld [vmem:[#allocation32_spill] sm:$0xff]  ;;  %v4772_v49 = vld [vmem:[#allocation33_spill] sm:$0xff]  ;;  %v1833_v20 = vpack.c.bf16 %v4777_v26, %v4777_v26  ;;  %v1836_v8 = vpack.c.bf16 %v4780_v3, %v4780_v3  ;;  %v4784_v55 = vmax.f32 %v3610_v2, 0.0  ;;  %v4785_v28 = vmax.f32 %v3615_v24, 0.0  ;;  %1640 = vst.msk [vmem:[%s4404_s5 + $0x14] sm:$0xf] %vm1634_vm2, %v1837_v44 }
 0x1d2   :  { %v4773_v41 = vld [vmem:[#allocation34_spill] sm:$0xff]  ;;  %v1838_v26 = vpack.c.bf16 %v4782_v47, %v4782_v47  ;;  %v1839_v4 = vpack.c.bf16 %v4783_v5, %v4783_v5  ;;  %v4786_v31 = vmax.f32 %v3620_v52, 0.0  ;;  %v4787_v17 = vmax.f32 %v3625_v59, 0.0  ;;  %1637 = vst.msk [vmem:[%s4404_s5 + $0x8] sm:$0xf] %vm1634_vm2, %v1834_v40 }
 0x1d3   :  { %v1840_v46 = vpack.c.bf16 %v4784_v55, %v4784_v55  ;;  %v1841_v3 = vpack.c.bf16 %v4785_v28, %v4785_v28  ;;  %1636 = vst.msk [vmem:[%s4404_s5 + $0x4] sm:$0xf] %vm1634_vm2, %v1833_v20  ;;  %1638 = vst.msk [vmem:[%s4404_s5 + $0xc] sm:$0xf] %vm1634_vm2, %v1835_v57  ;;  %v4788_v6 = vmax.f32 %v3630_v38, 0.0  ;;  %v4789_v24 = vmax.f32 %v3635_v10, 0.0 }
 0x1d4   :  { %v4775_v29 = vld [vmem:[#allocation36_spill] sm:$0xff]  ;;  %v1842_v11 = vpack.c.bf16 %v4786_v31, %v4786_v31  ;;  %v1843_v47 = vpack.c.bf16 %v4787_v17, %v4787_v17  ;;  %v4790_v59 = vmax.f32 %v3640_v34, 0.0  ;;  %v4791_v20 = vmax.f32 %v3645_v37, 0.0  ;;  %1639 = vst.msk [vmem:[%s4404_s5 + $0x10] sm:$0xf] %vm1634_vm2, %v1836_v8 }
 0x1d5   :  { %v1844_v2 = vpack.c.bf16 %v4788_v6, %v4788_v6  ;;  %v1845_v52 = vpack.c.bf16 %v4789_v24, %v4789_v24  ;;  %1641 = vst.msk [vmem:[%s4404_s5 + $0x18] sm:$0xf] %vm1634_vm2, %v1838_v26  ;;  %1642 = vst.msk [vmem:[%s4404_s5 + $0x1c] sm:$0xf] %vm1634_vm2, %v1839_v4  ;;  %v4792_v38 = vmax.f32 %v3650_v33, 0.0  ;;  %v4793_v34 = vmax.f32 %v3655_v36, 0.0 }
 0x1d6   :  { %v1846_v50 = vpack.c.bf16 %v4790_v59, %v4790_v59  ;;  %v1847_v40 = vpack.c.bf16 %v4791_v20, %v4791_v20  ;;  %v4794_v57 = vmax.f32 %v3660_v53, 0.0  ;;  %v4795_v44 = vmax.f32 %v3665_v61, 0.0  ;;  %1643 = vst.msk [vmem:[%s4404_s5 + $0x20] sm:$0xf] %vm1634_vm2, %v1840_v46  ;;  %1644 = vst.msk [vmem:[%s4404_s5 + $0x24] sm:$0xf] %vm1634_vm2, %v1841_v3 }
 0x1d7   :  { %v1848_v10 = vpack.c.bf16 %v4792_v38, %v4792_v38  ;;  %v1849_v37 = vpack.c.bf16 %v4793_v34, %v4793_v34  ;;  %1645 = vst.msk [vmem:[%s4404_s5 + $0x28] sm:$0xf] %vm1634_vm2, %v1842_v11  ;;  %1646 = vst.msk [vmem:[%s4404_s5 + $0x2c] sm:$0xf] %vm1634_vm2, %v1843_v47  ;;  %v4796_v33 = vmax.f32 %v3670_v51, 0.0  ;;  %v4797_v53 = vmax.f32 %v3675_v58, 0.0 }
 0x1d8   :  { %v1850_v8 = vpack.c.bf16 %v4794_v57, %v4794_v57  ;;  %v1851_v26 = vpack.c.bf16 %v4795_v44, %v4795_v44  ;;  %v4798_v5 = vmax.f32 %v3680_v16, 0.0  ;;  %v4799_v55 = vmax.f32 %v3685_v25, 0.0  ;;  %1647 = vst.msk [vmem:[%s4404_s5 + $0x30] sm:$0xf] %vm1634_vm2, %v1844_v2  ;;  %1648 = vst.msk [vmem:[%s4404_s5 + $0x34] sm:$0xf] %vm1634_vm2, %v1845_v52 }
 0x1d9   :  { %v1852_v36 = vpack.c.bf16 %v4796_v33, %v4796_v33  ;;  %v1853_v61 = vpack.c.bf16 %v4797_v53, %v4797_v53  ;;  %1649 = vst.msk [vmem:[%s4404_s5 + $0x38] sm:$0xf] %vm1634_vm2, %v1846_v50  ;;  %1650 = vst.msk [vmem:[%s4404_s5 + $0x3c] sm:$0xf] %vm1634_vm2, %v1847_v40  ;;  %v4800_v51 = vmax.f32 %v3690_v13, 0.0  ;;  %v4801_v16 = vmax.f32 %v3695_v22, 0.0 }
 0x1da   :  { %v1854_v4 = vpack.c.bf16 %v4798_v5, %v4798_v5  ;;  %v1855_v46 = vpack.c.bf16 %v4799_v55, %v4799_v55  ;;  %v4802_v28 = vmax.f32 %v3700_v48, 0.0  ;;  %v4803_v31 = vmax.f32 %v3705_v60, 0.0  ;;  %1651 = vst.msk [vmem:[%s4404_s5 + $0x40] sm:$0xf] %vm1634_vm2, %v1848_v10  ;;  %1652 = vst.msk [vmem:[%s4404_s5 + $0x44] sm:$0xf] %vm1634_vm2, %v1849_v37 }
 0x1db   :  { %v1856_v58 = vpack.c.bf16 %v4800_v51, %v4800_v51  ;;  %v1857_v25 = vpack.c.bf16 %v4801_v16, %v4801_v16  ;;  %1653 = vst.msk [vmem:[%s4404_s5 + $0x48] sm:$0xf] %vm1634_vm2, %v1850_v8  ;;  %1654 = vst.msk [vmem:[%s4404_s5 + $0x4c] sm:$0xf] %vm1634_vm2, %v1851_v26  ;;  %v4804_v13 = vmax.f32 %v3710_v45, 0.0  ;;  %v4805_v48 = vmax.f32 %v3715_v56, 0.0 }
 0x1dc   :  { %v1858_v3 = vpack.c.bf16 %v4802_v28, %v4802_v28  ;;  %v1859_v11 = vpack.c.bf16 %v4803_v31, %v4803_v31  ;;  %v4806_v17 = vmax.f32 %v3720_v23, 0.0  ;;  %v4807_v6 = vmax.f32 %v3725_v35, 0.0  ;;  %1655 = vst.msk [vmem:[%s4404_s5 + $0x50] sm:$0xf] %vm1634_vm2, %v1852_v36  ;;  %1656 = vst.msk [vmem:[%s4404_s5 + $0x54] sm:$0xf] %vm1634_vm2, %v1853_v61 }
 0x1dd   :  { %v1860_v22 = vpack.c.bf16 %v4804_v13, %v4804_v13  ;;  %v1861_v60 = vpack.c.bf16 %v4805_v48, %v4805_v48  ;;  %1657 = vst.msk [vmem:[%s4404_s5 + $0x58] sm:$0xf] %vm1634_vm2, %v1854_v4  ;;  %1658 = vst.msk [vmem:[%s4404_s5 + $0x5c] sm:$0xf] %vm1634_vm2, %v1855_v46  ;;  %v4808_v45 = vmax.f32 %v3730_v19, 0.0  ;;  %v4809_v23 = vmax.f32 %v3735_v30, 0.0 }
 0x1de   :  { %v1862_v47 = vpack.c.bf16 %v4806_v17, %v4806_v17  ;;  %v1863_v2 = vpack.c.bf16 %v4807_v6, %v4807_v6  ;;  %v4810_v24 = vmax.f32 %v3740_v9, 0.0  ;;  %v4811_v59 = vld [vmem:[#allocation17_spill] sm:$0xff]  ;;  %1659 = vst.msk [vmem:[%s4404_s5 + $0x60] sm:$0xf] %vm1634_vm2, %v1856_v58  ;;  %1660 = vst.msk [vmem:[%s4404_s5 + $0x64] sm:$0xf] %vm1634_vm2, %v1857_v25 }
 0x1df   :  { %v1864_v56 = vpack.c.bf16 %v4808_v45, %v4808_v45  ;;  %v1865_v35 = vpack.c.bf16 %v4809_v23, %v4809_v23  ;;  %v4812_v50 = vmax.f32 %v4811_v59, 0.0  ;;  %1661 = vst.msk [vmem:[%s4404_s5 + $0x68] sm:$0xf] %vm1634_vm2, %v1858_v3  ;;  %1662 = vst.msk [vmem:[%s4404_s5 + $0x6c] sm:$0xf] %vm1634_vm2, %v1859_v11  ;;  %v4813_v19 = vld [vmem:[#allocation16_spill] sm:$0xff] }
 0x1e0   :  { %v1866_v52 = vpack.c.bf16 %v4810_v24, %v4810_v24  ;;  %v4814_v30 = vmax.f32 %v4813_v19, 0.0  ;;  %v4815_v40 = vmax.f32 %v3755_v27, 0.0  ;;  %v4816_v10 = vld [vmem:[#allocation18_spill] sm:$0xff]  ;;  %v4818_v57 = vld [vmem:[#allocation3_spill] sm:$0xff]  ;;  %1663 = vst.msk [vmem:[%s4404_s5 + $0x70] sm:$0xf] %vm1634_vm2, %v1860_v22 }
 0x1e1   :  { %v1867_v20 = vpack.c.bf16 %v4812_v50, %v4812_v50  ;;  %v4817_v34 = vmax.f32 %v4816_v10, 0.0  ;;  %v4819_v8 = vmax.f32 %v4818_v57, 0.0  ;;  %1664 = vst.msk [vmem:[%s4404_s5 + $0x74] sm:$0xf] %vm1634_vm2, %v1861_v60  ;;  %1665 = vst.msk [vmem:[%s4404_s5 + $0x78] sm:$0xf] %vm1634_vm2, %v1862_v47 }
 0x1e2   :  { %v1868_v9 = vpack.c.bf16 %v4814_v30, %v4814_v30  ;;  %v1869_v38 = vpack.c.bf16 %v4815_v40, %v4815_v40  ;;  %1666 = vst.msk [vmem:[%s4404_s5 + $0x7c] sm:$0xf] %vm1634_vm2, %v1863_v2  ;;  %v4820_v27 = vld [vmem:[#allocation5_spill] sm:$0xff]  ;;  %v4822_v36 = vld [vmem:[#allocation7_spill] sm:$0xff]  ;;  %v4824_v5 = vld [vmem:[#allocation6_spill] sm:$0xff]  ;;  %v4830_v3 = vmax.f32 %v4765_v43, 0.0 }
 0x1e3   :  { %v1870_v37 = vpack.c.bf16 %v4817_v34, %v4817_v34  ;;  %v1871_v44 = vpack.c.bf16 %v4819_v8, %v4819_v8  ;;  %v4821_v26 = vmax.f32 %v4820_v27, 0.0  ;;  %v4823_v53 = vmax.f32 %v4822_v36, 0.0  ;;  %v4826_v46 = vld [vmem:[#allocation20_spill] sm:$0xff]  ;;  %1667 = vst.msk [vmem:[%s4404_s5 + $0x80] sm:$0xf] %vm1634_vm2, %v1864_v56  ;;  %v4828_v16 = vld [vmem:[#allocation25_spill] sm:$0xff] }
 0x1e4   :  { %v4825_v4 = vmax.f32 %v4824_v5, 0.0  ;;  %v4827_v51 = vmax.f32 %v4826_v46, 0.0  ;;  %1668 = vst.msk [vmem:[%s4404_s5 + $0x84] sm:$0xf] %vm1634_vm2, %v1865_v35  ;;  %1669 = vst.msk [vmem:[%s4404_s5 + $0x88] sm:$0xf] %vm1634_vm2, %v1866_v52  ;;  %v1877_v31 = vpack.c.bf16 %v4830_v3, %v4830_v3 }
 0x1e5   :  { %v1872_v33 = vpack.c.bf16 %v4821_v26, %v4821_v26  ;;  %v1873_v61 = vpack.c.bf16 %v4823_v53, %v4823_v53  ;;  %1670 = vst.msk [vmem:[%s4404_s5 + $0x8c] sm:$0xf] %vm1634_vm2, %v1867_v20  ;;  %v4829_v25 = vmax.f32 %v4828_v16, 0.0  ;;  %v4831_v11 = vld [vmem:[#allocation27_spill] sm:$0xff]  ;;  %v4833_v48 = vmax.f32 %v4767_v39, 0.0 }
 0x1e6   :  { %v1874_v55 = vpack.c.bf16 %v4825_v4, %v4825_v4  ;;  %v1875_v58 = vpack.c.bf16 %v4827_v51, %v4827_v51  ;;  %v4832_v13 = vmax.f32 %v4831_v11, 0.0  ;;  %1671 = vst.msk [vmem:[%s4404_s5 + $0x90] sm:$0xf] %vm1634_vm2, %v1868_v9  ;;  %1672 = vst.msk [vmem:[%s4404_s5 + $0x94] sm:$0xf] %vm1634_vm2, %v1869_v38  ;;  %v4834_v39 = vmax.f32 %v3810_v32, 0.0 }
 0x1e7   :  { %v1876_v28 = vpack.c.bf16 %v4829_v25, %v4829_v25  ;;  %v1879_v60 = vpack.c.bf16 %v4833_v48, %v4833_v48  ;;  %1673 = vst.msk [vmem:[%s4404_s5 + $0x98] sm:$0xf] %vm1634_vm2, %v1870_v37  ;;  %1674 = vst.msk [vmem:[%s4404_s5 + $0x9c] sm:$0xf] %vm1634_vm2, %v1871_v44  ;;  %v4835_v17 = vmax.f32 %v4768_v63, 0.0  ;;  %v4836_v6 = vmax.f32 %v4769_v54, 0.0 }
 0x1e8   :  { %v1878_v22 = vpack.c.bf16 %v4832_v13, %v4832_v13  ;;  %v1880_v43 = vpack.c.bf16 %v4834_v39, %v4834_v39  ;;  %v4837_v45 = vmax.f32 %v4770_v1, 0.0  ;;  %1675 = vst.msk [vmem:[%s4404_s5 + $0xa0] sm:$0xf] %vm1634_vm2, %v1872_v33  ;;  %1676 = vst.msk [vmem:[%s4404_s5 + $0xa4] sm:$0xf] %vm1634_vm2, %v1873_v61  ;;  %v4838_v63 = vmax.f32 %v4771_v0, 0.0 }
 0x1e9   :  { %v1881_v47 = vpack.c.bf16 %v4835_v17, %v4835_v17  ;;  %v1882_v2 = vpack.c.bf16 %v4836_v6, %v4836_v6  ;;  %1677 = vst.msk [vmem:[%s4404_s5 + $0xa8] sm:$0xf] %vm1634_vm2, %v1874_v55  ;;  %1678 = vst.msk [vmem:[%s4404_s5 + $0xac] sm:$0xf] %vm1634_vm2, %v1875_v58  ;;  %v4839_v1 = vmax.f32 %v4772_v49, 0.0  ;;  %v4840_v23 = vmax.f32 %v4773_v41, 0.0 }
 0x1ea   :  { %v1883_v56 = vpack.c.bf16 %v4837_v45, %v4837_v45  ;;  %v1884_v54 = vpack.c.bf16 %v4838_v63, %v4838_v63  ;;  %v4841_v24 = vmax.f32 %v4774_v15, 0.0  ;;  %1679 = vst.msk [vmem:[%s4404_s5 + $0xb0] sm:$0xf] %vm1634_vm2, %v1876_v28  ;;  %1680 = vst.msk [vmem:[%s4404_s5 + $0xb4] sm:$0xf] %vm1634_vm2, %v1877_v31  ;;  %v4842_v0 = vmax.f32 %v3850_v7, 0.0 }
 0x1eb   :  { %v1885_v32 = vpack.c.bf16 %v4839_v1, %v4839_v1  ;;  %v1886_v35 = vpack.c.bf16 %v4840_v23, %v4840_v23  ;;  %1681 = vst.msk [vmem:[%s4404_s5 + $0xb8] sm:$0xf] %vm1634_vm2, %v1878_v22  ;;  %1682 = vst.msk [vmem:[%s4404_s5 + $0xbc] sm:$0xf] %vm1634_vm2, %v1879_v60  ;;  %v4843_v41 = vmax.f32 %v4775_v29, 0.0  ;;  %v4844_v59 = vmax.f32 %v3860_v62, 0.0 }
 0x1ec   :  { %v1887_v52 = vpack.c.bf16 %v4841_v24, %v4841_v24  ;;  %v1888_v49 = vpack.c.bf16 %v4842_v0, %v4842_v0  ;;  %v4845_v20 = vmax.f32 %v3865_v12, 0.0  ;;  %1683 = vst.msk [vmem:[%s4404_s5 + $0xc0] sm:$0xf] %vm1634_vm2, %v1880_v43  ;;  %1684 = vst.msk [vmem:[%s4404_s5 + $0xc4] sm:$0xf] %vm1634_vm2, %v1881_v47  ;;  %v4846_v29 = vmax.f32 %v3870_v42, 0.0 }
 0x1ed   :  { %v1889_v15 = vpack.c.bf16 %v4843_v41, %v4843_v41  ;;  %v1890_v50 = vpack.c.bf16 %v4844_v59, %v4844_v59  ;;  %1685 = vst.msk [vmem:[%s4404_s5 + $0xc8] sm:$0xf] %vm1634_vm2, %v1882_v2  ;;  %1686 = vst.msk [vmem:[%s4404_s5 + $0xcc] sm:$0xf] %vm1634_vm2, %v1883_v56  ;;  %v4847_v62 = vmax.f32 %v3875_v21, 0.0  ;;  %v4848_v30 = vmax.f32 %v3880_v18, 0.0 }
 0x1ee   :  { %v1891_v19 = vpack.c.bf16 %v4845_v20, %v4845_v20  ;;  %v1892_v7 = vpack.c.bf16 %v4846_v29, %v4846_v29  ;;  %v4849_v40 = vmax.f32 %v3885_v14, 0.0  ;;  %1687 = vst.msk [vmem:[%s4404_s5 + $0xd0] sm:$0xf] %vm1634_vm2, %v1884_v54  ;;  %1688 = vst.msk [vmem:[%s4404_s5 + $0xd4] sm:$0xf] %vm1634_vm2, %v1885_v32 }
 0x1ef   :  { %v1893_v12 = vpack.c.bf16 %v4847_v62, %v4847_v62  ;;  %v1894_v9 = vpack.c.bf16 %v4848_v30, %v4848_v30  ;;  %1689 = vst.msk [vmem:[%s4404_s5 + $0xd8] sm:$0xf] %vm1634_vm2, %v1886_v35  ;;  %1690 = vst.msk [vmem:[%s4404_s5 + $0xdc] sm:$0xf] %vm1634_vm2, %v1887_v52 }
 0x1f0   :  { %v1895_v38 = vpack.c.bf16 %v4849_v40, %v4849_v40  ;;  %1691 = vst.msk [vmem:[%s4404_s5 + $0xe0] sm:$0xf] %vm1634_vm2, %v1888_v49  ;;  %1692 = vst.msk [vmem:[%s4404_s5 + $0xe4] sm:$0xf] %vm1634_vm2, %v1889_v15 }
 0x1f1   :  { %1693 = vst.msk [vmem:[%s4404_s5 + $0xe8] sm:$0xf] %vm1634_vm2, %v1890_v50  ;;  %1694 = vst.msk [vmem:[%s4404_s5 + $0xec] sm:$0xf] %vm1634_vm2, %v1891_v19 }
 0x1f2   :  { %1695 = vst.msk [vmem:[%s4404_s5 + $0xf0] sm:$0xf] %vm1634_vm2, %v1892_v7  ;;  %1696 = vst.msk [vmem:[%s4404_s5 + $0xf4] sm:$0xf] %vm1634_vm2, %v1893_v12 }
 0x1f3   :  { %1697 = vst.msk [vmem:[%s4404_s5 + $0xf8] sm:$0xf] %vm1634_vm2, %v1894_v9  ;;  %1698 = vst.msk [vmem:[%s4404_s5 + $0xfc] sm:$0xf] %vm1634_vm2, %v1895_v38 }

// kernel: shared_layers_forward.113
= control target key start
LH: loop header
LB: loop body
LE: loop exit
PB: predicated region body
PF: predicated region fallthrough
CT: control target
= control target key end

     0   :  { %vm106_vm0 = vcmask 523264   ;;  %vm228_vm1 = vcmask 261120   ;;  %vm455_vm2 = vcmask 257024   ;;  %s853_s1 = inlined_call_operand.vmem [shape: bf16[64,32], index: 1, kind: input, shape index: {}]   ;;  %s854_s0 = inlined_call_operand.vmem [shape: bf16[128,64], index: 0, kind: input, shape index: {}]   ;;  %s855_s2 = inlined_call_operand.vmem [shape: f32[1,32], index: 2, kind: input, shape index: {}]   ;;  %s856_s3 = inlined_call_operand.vmem [shape: f32[1,32], index: 3, kind: input, shape index: {}]   ;;  %s857_s4 = inlined_call_operand.vmem [shape: bf16[128,32], index: 4, kind: output, shape index: {}]  }
   0x1   :  { %v572_v0 = vld [vmem:[%s853_s1] sm:$0xff]   ;;  %v573_v1 = vld [vmem:[%s853_s1 + $0x8] sm:$0xff]   ;;  %v574_v2 = vld [vmem:[%s853_s1 + $0x10] sm:$0xff]  }
   0x2   :  { %540 = vmatprep.subr.bf16.mxu0 %v572_v0  ;;  %564 = vmatprep.subr.bf16.mxu1 %v572_v0  ;;  %v576_v3 = vld [vmem:[%s854_s0] sm:$0xff]   ;;  %v575_v4 = vld [vmem:[%s853_s1 + $0x18] sm:$0xff]   ;;  %v577_v6 = vld [vmem:[%s854_s0 + $0x8] sm:$0xff]  }
   0x3   :  { %541 = vmatpush3.bf16.msra.mxu0 %v572_v0  ;;  %568 = vmatpush3.bf16.msra.mxu1 %v572_v0  ;;  %v580_v5 = vld [vmem:[%s854_s0 + $0x20] sm:$0xff]   ;;  %v581_v7 = vld [vmem:[%s854_s0 + $0x28] sm:$0xff]   ;;  %v578_v8 = vld [vmem:[%s854_s0 + $0x10] sm:$0xff]  }
   0x4   :  { %542 = vmatprep.subr.bf16.mxu0 %v573_v1  ;;  %565 = vmatprep.subr.bf16.mxu1 %v573_v1  ;;  %v582_v9 = vld [vmem:[%s854_s0 + $0x30] sm:$0xff]   ;;  %v579_v10 = vld [vmem:[%s854_s0 + $0x18] sm:$0xff]  }
   0x5   :  { %548 = vmatprep.mubr.msk.bf16.mxu0 %vm106_vm0, %v576_v3  ;;  %556 = vmatprep.mubr.msk.bf16.mxu1 %vm106_vm0, %v580_v5  ;;  %v583_v11 = vld [vmem:[%s854_s0 + $0x38] sm:$0xff]  }
   0x7   :  { %543 = vmatpush3.bf16.msra.mxu0 %v573_v1  ;;  %569 = vmatpush3.bf16.msra.mxu1 %v573_v1 }
   0x8   :  { %544 = vmatprep.subr.bf16.mxu0 %v574_v2  ;;  %566 = vmatprep.subr.bf16.mxu1 %v574_v2 }
   0xb   :  { %545 = vmatpush3.bf16.msra.mxu0 %v574_v2  ;;  %570 = vmatpush3.bf16.msra.mxu1 %v574_v2 }
   0xc   :  { %546 = vmatprep.subr.bf16.mxu0 %v575_v4  ;;  %567 = vmatprep.subr.bf16.mxu1 %v575_v4 }
   0xf   :  { %547 = vmatpush3.bf16.msra.mxu0 %v575_v4  ;;  %571 = vmatpush3.bf16.msra.mxu1 %v575_v4 }
  0x12   :  { %549 = vmatmul.mubr.msk.bf16.vlgmr.msra.gmra.mrb[0].mxu0 %vm106_vm0, %v577_v6  ;;  %557 = vmatmul.mubr.msk.bf16.vlgmr.msra.gmra.mrb[0].mxu1 %vm106_vm0, %v581_v7 }
  0x13   :  { %552 = vmatprep.mubr.msk.bf16.mxu0 %vm106_vm0, %v578_v8  ;;  %560 = vmatprep.mubr.msk.bf16.mxu1 %vm106_vm0, %v582_v9 }
  0x1a   :  { %553 = vmatmul.mubr.msk.bf16.gmra.mrb[4].mxu0 %vm106_vm0, %v579_v10  ;;  %561 = vmatmul.mubr.msk.bf16.gmra.mrb[4].mxu1 %vm106_vm0, %v583_v11 }
  0xe5   :  { %v655_v12 = vpop.f32.mrb[0].mxu0  ;;  %v657_v13 = vpop.f32.mrb[0].mxu1 }
  0xe6   :  { %v659_v14 = vpop.f32.mrb[1].mxu0  ;;  %v661_v15 = vpop.f32.mrb[1].mxu1  ;;  %v269_v21 = vmul.f32 %v655_v12, %v655_v12  ;;  %v232_v26 = vsel %vm228_vm1, %v655_v12, 0.0  ;;  %v277_v7 = vmul.f32 %v657_v13, %v657_v13  ;;  %v248_v11 = vsel %vm228_vm1, %v657_v13, 0.0 }
  0xe7   :  { %v267_v16 = vmul.f32 %v659_v14, %v659_v14  ;;  %v665_v17 = vpop.f32.mrb[2].mxu0  ;;  %v667_v18 = vpop.f32.mrb[2].mxu1  ;;  %v229_v22 = vsel %vm228_vm1, %v659_v14, 0.0  ;;  %v275_v58 = vmul.f32 %v661_v15, %v661_v15  ;;  %v244_v63 = vsel %vm228_vm1, %v661_v15, 0.0 }
  0xe8   :  { %v669_v19 = vpop.f32.mrb[3].mxu0  ;;  %v671_v20 = vpop.f32.mrb[3].mxu1  ;;  %v270_v28 = vmul.f32 %v665_v17, %v665_v17  ;;  %v286_v32 = vsel %vm228_vm1, %v269_v21, 0.0  ;;  %v234_v33 = vsel %vm228_vm1, %v665_v17, 0.0 }
  0xe9   :  { %v230_v23 = vsel %vm228_vm1, %v669_v19, 0.0  ;;  %v268_v24 = vmul.f32 %v669_v19, %v669_v19  ;;  %v283_v27 = vsel %vm228_vm1, %v267_v16, 0.0  ;;  %v298_v3 = vsel %vm228_vm1, %v275_v58, 0.0 }
  0xea   :  { %v231_v25 = vadd.f32 %v230_v23, %v229_v22  ;;  %v288_v40 = vsel %vm228_vm1, %v270_v28, 0.0  ;;  %v276_v4 = vmul.f32 %v671_v20, %v671_v20  ;;  %v246_v8 = vsel %vm228_vm1, %v671_v20, 0.0 }
  0xeb   :  { %v284_v29 = vsel %vm228_vm1, %v268_v24, 0.0  ;;  %v278_v16 = vmul.f32 %v667_v18, %v667_v18 }
  0xec   :  { %v233_v30 = vadd.f32 %v232_v26, %v231_v25  ;;  %v285_v31 = vadd.f32 %v284_v29, %v283_v27  ;;  %v300_v21 = vsel %vm228_vm1, %v276_v4, 0.0  ;;  %v302_v25 = vsel %vm228_vm1, %v277_v7, 0.0 }
  0xed   :  { %v690_v34 = vpop.f32.mrb[4].mxu0  ;;  %v692_v35 = vpop.f32.mrb[4].mxu1  ;;  %v250_v26 = vsel %vm228_vm1, %v667_v18, 0.0 }
  0xee   :  { %v287_v36 = vadd.f32 %v286_v32, %v285_v31  ;;  %v694_v37 = vpop.f32.mrb[5].mxu0  ;;  %v235_v38 = vadd.f32 %v234_v33, %v233_v30  ;;  %v696_v39 = vpop.f32.mrb[5].mxu1  ;;  %v273_v49 = vmul.f32 %v690_v34, %v690_v34  ;;  %v240_v55 = vsel %vm228_vm1, %v690_v34, 0.0 }
  0xef   :  { %v236_v41 = vsel %vm228_vm1, %v694_v37, 0.0  ;;  %v271_v42 = vmul.f32 %v694_v37, %v694_v37  ;;  %v703_v43 = vpop.f32.mrb[6].mxu0  ;;  %v705_v44 = vpop.f32.mrb[6].mxu1  ;;  %v279_v22 = vmul.f32 %v696_v39, %v696_v39  ;;  %v252_v27 = vsel %vm228_vm1, %v696_v39, 0.0 }
  0xf0   :  { %v237_v45 = vadd.f32 %v236_v41, %v235_v38  ;;  %v289_v46 = vadd.f32 %v288_v40, %v287_v36  ;;  %v707_v47 = vpop.f32.mrb[7].mxu0  ;;  %v709_v48 = vpop.f32.mrb[7].mxu1  ;;  %v274_v56 = vmul.f32 %v703_v43, %v703_v43  ;;  %v294_v61 = vsel %vm228_vm1, %v273_v49, 0.0 }
  0xf1   :  { %v290_v50 = vsel %vm228_vm1, %v271_v42, 0.0  ;;  %v238_v51 = vsel %vm228_vm1, %v707_v47, 0.0  ;;  %v272_v52 = vmul.f32 %v707_v47, %v707_v47  ;;  %v242_v62 = vsel %vm228_vm1, %v703_v43, 0.0 }
  0xf2   :  { %v291_v53 = vadd.f32 %v290_v50, %v289_v46  ;;  %v239_v54 = vadd.f32 %v238_v51, %v237_v45  ;;  %v296_v2 = vsel %vm228_vm1, %v274_v56, 0.0  ;;  %v304_v30 = vsel %vm228_vm1, %v278_v16, 0.0 }
  0xf3   :  { %v292_v57 = vsel %vm228_vm1, %v272_v52, 0.0  ;;  %v306_v31 = vsel %vm228_vm1, %v279_v22, 0.0  ;;  %v280_v32 = vmul.f32 %v709_v48, %v709_v48  ;;  %v281_v38 = vmul.f32 %v692_v35, %v692_v35  ;;  %v324_v22 = vld [vmem:[%s855_s2] sm:$0x1] }
  0xf4   :  { %v241_v59 = vadd.f32 %v240_v55, %v239_v54  ;;  %v293_v60 = vadd.f32 %v292_v57, %v291_v53  ;;  %v254_v40 = vsel %vm228_vm1, %v709_v48, 0.0  ;;  %v256_v45 = vsel %vm228_vm1, %v692_v35, 0.0 }
  0xf5   :  { %v282_v46 = vmul.f32 %v705_v44, %v705_v44  ;;  %v308_v49 = vsel %vm228_vm1, %v280_v32, 0.0  ;;  %v310_v52 = vsel %vm228_vm1, %v281_v38, 0.0  ;;  %v258_v53 = vsel %vm228_vm1, %v705_v44, 0.0 }
  0xf6   :  { %v295_v0 = vadd.f32 %v294_v61, %v293_v60  ;;  %v243_v1 = vadd.f32 %v242_v62, %v241_v59  ;;  %v332_v16 = vlaneseq }
  0xf7   :  { %v312_v56 = vsel %vm228_vm1, %v282_v46, 0.0 }
  0xf8   :  { %v245_v5 = vadd.f32 %v244_v63, %v243_v1  ;;  %v297_v6 = vadd.f32 %v296_v2, %v295_v0 }
  0xfa   :  { %v299_v9 = vadd.f32 %v298_v3, %v297_v6  ;;  %v247_v10 = vadd.f32 %v246_v8, %v245_v5 }
  0xfc   :  { %v249_v23 = vadd.f32 %v248_v11, %v247_v10  ;;  %v301_v24 = vadd.f32 %v300_v21, %v299_v9  ;;  %v333_v21 = vshrl.u32 %v332_v16, 7 }
  0xfe   :  { %v303_v28 = vadd.f32 %v302_v25, %v301_v24  ;;  %v251_v29 = vadd.f32 %v250_v26, %v249_v23  ;;  %v334_v23 = vsub.s32 0, %v333_v21  ;;  %v328_v26 = vld [vmem:[%s856_s3] sm:$0x1] }
 0x100   :  { %v253_v33 = vadd.f32 %v252_v27, %v251_v29  ;;  %v305_v36 = vadd.f32 %v304_v30, %v303_v28 }
 0x102   :  { %v307_v41 = vadd.f32 %v306_v31, %v305_v36  ;;  %v255_v42 = vadd.f32 %v254_v40, %v253_v33 }
 0x104   :  { %v257_v50 = vadd.f32 %v256_v45, %v255_v42  ;;  %v309_v51 = vadd.f32 %v308_v49, %v307_v41 }
 0x106   :  { %v259_v54 = vadd.f32 %v258_v53, %v257_v50  ;;  %v311_v55 = vadd.f32 %v310_v52, %v309_v51 }
 0x108   :  { %v260_v57 = vrot.slane %v259_v54, 4  ;;  %v313_v58 = vadd.f32 %v312_v56, %v311_v55 }
 0x10a   :  { %v261_v59 = vadd.f32 %v260_v57, %v259_v54  ;;  %v314_v60 = vrot.slane %v313_v58, 4 }
 0x10c   :  { %v262_v61 = vrot.slane %v261_v59, 2  ;;  %v315_v62 = vadd.f32 %v314_v60, %v313_v58 }
 0x10e   :  { %v263_v63 = vadd.f32 %v262_v61, %v261_v59  ;;  %v316_v0 = vrot.slane %v315_v62, 2 }
 0x110   :  { %v264_v1 = vrot.slane %v263_v63, 1  ;;  %v317_v2 = vadd.f32 %v316_v0, %v315_v62 }
 0x112   :  { %v265_v3 = vadd.f32 %v264_v1, %v263_v63  ;;  %v318_v4 = vrot.slane %v317_v2, 1 }
 0x114   :  { %v266_v5 = vmul.f32 0.0078125, %v265_v3  ;;  %v319_v6 = vadd.f32 %v318_v4, %v317_v2 }
 0x116   :  { %v320_v7 = vmul.f32 0.0078125, %v319_v6  ;;  %v321_v8 = vmul.f32 %v266_v5, %v266_v5 }
 0x118   :  { %v322_v9 = vsub.f32 %v320_v7, %v321_v8 }
 0x11a   :  { %v323_v10 = vmax.f32 %v322_v9, 0.0 }
 0x11c   :  { %v325_v11 = vadd.f32 1e-05, %v323_v10 }
 0x11e   :  { %584 = vrsqrt.f32 %v325_v11 }
 0x128   :  { %v585_v24 = vpop.eup %584 }
 0x129   :  { %v327_v25 = vmul.f32 %v585_v24, %v324_v22 }
 0x12b   :  { %v329_v27 = vmul.f32 %v327_v25, %v266_v5  ;;  %v335_v28 = vrot.slane %v327_v25, %v334_v23 }
 0x12d   :  { %v330_v29 = vsub.f32 %v328_v26, %v329_v27  ;;  %v337_v30 = vmul.f32 %v335_v28, %v659_v14  ;;  %v338_v31 = vmul.f32 %v335_v28, %v669_v19  ;;  %v339_v32 = vmul.f32 %v655_v12, %v335_v28 }
 0x12e   :  { %v340_v33 = vmul.f32 %v665_v17, %v335_v28  ;;  %v341_v36 = vmul.f32 %v335_v28, %v694_v37  ;;  %v342_v38 = vmul.f32 %v335_v28, %v707_v47  ;;  %v343_v40 = vmul.f32 %v690_v34, %v335_v28 }
 0x12f   :  { %v344_v41 = vmul.f32 %v703_v43, %v335_v28  ;;  %v345_v42 = vmul.f32 %v335_v28, %v661_v15  ;;  %v346_v45 = vmul.f32 %v335_v28, %v671_v20  ;;  %v347_v14 = vmul.f32 %v657_v13, %v335_v28 }
 0x130   :  { %v348_v19 = vmul.f32 %v667_v18, %v335_v28  ;;  %v349_v12 = vmul.f32 %v335_v28, %v696_v39  ;;  %v350_v17 = vmul.f32 %v335_v28, %v709_v48  ;;  %v351_v37 = vmul.f32 %v692_v35, %v335_v28 }
 0x131   :  { %v352_v47 = vmul.f32 %v705_v44, %v335_v28  ;;  %v357_v46 = vrot.slane %v330_v29, %v334_v23 }
 0x133   :  { %v359_v34 = vadd.f32 %v357_v46, %v337_v30  ;;  %v360_v43 = vadd.f32 %v357_v46, %v338_v31  ;;  %v361_v49 = vadd.f32 %v357_v46, %v339_v32  ;;  %v362_v15 = vadd.f32 %v357_v46, %v340_v33 }
 0x134   :  { %v363_v50 = vadd.f32 %v357_v46, %v341_v36  ;;  %v364_v20 = vadd.f32 %v357_v46, %v342_v38  ;;  %v365_v51 = vadd.f32 %v357_v46, %v343_v40  ;;  %v366_v13 = vadd.f32 %v357_v46, %v344_v41 }
 0x135   :  { %v367_v52 = vadd.f32 %v357_v46, %v345_v42  ;;  %v368_v18 = vadd.f32 %v357_v46, %v346_v45  ;;  %v369_v53 = vadd.f32 %v357_v46, %v347_v14  ;;  %v370_v39 = vadd.f32 %v357_v46, %v348_v19 }
 0x136   :  { %v371_v54 = vadd.f32 %v357_v46, %v349_v12  ;;  %v372_v48 = vadd.f32 %v357_v46, %v350_v17  ;;  %v373_v55 = vadd.f32 %v357_v46, %v351_v37  ;;  %v374_v35 = vadd.f32 %v357_v46, %v352_v47 }
 0x137   :  { %v375_v56 = vmax.f32 %v359_v34, 0.0  ;;  %v376_v44 = vmax.f32 %v360_v43, 0.0  ;;  %v377_v57 = vmax.f32 %v361_v49, 0.0  ;;  %v378_v58 = vmax.f32 %v362_v15, 0.0 }
 0x138   :  { %v379_v59 = vmax.f32 %v363_v50, 0.0  ;;  %v380_v60 = vmax.f32 %v364_v20, 0.0  ;;  %v381_v61 = vmax.f32 %v365_v51, 0.0  ;;  %v382_v62 = vmax.f32 %v366_v13, 0.0 }
 0x139   :  { %v383_v63 = vmax.f32 %v367_v52, 0.0  ;;  %v384_v0 = vmax.f32 %v368_v18, 0.0  ;;  %v385_v1 = vmax.f32 %v369_v53, 0.0  ;;  %v386_v2 = vmax.f32 %v370_v39, 0.0 }
 0x13a   :  { %v387_v3 = vmax.f32 %v371_v54, 0.0  ;;  %v388_v4 = vmax.f32 %v372_v48, 0.0  ;;  %v389_v5 = vmax.f32 %v373_v55, 0.0  ;;  %v390_v6 = vmax.f32 %v374_v35, 0.0 }
 0x13b   :  { %v512_v7 = vpack.c.bf16 %v375_v56, %v375_v56  ;;  %v513_v8 = vpack.c.bf16 %v376_v44, %v376_v44  ;;  %v514_v9 = vpack.c.bf16 %v377_v57, %v377_v57  ;;  %v515_v10 = vpack.c.bf16 %v378_v58, %v378_v58 }
 0x13c   :  { %v516_v11 = vpack.c.bf16 %v379_v59, %v379_v59  ;;  %v517_v16 = vpack.c.bf16 %v380_v60, %v380_v60  ;;  %v518_v21 = vpack.c.bf16 %v381_v61, %v381_v61  ;;  %v519_v22 = vpack.c.bf16 %v382_v62, %v382_v62 }
 0x13d   :  { %v520_v23 = vpack.c.bf16 %v383_v63, %v383_v63  ;;  %v521_v24 = vpack.c.bf16 %v384_v0, %v384_v0  ;;  %v522_v25 = vpack.c.bf16 %v385_v1, %v385_v1  ;;  %v523_v26 = vpack.c.bf16 %v386_v2, %v386_v2  ;;  %456 = vst.msk [vmem:[%s857_s4] sm:$0xf] %vm455_vm2, %v512_v7 }
 0x13e   :  { %457 = vst.msk [vmem:[%s857_s4 + $0x4] sm:$0xf] %vm455_vm2, %v513_v8  ;;  %458 = vst.msk [vmem:[%s857_s4 + $0x8] sm:$0xf] %vm455_vm2, %v514_v9  ;;  %v524_v27 = vpack.c.bf16 %v387_v3, %v387_v3  ;;  %v525_v28 = vpack.c.bf16 %v388_v4, %v388_v4  ;;  %v526_v29 = vpack.c.bf16 %v389_v5, %v389_v5 }
 0x13f   :  { %459 = vst.msk [vmem:[%s857_s4 + $0xc] sm:$0xf] %vm455_vm2, %v515_v10  ;;  %v527_v30 = vpack.c.bf16 %v390_v6, %v390_v6  ;;  %460 = vst.msk [vmem:[%s857_s4 + $0x10] sm:$0xf] %vm455_vm2, %v516_v11 }
 0x140   :  { %461 = vst.msk [vmem:[%s857_s4 + $0x14] sm:$0xf] %vm455_vm2, %v517_v16  ;;  %462 = vst.msk [vmem:[%s857_s4 + $0x18] sm:$0xf] %vm455_vm2, %v518_v21 }
 0x141   :  { %463 = vst.msk [vmem:[%s857_s4 + $0x1c] sm:$0xf] %vm455_vm2, %v519_v22  ;;  %464 = vst.msk [vmem:[%s857_s4 + $0x20] sm:$0xf] %vm455_vm2, %v520_v23 }
 0x142   :  { %465 = vst.msk [vmem:[%s857_s4 + $0x24] sm:$0xf] %vm455_vm2, %v521_v24  ;;  %466 = vst.msk [vmem:[%s857_s4 + $0x28] sm:$0xf] %vm455_vm2, %v522_v25 }
 0x143   :  { %467 = vst.msk [vmem:[%s857_s4 + $0x2c] sm:$0xf] %vm455_vm2, %v523_v26  ;;  %468 = vst.msk [vmem:[%s857_s4 + $0x30] sm:$0xf] %vm455_vm2, %v524_v27 }
 0x144   :  { %469 = vst.msk [vmem:[%s857_s4 + $0x34] sm:$0xf] %vm455_vm2, %v525_v28  ;;  %470 = vst.msk [vmem:[%s857_s4 + $0x38] sm:$0xf] %vm455_vm2, %v526_v29 }
 0x145   :  { %471 = vst.msk [vmem:[%s857_s4 + $0x3c] sm:$0xf] %vm455_vm2, %v527_v30 }

// kernel: shared_layers_forward.80
= control target key start
LH: loop header
LB: loop body
LE: loop exit
PB: predicated region body
PF: predicated region fallthrough
CT: control target
= control target key end

     0   :  { %vm274_vm0 = vcmask 523264   ;;  %vm660_vm1 = vcmask 130048   ;;  %vm1463_vm2 = vcmask 125952   ;;  %s3545_s1 = inlined_call_operand.vmem [shape: bf16[64,16], index: 1, kind: input, shape index: {}]   ;;  %s3546_s0 = inlined_call_operand.vmem [shape: bf16[512,64], index: 0, kind: input, shape index: {}]   ;;  %s3547_s2 = inlined_call_operand.vmem [shape: f32[1,16], index: 2, kind: input, shape index: {}]   ;;  %s3548_s3 = inlined_call_operand.vmem [shape: f32[1,16], index: 3, kind: input, shape index: {}]   ;;  %s3549_s4 = inlined_call_operand.vmem [shape: bf16[512,16], index: 4, kind: output, shape index: {}]  }
   0x1   :  { %v1844_v0 = vld [vmem:[%s3545_s1] sm:$0xff]   ;;  %v1845_v1 = vld [vmem:[%s3545_s1 + $0x8] sm:$0xff]   ;;  %v1846_v2 = vld [vmem:[%s3545_s1 + $0x10] sm:$0xff]  }
   0x2   :  { %1764 = vmatprep.subr.bf16.mxu0 %v1844_v0  ;;  %1836 = vmatprep.subr.bf16.mxu1 %v1844_v0  ;;  %v1848_v3 = vld [vmem:[%s3546_s0] sm:$0xff]   ;;  %v1847_v4 = vld [vmem:[%s3545_s1 + $0x18] sm:$0xff]   ;;  %v1849_v5 = vld [vmem:[%s3546_s0 + $0x8] sm:$0xff]  }
   0x3   :  { %1765 = vmatpush3.bf16.msra.mxu0 %v1844_v0  ;;  %1840 = vmatpush3.bf16.msra.mxu1 %v1844_v0  ;;  %v1850_v6 = vld [vmem:[%s3546_s0 + $0x10] sm:$0xff]   ;;  %v1851_v7 = vld [vmem:[%s3546_s0 + $0x18] sm:$0xff]   ;;  %v1864_v8 = vld [vmem:[%s3546_s0 + $0x80] sm:$0xff]  }
   0x4   :  { %1766 = vmatprep.subr.bf16.mxu0 %v1845_v1  ;;  %1837 = vmatprep.subr.bf16.mxu1 %v1845_v1  ;;  %v1865_v9 = vld [vmem:[%s3546_s0 + $0x88] sm:$0xff]   ;;  %v1866_v10 = vld [vmem:[%s3546_s0 + $0x90] sm:$0xff]   ;;  %v1852_v11 = vld [vmem:[%s3546_s0 + $0x20] sm:$0xff]  }
   0x5   :  { %1772 = vmatprep.mubr.msk.bf16.mxu0 %vm274_vm0, %v1848_v3  ;;  %1804 = vmatprep.mubr.msk.bf16.mxu1 %vm274_vm0, %v1864_v8  ;;  %v1867_v12 = vld [vmem:[%s3546_s0 + $0x98] sm:$0xff]   ;;  %v1868_v13 = vld [vmem:[%s3546_s0 + $0xa0] sm:$0xff]   ;;  %v1853_v14 = vld [vmem:[%s3546_s0 + $0x28] sm:$0xff]  }
   0x6   :  { %v1854_v15 = vld [vmem:[%s3546_s0 + $0x30] sm:$0xff]   ;;  %v1869_v16 = vld [vmem:[%s3546_s0 + $0xa8] sm:$0xff]   ;;  %v1855_v18 = vld [vmem:[%s3546_s0 + $0x38] sm:$0xff]  }
   0x7   :  { %1767 = vmatpush3.bf16.msra.mxu0 %v1845_v1  ;;  %1841 = vmatpush3.bf16.msra.mxu1 %v1845_v1  ;;  %v1870_v17 = vld [vmem:[%s3546_s0 + $0xb0] sm:$0xff]   ;;  %v1856_v19 = vld [vmem:[%s3546_s0 + $0x40] sm:$0xff]   ;;  %v1871_v20 = vld [vmem:[%s3546_s0 + $0xb8] sm:$0xff]  }
   0x8   :  { %1768 = vmatprep.subr.bf16.mxu0 %v1846_v2  ;;  %1838 = vmatprep.subr.bf16.mxu1 %v1846_v2  ;;  %v1872_v21 = vld [vmem:[%s3546_s0 + $0xc0] sm:$0xff]   ;;  %v1857_v22 = vld [vmem:[%s3546_s0 + $0x48] sm:$0xff]   ;;  %v1858_v23 = vld [vmem:[%s3546_s0 + $0x50] sm:$0xff]  }
   0x9   :  { %v1873_v24 = vld [vmem:[%s3546_s0 + $0xc8] sm:$0xff]   ;;  %v1874_v25 = vld [vmem:[%s3546_s0 + $0xd0] sm:$0xff]   ;;  %v1859_v26 = vld [vmem:[%s3546_s0 + $0x58] sm:$0xff]  }
   0xa   :  { %v1860_v27 = vld [vmem:[%s3546_s0 + $0x60] sm:$0xff]   ;;  %v1875_v28 = vld [vmem:[%s3546_s0 + $0xd8] sm:$0xff]   ;;  %v1861_v30 = vld [vmem:[%s3546_s0 + $0x68] sm:$0xff]  }
   0xb   :  { %1769 = vmatpush3.bf16.msra.mxu0 %v1846_v2  ;;  %1842 = vmatpush3.bf16.msra.mxu1 %v1846_v2  ;;  %v1876_v29 = vld [vmem:[%s3546_s0 + $0xe0] sm:$0xff]   ;;  %v1862_v31 = vld [vmem:[%s3546_s0 + $0x70] sm:$0xff]   ;;  %v1877_v32 = vld [vmem:[%s3546_s0 + $0xe8] sm:$0xff]  }
   0xc   :  { %1770 = vmatprep.subr.bf16.mxu0 %v1847_v4  ;;  %1839 = vmatprep.subr.bf16.mxu1 %v1847_v4  ;;  %v1878_v33 = vld [vmem:[%s3546_s0 + $0xf0] sm:$0xff]   ;;  %v1863_v34 = vld [vmem:[%s3546_s0 + $0x78] sm:$0xff]  }
   0xd   :  { %v1879_v35 = vld [vmem:[%s3546_s0 + $0xf8] sm:$0xff]  }
   0xf   :  { %1771 = vmatpush3.bf16.msra.mxu0 %v1847_v4  ;;  %1843 = vmatpush3.bf16.msra.mxu1 %v1847_v4 }
  0x12   :  { %1773 = vmatmul.mubr.msk.bf16.vlgmr.msra.gmra.mrb[0].mxu0 %vm274_vm0, %v1849_v5  ;;  %1805 = vmatmul.mubr.msk.bf16.vlgmr.msra.gmra.mrb[0].mxu1 %vm274_vm0, %v1865_v9 }
  0x13   :  { %1776 = vmatprep.mubr.msk.bf16.mxu0 %vm274_vm0, %v1850_v6  ;;  %1808 = vmatprep.mubr.msk.bf16.mxu1 %vm274_vm0, %v1866_v10 }
  0x1a   :  { %1777 = vmatmul.mubr.msk.bf16.gmra.mrb[4].mxu0 %vm274_vm0, %v1851_v7  ;;  %1809 = vmatmul.mubr.msk.bf16.gmra.mrb[4].mxu1 %vm274_vm0, %v1867_v12 }
  0x1b   :  { %1780 = vmatprep.mubr.msk.bf16.mxu0 %vm274_vm0, %v1852_v11  ;;  %1812 = vmatprep.mubr.msk.bf16.mxu1 %vm274_vm0, %v1868_v13 }
  0x22   :  { %1781 = vmatmul.mubr.msk.bf16.gmra.mrb[8].mxu0 %vm274_vm0, %v1853_v14  ;;  %1813 = vmatmul.mubr.msk.bf16.gmra.mrb[8].mxu1 %vm274_vm0, %v1869_v16 }
  0x23   :  { %1784 = vmatprep.mubr.msk.bf16.mxu0 %vm274_vm0, %v1854_v15  ;;  %1816 = vmatprep.mubr.msk.bf16.mxu1 %vm274_vm0, %v1870_v17 }
  0x2a   :  { %1785 = vmatmul.mubr.msk.bf16.gmra.mrb[12].mxu0 %vm274_vm0, %v1855_v18  ;;  %1817 = vmatmul.mubr.msk.bf16.gmra.mrb[12].mxu1 %vm274_vm0, %v1871_v20 }
  0x2b   :  { %1788 = vmatprep.mubr.msk.bf16.mxu0 %vm274_vm0, %v1856_v19  ;;  %1820 = vmatprep.mubr.msk.bf16.mxu1 %vm274_vm0, %v1872_v21 }
  0x32   :  { %1789 = vmatmul.mubr.msk.bf16.gmra.mrb[16].mxu0 %vm274_vm0, %v1857_v22  ;;  %1821 = vmatmul.mubr.msk.bf16.gmra.mrb[16].mxu1 %vm274_vm0, %v1873_v24 }
  0x33   :  { %1792 = vmatprep.mubr.msk.bf16.mxu0 %vm274_vm0, %v1858_v23  ;;  %1824 = vmatprep.mubr.msk.bf16.mxu1 %vm274_vm0, %v1874_v25 }
  0x3a   :  { %1793 = vmatmul.mubr.msk.bf16.gmra.mrb[20].mxu0 %vm274_vm0, %v1859_v26  ;;  %1825 = vmatmul.mubr.msk.bf16.gmra.mrb[20].mxu1 %vm274_vm0, %v1875_v28 }
  0x3b   :  { %1796 = vmatprep.mubr.msk.bf16.mxu0 %vm274_vm0, %v1860_v27  ;;  %1828 = vmatprep.mubr.msk.bf16.mxu1 %vm274_vm0, %v1876_v29 }
  0x42   :  { %1797 = vmatmul.mubr.msk.bf16.gmra.mrb[24].mxu0 %vm274_vm0, %v1861_v30  ;;  %1829 = vmatmul.mubr.msk.bf16.gmra.mrb[24].mxu1 %vm274_vm0, %v1877_v32 }
  0x43   :  { %1800 = vmatprep.mubr.msk.bf16.mxu0 %vm274_vm0, %v1862_v31  ;;  %1832 = vmatprep.mubr.msk.bf16.mxu1 %vm274_vm0, %v1878_v33 }
  0x4a   :  { %1801 = vmatmul.mubr.msk.bf16.gmra.mrb[28].mxu0 %vm274_vm0, %v1863_v34  ;;  %1833 = vmatmul.mubr.msk.bf16.gmra.mrb[28].mxu1 %vm274_vm0, %v1879_v35 }
  0xe5   :  { %v2047_v36 = vpop.f32.mrb[0].mxu0  ;;  %v2065_v46 = vpop.f32.mrb[0].mxu1 }
  0xe6   :  { %v2049_v37 = vpop.f32.mrb[1].mxu0  ;;  %v797_v41 = vmul.f32 %v2047_v36, %v2047_v36  ;;  %v664_v47 = vsel %vm660_vm1, %v2047_v36, 0.0  ;;  %v2073_v51 = vpop.f32.mrb[1].mxu1 }
  0xe7   :  { %v795_v38 = vmul.f32 %v2049_v37, %v2049_v37  ;;  %v2053_v39 = vpop.f32.mrb[2].mxu0  ;;  %v661_v42 = vsel %vm660_vm1, %v2049_v37, 0.0  ;;  %3592 = vst [vmem:[#allocation2_spill] sm:$0xff] %v2073_v51  ;;  %v2075_v54 = vpop.f32.mrb[2].mxu1 }
  0xe8   :  { %v2055_v40 = vpop.f32.mrb[3].mxu0  ;;  %v798_v49 = vmul.f32 %v2053_v39, %v2053_v39  ;;  %v862_v55 = vsel %vm660_vm1, %v797_v41, 0.0  ;;  %v666_v56 = vsel %vm660_vm1, %v2053_v39, 0.0  ;;  %v2082_v58 = vpop.f32.mrb[3].mxu1 }
  0xe9   :  { %v662_v43 = vsel %vm660_vm1, %v2055_v40, 0.0  ;;  %v796_v44 = vmul.f32 %v2055_v40, %v2055_v40  ;;  %v859_v48 = vsel %vm660_vm1, %v795_v38, 0.0 }
  0xea   :  { %v663_v45 = vadd.f32 %v662_v43, %v661_v42  ;;  %v864_v62 = vsel %vm660_vm1, %v798_v49, 0.0 }
  0xeb   :  { %v860_v50 = vsel %vm660_vm1, %v796_v44, 0.0 }
  0xec   :  { %v665_v52 = vadd.f32 %v664_v47, %v663_v45  ;;  %v861_v53 = vadd.f32 %v860_v50, %v859_v48 }
  0xed   :  { %v2080_v57 = vpop.f32.mrb[4].mxu0  ;;  %v2102_v11 = vpop.f32.mrb[4].mxu1 }
  0xee   :  { %v863_v59 = vadd.f32 %v862_v55, %v861_v53  ;;  %v2084_v60 = vpop.f32.mrb[5].mxu0  ;;  %v667_v61 = vadd.f32 %v666_v56, %v665_v52  ;;  %v801_v5 = vmul.f32 %v2080_v57, %v2080_v57  ;;  %v672_v12 = vsel %vm660_vm1, %v2080_v57, 0.0  ;;  %v2109_v15 = vpop.f32.mrb[5].mxu1 }
  0xef   :  { %v668_v63 = vsel %vm660_vm1, %v2084_v60, 0.0  ;;  %v799_v0 = vmul.f32 %v2084_v60, %v2084_v60  ;;  %v2091_v1 = vpop.f32.mrb[6].mxu0  ;;  %v2111_v18 = vpop.f32.mrb[6].mxu1 }
  0xf0   :  { %v669_v2 = vadd.f32 %v668_v63, %v667_v61  ;;  %v865_v3 = vadd.f32 %v864_v62, %v863_v59  ;;  %v2093_v4 = vpop.f32.mrb[7].mxu0  ;;  %v802_v13 = vmul.f32 %v2091_v1, %v2091_v1  ;;  %v870_v19 = vsel %vm660_vm1, %v801_v5, 0.0  ;;  %v2118_v22 = vpop.f32.mrb[7].mxu1 }
  0xf1   :  { %v866_v6 = vsel %vm660_vm1, %v799_v0, 0.0  ;;  %v670_v7 = vsel %vm660_vm1, %v2093_v4, 0.0  ;;  %v800_v8 = vmul.f32 %v2093_v4, %v2093_v4  ;;  %v674_v20 = vsel %vm660_vm1, %v2091_v1, 0.0 }
  0xf2   :  { %v867_v9 = vadd.f32 %v866_v6, %v865_v3  ;;  %v671_v10 = vadd.f32 %v670_v7, %v669_v2  ;;  %v872_v26 = vsel %vm660_vm1, %v802_v13, 0.0 }
  0xf3   :  { %v868_v14 = vsel %vm660_vm1, %v800_v8, 0.0 }
  0xf4   :  { %v673_v16 = vadd.f32 %v672_v12, %v671_v10  ;;  %v869_v17 = vadd.f32 %v868_v14, %v867_v9 }
  0xf5   :  { %v2116_v21 = vpop.f32.mrb[8].mxu0  ;;  %v2138_v43 = vpop.f32.mrb[8].mxu1 }
  0xf6   :  { %v871_v23 = vadd.f32 %v870_v19, %v869_v17  ;;  %v2120_v24 = vpop.f32.mrb[9].mxu0  ;;  %v675_v25 = vadd.f32 %v674_v20, %v673_v16  ;;  %v805_v33 = vmul.f32 %v2116_v21, %v2116_v21  ;;  %v680_v44 = vsel %vm660_vm1, %v2116_v21, 0.0  ;;  %v2145_v48 = vpop.f32.mrb[9].mxu1 }
  0xf7   :  { %v676_v27 = vsel %vm660_vm1, %v2120_v24, 0.0  ;;  %v803_v28 = vmul.f32 %v2120_v24, %v2120_v24  ;;  %v2127_v29 = vpop.f32.mrb[10].mxu0  ;;  %v2147_v52 = vpop.f32.mrb[10].mxu1 }
  0xf8   :  { %v677_v30 = vadd.f32 %v676_v27, %v675_v25  ;;  %v873_v31 = vadd.f32 %v872_v26, %v871_v23  ;;  %v2129_v32 = vpop.f32.mrb[11].mxu0  ;;  %v806_v45 = vmul.f32 %v2127_v29, %v2127_v29  ;;  %v878_v53 = vsel %vm660_vm1, %v805_v33, 0.0  ;;  %v2154_v59 = vpop.f32.mrb[11].mxu1 }
  0xf9   :  { %v874_v34 = vsel %vm660_vm1, %v803_v28, 0.0  ;;  %v678_v35 = vsel %vm660_vm1, %v2129_v32, 0.0  ;;  %v804_v38 = vmul.f32 %v2129_v32, %v2129_v32  ;;  %v682_v55 = vsel %vm660_vm1, %v2127_v29, 0.0 }
  0xfa   :  { %v875_v41 = vadd.f32 %v874_v34, %v873_v31  ;;  %v679_v42 = vadd.f32 %v678_v35, %v677_v30  ;;  %v880_v0 = vsel %vm660_vm1, %v806_v45, 0.0 }
  0xfb   :  { %v876_v47 = vsel %vm660_vm1, %v804_v38, 0.0 }
  0xfc   :  { %v681_v49 = vadd.f32 %v680_v44, %v679_v42  ;;  %v877_v50 = vadd.f32 %v876_v47, %v875_v41 }
  0xfd   :  { %v2152_v56 = vpop.f32.mrb[12].mxu0  ;;  %v2174_v17 = vpop.f32.mrb[12].mxu1 }
  0xfe   :  { %v879_v61 = vadd.f32 %v878_v53, %v877_v50  ;;  %v2156_v62 = vpop.f32.mrb[13].mxu0  ;;  %v683_v63 = vadd.f32 %v682_v55, %v681_v49  ;;  %v809_v9 = vmul.f32 %v2152_v56, %v2152_v56  ;;  %v688_v19 = vsel %vm660_vm1, %v2152_v56, 0.0  ;;  %v2181_v25 = vpop.f32.mrb[13].mxu1 }
  0xff   :  { %v684_v2 = vsel %vm660_vm1, %v2156_v62, 0.0  ;;  %v807_v3 = vmul.f32 %v2156_v62, %v2156_v62  ;;  %v2163_v5 = vpop.f32.mrb[14].mxu0  ;;  %v2183_v28 = vpop.f32.mrb[14].mxu1 }
 0x100   :  { %3593 = vst [vmem:[#allocation3_spill] sm:$0xff] %v2163_v5  ;;  %v685_v6 = vadd.f32 %v684_v2, %v683_v63  ;;  %v881_v7 = vadd.f32 %v880_v0, %v879_v61  ;;  %v2165_v8 = vpop.f32.mrb[15].mxu0  ;;  %v810_v20 = vmul.f32 %v2163_v5, %v2163_v5  ;;  %v886_v30 = vsel %vm660_vm1, %v809_v9, 0.0  ;;  %v2190_v34 = vpop.f32.mrb[15].mxu1 }
 0x101   :  { %v882_v10 = vsel %vm660_vm1, %v807_v3, 0.0  ;;  %v686_v12 = vsel %vm660_vm1, %v2165_v8, 0.0  ;;  %v808_v13 = vmul.f32 %v2165_v8, %v2165_v8  ;;  %v690_v31 = vsel %vm660_vm1, %v2163_v5, 0.0 }
 0x102   :  { %v883_v14 = vadd.f32 %v882_v10, %v881_v7  ;;  %v687_v16 = vadd.f32 %v686_v12, %v685_v6  ;;  %v888_v42 = vsel %vm660_vm1, %v810_v20, 0.0 }
 0x103   :  { %v884_v23 = vsel %vm660_vm1, %v808_v13, 0.0 }
 0x104   :  { %v689_v26 = vadd.f32 %v688_v19, %v687_v16  ;;  %v885_v27 = vadd.f32 %v884_v23, %v883_v14 }
 0x105   :  { %v2188_v33 = vpop.f32.mrb[16].mxu0  ;;  %v2210_v6 = vpop.f32.mrb[16].mxu1 }
 0x106   :  { %3594 = vst [vmem:[#allocation4_spill] sm:$0xff] %v2188_v33  ;;  %v887_v35 = vadd.f32 %v886_v30, %v885_v27  ;;  %v2192_v38 = vpop.f32.mrb[17].mxu0  ;;  %v691_v41 = vadd.f32 %v690_v31, %v689_v26  ;;  %v813_v55 = vmul.f32 %v2188_v33, %v2188_v33  ;;  %v696_v7 = vsel %vm660_vm1, %v2188_v33, 0.0  ;;  %v2217_v12 = vpop.f32.mrb[17].mxu1 }
 0x107   :  { %3595 = vst [vmem:[#allocation5_spill] sm:$0xff] %v2192_v38  ;;  %v692_v44 = vsel %vm660_vm1, %v2192_v38, 0.0  ;;  %v811_v45 = vmul.f32 %v2192_v38, %v2192_v38  ;;  %v2199_v47 = vpop.f32.mrb[18].mxu0  ;;  %v2219_v16 = vpop.f32.mrb[18].mxu1 }
 0x108   :  { %3596 = vst [vmem:[#allocation6_spill] sm:$0xff] %v2199_v47  ;;  %v693_v49 = vadd.f32 %v692_v44, %v691_v41  ;;  %v889_v50 = vadd.f32 %v888_v42, %v887_v35  ;;  %v2201_v53 = vpop.f32.mrb[19].mxu0  ;;  %v814_v9 = vmul.f32 %v2199_v47, %v2199_v47  ;;  %v894_v19 = vsel %vm660_vm1, %v813_v55, 0.0  ;;  %v2226_v26 = vpop.f32.mrb[19].mxu1 }
 0x109   :  { %3597 = vst [vmem:[#allocation7_spill] sm:$0xff] %v2201_v53  ;;  %v890_v61 = vsel %vm660_vm1, %v811_v45, 0.0  ;;  %v694_v63 = vsel %vm660_vm1, %v2201_v53, 0.0  ;;  %v812_v0 = vmul.f32 %v2201_v53, %v2201_v53  ;;  %v698_v20 = vsel %vm660_vm1, %v2199_v47, 0.0 }
 0x10a   :  { %v891_v2 = vadd.f32 %v890_v61, %v889_v50  ;;  %v695_v3 = vadd.f32 %v694_v63, %v693_v49  ;;  %v896_v35 = vsel %vm660_vm1, %v814_v9, 0.0 }
 0x10b   :  { %v892_v10 = vsel %vm660_vm1, %v812_v0, 0.0 }
 0x10c   :  { %v697_v13 = vadd.f32 %v696_v7, %v695_v3  ;;  %v893_v14 = vadd.f32 %v892_v10, %v891_v2 }
 0x10d   :  { %v2224_v23 = vpop.f32.mrb[20].mxu0  ;;  %v2246_v7 = vpop.f32.mrb[20].mxu1 }
 0x10e   :  { %3598 = vst [vmem:[#allocation8_spill] sm:$0xff] %v2224_v23  ;;  %v895_v27 = vadd.f32 %v894_v19, %v893_v14  ;;  %v2228_v30 = vpop.f32.mrb[21].mxu0  ;;  %v699_v31 = vadd.f32 %v698_v20, %v697_v13  ;;  %v817_v55 = vmul.f32 %v2224_v23, %v2224_v23  ;;  %v704_v9 = vsel %vm660_vm1, %v2224_v23, 0.0  ;;  %v2253_v14 = vpop.f32.mrb[21].mxu1 }
 0x10f   :  { %3599 = vst [vmem:[#allocation9_spill] sm:$0xff] %v2228_v30  ;;  %v700_v41 = vsel %vm660_vm1, %v2228_v30, 0.0  ;;  %v815_v42 = vmul.f32 %v2228_v30, %v2228_v30  ;;  %v2235_v44 = vpop.f32.mrb[22].mxu0 }
 0x110   :  { %3600 = vst [vmem:[#allocation10_spill] sm:$0xff] %v2235_v44  ;;  %v701_v45 = vadd.f32 %v700_v41, %v699_v31  ;;  %v897_v49 = vadd.f32 %v896_v35, %v895_v27  ;;  %v2237_v50 = vpop.f32.mrb[23].mxu0  ;;  %v818_v10 = vmul.f32 %v2235_v44, %v2235_v44  ;;  %v2255_v27 = vpop.f32.mrb[22].mxu1  ;;  %v902_v31 = vsel %vm660_vm1, %v817_v55, 0.0 }
 0x111   :  { %3601 = vst [vmem:[#allocation11_spill] sm:$0xff] %v2237_v50  ;;  %v898_v61 = vsel %vm660_vm1, %v815_v42, 0.0  ;;  %v702_v63 = vsel %vm660_vm1, %v2237_v50, 0.0  ;;  %v816_v0 = vmul.f32 %v2237_v50, %v2237_v50  ;;  %v706_v35 = vsel %vm660_vm1, %v2235_v44, 0.0  ;;  %v2262_v42 = vpop.f32.mrb[23].mxu1 }
 0x112   :  { %v899_v2 = vadd.f32 %v898_v61, %v897_v49  ;;  %v703_v3 = vadd.f32 %v702_v63, %v701_v45  ;;  %v904_v63 = vsel %vm660_vm1, %v818_v10, 0.0 }
 0x113   :  { %v900_v13 = vsel %vm660_vm1, %v816_v0, 0.0 }
 0x114   :  { %v705_v19 = vadd.f32 %v704_v9, %v703_v3  ;;  %v901_v20 = vadd.f32 %v900_v13, %v899_v2 }
 0x115   :  { %v2260_v41 = vpop.f32.mrb[24].mxu0 }
 0x116   :  { %3602 = vst [vmem:[#allocation12_spill] sm:$0xff] %v2260_v41  ;;  %v903_v45 = vadd.f32 %v902_v31, %v901_v20  ;;  %v2264_v49 = vpop.f32.mrb[25].mxu0  ;;  %v707_v61 = vadd.f32 %v706_v35, %v705_v19  ;;  %v821_v20 = vmul.f32 %v2260_v41, %v2260_v41 }
 0x117   :  { %3603 = vst [vmem:[#allocation13_spill] sm:$0xff] %v2264_v49  ;;  %v708_v0 = vsel %vm660_vm1, %v2264_v49, 0.0  ;;  %v819_v2 = vmul.f32 %v2264_v49, %v2264_v49  ;;  %v2271_v55 = vpop.f32.mrb[26].mxu0  ;;  %v2282_v49 = vpop.f32.mrb[24].mxu1 }
 0x118   :  { %3604 = vst [vmem:[#allocation14_spill] sm:$0xff] %v2271_v55  ;;  %v709_v3 = vadd.f32 %v708_v0, %v707_v61  ;;  %v905_v9 = vadd.f32 %v904_v63, %v903_v45  ;;  %v2273_v13 = vpop.f32.mrb[27].mxu0  ;;  %3606 = vst [vmem:[#allocation16_spill] sm:$0xff] %v2282_v49  ;;  %v712_v45 = vsel %vm660_vm1, %v2260_v41, 0.0  ;;  %v822_v61 = vmul.f32 %v2271_v55, %v2271_v55  ;;  %v2289_v0 = vpop.f32.mrb[25].mxu1 }
 0x119   :  { %3605 = vst [vmem:[#allocation15_spill] sm:$0xff] %v2273_v13  ;;  %v906_v31 = vsel %vm660_vm1, %v819_v2, 0.0  ;;  %v710_v10 = vsel %vm660_vm1, %v2273_v13, 0.0  ;;  %v820_v19 = vmul.f32 %v2273_v13, %v2273_v13  ;;  %v2291_v50 = vpop.f32.mrb[26].mxu1  ;;  %v910_v13 = vsel %vm660_vm1, %v821_v20, 0.0 }
 0x11a   :  { %v907_v35 = vadd.f32 %v906_v31, %v905_v9  ;;  %v711_v44 = vadd.f32 %v710_v10, %v709_v3  ;;  %3607 = vst [vmem:[#allocation17_spill] sm:$0xff] %v2291_v50  ;;  %v714_v3 = vsel %vm660_vm1, %v2271_v55, 0.0  ;;  %v2298_v31 = vpop.f32.mrb[27].mxu1 }
 0x11b   :  { %v908_v63 = vsel %vm660_vm1, %v820_v19, 0.0  ;;  %v912_v19 = vsel %vm660_vm1, %v822_v61, 0.0 }
 0x11c   :  { %v713_v2 = vadd.f32 %v712_v45, %v711_v44  ;;  %v909_v23 = vadd.f32 %v908_v63, %v907_v35 }
 0x11d   :  { %v2296_v9 = vpop.f32.mrb[28].mxu0 }
 0x11e   :  { %3608 = vst [vmem:[#allocation18_spill] sm:$0xff] %v2296_v9  ;;  %v911_v10 = vadd.f32 %v910_v13, %v909_v23  ;;  %v2300_v41 = vpop.f32.mrb[29].mxu0  ;;  %v715_v30 = vadd.f32 %v714_v3, %v713_v2  ;;  %v825_v23 = vmul.f32 %v2296_v9, %v2296_v9 }
 0x11f   :  { %3609 = vst [vmem:[#allocation19_spill] sm:$0xff] %v2300_v41  ;;  %v716_v44 = vsel %vm660_vm1, %v2300_v41, 0.0  ;;  %v823_v35 = vmul.f32 %v2300_v41, %v2300_v41  ;;  %v2307_v20 = vpop.f32.mrb[30].mxu0  ;;  %v2318_v41 = vpop.f32.mrb[28].mxu1 }
 0x120   :  { %3610 = vst [vmem:[#allocation20_spill] sm:$0xff] %v2307_v20  ;;  %v717_v45 = vadd.f32 %v716_v44, %v715_v30  ;;  %v913_v63 = vadd.f32 %v912_v19, %v911_v10  ;;  %v2309_v55 = vpop.f32.mrb[31].mxu0  ;;  %3612 = vst [vmem:[#allocation22_spill] sm:$0xff] %v2318_v41  ;;  %v720_v30 = vsel %vm660_vm1, %v2296_v9, 0.0  ;;  %v826_v10 = vmul.f32 %v2307_v20, %v2307_v20 }
 0x121   :  { %3611 = vst [vmem:[#allocation21_spill] sm:$0xff] %v2309_v55  ;;  %v914_v13 = vsel %vm660_vm1, %v823_v35, 0.0  ;;  %v718_v61 = vsel %vm660_vm1, %v2309_v55, 0.0  ;;  %v824_v2 = vmul.f32 %v2309_v55, %v2309_v55  ;;  %v827_v44 = vmul.f32 %v2073_v51, %v2073_v51  ;;  %v2327_v35 = vpop.f32.mrb[29].mxu1 }
 0x122   :  { %v915_v3 = vadd.f32 %v914_v13, %v913_v63  ;;  %v719_v47 = vadd.f32 %v718_v61, %v717_v45  ;;  %3613 = vst [vmem:[#allocation23_spill] sm:$0xff] %v2327_v35  ;;  %v2329_v55 = vpop.f32.mrb[30].mxu1  ;;  %v918_v45 = vsel %vm660_vm1, %v825_v23, 0.0  ;;  %v722_v63 = vsel %vm660_vm1, %v2307_v20, 0.0 }
 0x123   :  { %v916_v19 = vsel %vm660_vm1, %v824_v2, 0.0  ;;  %3614 = vst [vmem:[#allocation24_spill] sm:$0xff] %v2329_v55  ;;  %v724_v13 = vsel %vm660_vm1, %v2073_v51, 0.0  ;;  %v2336_v61 = vpop.f32.mrb[31].mxu1  ;;  %v920_v38 = vsel %vm660_vm1, %v826_v10, 0.0  ;;  %v922_v5 = vsel %vm660_vm1, %v827_v44, 0.0 }
 0x124   :  { %v721_v33 = vadd.f32 %v720_v30, %v719_v47  ;;  %v917_v53 = vadd.f32 %v916_v19, %v915_v3  ;;  %3615 = vst [vmem:[#allocation25_spill] sm:$0xff] %v2336_v61  ;;  %v828_v47 = vmul.f32 %v2082_v58, %v2082_v58  ;;  %v829_v23 = vmul.f32 %v2065_v46, %v2065_v46 }
 0x125   :  { %v726_v19 = vsel %vm660_vm1, %v2082_v58, 0.0 }
 0x126   :  { %v919_v2 = vadd.f32 %v918_v45, %v917_v53  ;;  %v723_v9 = vadd.f32 %v722_v63, %v721_v33  ;;  %v728_v33 = vsel %vm660_vm1, %v2065_v46, 0.0  ;;  %v830_v53 = vmul.f32 %v2075_v54, %v2075_v54 }
 0x127   :  { %v924_v10 = vsel %vm660_vm1, %v828_v47, 0.0  ;;  %v926_v45 = vsel %vm660_vm1, %v829_v23, 0.0  ;;  %v730_v63 = vsel %vm660_vm1, %v2075_v54, 0.0  ;;  %v832_v47 = vmul.f32 %v2118_v22, %v2118_v22 }
 0x128   :  { %v725_v3 = vadd.f32 %v724_v13, %v723_v9  ;;  %v921_v30 = vadd.f32 %v920_v38, %v919_v2  ;;  %v831_v9 = vmul.f32 %v2109_v15, %v2109_v15  ;;  %v734_v23 = vsel %vm660_vm1, %v2118_v22, 0.0 }
 0x12a   :  { %v923_v51 = vadd.f32 %v922_v5, %v921_v30  ;;  %v727_v20 = vadd.f32 %v726_v19, %v725_v3  ;;  %v732_v5 = vsel %vm660_vm1, %v2109_v15, 0.0  ;;  %v928_v3 = vsel %vm660_vm1, %v830_v53, 0.0 }
 0x12b   :  { %v930_v30 = vsel %vm660_vm1, %v831_v9, 0.0  ;;  %v834_v53 = vmul.f32 %v2111_v18, %v2111_v18  ;;  %v932_v9 = vsel %vm660_vm1, %v832_v47, 0.0  ;;  %v836_v47 = vmul.f32 %v2154_v59, %v2154_v59 }
 0x12c   :  { %v729_v38 = vadd.f32 %v728_v33, %v727_v20  ;;  %v925_v44 = vadd.f32 %v924_v10, %v923_v51  ;;  %v833_v51 = vmul.f32 %v2102_v11, %v2102_v11 }
 0x12e   :  { %v927_v13 = vadd.f32 %v926_v45, %v925_v44  ;;  %v731_v2 = vadd.f32 %v730_v63, %v729_v38  ;;  %v736_v38 = vsel %vm660_vm1, %v2102_v11, 0.0  ;;  %v835_v44 = vmul.f32 %v2145_v48, %v2145_v48 }
 0x130   :  { %v733_v19 = vadd.f32 %v732_v5, %v731_v2  ;;  %v929_v20 = vadd.f32 %v928_v3, %v927_v13  ;;  %v934_v5 = vsel %vm660_vm1, %v833_v51, 0.0  ;;  %v738_v13 = vsel %vm660_vm1, %v2111_v18, 0.0 }
 0x131   :  { %v740_v2 = vsel %vm660_vm1, %v2145_v48, 0.0  ;;  %v837_v51 = vmul.f32 %v2138_v43, %v2138_v43 }
 0x132   :  { %v931_v33 = vadd.f32 %v930_v30, %v929_v20  ;;  %v735_v10 = vadd.f32 %v734_v23, %v733_v19  ;;  %v936_v19 = vsel %vm660_vm1, %v834_v53, 0.0  ;;  %v938_v20 = vsel %vm660_vm1, %v835_v44, 0.0 }
 0x133   :  { %v838_v53 = vmul.f32 %v2147_v52, %v2147_v52  ;;  %v940_v44 = vsel %vm660_vm1, %v836_v47, 0.0  ;;  %v840_v47 = vmul.f32 %v2190_v34, %v2190_v34 }
 0x134   :  { %v737_v45 = vadd.f32 %v736_v38, %v735_v10  ;;  %v933_v63 = vadd.f32 %v932_v9, %v931_v33  ;;  %v742_v33 = vsel %vm660_vm1, %v2154_v59, 0.0 }
 0x136   :  { %v935_v3 = vadd.f32 %v934_v5, %v933_v63  ;;  %v739_v30 = vadd.f32 %v738_v13, %v737_v45  ;;  %v744_v45 = vsel %vm660_vm1, %v2138_v43, 0.0  ;;  %v839_v63 = vmul.f32 %v2181_v25, %v2181_v25 }
 0x138   :  { %v741_v23 = vadd.f32 %v740_v2, %v739_v30  ;;  %v937_v10 = vadd.f32 %v936_v19, %v935_v3  ;;  %v942_v2 = vsel %vm660_vm1, %v837_v51, 0.0  ;;  %v746_v3 = vsel %vm660_vm1, %v2147_v52, 0.0 }
 0x139   :  { %v748_v30 = vsel %vm660_vm1, %v2181_v25, 0.0  ;;  %v841_v51 = vmul.f32 %v2174_v17, %v2174_v17 }
 0x13a   :  { %v939_v38 = vadd.f32 %v938_v20, %v937_v10  ;;  %v743_v9 = vadd.f32 %v742_v33, %v741_v23  ;;  %v944_v23 = vsel %vm660_vm1, %v838_v53, 0.0  ;;  %v946_v10 = vsel %vm660_vm1, %v839_v63, 0.0 }
 0x13b   :  { %v842_v53 = vmul.f32 %v2183_v28, %v2183_v28  ;;  %v948_v63 = vsel %vm660_vm1, %v840_v47, 0.0  ;;  %v844_v47 = vmul.f32 %v2226_v26, %v2226_v26 }
 0x13c   :  { %v745_v5 = vadd.f32 %v744_v45, %v743_v9  ;;  %v941_v13 = vadd.f32 %v940_v44, %v939_v38  ;;  %v750_v38 = vsel %vm660_vm1, %v2190_v34, 0.0 }
 0x13e   :  { %v943_v19 = vadd.f32 %v942_v2, %v941_v13  ;;  %v747_v20 = vadd.f32 %v746_v3, %v745_v5  ;;  %v752_v5 = vsel %vm660_vm1, %v2174_v17, 0.0  ;;  %v843_v13 = vmul.f32 %v2217_v12, %v2217_v12 }
 0x140   :  { %v749_v33 = vadd.f32 %v748_v30, %v747_v20  ;;  %v945_v9 = vadd.f32 %v944_v23, %v943_v19  ;;  %v950_v30 = vsel %vm660_vm1, %v841_v51, 0.0  ;;  %v754_v19 = vsel %vm660_vm1, %v2183_v28, 0.0 }
 0x141   :  { %v756_v20 = vsel %vm660_vm1, %v2217_v12, 0.0  ;;  %v845_v51 = vmul.f32 %v2210_v6, %v2210_v6 }
 0x142   :  { %v947_v45 = vadd.f32 %v946_v10, %v945_v9  ;;  %v751_v44 = vadd.f32 %v750_v38, %v749_v33  ;;  %v952_v33 = vsel %vm660_vm1, %v842_v53, 0.0  ;;  %v954_v9 = vsel %vm660_vm1, %v843_v13, 0.0 }
 0x143   :  { %v846_v53 = vmul.f32 %v2219_v16, %v2219_v16  ;;  %v956_v13 = vsel %vm660_vm1, %v844_v47, 0.0  ;;  %v848_v47 = vmul.f32 %v2262_v42, %v2262_v42 }
 0x144   :  { %v753_v2 = vadd.f32 %v752_v5, %v751_v44  ;;  %v949_v3 = vadd.f32 %v948_v63, %v947_v45  ;;  %v758_v45 = vsel %vm660_vm1, %v2226_v26, 0.0 }
 0x146   :  { %v951_v23 = vadd.f32 %v950_v30, %v949_v3  ;;  %v755_v10 = vadd.f32 %v754_v19, %v753_v2  ;;  %v760_v2 = vsel %vm660_vm1, %v2210_v6, 0.0  ;;  %v847_v3 = vmul.f32 %v2253_v14, %v2253_v14 }
 0x148   :  { %v757_v38 = vadd.f32 %v756_v20, %v755_v10  ;;  %v953_v44 = vadd.f32 %v952_v33, %v951_v23  ;;  %v958_v20 = vsel %vm660_vm1, %v845_v51, 0.0  ;;  %v762_v23 = vsel %vm660_vm1, %v2219_v16, 0.0 }
 0x149   :  { %v764_v10 = vsel %vm660_vm1, %v2253_v14, 0.0  ;;  %v849_v51 = vmul.f32 %v2246_v7, %v2246_v7 }
 0x14a   :  { %v955_v5 = vadd.f32 %v954_v9, %v953_v44  ;;  %v759_v63 = vadd.f32 %v758_v45, %v757_v38  ;;  %v960_v38 = vsel %vm660_vm1, %v846_v53, 0.0  ;;  %v962_v44 = vsel %vm660_vm1, %v847_v3, 0.0 }
 0x14b   :  { %v850_v53 = vmul.f32 %v2255_v27, %v2255_v27  ;;  %v964_v3 = vsel %vm660_vm1, %v848_v47, 0.0  ;;  %v852_v47 = vmul.f32 %v2298_v31, %v2298_v31 }
 0x14c   :  { %v761_v30 = vadd.f32 %v760_v2, %v759_v63  ;;  %v957_v19 = vadd.f32 %v956_v13, %v955_v5  ;;  %v766_v5 = vsel %vm660_vm1, %v2262_v42, 0.0 }
 0x14e   :  { %v959_v33 = vadd.f32 %v958_v20, %v957_v19  ;;  %v763_v9 = vadd.f32 %v762_v23, %v761_v30  ;;  %v768_v30 = vsel %vm660_vm1, %v2246_v7, 0.0  ;;  %v851_v19 = vmul.f32 %v2289_v0, %v2289_v0 }
 0x150   :  { %v765_v45 = vadd.f32 %v764_v10, %v763_v9  ;;  %v961_v63 = vadd.f32 %v960_v38, %v959_v33  ;;  %v966_v10 = vsel %vm660_vm1, %v849_v51, 0.0  ;;  %v770_v33 = vsel %vm660_vm1, %v2255_v27, 0.0 }
 0x151   :  { %v772_v9 = vsel %vm660_vm1, %v2289_v0, 0.0  ;;  %v853_v51 = vmul.f32 %v2282_v49, %v2282_v49 }
 0x152   :  { %v963_v2 = vadd.f32 %v962_v44, %v961_v63  ;;  %v767_v13 = vadd.f32 %v766_v5, %v765_v45  ;;  %v968_v45 = vsel %vm660_vm1, %v850_v53, 0.0  ;;  %v970_v63 = vsel %vm660_vm1, %v851_v19, 0.0 }
 0x153   :  { %v854_v53 = vmul.f32 %v2291_v50, %v2291_v50  ;;  %v972_v19 = vsel %vm660_vm1, %v852_v47, 0.0  ;;  %v856_v47 = vmul.f32 %v2336_v61, %v2336_v61 }
 0x154   :  { %v769_v20 = vadd.f32 %v768_v30, %v767_v13  ;;  %v965_v23 = vadd.f32 %v964_v3, %v963_v2  ;;  %v774_v2 = vsel %vm660_vm1, %v2298_v31, 0.0 }
 0x156   :  { %v967_v38 = vadd.f32 %v966_v10, %v965_v23  ;;  %v771_v44 = vadd.f32 %v770_v33, %v769_v20  ;;  %v776_v20 = vsel %vm660_vm1, %v2282_v49, 0.0  ;;  %v855_v23 = vmul.f32 %v2327_v35, %v2327_v35 }
 0x158   :  { %v773_v5 = vadd.f32 %v772_v9, %v771_v44  ;;  %v969_v13 = vadd.f32 %v968_v45, %v967_v38  ;;  %v974_v9 = vsel %vm660_vm1, %v853_v51, 0.0  ;;  %v778_v38 = vsel %vm660_vm1, %v2291_v50, 0.0 }
 0x159   :  { %v780_v44 = vsel %vm660_vm1, %v2327_v35, 0.0  ;;  %v857_v51 = vmul.f32 %v2318_v41, %v2318_v41 }
 0x15a   :  { %v971_v30 = vadd.f32 %v970_v63, %v969_v13  ;;  %v775_v3 = vadd.f32 %v774_v2, %v773_v5  ;;  %v976_v5 = vsel %vm660_vm1, %v854_v53, 0.0  ;;  %v978_v13 = vsel %vm660_vm1, %v855_v23, 0.0 }
 0x15b   :  { %v858_v53 = vmul.f32 %v2329_v55, %v2329_v55  ;;  %v980_v23 = vsel %vm660_vm1, %v856_v47, 0.0 }
 0x15c   :  { %v777_v10 = vadd.f32 %v776_v20, %v775_v3  ;;  %v973_v33 = vadd.f32 %v972_v19, %v971_v30  ;;  %v782_v30 = vsel %vm660_vm1, %v2336_v61, 0.0 }
 0x15e   :  { %v975_v45 = vadd.f32 %v974_v9, %v973_v33  ;;  %v779_v63 = vadd.f32 %v778_v38, %v777_v10  ;;  %v784_v10 = vsel %vm660_vm1, %v2318_v41, 0.0  ;;  %v982_v38 = vsel %vm660_vm1, %v857_v51, 0.0 }
 0x160   :  { %v781_v2 = vadd.f32 %v780_v44, %v779_v63  ;;  %v977_v3 = vadd.f32 %v976_v5, %v975_v45  ;;  %v786_v44 = vsel %vm660_vm1, %v2329_v55, 0.0  ;;  %v984_v5 = vsel %vm660_vm1, %v858_v53, 0.0 }
 0x161   :  { %v1004_v53 = vlaneseq }
 0x162   :  { %v979_v20 = vadd.f32 %v978_v13, %v977_v3  ;;  %v783_v19 = vadd.f32 %v782_v30, %v781_v2 }
 0x164   :  { %v785_v33 = vadd.f32 %v784_v10, %v783_v19  ;;  %v981_v9 = vadd.f32 %v980_v23, %v979_v20 }
 0x166   :  { %v787_v45 = vadd.f32 %v786_v44, %v785_v33  ;;  %v983_v63 = vadd.f32 %v982_v38, %v981_v9  ;;  %v2495_v44 = vshrl.u32 %v1004_v53, 7  ;;  %v3623_v53 = vld [vmem:[#allocation8_spill] sm:$0xff] }
 0x168   :  { %v788_v13 = vrot.slane %v787_v45, 4  ;;  %v985_v2 = vadd.f32 %v984_v5, %v983_v63  ;;  %v3632_v63 = vld [vmem:[#allocation19_spill] sm:$0xff] }
 0x16a   :  { %v789_v3 = vadd.f32 %v788_v13, %v787_v45  ;;  %v986_v30 = vrot.slane %v985_v2, 4  ;;  %v3574_v45 = vsub.s32 0, %v2495_v44 }
 0x16c   :  { %v790_v41 = vrot.slane %v789_v3, 2  ;;  %v987_v61 = vadd.f32 %v986_v30, %v985_v2 }
 0x16e   :  { %v791_v35 = vadd.f32 %v790_v41, %v789_v3  ;;  %v988_v50 = vrot.slane %v987_v61, 2  ;;  %v996_v41 = vld [vmem:[%s3547_s2] sm:$0x1] }
 0x170   :  { %v792_v47 = vrot.slane %v791_v35, 1  ;;  %v989_v19 = vadd.f32 %v988_v50, %v987_v61  ;;  %v2504_v61 = vld [vmem:[%s3548_s3] sm:$0x1] }
 0x172   :  { %v793_v20 = vadd.f32 %v792_v47, %v791_v35  ;;  %v990_v10 = vrot.slane %v989_v19, 1  ;;  %v3616_v47 = vld [vmem:[#allocation3_spill] sm:$0xff] }
 0x174   :  { %v794_v51 = vmul.f32 0.001953125, %v793_v20  ;;  %v991_v23 = vadd.f32 %v990_v10, %v989_v19  ;;  %v3617_v19 = vld [vmem:[#allocation5_spill] sm:$0xff]  ;;  %v3618_v20 = vld [vmem:[#allocation7_spill] sm:$0xff]  ;;  %v3619_v10 = vld [vmem:[#allocation4_spill] sm:$0xff] }
 0x176   :  { %v992_v49 = vmul.f32 0.001953125, %v991_v23  ;;  %v993_v55 = vmul.f32 %v794_v51, %v794_v51  ;;  %v3621_v23 = vld [vmem:[#allocation9_spill] sm:$0xff] }
 0x178   :  { %v994_v33 = vsub.f32 %v992_v49, %v993_v55 }
 0x17a   :  { %v995_v9 = vmax.f32 %v994_v33, 0.0 }
 0x17c   :  { %v997_v38 = vadd.f32 1e-05, %v995_v9  ;;  %v3622_v9 = vld [vmem:[#allocation11_spill] sm:$0xff] }
 0x17e   :  { %1880 = vrsqrt.f32 %v997_v38 }
 0x188   :  { %v1881_v50 = vpop.eup %1880 }
 0x189   :  { %v999_v35 = vmul.f32 %v1881_v50, %v996_v41  ;;  %v3624_v50 = vld [vmem:[#allocation10_spill] sm:$0xff] }
 0x18b   :  { %v2506_v49 = vmul.f32 %v999_v35, %v794_v51  ;;  %v2510_v55 = vrot.slane %v999_v35, %v3574_v45  ;;  %v3620_v51 = vld [vmem:[#allocation6_spill] sm:$0xff]  ;;  %v3633_v45 = vld [vmem:[#allocation21_spill] sm:$0xff] }
 0x18d   :  { %v2516_v5 = vmul.f32 %v2510_v55, %v2049_v37  ;;  %v2520_v13 = vmul.f32 %v2510_v55, %v2055_v40  ;;  %v2524_v2 = vmul.f32 %v2047_v36, %v2510_v55  ;;  %v2528_v3 = vmul.f32 %v2053_v39, %v2510_v55 }
 0x18e   :  { %v2532_v30 = vmul.f32 %v2510_v55, %v2084_v60  ;;  %v2536_v37 = vmul.f32 %v2510_v55, %v2093_v4  ;;  %v2540_v40 = vmul.f32 %v2080_v57, %v2510_v55  ;;  %v2544_v36 = vmul.f32 %v2091_v1, %v2510_v55 }
 0x18f   :  { %v2548_v39 = vmul.f32 %v2510_v55, %v2120_v24  ;;  %v2552_v60 = vmul.f32 %v2510_v55, %v2129_v32  ;;  %v2556_v4 = vmul.f32 %v2116_v21, %v2510_v55  ;;  %v2560_v57 = vmul.f32 %v2127_v29, %v2510_v55 }
 0x190   :  { %v2564_v1 = vmul.f32 %v2510_v55, %v2156_v62  ;;  %v2568_v24 = vmul.f32 %v2510_v55, %v2165_v8  ;;  %v2572_v32 = vmul.f32 %v2152_v56, %v2510_v55  ;;  %v2576_v21 = vmul.f32 %v3616_v47, %v2510_v55  ;;  %v3625_v47 = vld [vmem:[#allocation13_spill] sm:$0xff] }
 0x191   :  { %v2580_v29 = vmul.f32 %v2510_v55, %v3617_v19  ;;  %v2584_v62 = vmul.f32 %v2510_v55, %v3618_v20  ;;  %v2588_v8 = vmul.f32 %v3619_v10, %v2510_v55  ;;  %v2592_v56 = vmul.f32 %v3620_v51, %v2510_v55  ;;  %v3627_v20 = vld [vmem:[#allocation15_spill] sm:$0xff]  ;;  %v3629_v51 = vld [vmem:[#allocation12_spill] sm:$0xff] }
 0x192   :  { %v2596_v33 = vmul.f32 %v2510_v55, %v3621_v23  ;;  %v2600_v38 = vmul.f32 %v2510_v55, %v3622_v9  ;;  %v2604_v41 = vmul.f32 %v3623_v53, %v2510_v55  ;;  %v2608_v35 = vmul.f32 %v3624_v50, %v2510_v55  ;;  %v3631_v9 = vld [vmem:[#allocation14_spill] sm:$0xff] }
 0x193   :  { %v2612_v19 = vmul.f32 %v2510_v55, %v3625_v47  ;;  %v2616_v10 = vmul.f32 %v2510_v55, %v3627_v20  ;;  %v2620_v23 = vmul.f32 %v3629_v51, %v2510_v55  ;;  %v2624_v53 = vmul.f32 %v3631_v9, %v2510_v55 }
 0x194   :  { %v2628_v50 = vmul.f32 %v2510_v55, %v3632_v63  ;;  %v2632_v47 = vmul.f32 %v2510_v55, %v3633_v45  ;;  %v2648_v63 = vmul.f32 %v2510_v55, %v2082_v58  ;;  %v2652_v45 = vmul.f32 %v2065_v46, %v2510_v55 }
 0x195   :  { %3626 = vst [vmem:[#allocation3_spill] sm:$0xff] %v2612_v19  ;;  %3628 = vst [vmem:[#allocation5_spill] sm:$0xff] %v2616_v10  ;;  %v3634_v19 = vld [vmem:[#allocation18_spill] sm:$0xff]  ;;  %v3635_v10 = vld [vmem:[#allocation20_spill] sm:$0xff]  ;;  %v2668_v58 = vmul.f32 %v2102_v11, %v2510_v55  ;;  %v2672_v46 = vmul.f32 %v2111_v18, %v2510_v55  ;;  %v2688_v11 = vmul.f32 %v2147_v52, %v2510_v55 }
 0x196   :  { %3630 = vst [vmem:[#allocation7_spill] sm:$0xff] %v2620_v23  ;;  %v2636_v20 = vmul.f32 %v3634_v19, %v2510_v55  ;;  %v2640_v51 = vmul.f32 %v3635_v10, %v2510_v55  ;;  %v3636_v23 = vld [vmem:[#allocation2_spill] sm:$0xff]  ;;  %v2656_v19 = vmul.f32 %v2075_v54, %v2510_v55  ;;  %v2660_v10 = vmul.f32 %v2510_v55, %v2109_v15 }
 0x197   :  { %v2644_v9 = vmul.f32 %v2510_v55, %v3636_v23  ;;  %v2664_v23 = vmul.f32 %v2510_v55, %v2118_v22  ;;  %v2676_v54 = vmul.f32 %v2510_v55, %v2145_v48  ;;  %v2680_v15 = vmul.f32 %v2510_v55, %v2154_v59 }
 0x198   :  { %v2684_v22 = vmul.f32 %v2138_v43, %v2510_v55  ;;  %v2692_v18 = vmul.f32 %v2510_v55, %v2181_v25  ;;  %v2696_v48 = vmul.f32 %v2510_v55, %v2190_v34  ;;  %v2700_v59 = vmul.f32 %v2174_v17, %v2510_v55 }
 0x199   :  { %v2704_v43 = vmul.f32 %v2183_v28, %v2510_v55  ;;  %v2708_v52 = vmul.f32 %v2510_v55, %v2217_v12  ;;  %v2712_v25 = vmul.f32 %v2510_v55, %v2226_v26  ;;  %v2716_v34 = vmul.f32 %v2210_v6, %v2510_v55 }
 0x19a   :  { %v2720_v17 = vmul.f32 %v2219_v16, %v2510_v55  ;;  %v2724_v28 = vmul.f32 %v2510_v55, %v2253_v14  ;;  %v2728_v12 = vmul.f32 %v2510_v55, %v2262_v42  ;;  %v2732_v26 = vmul.f32 %v2246_v7, %v2510_v55 }
 0x19b   :  { %v2736_v6 = vmul.f32 %v2255_v27, %v2510_v55  ;;  %v2740_v16 = vmul.f32 %v2510_v55, %v2289_v0  ;;  %v2744_v14 = vmul.f32 %v2510_v55, %v2298_v31 }
 0x19c   :  { %3637 = vst [vmem:[#allocation4_spill] sm:$0xff] %v2724_v28  ;;  %3638 = vst [vmem:[#allocation6_spill] sm:$0xff] %v2728_v12  ;;  %v3643_v28 = vld [vmem:[#allocation16_spill] sm:$0xff]  ;;  %v3645_v12 = vld [vmem:[#allocation17_spill] sm:$0xff] }
 0x19d   :  { %3639 = vst [vmem:[#allocation9_spill] sm:$0xff] %v2732_v26  ;;  %3640 = vst [vmem:[#allocation11_spill] sm:$0xff] %v2736_v6  ;;  %v2748_v42 = vmul.f32 %v3643_v28, %v2510_v55  ;;  %v2752_v7 = vmul.f32 %v3645_v12, %v2510_v55  ;;  %v3647_v26 = vld [vmem:[#allocation23_spill] sm:$0xff]  ;;  %v3648_v6 = vld [vmem:[#allocation25_spill] sm:$0xff]  ;;  %v3652_v12 = vsub.f32 %v2504_v61, %v2506_v49 }
 0x19e   :  { %3641 = vst [vmem:[#allocation8_spill] sm:$0xff] %v2740_v16  ;;  %3642 = vst [vmem:[#allocation10_spill] sm:$0xff] %v2744_v14  ;;  %v2756_v27 = vmul.f32 %v2510_v55, %v3647_v26  ;;  %v2760_v0 = vmul.f32 %v2510_v55, %v3648_v6  ;;  %v3649_v16 = vld [vmem:[#allocation22_spill] sm:$0xff]  ;;  %v3650_v14 = vld [vmem:[#allocation24_spill] sm:$0xff] }
 0x19f   :  { %3644 = vst [vmem:[#allocation13_spill] sm:$0xff] %v2748_v42  ;;  %3646 = vst [vmem:[#allocation15_spill] sm:$0xff] %v2752_v7  ;;  %v2764_v31 = vmul.f32 %v3649_v16, %v2510_v55  ;;  %v2768_v28 = vmul.f32 %v3650_v14, %v2510_v55  ;;  %v3651_v42 = vsub.s32 0, %v2495_v44  ;;  %v3655_v14 = vld [vmem:[#allocation7_spill] sm:$0xff] }
 0x1a1   :  { %v2775_v7 = vrot.slane %v3652_v12, %v3651_v42 }
 0x1a3   :  { %v2779_v26 = vadd.f32 %v2775_v7, %v2516_v5  ;;  %v2783_v6 = vadd.f32 %v2775_v7, %v2520_v13  ;;  %v2787_v16 = vadd.f32 %v2775_v7, %v2524_v2  ;;  %v2791_v44 = vadd.f32 %v2775_v7, %v2528_v3 }
 0x1a4   :  { %v2795_v61 = vadd.f32 %v2775_v7, %v2532_v30  ;;  %v2799_v49 = vadd.f32 %v2775_v7, %v2536_v37  ;;  %v2803_v55 = vadd.f32 %v2775_v7, %v2540_v40  ;;  %v2807_v5 = vadd.f32 %v2775_v7, %v2544_v36 }
 0x1a5   :  { %v2811_v13 = vadd.f32 %v2775_v7, %v2548_v39  ;;  %v2815_v2 = vadd.f32 %v2775_v7, %v2552_v60  ;;  %v2819_v3 = vadd.f32 %v2775_v7, %v2556_v4  ;;  %v2823_v30 = vadd.f32 %v2775_v7, %v2560_v57 }
 0x1a6   :  { %v2827_v37 = vadd.f32 %v2775_v7, %v2564_v1  ;;  %v2831_v40 = vadd.f32 %v2775_v7, %v2568_v24  ;;  %v2835_v36 = vadd.f32 %v2775_v7, %v2572_v32  ;;  %v2839_v39 = vadd.f32 %v2775_v7, %v2576_v21 }
 0x1a7   :  { %v2843_v60 = vadd.f32 %v2775_v7, %v2580_v29  ;;  %v2847_v4 = vadd.f32 %v2775_v7, %v2584_v62  ;;  %v2851_v57 = vadd.f32 %v2775_v7, %v2588_v8  ;;  %v2855_v1 = vadd.f32 %v2775_v7, %v2592_v56  ;;  %v3653_v62 = vld [vmem:[#allocation3_spill] sm:$0xff]  ;;  %v3654_v56 = vld [vmem:[#allocation5_spill] sm:$0xff] }
 0x1a8   :  { %v2859_v24 = vadd.f32 %v2775_v7, %v2596_v33  ;;  %v2863_v32 = vadd.f32 %v2775_v7, %v2600_v38  ;;  %v2867_v21 = vadd.f32 %v2775_v7, %v2604_v41  ;;  %v2871_v29 = vadd.f32 %v2775_v7, %v2608_v35 }
 0x1a9   :  { %v2875_v8 = vadd.f32 %v2775_v7, %v3653_v62  ;;  %v2879_v33 = vadd.f32 %v2775_v7, %v3654_v56  ;;  %v2883_v38 = vadd.f32 %v2775_v7, %v3655_v14  ;;  %v2887_v41 = vadd.f32 %v2775_v7, %v2624_v53  ;;  %v3666_v56 = vld [vmem:[#allocation4_spill] sm:$0xff]  ;;  %v3668_v14 = vld [vmem:[#allocation6_spill] sm:$0xff] }
 0x1aa   :  { %v2891_v35 = vadd.f32 %v2775_v7, %v2628_v50  ;;  %v2895_v42 = vadd.f32 %v2775_v7, %v2632_v47  ;;  %v2899_v12 = vadd.f32 %v2775_v7, %v2636_v20  ;;  %v2903_v62 = vadd.f32 %v2775_v7, %v2640_v51 }
 0x1ab   :  { %v2907_v53 = vadd.f32 %v2775_v7, %v2644_v9  ;;  %v2911_v50 = vadd.f32 %v2775_v7, %v2648_v63  ;;  %v2915_v47 = vadd.f32 %v2775_v7, %v2652_v45  ;;  %v2919_v20 = vadd.f32 %v2775_v7, %v2656_v19 }
 0x1ac   :  { %v2923_v51 = vadd.f32 %v2775_v7, %v2660_v10  ;;  %v2927_v9 = vadd.f32 %v2775_v7, %v2664_v23  ;;  %v2931_v63 = vadd.f32 %v2775_v7, %v2668_v58  ;;  %v2935_v45 = vadd.f32 %v2775_v7, %v2672_v46 }
 0x1ad   :  { %v2939_v19 = vadd.f32 %v2775_v7, %v2676_v54  ;;  %v2943_v10 = vadd.f32 %v2775_v7, %v2680_v15  ;;  %v2947_v23 = vadd.f32 %v2775_v7, %v2684_v22  ;;  %v2951_v58 = vadd.f32 %v2775_v7, %v2688_v11 }
 0x1ae   :  { %3656 = vst [vmem:[#allocation12_spill] sm:$0xff] %v2931_v63  ;;  %3657 = vst [vmem:[#allocation14_spill] sm:$0xff] %v2935_v45  ;;  %v2955_v46 = vadd.f32 %v2775_v7, %v2692_v18  ;;  %v2959_v54 = vadd.f32 %v2775_v7, %v2696_v48  ;;  %v2963_v15 = vadd.f32 %v2775_v7, %v2700_v59 }
 0x1af   :  { %3658 = vst [vmem:[#allocation19_spill] sm:$0xff] %v2939_v19  ;;  %3659 = vst [vmem:[#allocation21_spill] sm:$0xff] %v2943_v10  ;;  %v2967_v22 = vadd.f32 %v2775_v7, %v2704_v43  ;;  %v2971_v11 = vadd.f32 %v2775_v7, %v2708_v52  ;;  %v2975_v18 = vadd.f32 %v2775_v7, %v2712_v25 }
 0x1b0   :  { %3660 = vst [vmem:[#allocation18_spill] sm:$0xff] %v2947_v23  ;;  %v2979_v48 = vadd.f32 %v2775_v7, %v2716_v34  ;;  %v2983_v59 = vadd.f32 %v2775_v7, %v2720_v17  ;;  %v2987_v43 = vadd.f32 %v2775_v7, %v3666_v56  ;;  %v2991_v52 = vadd.f32 %v2775_v7, %v3668_v14 }
 0x1b1   :  { %3661 = vst [vmem:[#allocation20_spill] sm:$0xff] %v2967_v22  ;;  %3662 = vst [vmem:[#allocation2_spill] sm:$0xff] %v2971_v11  ;;  %v3670_v11 = vld [vmem:[#allocation9_spill] sm:$0xff] }
 0x1b2   :  { %3663 = vst [vmem:[#allocation16_spill] sm:$0xff] %v2975_v18  ;;  %3664 = vst [vmem:[#allocation17_spill] sm:$0xff] %v2979_v48  ;;  %v2995_v25 = vadd.f32 %v2775_v7, %v3670_v11  ;;  %v3671_v18 = vld [vmem:[#allocation11_spill] sm:$0xff]  ;;  %v3672_v48 = vld [vmem:[#allocation8_spill] sm:$0xff] }
 0x1b3   :  { %3665 = vst [vmem:[#allocation23_spill] sm:$0xff] %v2983_v59  ;;  %3667 = vst [vmem:[#allocation25_spill] sm:$0xff] %v2987_v43  ;;  %v2999_v34 = vadd.f32 %v2775_v7, %v3671_v18  ;;  %v3003_v17 = vadd.f32 %v2775_v7, %v3672_v48  ;;  %v3673_v59 = vld [vmem:[#allocation10_spill] sm:$0xff]  ;;  %v3674_v43 = vld [vmem:[#allocation13_spill] sm:$0xff]  ;;  %v3019_v18 = vadd.f32 %v2775_v7, %v2756_v27 }
 0x1b4   :  { %3669 = vst [vmem:[#allocation22_spill] sm:$0xff] %v2991_v52  ;;  %v3007_v56 = vadd.f32 %v2775_v7, %v3673_v59  ;;  %v3011_v14 = vadd.f32 %v2775_v7, %v3674_v43  ;;  %v3676_v52 = vld [vmem:[#allocation15_spill] sm:$0xff]  ;;  %v3023_v48 = vadd.f32 %v2775_v7, %v2760_v0  ;;  %v3027_v59 = vadd.f32 %v2775_v7, %v2764_v31 }
 0x1b5   :  { %v3015_v11 = vadd.f32 %v2775_v7, %v3676_v52  ;;  %3678 = vst [vmem:[#allocation5_spill] sm:$0xff] %v3019_v18  ;;  %v3031_v43 = vadd.f32 %v2775_v7, %v2768_v28  ;;  %v3689_v63 = vmov %v3019_v18  ;;  %v3692_v18 = vmax.f32 %v2779_v26, 0.0 }
 0x1b6   :  { %3675 = vst [vmem:[#allocation24_spill] sm:$0xff] %v3011_v14  ;;  %3679 = vst [vmem:[#allocation7_spill] sm:$0xff] %v3023_v48  ;;  %v3690_v45 = vmov %v3023_v48  ;;  %v3691_v19 = vmov %v3027_v59  ;;  %v3693_v48 = vmax.f32 %v2783_v6, 0.0  ;;  %v3695_v28 = vmax.f32 %v2791_v44, 0.0 }
 0x1b7   :  { %3677 = vst [vmem:[#allocation3_spill] sm:$0xff] %v3015_v11  ;;  %3680 = vst [vmem:[#allocation4_spill] sm:$0xff] %v3027_v59  ;;  %v3688_v14 = vmov %v3015_v11  ;;  %v1664_v0 = vpack.c.bf16 %v3692_v18, %v3692_v18  ;;  %v3694_v59 = vmax.f32 %v2787_v16, 0.0  ;;  %v3696_v11 = vmax.f32 %v2795_v61, 0.0 }
 0x1b8   :  { %v1665_v31 = vpack.c.bf16 %v3693_v48, %v3693_v48  ;;  %v1667_v52 = vpack.c.bf16 %v3695_v28, %v3695_v28  ;;  %v3697_v26 = vmax.f32 %v2799_v49, 0.0  ;;  %v3698_v6 = vmax.f32 %v2803_v55, 0.0 }
 0x1b9   :  { %v1666_v7 = vpack.c.bf16 %v3694_v59, %v3694_v59  ;;  %v1668_v27 = vpack.c.bf16 %v3696_v11, %v3696_v11  ;;  %v3699_v16 = vmax.f32 %v2807_v5, 0.0  ;;  %v3700_v44 = vmax.f32 %v2811_v13, 0.0  ;;  %1464 = vst.msk [vmem:[%s3549_s4] sm:$0xf] %vm1463_vm2, %v1664_v0 }
 0x1ba   :  { %v3685_v10 = vld [vmem:[#allocation25_spill] sm:$0xff]  ;;  %v1669_v18 = vpack.c.bf16 %v3697_v26, %v3697_v26  ;;  %v1670_v48 = vpack.c.bf16 %v3698_v6, %v3698_v6  ;;  %v3701_v61 = vmax.f32 %v2815_v2, 0.0  ;;  %v3702_v49 = vmax.f32 %v2819_v3, 0.0  ;;  %1465 = vst.msk [vmem:[%s3549_s4 + $0x4] sm:$0xf] %vm1463_vm2, %v1665_v31 }
 0x1bb   :  { %v3686_v23 = vld [vmem:[#allocation22_spill] sm:$0xff]  ;;  %v1671_v59 = vpack.c.bf16 %v3699_v16, %v3699_v16  ;;  %v1672_v28 = vpack.c.bf16 %v3700_v44, %v3700_v44  ;;  %v3703_v55 = vmax.f32 %v2823_v30, 0.0  ;;  %1466 = vst.msk [vmem:[%s3549_s4 + $0x8] sm:$0xf] %vm1463_vm2, %v1666_v7  ;;  %1467 = vst.msk [vmem:[%s3549_s4 + $0xc] sm:$0xf] %vm1463_vm2, %v1667_v52 }
 0x1bc   :  { %v1673_v11 = vpack.c.bf16 %v3701_v61, %v3701_v61  ;;  %v1674_v26 = vpack.c.bf16 %v3702_v49, %v3702_v49  ;;  %v3704_v5 = vmax.f32 %v2827_v37, 0.0  ;;  %v3705_v2 = vmax.f32 %v2831_v40, 0.0  ;;  %1468 = vst.msk [vmem:[%s3549_s4 + $0x10] sm:$0xf] %vm1463_vm2, %v1668_v27  ;;  %1469 = vst.msk [vmem:[%s3549_s4 + $0x14] sm:$0xf] %vm1463_vm2, %v1669_v18 }
 0x1bd   :  { %v3687_v22 = vld [vmem:[#allocation24_spill] sm:$0xff]  ;;  %v1675_v6 = vpack.c.bf16 %v3703_v55, %v3703_v55  ;;  %v3706_v30 = vmax.f32 %v2835_v36, 0.0  ;;  %v3707_v31 = vmax.f32 %v2839_v39, 0.0  ;;  %1470 = vst.msk [vmem:[%s3549_s4 + $0x18] sm:$0xf] %vm1463_vm2, %v1670_v48  ;;  %v3708_v37 = vmax.f32 %v2843_v60, 0.0 }
 0x1be   :  { %v1676_v13 = vpack.c.bf16 %v3704_v5, %v3704_v5  ;;  %v1677_v3 = vpack.c.bf16 %v3705_v2, %v3705_v2  ;;  %1471 = vst.msk [vmem:[%s3549_s4 + $0x1c] sm:$0xf] %vm1463_vm2, %v1671_v59  ;;  %v3709_v36 = vmax.f32 %v2847_v4, 0.0  ;;  %v3710_v52 = vmax.f32 %v2851_v57, 0.0  ;;  %1472 = vst.msk [vmem:[%s3549_s4 + $0x20] sm:$0xf] %vm1463_vm2, %v1672_v28 }
 0x1bf   :  { %v1678_v0 = vpack.c.bf16 %v3706_v30, %v3706_v30  ;;  %v1679_v7 = vpack.c.bf16 %v3707_v31, %v3707_v31  ;;  %v1680_v40 = vpack.c.bf16 %v3708_v37, %v3708_v37  ;;  %v3711_v18 = vmax.f32 %v2855_v1, 0.0  ;;  %1473 = vst.msk [vmem:[%s3549_s4 + $0x24] sm:$0xf] %vm1463_vm2, %v1673_v11  ;;  %1474 = vst.msk [vmem:[%s3549_s4 + $0x28] sm:$0xf] %vm1463_vm2, %v1674_v26  ;;  %v3730_v31 = vld [vmem:[#allocation12_spill] sm:$0xff] }
 0x1c0   :  { %v1681_v39 = vpack.c.bf16 %v3709_v36, %v3709_v36  ;;  %v1682_v27 = vpack.c.bf16 %v3710_v52, %v3710_v52  ;;  %1475 = vst.msk [vmem:[%s3549_s4 + $0x2c] sm:$0xf] %vm1463_vm2, %v1675_v6  ;;  %v3712_v60 = vmax.f32 %v2859_v24, 0.0  ;;  %v3713_v57 = vmax.f32 %v2863_v32, 0.0  ;;  %1476 = vst.msk [vmem:[%s3549_s4 + $0x30] sm:$0xf] %vm1463_vm2, %v1676_v13 }
 0x1c1   :  { %v1683_v48 = vpack.c.bf16 %v3711_v18, %v3711_v18  ;;  %v3714_v16 = vmax.f32 %v2867_v21, 0.0  ;;  %v3715_v44 = vmax.f32 %v2871_v29, 0.0  ;;  %1477 = vst.msk [vmem:[%s3549_s4 + $0x34] sm:$0xf] %vm1463_vm2, %v1677_v3  ;;  %1478 = vst.msk [vmem:[%s3549_s4 + $0x38] sm:$0xf] %vm1463_vm2, %v1678_v0 }
 0x1c2   :  { %v1684_v4 = vpack.c.bf16 %v3712_v60, %v3712_v60  ;;  %v1685_v1 = vpack.c.bf16 %v3713_v57, %v3713_v57  ;;  %1479 = vst.msk [vmem:[%s3549_s4 + $0x3c] sm:$0xf] %vm1463_vm2, %v1679_v7  ;;  %v3716_v24 = vmax.f32 %v2875_v8, 0.0  ;;  %v3717_v21 = vmax.f32 %v2879_v33, 0.0  ;;  %1480 = vst.msk [vmem:[%s3549_s4 + $0x40] sm:$0xf] %vm1463_vm2, %v1680_v40 }
 0x1c3   :  { %v1686_v59 = vpack.c.bf16 %v3714_v16, %v3714_v16  ;;  %v1687_v28 = vpack.c.bf16 %v3715_v44, %v3715_v44  ;;  %v3718_v61 = vmax.f32 %v2883_v38, 0.0  ;;  %v3719_v49 = vmax.f32 %v2887_v41, 0.0  ;;  %1481 = vst.msk [vmem:[%s3549_s4 + $0x44] sm:$0xf] %vm1463_vm2, %v1681_v39  ;;  %1482 = vst.msk [vmem:[%s3549_s4 + $0x48] sm:$0xf] %vm1463_vm2, %v1682_v27 }
 0x1c4   :  { %v1688_v32 = vpack.c.bf16 %v3716_v24, %v3716_v24  ;;  %v1689_v29 = vpack.c.bf16 %v3717_v21, %v3717_v21  ;;  %1483 = vst.msk [vmem:[%s3549_s4 + $0x4c] sm:$0xf] %vm1463_vm2, %v1683_v48  ;;  %v3720_v8 = vmax.f32 %v2891_v35, 0.0  ;;  %v3721_v38 = vmax.f32 %v2895_v42, 0.0  ;;  %1484 = vst.msk [vmem:[%s3549_s4 + $0x50] sm:$0xf] %vm1463_vm2, %v1684_v4 }
 0x1c5   :  { %v1690_v11 = vpack.c.bf16 %v3718_v61, %v3718_v61  ;;  %v1691_v26 = vpack.c.bf16 %v3719_v49, %v3719_v49  ;;  %v3722_v55 = vmax.f32 %v2899_v12, 0.0  ;;  %v3723_v5 = vmax.f32 %v2903_v62, 0.0  ;;  %1485 = vst.msk [vmem:[%s3549_s4 + $0x54] sm:$0xf] %vm1463_vm2, %v1685_v1  ;;  %1486 = vst.msk [vmem:[%s3549_s4 + $0x58] sm:$0xf] %vm1463_vm2, %v1686_v59 }
 0x1c6   :  { %v1692_v33 = vpack.c.bf16 %v3720_v8, %v3720_v8  ;;  %v1693_v41 = vpack.c.bf16 %v3721_v38, %v3721_v38  ;;  %1487 = vst.msk [vmem:[%s3549_s4 + $0x5c] sm:$0xf] %vm1463_vm2, %v1687_v28  ;;  %v3724_v35 = vmax.f32 %v2907_v53, 0.0  ;;  %v3725_v12 = vmax.f32 %v2911_v50, 0.0  ;;  %1488 = vst.msk [vmem:[%s3549_s4 + $0x60] sm:$0xf] %vm1463_vm2, %v1688_v32 }
 0x1c7   :  { %v1694_v6 = vpack.c.bf16 %v3722_v55, %v3722_v55  ;;  %v1695_v13 = vpack.c.bf16 %v3723_v5, %v3723_v5  ;;  %v3726_v2 = vmax.f32 %v2915_v47, 0.0  ;;  %v3727_v30 = vmax.f32 %v2919_v20, 0.0  ;;  %1489 = vst.msk [vmem:[%s3549_s4 + $0x64] sm:$0xf] %vm1463_vm2, %v1689_v29  ;;  %1490 = vst.msk [vmem:[%s3549_s4 + $0x68] sm:$0xf] %vm1463_vm2, %v1690_v11 }
 0x1c8   :  { %v1696_v42 = vpack.c.bf16 %v3724_v35, %v3724_v35  ;;  %v1697_v62 = vpack.c.bf16 %v3725_v12, %v3725_v12  ;;  %1491 = vst.msk [vmem:[%s3549_s4 + $0x6c] sm:$0xf] %vm1463_vm2, %v1691_v26  ;;  %v3728_v53 = vmax.f32 %v2923_v51, 0.0  ;;  %v3729_v47 = vmax.f32 %v2927_v9, 0.0  ;;  %v3732_v40 = vld [vmem:[#allocation14_spill] sm:$0xff]  ;;  %v3734_v51 = vld [vmem:[#allocation19_spill] sm:$0xff] }
 0x1c9   :  { %v1698_v3 = vpack.c.bf16 %v3726_v2, %v3726_v2  ;;  %v1699_v0 = vpack.c.bf16 %v3727_v30, %v3727_v30  ;;  %v3731_v7 = vmax.f32 %v3730_v31, 0.0  ;;  %v3733_v36 = vmax.f32 %v3732_v40, 0.0  ;;  %1492 = vst.msk [vmem:[%s3549_s4 + $0x70] sm:$0xf] %vm1463_vm2, %v1692_v33  ;;  %1493 = vst.msk [vmem:[%s3549_s4 + $0x74] sm:$0xf] %vm1463_vm2, %v1693_v41 }
 0x1ca   :  { %v1700_v50 = vpack.c.bf16 %v3728_v53, %v3728_v53  ;;  %v1701_v20 = vpack.c.bf16 %v3729_v47, %v3729_v47  ;;  %1494 = vst.msk [vmem:[%s3549_s4 + $0x78] sm:$0xf] %vm1463_vm2, %v1694_v6  ;;  %1495 = vst.msk [vmem:[%s3549_s4 + $0x7c] sm:$0xf] %vm1463_vm2, %v1695_v13  ;;  %v3735_v9 = vmax.f32 %v3734_v51, 0.0  ;;  %v3736_v27 = vld [vmem:[#allocation21_spill] sm:$0xff] }
 0x1cb   :  { %v1702_v37 = vpack.c.bf16 %v3731_v7, %v3731_v7  ;;  %v1703_v39 = vpack.c.bf16 %v3733_v36, %v3733_v36  ;;  %v3737_v18 = vmax.f32 %v3736_v27, 0.0  ;;  %v3738_v60 = vld [vmem:[#allocation18_spill] sm:$0xff]  ;;  %v3740_v1 = vmax.f32 %v2951_v58, 0.0  ;;  %1496 = vst.msk [vmem:[%s3549_s4 + $0x80] sm:$0xf] %vm1463_vm2, %v1696_v42  ;;  %v3744_v21 = vld [vmem:[#allocation20_spill] sm:$0xff] }
 0x1cc   :  { %v1704_v52 = vpack.c.bf16 %v3735_v9, %v3735_v9  ;;  %v3739_v4 = vmax.f32 %v3738_v60, 0.0  ;;  %1497 = vst.msk [vmem:[%s3549_s4 + $0x84] sm:$0xf] %vm1463_vm2, %v1697_v62  ;;  %1498 = vst.msk [vmem:[%s3549_s4 + $0x88] sm:$0xf] %vm1463_vm2, %v1698_v3  ;;  %v3741_v58 = vmax.f32 %v2955_v46, 0.0 }
 0x1cd   :  { %v1705_v48 = vpack.c.bf16 %v3737_v18, %v3737_v18  ;;  %v1707_v16 = vpack.c.bf16 %v3740_v1, %v3740_v1  ;;  %1499 = vst.msk [vmem:[%s3549_s4 + $0x8c] sm:$0xf] %vm1463_vm2, %v1699_v0  ;;  %v3742_v44 = vmax.f32 %v2959_v54, 0.0  ;;  %v3743_v24 = vmax.f32 %v2963_v15, 0.0  ;;  %1500 = vst.msk [vmem:[%s3549_s4 + $0x90] sm:$0xf] %vm1463_vm2, %v1700_v50 }
 0x1ce   :  { %v1706_v57 = vpack.c.bf16 %v3739_v4, %v3739_v4  ;;  %v1708_v59 = vpack.c.bf16 %v3741_v58, %v3741_v58  ;;  %v3745_v29 = vmax.f32 %v3744_v21, 0.0  ;;  %1501 = vst.msk [vmem:[%s3549_s4 + $0x94] sm:$0xf] %vm1463_vm2, %v1701_v20  ;;  %1502 = vst.msk [vmem:[%s3549_s4 + $0x98] sm:$0xf] %vm1463_vm2, %v1702_v37  ;;  %v3746_v46 = vld [vmem:[#allocation2_spill] sm:$0xff] }
 0x1cf   :  { %v1709_v28 = vpack.c.bf16 %v3742_v44, %v3742_v44  ;;  %v1710_v32 = vpack.c.bf16 %v3743_v24, %v3743_v24  ;;  %1503 = vst.msk [vmem:[%s3549_s4 + $0x9c] sm:$0xf] %vm1463_vm2, %v1703_v39  ;;  %v3747_v54 = vmax.f32 %v3746_v46, 0.0  ;;  %v3748_v11 = vld [vmem:[#allocation16_spill] sm:$0xff]  ;;  %v3750_v8 = vld [vmem:[#allocation17_spill] sm:$0xff]  ;;  %v3752_v41 = vld [vmem:[#allocation23_spill] sm:$0xff] }
 0x1d0   :  { %v1711_v61 = vpack.c.bf16 %v3745_v29, %v3745_v29  ;;  %v3749_v49 = vmax.f32 %v3748_v11, 0.0  ;;  %v3751_v33 = vmax.f32 %v3750_v8, 0.0  ;;  %v3753_v55 = vmax.f32 %v3752_v41, 0.0  ;;  %1504 = vst.msk [vmem:[%s3549_s4 + $0xa0] sm:$0xf] %vm1463_vm2, %v1704_v52 }
 0x1d1   :  { %v1712_v15 = vpack.c.bf16 %v3747_v54, %v3747_v54  ;;  %1505 = vst.msk [vmem:[%s3549_s4 + $0xa4] sm:$0xf] %vm1463_vm2, %v1705_v48  ;;  %1506 = vst.msk [vmem:[%s3549_s4 + $0xa8] sm:$0xf] %vm1463_vm2, %v1706_v57  ;;  %v3754_v5 = vmax.f32 %v3685_v10, 0.0  ;;  %v3755_v35 = vmax.f32 %v3686_v23, 0.0 }
 0x1d2   :  { %v1713_v26 = vpack.c.bf16 %v3749_v49, %v3749_v49  ;;  %v1714_v38 = vpack.c.bf16 %v3751_v33, %v3751_v33  ;;  %v1715_v6 = vpack.c.bf16 %v3753_v55, %v3753_v55  ;;  %1507 = vst.msk [vmem:[%s3549_s4 + $0xac] sm:$0xf] %vm1463_vm2, %v1707_v16  ;;  %v3756_v12 = vmax.f32 %v2995_v25, 0.0  ;;  %1508 = vst.msk [vmem:[%s3549_s4 + $0xb0] sm:$0xf] %vm1463_vm2, %v1708_v59 }
 0x1d3   :  { %v1716_v13 = vpack.c.bf16 %v3754_v5, %v3754_v5  ;;  %v1717_v42 = vpack.c.bf16 %v3755_v35, %v3755_v35  ;;  %v3757_v2 = vmax.f32 %v2999_v34, 0.0  ;;  %1509 = vst.msk [vmem:[%s3549_s4 + $0xb4] sm:$0xf] %vm1463_vm2, %v1709_v28  ;;  %1510 = vst.msk [vmem:[%s3549_s4 + $0xb8] sm:$0xf] %vm1463_vm2, %v1710_v32  ;;  %v3758_v10 = vmax.f32 %v3003_v17, 0.0 }
 0x1d4   :  { %v1718_v62 = vpack.c.bf16 %v3756_v12, %v3756_v12  ;;  %1511 = vst.msk [vmem:[%s3549_s4 + $0xbc] sm:$0xf] %vm1463_vm2, %v1711_v61  ;;  %v3759_v25 = vmax.f32 %v3007_v56, 0.0  ;;  %v3760_v30 = vmax.f32 %v3687_v22, 0.0  ;;  %v3761_v53 = vmax.f32 %v3688_v14, 0.0 }
 0x1d5   :  { %v1719_v3 = vpack.c.bf16 %v3757_v2, %v3757_v2  ;;  %v1720_v23 = vpack.c.bf16 %v3758_v10, %v3758_v10  ;;  %1512 = vst.msk [vmem:[%s3549_s4 + $0xc0] sm:$0xf] %vm1463_vm2, %v1712_v15  ;;  %1513 = vst.msk [vmem:[%s3549_s4 + $0xc4] sm:$0xf] %vm1463_vm2, %v1713_v26  ;;  %v3762_v22 = vmax.f32 %v3689_v63, 0.0  ;;  %v3763_v56 = vmax.f32 %v3690_v45, 0.0 }
 0x1d6   :  { %v1721_v34 = vpack.c.bf16 %v3759_v25, %v3759_v25  ;;  %v1722_v0 = vpack.c.bf16 %v3760_v30, %v3760_v30  ;;  %v1723_v50 = vpack.c.bf16 %v3761_v53, %v3761_v53  ;;  %1514 = vst.msk [vmem:[%s3549_s4 + $0xc8] sm:$0xf] %vm1463_vm2, %v1714_v38  ;;  %1515 = vst.msk [vmem:[%s3549_s4 + $0xcc] sm:$0xf] %vm1463_vm2, %v1715_v6  ;;  %v3764_v47 = vmax.f32 %v3691_v19, 0.0 }
 0x1d7   :  { %v1724_v17 = vpack.c.bf16 %v3762_v22, %v3762_v22  ;;  %v1725_v14 = vpack.c.bf16 %v3763_v56, %v3763_v56  ;;  %v3765_v31 = vmax.f32 %v3031_v43, 0.0  ;;  %1516 = vst.msk [vmem:[%s3549_s4 + $0xd0] sm:$0xf] %vm1463_vm2, %v1716_v13  ;;  %1517 = vst.msk [vmem:[%s3549_s4 + $0xd4] sm:$0xf] %vm1463_vm2, %v1717_v42 }
 0x1d8   :  { %v1726_v20 = vpack.c.bf16 %v3764_v47, %v3764_v47  ;;  %1518 = vst.msk [vmem:[%s3549_s4 + $0xd8] sm:$0xf] %vm1463_vm2, %v1718_v62  ;;  %1519 = vst.msk [vmem:[%s3549_s4 + $0xdc] sm:$0xf] %vm1463_vm2, %v1719_v3 }
 0x1d9   :  { %v1727_v7 = vpack.c.bf16 %v3765_v31, %v3765_v31  ;;  %1520 = vst.msk [vmem:[%s3549_s4 + $0xe0] sm:$0xf] %vm1463_vm2, %v1720_v23  ;;  %1521 = vst.msk [vmem:[%s3549_s4 + $0xe4] sm:$0xf] %vm1463_vm2, %v1721_v34 }
 0x1da   :  { %1522 = vst.msk [vmem:[%s3549_s4 + $0xe8] sm:$0xf] %vm1463_vm2, %v1722_v0  ;;  %1523 = vst.msk [vmem:[%s3549_s4 + $0xec] sm:$0xf] %vm1463_vm2, %v1723_v50 }
 0x1db   :  { %1524 = vst.msk [vmem:[%s3549_s4 + $0xf0] sm:$0xf] %vm1463_vm2, %v1724_v17  ;;  %1525 = vst.msk [vmem:[%s3549_s4 + $0xf4] sm:$0xf] %vm1463_vm2, %v1725_v14 }
 0x1dc   :  { %1526 = vst.msk [vmem:[%s3549_s4 + $0xf8] sm:$0xf] %vm1463_vm2, %v1726_v20  ;;  %1527 = vst.msk [vmem:[%s3549_s4 + $0xfc] sm:$0xf] %vm1463_vm2, %v1727_v7 }

// kernel: shared_layers_forward.114
= control target key start
LH: loop header
LB: loop body
LE: loop exit
PB: predicated region body
PF: predicated region fallthrough
CT: control target
= control target key end

     0   :  { %vm314_vm0 = vcmask 261120   ;;  %vm759_vm1 = vcmask 257024   ;;  %s1393_s1 = inlined_call_operand.vmem [shape: bf16[288,32], index: 1, kind: input, shape index: {}]   ;;  %s1394_s0 = inlined_call_operand.vmem [shape: bf16[128,288], index: 0, kind: input, shape index: {}]   ;;  %s1395_s2 = inlined_call_operand.vmem [shape: f32[1,32], index: 2, kind: input, shape index: {}]   ;;  %s1396_s3 = inlined_call_operand.vmem [shape: f32[1,32], index: 3, kind: input, shape index: {}]   ;;  %s1397_s4 = inlined_call_operand.vmem [shape: bf16[128,32], index: 4, kind: output, shape index: {}]  }
   0x1   :  { %v972_v0 = vld [vmem:[%s1393_s1 + $0x40] sm:$0xff]   ;;  %v974_v2 = vld [vmem:[%s1393_s1 + $0x48] sm:$0xff]   ;;  %v976_v4 = vld [vmem:[%s1393_s1 + $0x50] sm:$0xff]  }
   0x2   :  { %v973_v1 = vld [vmem:[%s1393_s1] sm:$0xff]   ;;  %862 = vmatprep.subr.bf16.mxu0 %v972_v0  ;;  %956 = vmatprep.subr.bf16.mxu1 %v972_v0  ;;  %v975_v3 = vld [vmem:[%s1393_s1 + $0x8] sm:$0xff]   ;;  %v977_v5 = vld [vmem:[%s1393_s1 + $0x10] sm:$0xff]  }
   0x3   :  { %863 = vmatpush3.bf16.msra.mxu0 %v973_v1  ;;  %964 = vmatpush3.bf16.msra.mxu1 %v973_v1  ;;  %v978_v6 = vld [vmem:[%s1393_s1 + $0x58] sm:$0xff]   ;;  %v980_v8 = vld [vmem:[%s1393_s1 + $0x60] sm:$0xff]   ;;  %v982_v10 = vld [vmem:[%s1393_s1 + $0x68] sm:$0xff]  }
   0x4   :  { %864 = vmatprep.subr.bf16.mxu0 %v974_v2  ;;  %957 = vmatprep.subr.bf16.mxu1 %v974_v2  ;;  %v979_v7 = vld [vmem:[%s1393_s1 + $0x18] sm:$0xff]   ;;  %v981_v9 = vld [vmem:[%s1393_s1 + $0x20] sm:$0xff]   ;;  %v983_v13 = vld [vmem:[%s1393_s1 + $0x28] sm:$0xff]  }
   0x5   :  { %v990_v11 = vld [vmem:[%s1394_s0 + $0x4] ss:$12 sps:$4 sm:$0xff]   ;;  %v993_v12 = vld [vmem:[%s1394_s0 + $0x94] ss:$12 sps:$4 sm:$0xff]   ;;  %v986_v16 = vld [vmem:[%s1393_s1 + $0x78] sm:$0xff]  }
   0x6   :  { %v984_v14 = vld [vmem:[%s1393_s1 + $0x70] sm:$0xff]   ;;  %371 = vmatprep.mubr.bf16.mxu0 %v990_v11  ;;  %419 = vmatprep.mubr.bf16.mxu1 %v993_v12  ;;  %v987_v17 = vld [vmem:[%s1393_s1 + $0x38] sm:$0xff]   ;;  %v988_v18 = vld [vmem:[%s1394_s0] ss:$12 sps:$4 sm:$0xff]  }
   0x7   :  { %865 = vmatpush3.bf16.msra.mxu0 %v975_v3  ;;  %965 = vmatpush3.bf16.msra.mxu1 %v975_v3  ;;  %v985_v15 = vld [vmem:[%s1393_s1 + $0x30] sm:$0xff]   ;;  %v994_v19 = vld [vmem:[%s1393_s1 + $0x80] sm:$0xff]   ;;  %v995_v21 = vld [vmem:[%s1394_s0 + $0x1c] ss:$12 sps:$4 sm:$0xff]  }
   0x8   :  { %866 = vmatprep.subr.bf16.mxu0 %v976_v4  ;;  %958 = vmatprep.subr.bf16.mxu1 %v976_v4  ;;  %v991_v20 = vld [vmem:[%s1394_s0 + $0x90] ss:$12 sps:$4 sm:$0xff]   ;;  %v997_v22 = vld [vmem:[%s1394_s0 + $0xac] ss:$12 sps:$4 sm:$0xff]   ;;  %v1000_v25 = vld [vmem:[%s1394_s0 + $0xa8] ss:$12 sps:$4 sm:$0xff]  }
   0x9   :  { %v1001_v23 = vld [vmem:[%s1393_s1 + $0x88] sm:$0xff]   ;;  %v999_v24 = vld [vmem:[%s1394_s0 + $0x18] ss:$12 sps:$4 sm:$0xff]   ;;  %v1002_v26 = vld [vmem:[%s1394_s0 + $0x34] ss:$12 sps:$4 sm:$0xff]  }
   0xa   :  { %v1004_v27 = vld [vmem:[%s1394_s0 + $0x8] ss:$12 sps:$4 sm:$0xff]   ;;  %v1005_v28 = vld [vmem:[%s1394_s0 + $0x30] ss:$12 sps:$4 sm:$0xff]   ;;  %v1006_v29 = vld [vmem:[%s1394_s0 + $0x20] ss:$12 sps:$4 sm:$0xff]  }
   0xb   :  { %867 = vmatpush3.bf16.msra.mxu0 %v977_v5  ;;  %966 = vmatpush3.bf16.msra.mxu1 %v977_v5  ;;  %v1007_v30 = vld [vmem:[%s1394_s0 + $0x4c] ss:$12 sps:$4 sm:$0xff]   ;;  %v1010_v32 = vld [vmem:[%s1394_s0 + $0x48] ss:$12 sps:$4 sm:$0xff]   ;;  %v1011_v33 = vld [vmem:[%s1394_s0 + $0x50] ss:$12 sps:$4 sm:$0xff]  }
   0xc   :  { %868 = vmatprep.subr.bf16.mxu0 %v978_v6  ;;  %959 = vmatprep.subr.bf16.mxu1 %v978_v6  ;;  %v1009_v31 = vld [vmem:[%s1394_s0 + $0x38] ss:$12 sps:$4 sm:$0xff]   ;;  %v1014_v35 = vld [vmem:[%s1394_s0 + $0x68] ss:$12 sps:$4 sm:$0xff]   ;;  %v1015_v36 = vld [vmem:[%s1394_s0 + $0x60] ss:$12 sps:$4 sm:$0xff]  }
   0xd   :  { %v1012_v34 = vld [vmem:[%s1394_s0 + $0x64] ss:$12 sps:$4 sm:$0xff]   ;;  %v1016_v37 = vld [vmem:[%s1394_s0 + $0x80] ss:$12 sps:$4 sm:$0xff]   ;;  %v1017_v38 = vld [vmem:[%s1394_s0 + $0x7c] ss:$12 sps:$4 sm:$0xff]  }
   0xe   :  { %v1019_v39 = vld [vmem:[%s1394_s0 + $0x98] ss:$12 sps:$4 sm:$0xff]   ;;  %v1021_v41 = vld [vmem:[%s1394_s0 + $0xb0] ss:$12 sps:$4 sm:$0xff]  }
   0xf   :  { %869 = vmatpush3.bf16.msra.mxu0 %v979_v7  ;;  %967 = vmatpush3.bf16.msra.mxu1 %v979_v7  ;;  %v1020_v40 = vld [vmem:[%s1394_s0 + $0x78] ss:$12 sps:$4 sm:$0xff]  }
  0x10   :  { %870 = vmatprep.subr.bf16.mxu0 %v980_v8  ;;  %960 = vmatprep.subr.bf16.mxu1 %v980_v8 }
  0x13   :  { %871 = vmatpush3.bf16.msra.mxu0 %v981_v9  ;;  %968 = vmatpush3.bf16.msra.mxu1 %v981_v9 }
  0x14   :  { %872 = vmatprep.subr.bf16.mxu0 %v982_v10  ;;  %961 = vmatprep.subr.bf16.mxu1 %v982_v10 }
  0x17   :  { %873 = vmatpush3.bf16.msra.mxu0 %v983_v13  ;;  %969 = vmatpush3.bf16.msra.mxu1 %v983_v13 }
  0x18   :  { %874 = vmatprep.subr.bf16.mxu0 %v984_v14  ;;  %962 = vmatprep.subr.bf16.mxu1 %v984_v14 }
  0x1b   :  { %875 = vmatpush3.bf16.msra.mxu0 %v985_v15  ;;  %970 = vmatpush3.bf16.msra.mxu1 %v985_v15 }
  0x1c   :  { %876 = vmatprep.subr.bf16.mxu0 %v986_v16  ;;  %963 = vmatprep.subr.bf16.mxu1 %v986_v16 }
  0x1f   :  { %877 = vmatpush3.bf16.msra.mxu0 %v987_v17  ;;  %971 = vmatpush3.bf16.msra.mxu1 %v987_v17 }
  0x20   :  { %936 = vmatprep.subr.bf16.mxu1 %v994_v19 }
  0x22   :  { %372 = vmatmul.mubr.bf16.vlgmr.msra.gmra.mrb[0].mxu0 %v988_v18  ;;  %420 = vmatmul.mubr.bf16.vlgmr.msra.gmra.mrb[0].mxu1 %v991_v20 }
  0x23   :  { %937 = vmatpush3.bf16.msra.mxu1 %v994_v19  ;;  %379 = vmatprep.mubr.bf16.mxu0 %v995_v21 }
  0x24   :  { %427 = vmatprep.mubr.bf16.mxu1 %v997_v22  ;;  %938 = vmatprep.subr.bf16.mxu1 %v1001_v23 }
  0x27   :  { %939 = vmatpush3.bf16.msra.mxu1 %v1001_v23 }
  0x2a   :  { %380 = vmatmul.mubr.bf16.gmra.mrb[4].mxu0 %v999_v24  ;;  %428 = vmatmul.mubr.bf16.gmra.mrb[4].mxu1 %v1000_v25 }
  0x2b   :  { %387 = vmatprep.mubr.bf16.mxu0 %v1002_v26  ;;  %940 = vmatprep.mubr.msk.bf16.mxu1 %vm314_vm0, %v1004_v27 }
  0x32   :  { %388 = vmatmul.mubr.bf16.gmra.mrb[8].mxu0 %v1005_v28  ;;  %941 = vmatmul.mubr.msk.bf16.vlgmr.msra.gmra.mrb[8].mxu1 %vm314_vm0, %v1006_v29 }
  0x33   :  { %395 = vmatprep.mubr.bf16.mxu0 %v1007_v30  ;;  %944 = vmatprep.mubr.msk.bf16.mxu1 %vm314_vm0, %v1009_v31 }
  0x3a   :  { %396 = vmatmul.mubr.bf16.gmra.mrb[12].mxu0 %v1010_v32  ;;  %945 = vmatmul.mubr.msk.bf16.gmra.mrb[12].mxu1 %vm314_vm0, %v1011_v33 }
  0x3b   :  { %403 = vmatprep.mubr.bf16.mxu0 %v1012_v34  ;;  %948 = vmatprep.mubr.msk.bf16.mxu1 %vm314_vm0, %v1014_v35 }
  0x42   :  { %404 = vmatmul.mubr.bf16.gmra.mrb[16].mxu0 %v1015_v36  ;;  %949 = vmatmul.mubr.msk.bf16.gmra.mrb[16].mxu1 %vm314_vm0, %v1016_v37 }
  0x43   :  { %411 = vmatprep.mubr.bf16.mxu0 %v1017_v38  ;;  %952 = vmatprep.mubr.msk.bf16.mxu1 %vm314_vm0, %v1019_v39 }
  0x4a   :  { %412 = vmatmul.mubr.bf16.gmra.mrb[20].mxu0 %v1020_v40  ;;  %953 = vmatmul.mubr.msk.bf16.gmra.mrb[20].mxu1 %vm314_vm0, %v1021_v41 }
  0xf5   :  { %v878_v42 = vpop.f32.mrb[0].mxu0  ;;  %v914_v43 = vpop.f32.mrb[0].mxu1 }
  0xf6   :  { %v879_v44 = vpop.f32.mrb[1].mxu0  ;;  %v915_v45 = vpop.f32.mrb[1].mxu1 }
  0xf7   :  { %v880_v46 = vadd.f32 %v879_v44, %v878_v42  ;;  %v881_v47 = vpop.f32.mrb[2].mxu0  ;;  %v1183_v48 = vadd.f32 %v915_v45, %v914_v43  ;;  %v917_v49 = vpop.f32.mrb[2].mxu1 }
  0xf8   :  { %v882_v50 = vpop.f32.mrb[3].mxu0  ;;  %v918_v51 = vpop.f32.mrb[3].mxu1 }
  0xf9   :  { %v883_v52 = vadd.f32 %v882_v50, %v881_v47  ;;  %v1185_v53 = vadd.f32 %v918_v51, %v917_v49 }
  0xfd   :  { %v884_v54 = vpop.f32.mrb[4].mxu0  ;;  %v920_v55 = vpop.f32.mrb[4].mxu1 }
  0xfe   :  { %v885_v56 = vpop.f32.mrb[5].mxu0  ;;  %v921_v57 = vpop.f32.mrb[5].mxu1 }
  0xff   :  { %v886_v58 = vadd.f32 %v885_v56, %v884_v54  ;;  %v887_v59 = vpop.f32.mrb[6].mxu0  ;;  %v1187_v60 = vadd.f32 %v921_v57, %v920_v55  ;;  %v923_v61 = vpop.f32.mrb[6].mxu1 }
 0x100   :  { %v888_v62 = vpop.f32.mrb[7].mxu0  ;;  %v924_v63 = vpop.f32.mrb[7].mxu1 }
 0x101   :  { %v889_v0 = vadd.f32 %v888_v62, %v887_v59  ;;  %v1189_v1 = vadd.f32 %v924_v63, %v923_v61 }
 0x105   :  { %v890_v2 = vpop.f32.mrb[8].mxu0  ;;  %v942_v3 = vpop.f32.mrb[8].mxu1 }
 0x106   :  { %v1191_v4 = vadd.f32 %v942_v3, %v886_v58  ;;  %v891_v5 = vpop.f32.mrb[9].mxu0  ;;  %v470_v6 = vpop.f32.mrb[9].mxu1 }
 0x107   :  { %v892_v7 = vadd.f32 %v891_v5, %v890_v2  ;;  %v1193_v8 = vadd.f32 %v880_v46, %v470_v6  ;;  %v893_v9 = vpop.f32.mrb[10].mxu0  ;;  %v943_v10 = vpop.f32.mrb[10].mxu1 }
 0x108   :  { %v1195_v11 = vadd.f32 %v943_v10, %v889_v0  ;;  %v894_v12 = vpop.f32.mrb[11].mxu0  ;;  %v473_v13 = vpop.f32.mrb[11].mxu1  ;;  %v573_v17 = vmul.f32 %v1191_v4, %v1191_v4  ;;  %v536_v23 = vsel %vm314_vm0, %v1191_v4, 0.0 }
 0x109   :  { %v571_v14 = vmul.f32 %v1193_v8, %v1193_v8  ;;  %v895_v15 = vadd.f32 %v894_v12, %v893_v9  ;;  %v1199_v16 = vadd.f32 %v883_v52, %v473_v13  ;;  %v533_v18 = vsel %vm314_vm0, %v1193_v8, 0.0 }
 0x10a   :  { %v574_v21 = vmul.f32 %v1195_v11, %v1195_v11  ;;  %v590_v32 = vsel %vm314_vm0, %v573_v17, 0.0  ;;  %v538_v33 = vsel %vm314_vm0, %v1195_v11, 0.0 }
 0x10b   :  { %v534_v19 = vsel %vm314_vm0, %v1199_v16, 0.0  ;;  %v572_v20 = vmul.f32 %v1199_v16, %v1199_v16  ;;  %v587_v24 = vsel %vm314_vm0, %v571_v14, 0.0 }
 0x10c   :  { %v535_v22 = vadd.f32 %v534_v19, %v533_v18  ;;  %v592_v38 = vsel %vm314_vm0, %v574_v21, 0.0 }
 0x10d   :  { %v588_v25 = vsel %vm314_vm0, %v572_v20, 0.0  ;;  %v896_v26 = vpop.f32.mrb[12].mxu0  ;;  %v946_v27 = vpop.f32.mrb[12].mxu1 }
 0x10e   :  { %v537_v28 = vadd.f32 %v536_v23, %v535_v22  ;;  %v589_v29 = vadd.f32 %v588_v25, %v587_v24  ;;  %v897_v30 = vpop.f32.mrb[13].mxu0  ;;  %v486_v31 = vpop.f32.mrb[13].mxu1 }
 0x10f   :  { %v898_v34 = vadd.f32 %v897_v30, %v896_v26  ;;  %v1218_v35 = vadd.f32 %v892_v7, %v486_v31  ;;  %v899_v36 = vpop.f32.mrb[14].mxu0  ;;  %v947_v37 = vpop.f32.mrb[14].mxu1 }
 0x110   :  { %v591_v39 = vadd.f32 %v590_v32, %v589_v29  ;;  %v539_v40 = vadd.f32 %v538_v33, %v537_v28  ;;  %v900_v41 = vpop.f32.mrb[15].mxu0  ;;  %v489_v42 = vpop.f32.mrb[15].mxu1 }
 0x111   :  { %v1221_v43 = vadd.f32 %v946_v27, %v898_v34  ;;  %v540_v44 = vsel %vm314_vm0, %v1218_v35, 0.0  ;;  %v575_v45 = vmul.f32 %v1218_v35, %v1218_v35  ;;  %v901_v46 = vadd.f32 %v900_v41, %v899_v36 }
 0x112   :  { %v541_v47 = vadd.f32 %v540_v44, %v539_v40  ;;  %v593_v49 = vadd.f32 %v592_v38, %v591_v39  ;;  %v1227_v50 = vadd.f32 %v895_v15, %v489_v42 }
 0x113   :  { %v594_v51 = vsel %vm314_vm0, %v575_v45, 0.0  ;;  %v1230_v52 = vadd.f32 %v947_v37, %v901_v46  ;;  %v577_v54 = vmul.f32 %v1221_v43, %v1221_v43  ;;  %v544_v62 = vsel %vm314_vm0, %v1221_v43, 0.0 }
 0x114   :  { %v595_v55 = vadd.f32 %v594_v51, %v593_v49  ;;  %v542_v56 = vsel %vm314_vm0, %v1227_v50, 0.0  ;;  %v576_v57 = vmul.f32 %v1227_v50, %v1227_v50 }
 0x115   :  { %v543_v58 = vadd.f32 %v542_v56, %v541_v47  ;;  %v902_v59 = vpop.f32.mrb[16].mxu0  ;;  %v950_v61 = vpop.f32.mrb[16].mxu1  ;;  %v578_v63 = vmul.f32 %v1230_v52, %v1230_v52  ;;  %v598_v12 = vsel %vm314_vm0, %v577_v54, 0.0  ;;  %v546_v13 = vsel %vm314_vm0, %v1230_v52, 0.0 }
 0x116   :  { %v596_v0 = vsel %vm314_vm0, %v576_v57, 0.0  ;;  %v903_v2 = vpop.f32.mrb[17].mxu0  ;;  %v502_v3 = vpop.f32.mrb[17].mxu1 }
 0x117   :  { %v545_v5 = vadd.f32 %v544_v62, %v543_v58  ;;  %v597_v6 = vadd.f32 %v596_v0, %v595_v55  ;;  %v904_v7 = vadd.f32 %v903_v2, %v902_v59  ;;  %v905_v9 = vpop.f32.mrb[18].mxu0  ;;  %v951_v10 = vpop.f32.mrb[18].mxu1  ;;  %v600_v21 = vsel %vm314_vm0, %v578_v63, 0.0 }
 0x118   :  { %v906_v14 = vpop.f32.mrb[19].mxu0  ;;  %v505_v15 = vpop.f32.mrb[19].mxu1 }
 0x119   :  { %v599_v17 = vadd.f32 %v598_v12, %v597_v6  ;;  %v907_v18 = vadd.f32 %v906_v14, %v905_v9  ;;  %v1246_v19 = vadd.f32 %v904_v7, %v502_v3  ;;  %v547_v20 = vadd.f32 %v546_v13, %v545_v5 }
 0x11b   :  { %v548_v22 = vsel %vm314_vm0, %v1246_v19, 0.0  ;;  %v579_v23 = vmul.f32 %v1246_v19, %v1246_v19  ;;  %v601_v24 = vadd.f32 %v600_v21, %v599_v17  ;;  %v1253_v25 = vadd.f32 %v907_v18, %v505_v15 }
 0x11c   :  { %v549_v26 = vadd.f32 %v548_v22, %v547_v20 }
 0x11d   :  { %v602_v27 = vsel %vm314_vm0, %v579_v23, 0.0  ;;  %v550_v28 = vsel %vm314_vm0, %v1253_v25, 0.0  ;;  %v580_v29 = vmul.f32 %v1253_v25, %v1253_v25  ;;  %v908_v30 = vpop.f32.mrb[20].mxu0  ;;  %v954_v31 = vpop.f32.mrb[20].mxu1 }
 0x11e   :  { %v603_v32 = vadd.f32 %v602_v27, %v601_v24  ;;  %v551_v33 = vadd.f32 %v550_v28, %v549_v26  ;;  %v1261_v34 = vadd.f32 %v954_v31, %v1187_v60  ;;  %v909_v36 = vpop.f32.mrb[21].mxu0  ;;  %v518_v37 = vpop.f32.mrb[21].mxu1 }
 0x11f   :  { %v604_v38 = vsel %vm314_vm0, %v580_v29, 0.0  ;;  %v910_v39 = vadd.f32 %v909_v36, %v908_v30  ;;  %v1265_v40 = vadd.f32 %v1183_v48, %v518_v37  ;;  %v911_v41 = vpop.f32.mrb[22].mxu0  ;;  %v955_v42 = vpop.f32.mrb[22].mxu1 }
 0x120   :  { %v605_v44 = vadd.f32 %v604_v38, %v603_v32  ;;  %v1268_v45 = vadd.f32 %v955_v42, %v1189_v1  ;;  %v912_v46 = vpop.f32.mrb[23].mxu0  ;;  %v521_v47 = vpop.f32.mrb[23].mxu1  ;;  %v585_v5 = vmul.f32 %v1261_v34, %v1261_v34  ;;  %v560_v12 = vsel %vm314_vm0, %v1261_v34, 0.0 }
 0x121   :  { %v1270_v49 = vadd.f32 %v950_v61, %v910_v39  ;;  %v913_v60 = vadd.f32 %v912_v46, %v911_v41  ;;  %v1273_v51 = vadd.f32 %v1185_v53, %v521_v47  ;;  %v583_v57 = vmul.f32 %v1265_v40, %v1265_v40 }
 0x122   :  { %v556_v62 = vsel %vm314_vm0, %v1265_v40, 0.0  ;;  %v586_v13 = vmul.f32 %v1268_v45, %v1268_v45  ;;  %v614_v18 = vsel %vm314_vm0, %v585_v5, 0.0  ;;  %v562_v20 = vsel %vm314_vm0, %v1268_v45, 0.0 }
 0x123   :  { %v552_v54 = vsel %vm314_vm0, %v1270_v49, 0.0  ;;  %v581_v48 = vmul.f32 %v1270_v49, %v1270_v49  ;;  %v1279_v55 = vadd.f32 %v951_v10, %v913_v60  ;;  %v584_v0 = vmul.f32 %v1273_v51, %v1273_v51 }
 0x124   :  { %v553_v56 = vadd.f32 %v552_v54, %v551_v33  ;;  %v610_v6 = vsel %vm314_vm0, %v583_v57, 0.0  ;;  %v558_v7 = vsel %vm314_vm0, %v1273_v51, 0.0  ;;  %v616_v23 = vsel %vm314_vm0, %v586_v13, 0.0 }
 0x125   :  { %v606_v1 = vsel %vm314_vm0, %v581_v48, 0.0  ;;  %v554_v58 = vsel %vm314_vm0, %v1279_v55, 0.0  ;;  %v582_v53 = vmul.f32 %v1279_v55, %v1279_v55  ;;  %v612_v14 = vsel %vm314_vm0, %v584_v0, 0.0 }
 0x126   :  { %v607_v59 = vadd.f32 %v606_v1, %v605_v44  ;;  %v555_v61 = vadd.f32 %v554_v58, %v553_v56  ;;  %v636_v54 = vlaneseq  ;;  %v628_v56 = vld [vmem:[%s1395_s2] sm:$0x1] }
 0x127   :  { %v608_v63 = vsel %vm314_vm0, %v582_v53, 0.0  ;;  %v632_v53 = vld [vmem:[%s1396_s3] sm:$0x1] }
 0x128   :  { %v609_v2 = vadd.f32 %v608_v63, %v607_v59  ;;  %v557_v3 = vadd.f32 %v556_v62, %v555_v61  ;;  %v637_v48 = vshrl.u32 %v636_v54, 7 }
 0x12a   :  { %v559_v9 = vadd.f32 %v558_v7, %v557_v3  ;;  %v611_v10 = vadd.f32 %v610_v6, %v609_v2  ;;  %v638_v1 = vsub.s32 0, %v637_v48 }
 0x12c   :  { %v561_v15 = vadd.f32 %v560_v12, %v559_v9  ;;  %v613_v17 = vadd.f32 %v612_v14, %v611_v10 }
 0x12e   :  { %v563_v21 = vadd.f32 %v562_v20, %v561_v15  ;;  %v615_v22 = vadd.f32 %v614_v18, %v613_v17 }
 0x130   :  { %v564_v24 = vrot.slane %v563_v21, 4  ;;  %v617_v26 = vadd.f32 %v616_v23, %v615_v22 }
 0x132   :  { %v565_v27 = vadd.f32 %v564_v24, %v563_v21  ;;  %v618_v28 = vrot.slane %v617_v26, 4 }
 0x134   :  { %v566_v29 = vrot.slane %v565_v27, 2  ;;  %v619_v30 = vadd.f32 %v618_v28, %v617_v26 }
 0x136   :  { %v567_v31 = vadd.f32 %v566_v29, %v565_v27  ;;  %v620_v32 = vrot.slane %v619_v30, 2 }
 0x138   :  { %v568_v33 = vrot.slane %v567_v31, 1  ;;  %v621_v36 = vadd.f32 %v620_v32, %v619_v30 }
 0x13a   :  { %v569_v37 = vadd.f32 %v568_v33, %v567_v31  ;;  %v622_v38 = vrot.slane %v621_v36, 1 }
 0x13c   :  { %v570_v39 = vmul.f32 0.0078125, %v569_v37  ;;  %v623_v41 = vadd.f32 %v622_v38, %v621_v36 }
 0x13e   :  { %v624_v42 = vmul.f32 0.0078125, %v623_v41  ;;  %v625_v44 = vmul.f32 %v570_v39, %v570_v39 }
 0x140   :  { %v626_v46 = vsub.f32 %v624_v42, %v625_v44 }
 0x142   :  { %v627_v47 = vmax.f32 %v626_v46, 0.0 }
 0x144   :  { %v629_v60 = vadd.f32 1e-05, %v627_v47 }
 0x146   :  { %1022 = vrsqrt.f32 %v629_v60 }
 0x150   :  { %v1023_v57 = vpop.eup %1022 }
 0x151   :  { %v631_v58 = vmul.f32 %v1023_v57, %v628_v56 }
 0x153   :  { %v633_v59 = vmul.f32 %v631_v58, %v570_v39  ;;  %v639_v61 = vrot.slane %v631_v58, %v638_v1 }
 0x155   :  { %v634_v62 = vsub.f32 %v632_v53, %v633_v59  ;;  %v641_v63 = vmul.f32 %v639_v61, %v1193_v8  ;;  %v642_v0 = vmul.f32 %v639_v61, %v1199_v16  ;;  %v646_v2 = vmul.f32 %v639_v61, %v1227_v50 }
 0x156   :  { %v647_v3 = vmul.f32 %v639_v61, %v1221_v43  ;;  %v648_v5 = vmul.f32 %v639_v61, %v1230_v52  ;;  %v649_v6 = vmul.f32 %v639_v61, %v1246_v19  ;;  %v650_v7 = vmul.f32 %v639_v61, %v1253_v25 }
 0x157   :  { %v651_v9 = vmul.f32 %v639_v61, %v1270_v49  ;;  %v652_v10 = vmul.f32 %v639_v61, %v1279_v55  ;;  %v653_v12 = vmul.f32 %v639_v61, %v1265_v40  ;;  %v654_v8 = vmul.f32 %v639_v61, %v1273_v51 }
 0x158   :  { %v655_v16 = vmul.f32 %v639_v61, %v1261_v34  ;;  %v643_v50 = vmul.f32 %v639_v61, %v1191_v4  ;;  %v644_v43 = vmul.f32 %v639_v61, %v1195_v11  ;;  %v656_v52 = vmul.f32 %v639_v61, %v1268_v45 }
 0x159   :  { %v661_v13 = vrot.slane %v634_v62, %v638_v1  ;;  %v645_v19 = vmul.f32 %v639_v61, %v1218_v35 }
 0x15b   :  { %v663_v25 = vadd.f32 %v661_v13, %v641_v63  ;;  %v664_v49 = vadd.f32 %v661_v13, %v642_v0  ;;  %v665_v14 = vadd.f32 %v661_v13, %v643_v50  ;;  %v666_v55 = vadd.f32 %v661_v13, %v644_v43 }
 0x15c   :  { %v667_v15 = vadd.f32 %v661_v13, %v645_v19  ;;  %v668_v40 = vadd.f32 %v661_v13, %v646_v2  ;;  %v669_v17 = vadd.f32 %v661_v13, %v647_v3  ;;  %v670_v51 = vadd.f32 %v661_v13, %v648_v5 }
 0x15d   :  { %v671_v18 = vadd.f32 %v661_v13, %v649_v6  ;;  %v672_v34 = vadd.f32 %v661_v13, %v650_v7  ;;  %v673_v20 = vadd.f32 %v661_v13, %v651_v9  ;;  %v674_v4 = vadd.f32 %v661_v13, %v652_v10 }
 0x15e   :  { %v675_v21 = vadd.f32 %v661_v13, %v653_v12  ;;  %v676_v11 = vadd.f32 %v661_v13, %v654_v8  ;;  %v677_v22 = vadd.f32 %v661_v13, %v655_v16  ;;  %v678_v45 = vadd.f32 %v661_v13, %v656_v52 }
 0x15f   :  { %v679_v23 = vmax.f32 %v663_v25, 0.0  ;;  %v680_v24 = vmax.f32 %v664_v49, 0.0  ;;  %v681_v35 = vmax.f32 %v665_v14, 0.0  ;;  %v682_v26 = vmax.f32 %v666_v55, 0.0 }
 0x160   :  { %v683_v27 = vmax.f32 %v667_v15, 0.0  ;;  %v684_v28 = vmax.f32 %v668_v40, 0.0  ;;  %v685_v29 = vmax.f32 %v669_v17, 0.0  ;;  %v686_v30 = vmax.f32 %v670_v51, 0.0 }
 0x161   :  { %v687_v31 = vmax.f32 %v671_v18, 0.0  ;;  %v688_v32 = vmax.f32 %v672_v34, 0.0  ;;  %v689_v33 = vmax.f32 %v673_v20, 0.0  ;;  %v690_v36 = vmax.f32 %v674_v4, 0.0 }
 0x162   :  { %v691_v37 = vmax.f32 %v675_v21, 0.0  ;;  %v692_v38 = vmax.f32 %v676_v11, 0.0  ;;  %v693_v39 = vmax.f32 %v677_v22, 0.0  ;;  %v694_v41 = vmax.f32 %v678_v45, 0.0 }
 0x163   :  { %v846_v42 = vpack.c.bf16 %v679_v23, %v679_v23  ;;  %v847_v44 = vpack.c.bf16 %v680_v24, %v680_v24  ;;  %v848_v46 = vpack.c.bf16 %v681_v35, %v681_v35  ;;  %v849_v47 = vpack.c.bf16 %v682_v26, %v682_v26 }
 0x164   :  { %v850_v60 = vpack.c.bf16 %v683_v27, %v683_v27  ;;  %v851_v54 = vpack.c.bf16 %v684_v28, %v684_v28  ;;  %v852_v48 = vpack.c.bf16 %v685_v29, %v685_v29  ;;  %v853_v56 = vpack.c.bf16 %v686_v30, %v686_v30 }
 0x165   :  { %v854_v1 = vpack.c.bf16 %v687_v31, %v687_v31  ;;  %v855_v57 = vpack.c.bf16 %v688_v32, %v688_v32  ;;  %v856_v58 = vpack.c.bf16 %v689_v33, %v689_v33  ;;  %v857_v53 = vpack.c.bf16 %v690_v36, %v690_v36  ;;  %760 = vst.msk [vmem:[%s1397_s4] sm:$0xf] %vm759_vm1, %v846_v42 }
 0x166   :  { %761 = vst.msk [vmem:[%s1397_s4 + $0x4] sm:$0xf] %vm759_vm1, %v847_v44  ;;  %762 = vst.msk [vmem:[%s1397_s4 + $0x8] sm:$0xf] %vm759_vm1, %v848_v46  ;;  %v858_v59 = vpack.c.bf16 %v691_v37, %v691_v37  ;;  %v859_v61 = vpack.c.bf16 %v692_v38, %v692_v38  ;;  %v860_v62 = vpack.c.bf16 %v693_v39, %v693_v39 }
 0x167   :  { %763 = vst.msk [vmem:[%s1397_s4 + $0xc] sm:$0xf] %vm759_vm1, %v849_v47  ;;  %v861_v63 = vpack.c.bf16 %v694_v41, %v694_v41  ;;  %764 = vst.msk [vmem:[%s1397_s4 + $0x10] sm:$0xf] %vm759_vm1, %v850_v60 }
 0x168   :  { %765 = vst.msk [vmem:[%s1397_s4 + $0x14] sm:$0xf] %vm759_vm1, %v851_v54  ;;  %766 = vst.msk [vmem:[%s1397_s4 + $0x18] sm:$0xf] %vm759_vm1, %v852_v48 }
 0x169   :  { %767 = vst.msk [vmem:[%s1397_s4 + $0x1c] sm:$0xf] %vm759_vm1, %v853_v56  ;;  %768 = vst.msk [vmem:[%s1397_s4 + $0x20] sm:$0xf] %vm759_vm1, %v854_v1 }
 0x16a   :  { %769 = vst.msk [vmem:[%s1397_s4 + $0x24] sm:$0xf] %vm759_vm1, %v855_v57  ;;  %770 = vst.msk [vmem:[%s1397_s4 + $0x28] sm:$0xf] %vm759_vm1, %v856_v58 }
 0x16b   :  { %771 = vst.msk [vmem:[%s1397_s4 + $0x2c] sm:$0xf] %vm759_vm1, %v857_v53  ;;  %772 = vst.msk [vmem:[%s1397_s4 + $0x30] sm:$0xf] %vm759_vm1, %v858_v59 }
 0x16c   :  { %773 = vst.msk [vmem:[%s1397_s4 + $0x34] sm:$0xf] %vm759_vm1, %v859_v61  ;;  %774 = vst.msk [vmem:[%s1397_s4 + $0x38] sm:$0xf] %vm759_vm1, %v860_v62 }
 0x16d   :  { %775 = vst.msk [vmem:[%s1397_s4 + $0x3c] sm:$0xf] %vm759_vm1, %v861_v63 }

// kernel: shared_layers_forward.115
= control target key start
LH: loop header
LB: loop body
LE: loop exit
PB: predicated region body
PF: predicated region fallthrough
CT: control target
= control target key end

     0   :  { %vm106_vm0 = vcmask 523264   ;;  %s778_s1 = inlined_call_operand.vmem [shape: bf16[64,128], index: 1, kind: input, shape index: {}]   ;;  %s779_s0 = inlined_call_operand.vmem [shape: bf16[128,64], index: 0, kind: input, shape index: {}]   ;;  %s780_s2 = inlined_call_operand.vmem [shape: f32[1,128], index: 2, kind: input, shape index: {}]   ;;  %s781_s3 = inlined_call_operand.vmem [shape: f32[1,128], index: 3, kind: input, shape index: {}]   ;;  %s782_s4 = inlined_call_operand.vmem [shape: bf16[128,128], index: 4, kind: output, shape index: {}]  }
   0x1   :  { %v569_v0 = vld [vmem:[%s778_s1] sm:$0xff]   ;;  %v570_v1 = vld [vmem:[%s778_s1 + $0x8] sm:$0xff]   ;;  %v571_v2 = vld [vmem:[%s778_s1 + $0x10] sm:$0xff]  }
   0x2   :  { %537 = vmatprep.subr.bf16.mxu0 %v569_v0  ;;  %561 = vmatprep.subr.bf16.mxu1 %v569_v0  ;;  %v573_v3 = vld [vmem:[%s779_s0] sm:$0xff]   ;;  %v572_v4 = vld [vmem:[%s778_s1 + $0x18] sm:$0xff]   ;;  %v574_v6 = vld [vmem:[%s779_s0 + $0x8] sm:$0xff]  }
   0x3   :  { %538 = vmatpush3.bf16.msra.mxu0 %v569_v0  ;;  %565 = vmatpush3.bf16.msra.mxu1 %v569_v0  ;;  %v577_v5 = vld [vmem:[%s779_s0 + $0x20] sm:$0xff]   ;;  %v578_v7 = vld [vmem:[%s779_s0 + $0x28] sm:$0xff]   ;;  %v575_v8 = vld [vmem:[%s779_s0 + $0x10] sm:$0xff]  }
   0x4   :  { %539 = vmatprep.subr.bf16.mxu0 %v570_v1  ;;  %562 = vmatprep.subr.bf16.mxu1 %v570_v1  ;;  %v579_v9 = vld [vmem:[%s779_s0 + $0x30] sm:$0xff]   ;;  %v576_v10 = vld [vmem:[%s779_s0 + $0x18] sm:$0xff]  }
   0x5   :  { %545 = vmatprep.mubr.msk.bf16.mxu0 %vm106_vm0, %v573_v3  ;;  %553 = vmatprep.mubr.msk.bf16.mxu1 %vm106_vm0, %v577_v5  ;;  %v580_v11 = vld [vmem:[%s779_s0 + $0x38] sm:$0xff]  }
   0x7   :  { %540 = vmatpush3.bf16.msra.mxu0 %v570_v1  ;;  %566 = vmatpush3.bf16.msra.mxu1 %v570_v1 }
   0x8   :  { %541 = vmatprep.subr.bf16.mxu0 %v571_v2  ;;  %563 = vmatprep.subr.bf16.mxu1 %v571_v2 }
   0xb   :  { %542 = vmatpush3.bf16.msra.mxu0 %v571_v2  ;;  %567 = vmatpush3.bf16.msra.mxu1 %v571_v2 }
   0xc   :  { %543 = vmatprep.subr.bf16.mxu0 %v572_v4  ;;  %564 = vmatprep.subr.bf16.mxu1 %v572_v4 }
   0xf   :  { %544 = vmatpush3.bf16.msra.mxu0 %v572_v4  ;;  %568 = vmatpush3.bf16.msra.mxu1 %v572_v4 }
  0x12   :  { %546 = vmatmul.mubr.msk.bf16.vlgmr.msra.gmra.mrb[0].mxu0 %vm106_vm0, %v574_v6  ;;  %554 = vmatmul.mubr.msk.bf16.vlgmr.msra.gmra.mrb[0].mxu1 %vm106_vm0, %v578_v7 }
  0x13   :  { %549 = vmatprep.mubr.msk.bf16.mxu0 %vm106_vm0, %v575_v8  ;;  %557 = vmatprep.mubr.msk.bf16.mxu1 %vm106_vm0, %v579_v9 }
  0x1a   :  { %550 = vmatmul.mubr.msk.bf16.gmra.mrb[4].mxu0 %vm106_vm0, %v576_v10  ;;  %558 = vmatmul.mubr.msk.bf16.gmra.mrb[4].mxu1 %vm106_vm0, %v580_v11 }
  0xe5   :  { %v652_v12 = vpop.f32.mrb[0].mxu0  ;;  %v654_v13 = vpop.f32.mrb[0].mxu1 }
  0xe6   :  { %v656_v14 = vpop.f32.mrb[1].mxu0  ;;  %v658_v15 = vpop.f32.mrb[1].mxu1  ;;  %v252_v23 = vmul.f32 %v652_v12, %v652_v12  ;;  %v260_v55 = vmul.f32 %v654_v13, %v654_v13 }
  0xe7   :  { %v660_v16 = vpop.f32.mrb[2].mxu0  ;;  %v662_v17 = vpop.f32.mrb[2].mxu1  ;;  %v250_v20 = vmul.f32 %v656_v14, %v656_v14  ;;  %v258_v49 = vmul.f32 %v658_v15, %v658_v15 }
  0xe8   :  { %v664_v18 = vpop.f32.mrb[3].mxu0  ;;  %v666_v19 = vpop.f32.mrb[3].mxu1  ;;  %v253_v26 = vmul.f32 %v660_v16, %v660_v16  ;;  %v261_v58 = vmul.f32 %v662_v17, %v662_v17 }
  0xe9   :  { %v228_v21 = vadd.f32 %v664_v18, %v656_v14  ;;  %v251_v22 = vmul.f32 %v664_v18, %v664_v18  ;;  %v259_v54 = vmul.f32 %v666_v19, %v666_v19 }
  0xeb   :  { %v229_v24 = vadd.f32 %v652_v12, %v228_v21  ;;  %v266_v25 = vadd.f32 %v251_v22, %v250_v20 }
  0xed   :  { %v267_v27 = vadd.f32 %v266_v25, %v252_v23  ;;  %v679_v28 = vpop.f32.mrb[4].mxu0  ;;  %v230_v29 = vadd.f32 %v660_v16, %v229_v24  ;;  %v682_v30 = vpop.f32.mrb[4].mxu1 }
  0xee   :  { %v684_v31 = vpop.f32.mrb[5].mxu0  ;;  %v686_v32 = vpop.f32.mrb[5].mxu1  ;;  %v256_v43 = vmul.f32 %v679_v28, %v679_v28  ;;  %v264_v3 = vmul.f32 %v682_v30, %v682_v30 }
  0xef   :  { %v231_v33 = vadd.f32 %v230_v29, %v684_v31  ;;  %v254_v34 = vmul.f32 %v684_v31, %v684_v31  ;;  %v268_v35 = vadd.f32 %v267_v27, %v253_v26  ;;  %v691_v36 = vpop.f32.mrb[6].mxu0  ;;  %v693_v37 = vpop.f32.mrb[6].mxu1  ;;  %v262_v61 = vmul.f32 %v686_v32, %v686_v32 }
  0xf0   :  { %v695_v38 = vpop.f32.mrb[7].mxu0  ;;  %v697_v39 = vpop.f32.mrb[7].mxu1  ;;  %v257_v46 = vmul.f32 %v691_v36, %v691_v36  ;;  %v265_v6 = vmul.f32 %v693_v37, %v693_v37 }
  0xf1   :  { %v269_v40 = vadd.f32 %v268_v35, %v254_v34  ;;  %v232_v41 = vadd.f32 %v231_v33, %v695_v38  ;;  %v255_v42 = vmul.f32 %v695_v38, %v695_v38  ;;  %v263_v2 = vmul.f32 %v697_v39, %v697_v39 }
  0xf3   :  { %v233_v44 = vadd.f32 %v679_v28, %v232_v41  ;;  %v270_v45 = vadd.f32 %v269_v40, %v255_v42 }
  0xf5   :  { %v271_v47 = vadd.f32 %v270_v45, %v256_v43  ;;  %v234_v48 = vadd.f32 %v691_v36, %v233_v44  ;;  %v299_v44 = vlaneseq }
  0xf7   :  { %v235_v50 = vadd.f32 %v234_v48, %v658_v15  ;;  %v272_v51 = vadd.f32 %v271_v47, %v257_v46  ;;  %v300_v45 = vshrl.u32 %v299_v44, 7  ;;  %v291_v46 = vld [vmem:[%s780_s2] sm:$0x1] }
  0xf9   :  { %v273_v52 = vadd.f32 %v272_v51, %v258_v49  ;;  %v236_v53 = vadd.f32 %v235_v50, %v666_v19  ;;  %v301_v47 = vsub.s32 0, %v300_v45  ;;  %v295_v50 = vld [vmem:[%s781_s3] sm:$0x1] }
  0xfb   :  { %v237_v56 = vadd.f32 %v654_v13, %v236_v53  ;;  %v274_v57 = vadd.f32 %v273_v52, %v259_v54 }
  0xfd   :  { %v275_v59 = vadd.f32 %v274_v57, %v260_v55  ;;  %v238_v60 = vadd.f32 %v662_v17, %v237_v56 }
  0xff   :  { %v239_v62 = vadd.f32 %v238_v60, %v686_v32  ;;  %v276_v63 = vadd.f32 %v275_v59, %v261_v58 }
 0x101   :  { %v277_v0 = vadd.f32 %v276_v63, %v262_v61  ;;  %v240_v1 = vadd.f32 %v239_v62, %v697_v39 }
 0x103   :  { %v241_v4 = vadd.f32 %v682_v30, %v240_v1  ;;  %v278_v5 = vadd.f32 %v277_v0, %v263_v2 }
 0x105   :  { %v242_v7 = vadd.f32 %v693_v37, %v241_v4  ;;  %v279_v8 = vadd.f32 %v278_v5, %v264_v3 }
 0x107   :  { %v243_v9 = vrot.slane %v242_v7, 4  ;;  %v280_v10 = vadd.f32 %v279_v8, %v265_v6 }
 0x109   :  { %v244_v11 = vadd.f32 %v243_v9, %v242_v7  ;;  %v281_v20 = vrot.slane %v280_v10, 4 }
 0x10b   :  { %v245_v21 = vrot.slane %v244_v11, 2  ;;  %v282_v22 = vadd.f32 %v281_v20, %v280_v10 }
 0x10d   :  { %v246_v23 = vadd.f32 %v245_v21, %v244_v11  ;;  %v283_v24 = vrot.slane %v282_v22, 2 }
 0x10f   :  { %v247_v25 = vrot.slane %v246_v23, 1  ;;  %v284_v26 = vadd.f32 %v283_v24, %v282_v22 }
 0x111   :  { %v248_v27 = vadd.f32 %v247_v25, %v246_v23  ;;  %v285_v29 = vrot.slane %v284_v26, 1 }
 0x113   :  { %v249_v33 = vmul.f32 0.0078125, %v248_v27  ;;  %v286_v34 = vadd.f32 %v285_v29, %v284_v26 }
 0x115   :  { %v287_v35 = vmul.f32 0.0078125, %v286_v34  ;;  %v288_v40 = vmul.f32 %v249_v33, %v249_v33 }
 0x117   :  { %v289_v41 = vsub.f32 %v287_v35, %v288_v40 }
 0x119   :  { %v290_v42 = vmax.f32 %v289_v41, 0.0 }
 0x11b   :  { %v292_v43 = vadd.f32 1e-05, %v290_v42 }
 0x11d   :  { %581 = vrsqrt.f32 %v292_v43 }
 0x127   :  { %v582_v48 = vpop.eup %581 }
 0x128   :  { %v294_v49 = vmul.f32 %v582_v48, %v291_v46 }
 0x12a   :  { %v296_v51 = vmul.f32 %v294_v49, %v249_v33  ;;  %v302_v52 = vrot.slane %v294_v49, %v301_v47 }
 0x12c   :  { %v297_v53 = vsub.f32 %v295_v50, %v296_v51  ;;  %v304_v54 = vmul.f32 %v302_v52, %v656_v14  ;;  %v305_v55 = vmul.f32 %v302_v52, %v664_v18  ;;  %v306_v56 = vmul.f32 %v652_v12, %v302_v52 }
 0x12d   :  { %v307_v57 = vmul.f32 %v660_v16, %v302_v52  ;;  %v308_v58 = vmul.f32 %v302_v52, %v684_v31  ;;  %v309_v59 = vmul.f32 %v302_v52, %v695_v38  ;;  %v310_v60 = vmul.f32 %v679_v28, %v302_v52 }
 0x12e   :  { %v311_v61 = vmul.f32 %v691_v36, %v302_v52  ;;  %v312_v62 = vmul.f32 %v302_v52, %v658_v15  ;;  %v313_v63 = vmul.f32 %v302_v52, %v666_v19  ;;  %v314_v14 = vmul.f32 %v654_v13, %v302_v52 }
 0x12f   :  { %v315_v18 = vmul.f32 %v662_v17, %v302_v52  ;;  %v316_v12 = vmul.f32 %v302_v52, %v686_v32  ;;  %v317_v16 = vmul.f32 %v302_v52, %v697_v39  ;;  %v318_v31 = vmul.f32 %v682_v30, %v302_v52 }
 0x130   :  { %v319_v38 = vmul.f32 %v693_v37, %v302_v52  ;;  %v324_v0 = vrot.slane %v297_v53, %v301_v47 }
 0x132   :  { %v326_v28 = vadd.f32 %v324_v0, %v304_v54  ;;  %v327_v1 = vadd.f32 %v324_v0, %v305_v55  ;;  %v328_v36 = vadd.f32 %v324_v0, %v306_v56  ;;  %v329_v2 = vadd.f32 %v324_v0, %v307_v57 }
 0x133   :  { %v330_v15 = vadd.f32 %v324_v0, %v308_v58  ;;  %v331_v3 = vadd.f32 %v324_v0, %v309_v59  ;;  %v332_v19 = vadd.f32 %v324_v0, %v310_v60  ;;  %v333_v4 = vadd.f32 %v324_v0, %v311_v61 }
 0x134   :  { %v334_v13 = vadd.f32 %v324_v0, %v312_v62  ;;  %v335_v5 = vadd.f32 %v324_v0, %v313_v63  ;;  %v336_v17 = vadd.f32 %v324_v0, %v314_v14  ;;  %v337_v6 = vadd.f32 %v324_v0, %v315_v18 }
 0x135   :  { %v338_v32 = vadd.f32 %v324_v0, %v316_v12  ;;  %v339_v7 = vadd.f32 %v324_v0, %v317_v16  ;;  %v340_v39 = vadd.f32 %v324_v0, %v318_v31  ;;  %v341_v8 = vadd.f32 %v324_v0, %v319_v38 }
 0x136   :  { %v481_v30 = vpack.c.bf16 %v327_v1, %v326_v28  ;;  %v486_v9 = vpack.c.bf16 %v329_v2, %v328_v36  ;;  %v491_v37 = vpack.c.bf16 %v331_v3, %v330_v15  ;;  %v496_v10 = vpack.c.bf16 %v333_v4, %v332_v19 }
 0x137   :  { %v501_v11 = vpack.c.bf16 %v335_v5, %v334_v13  ;;  %v506_v20 = vpack.c.bf16 %v337_v6, %v336_v17  ;;  %v511_v21 = vpack.c.bf16 %v339_v7, %v338_v32  ;;  %v516_v22 = vpack.c.bf16 %v341_v8, %v340_v39 }
 0x138   :  { %482 = vst [vmem:[%s782_s4] sm:$0xff] %v481_v30   ;;  %518 = vst [vmem:[%s782_s4 + $0x8] sm:$0xff] %v486_v9  }
 0x139   :  { %519 = vst [vmem:[%s782_s4 + $0x10] sm:$0xff] %v491_v37   ;;  %520 = vst [vmem:[%s782_s4 + $0x18] sm:$0xff] %v496_v10  }
 0x13a   :  { %521 = vst [vmem:[%s782_s4 + $0x20] sm:$0xff] %v501_v11   ;;  %522 = vst [vmem:[%s782_s4 + $0x28] sm:$0xff] %v506_v20  }
 0x13b   :  { %523 = vst [vmem:[%s782_s4 + $0x30] sm:$0xff] %v511_v21   ;;  %524 = vst [vmem:[%s782_s4 + $0x38] sm:$0xff] %v516_v22  }

// kernel: shared_layers_forward.116
= control target key start
LH: loop header
LB: loop body
LE: loop exit
PB: predicated region body
PF: predicated region fallthrough
CT: control target
= control target key end

     0   :  { %vm93_vm0 = vcmask 261120   ;;  %s897_s1 = inlined_call_operand.vmem [shape: bf16[32,128], index: 1, kind: input, shape index: {}]   ;;  %s898_s0 = inlined_call_operand.vmem [shape: bf16[128,32], index: 0, kind: input, shape index: {}]   ;;  %s899_s3 = inlined_call_operand.vmem [shape: f32[1,128], index: 3, kind: input, shape index: {}]   ;;  %s900_s2 = inlined_call_operand.vmem [shape: bf16[128,128], index: 2, kind: input, shape index: {}]   ;;  %s901_s4 = inlined_call_operand.vmem [shape: f32[1,128], index: 4, kind: input, shape index: {}]   ;;  %s902_s5 = inlined_call_operand.vmem [shape: bf16[128,128], index: 5, kind: output, shape index: {}]  }
   0x1   :  { %v647_v0 = vld [vmem:[%s897_s1] sm:$0xff]   ;;  %v648_v1 = vld [vmem:[%s897_s1 + $0x8] sm:$0xff]   ;;  %v651_v4 = vld [vmem:[%s898_s0 + $0x10] sm:$0xff]  }
   0x2   :  { %623 = vmatprep.subr.bf16.mxu0 %v647_v0  ;;  %v649_v2 = vld [vmem:[%s898_s0] sm:$0xff]   ;;  %643 = vmatprep.subr.bf16.mxu1 %v647_v0  ;;  %v650_v3 = vld [vmem:[%s898_s0 + $0x8] sm:$0xff]   ;;  %v655_v7 = vld [vmem:[%s898_s0 + $0x30] sm:$0xff]  }
   0x3   :  { %624 = vmatpush3.bf16.msra.mxu0 %v647_v0  ;;  %645 = vmatpush3.bf16.msra.mxu1 %v647_v0  ;;  %v653_v5 = vld [vmem:[%s898_s0 + $0x20] sm:$0xff]   ;;  %v654_v6 = vld [vmem:[%s898_s0 + $0x28] sm:$0xff]   ;;  %v652_v8 = vld [vmem:[%s898_s0 + $0x18] sm:$0xff]  }
   0x4   :  { %625 = vmatprep.subr.bf16.mxu0 %v648_v1  ;;  %627 = vmatprep.mubr.msk.bf16.mxu0 %vm93_vm0, %v649_v2  ;;  %v656_v9 = vld [vmem:[%s898_s0 + $0x38] sm:$0xff]  }
   0x5   :  { %644 = vmatprep.subr.bf16.mxu1 %v648_v1  ;;  %635 = vmatprep.mubr.msk.bf16.mxu1 %vm93_vm0, %v653_v5 }
   0x7   :  { %626 = vmatpush3.bf16.msra.mxu0 %v648_v1  ;;  %646 = vmatpush3.bf16.msra.mxu1 %v648_v1 }
   0xa   :  { %628 = vmatmul.mubr.msk.bf16.vlgmr.msra.gmra.mrb[0].mxu0 %vm93_vm0, %v650_v3  ;;  %636 = vmatmul.mubr.msk.bf16.vlgmr.msra.gmra.mrb[0].mxu1 %vm93_vm0, %v654_v6 }
   0xb   :  { %631 = vmatprep.mubr.msk.bf16.mxu0 %vm93_vm0, %v651_v4  ;;  %639 = vmatprep.mubr.msk.bf16.mxu1 %vm93_vm0, %v655_v7 }
  0x12   :  { %632 = vmatmul.mubr.msk.bf16.gmra.mrb[4].mxu0 %vm93_vm0, %v652_v8  ;;  %640 = vmatmul.mubr.msk.bf16.gmra.mrb[4].mxu1 %vm93_vm0, %v656_v9 }
  0xdd   :  { %v727_v10 = vpop.f32.mrb[0].mxu0  ;;  %v729_v11 = vpop.f32.mrb[0].mxu1 }
  0xde   :  { %v731_v12 = vpop.f32.mrb[1].mxu0  ;;  %v733_v13 = vpop.f32.mrb[1].mxu1  ;;  %v239_v21 = vmul.f32 %v727_v10, %v727_v10  ;;  %v247_v53 = vmul.f32 %v729_v11, %v729_v11 }
  0xdf   :  { %v735_v14 = vpop.f32.mrb[2].mxu0  ;;  %v737_v15 = vpop.f32.mrb[2].mxu1  ;;  %v237_v18 = vmul.f32 %v731_v12, %v731_v12  ;;  %v245_v47 = vmul.f32 %v733_v13, %v733_v13 }
  0xe0   :  { %v739_v16 = vpop.f32.mrb[3].mxu0  ;;  %v741_v17 = vpop.f32.mrb[3].mxu1  ;;  %v240_v24 = vmul.f32 %v735_v14, %v735_v14  ;;  %v248_v56 = vmul.f32 %v737_v15, %v737_v15 }
  0xe1   :  { %v215_v19 = vadd.f32 %v739_v16, %v731_v12  ;;  %v238_v20 = vmul.f32 %v739_v16, %v739_v16  ;;  %v246_v52 = vmul.f32 %v741_v17, %v741_v17 }
  0xe3   :  { %v216_v22 = vadd.f32 %v727_v10, %v215_v19  ;;  %v253_v23 = vadd.f32 %v238_v20, %v237_v18 }
  0xe5   :  { %v254_v25 = vadd.f32 %v253_v23, %v239_v21  ;;  %v754_v26 = vpop.f32.mrb[4].mxu0  ;;  %v217_v27 = vadd.f32 %v735_v14, %v216_v22  ;;  %v757_v28 = vpop.f32.mrb[4].mxu1 }
  0xe6   :  { %v759_v29 = vpop.f32.mrb[5].mxu0  ;;  %v761_v30 = vpop.f32.mrb[5].mxu1  ;;  %v243_v41 = vmul.f32 %v754_v26, %v754_v26  ;;  %v251_v1 = vmul.f32 %v757_v28, %v757_v28 }
  0xe7   :  { %v218_v31 = vadd.f32 %v217_v27, %v759_v29  ;;  %v241_v32 = vmul.f32 %v759_v29, %v759_v29  ;;  %v255_v33 = vadd.f32 %v254_v25, %v240_v24  ;;  %v766_v34 = vpop.f32.mrb[6].mxu0  ;;  %v768_v35 = vpop.f32.mrb[6].mxu1  ;;  %v249_v59 = vmul.f32 %v761_v30, %v761_v30 }
  0xe8   :  { %v770_v36 = vpop.f32.mrb[7].mxu0  ;;  %v772_v37 = vpop.f32.mrb[7].mxu1  ;;  %v244_v44 = vmul.f32 %v766_v34, %v766_v34  ;;  %v252_v4 = vmul.f32 %v768_v35, %v768_v35 }
  0xe9   :  { %v256_v38 = vadd.f32 %v255_v33, %v241_v32  ;;  %v219_v39 = vadd.f32 %v218_v31, %v770_v36  ;;  %v242_v40 = vmul.f32 %v770_v36, %v770_v36  ;;  %v250_v0 = vmul.f32 %v772_v37, %v772_v37 }
  0xeb   :  { %v220_v42 = vadd.f32 %v754_v26, %v219_v39  ;;  %v257_v43 = vadd.f32 %v256_v38, %v242_v40 }
  0xed   :  { %v258_v45 = vadd.f32 %v257_v43, %v243_v41  ;;  %v221_v46 = vadd.f32 %v766_v34, %v220_v42  ;;  %v286_v42 = vlaneseq }
  0xef   :  { %v222_v48 = vadd.f32 %v221_v46, %v733_v13  ;;  %v259_v49 = vadd.f32 %v258_v45, %v244_v44  ;;  %v287_v43 = vshrl.u32 %v286_v42, 7  ;;  %v278_v44 = vld [vmem:[%s899_s3] sm:$0x1] }
  0xf0   :  { %v813_v46 = vld [vmem:[%s900_s2] sm:$0xff]  }
  0xf1   :  { %v260_v50 = vadd.f32 %v259_v49, %v245_v47  ;;  %v223_v51 = vadd.f32 %v222_v48, %v741_v17  ;;  %v288_v45 = vsub.s32 0, %v287_v43  ;;  %v818_v47 = vld [vmem:[%s900_s2 + $0x8] sm:$0xff]   ;;  %v823_v49 = vld [vmem:[%s900_s2 + $0x10] sm:$0xff]  }
  0xf3   :  { %v224_v54 = vadd.f32 %v729_v11, %v223_v51  ;;  %v261_v55 = vadd.f32 %v260_v50, %v246_v52  ;;  %v828_v51 = vld [vmem:[%s900_s2 + $0x18] sm:$0xff]   ;;  %v833_v52 = vld [vmem:[%s900_s2 + $0x20] sm:$0xff]  }
  0xf5   :  { %v262_v57 = vadd.f32 %v261_v55, %v247_v53  ;;  %v225_v58 = vadd.f32 %v737_v15, %v224_v54  ;;  %v282_v53 = vld [vmem:[%s901_s4] sm:$0x1]  ;;  %v529_v54 = vunpack.c.l.bf16 %v813_v46  ;;  %v530_v55 = vunpack.c.h.bf16 %v813_v46 }
  0xf7   :  { %v226_v60 = vadd.f32 %v225_v58, %v761_v30  ;;  %v263_v61 = vadd.f32 %v262_v57, %v248_v56  ;;  %v533_v56 = vunpack.c.l.bf16 %v818_v47  ;;  %v534_v57 = vunpack.c.h.bf16 %v818_v47 }
  0xf9   :  { %v264_v62 = vadd.f32 %v263_v61, %v249_v59  ;;  %v227_v63 = vadd.f32 %v226_v60, %v772_v37  ;;  %v537_v60 = vunpack.c.l.bf16 %v823_v49  ;;  %v538_v61 = vunpack.c.h.bf16 %v823_v49 }
  0xfb   :  { %v228_v2 = vadd.f32 %v757_v28, %v227_v63  ;;  %v265_v3 = vadd.f32 %v264_v62, %v250_v0  ;;  %v541_v62 = vunpack.c.l.bf16 %v828_v51  ;;  %v542_v63 = vunpack.c.h.bf16 %v828_v51 }
  0xfc   :  { %v545_v0 = vunpack.c.l.bf16 %v833_v52 }
  0xfd   :  { %v229_v5 = vadd.f32 %v768_v35, %v228_v2  ;;  %v266_v6 = vadd.f32 %v265_v3, %v251_v1  ;;  %v546_v1 = vunpack.c.h.bf16 %v833_v52 }
  0xff   :  { %v230_v7 = vrot.slane %v229_v5, 4  ;;  %v267_v8 = vadd.f32 %v266_v6, %v252_v4 }
 0x101   :  { %v231_v9 = vadd.f32 %v230_v7, %v229_v5  ;;  %v268_v18 = vrot.slane %v267_v8, 4 }
 0x103   :  { %v232_v19 = vrot.slane %v231_v9, 2  ;;  %v269_v20 = vadd.f32 %v268_v18, %v267_v8  ;;  %v603_v18 = vld [vmem:[%s900_s2 + $0x28] sm:$0xff]  }
 0x105   :  { %v233_v21 = vadd.f32 %v232_v19, %v231_v9  ;;  %v270_v22 = vrot.slane %v269_v20, 2 }
 0x107   :  { %v234_v23 = vrot.slane %v233_v21, 1  ;;  %v271_v24 = vadd.f32 %v270_v22, %v269_v20 }
 0x109   :  { %v235_v25 = vadd.f32 %v234_v23, %v233_v21  ;;  %v272_v27 = vrot.slane %v271_v24, 1  ;;  %v550_v21 = vunpack.c.h.bf16 %v603_v18 }
 0x10b   :  { %v236_v31 = vmul.f32 0.0078125, %v235_v25  ;;  %v273_v32 = vadd.f32 %v272_v27, %v271_v24 }
 0x10d   :  { %v274_v33 = vmul.f32 0.0078125, %v273_v32  ;;  %v275_v38 = vmul.f32 %v236_v31, %v236_v31 }
 0x10f   :  { %v276_v39 = vsub.f32 %v274_v33, %v275_v38 }
 0x111   :  { %v277_v40 = vmax.f32 %v276_v39, 0.0 }
 0x113   :  { %v279_v41 = vadd.f32 1e-05, %v277_v40 }
 0x115   :  { %657 = vrsqrt.f32 %v279_v41 }
 0x11f   :  { %v658_v48 = vpop.eup %657 }
 0x120   :  { %v281_v50 = vmul.f32 %v658_v48, %v278_v44 }
 0x122   :  { %v283_v58 = vmul.f32 %v281_v50, %v236_v31  ;;  %v289_v59 = vrot.slane %v281_v50, %v288_v45 }
 0x124   :  { %v284_v2 = vsub.f32 %v282_v53, %v283_v58  ;;  %v291_v3 = vmul.f32 %v289_v59, %v731_v12  ;;  %v292_v4 = vmul.f32 %v289_v59, %v739_v16  ;;  %v293_v5 = vmul.f32 %v727_v10, %v289_v59 }
 0x125   :  { %v294_v6 = vmul.f32 %v735_v14, %v289_v59  ;;  %v295_v7 = vmul.f32 %v289_v59, %v759_v29  ;;  %v296_v8 = vmul.f32 %v289_v59, %v770_v36  ;;  %v297_v9 = vmul.f32 %v754_v26, %v289_v59  ;;  %v604_v14 = vld [vmem:[%s900_s2 + $0x30] sm:$0xff]   ;;  %v605_v26 = vld [vmem:[%s900_s2 + $0x38] sm:$0xff]  }
 0x126   :  { %v298_v19 = vmul.f32 %v766_v34, %v289_v59  ;;  %v299_v12 = vmul.f32 %v289_v59, %v733_v13  ;;  %v300_v16 = vmul.f32 %v289_v59, %v741_v17  ;;  %v301_v10 = vmul.f32 %v729_v11, %v289_v59 }
 0x127   :  { %v302_v29 = vmul.f32 %v737_v15, %v289_v59  ;;  %v303_v36 = vmul.f32 %v289_v59, %v761_v30  ;;  %v304_v34 = vmul.f32 %v289_v59, %v772_v37  ;;  %v305_v13 = vmul.f32 %v757_v28, %v289_v59 }
 0x128   :  { %v306_v17 = vmul.f32 %v768_v35, %v289_v59  ;;  %v311_v20 = vrot.slane %v284_v2, %v288_v45  ;;  %v549_v11 = vunpack.c.l.bf16 %v603_v18  ;;  %v553_v22 = vunpack.c.l.bf16 %v604_v14 }
 0x129   :  { %v554_v23 = vunpack.c.h.bf16 %v604_v14  ;;  %v557_v24 = vunpack.c.l.bf16 %v605_v26  ;;  %v558_v25 = vunpack.c.h.bf16 %v605_v26 }
 0x12a   :  { %v313_v27 = vadd.f32 %v311_v20, %v291_v3  ;;  %v314_v31 = vadd.f32 %v311_v20, %v292_v4  ;;  %v315_v32 = vadd.f32 %v311_v20, %v293_v5  ;;  %v316_v33 = vadd.f32 %v311_v20, %v294_v6 }
 0x12b   :  { %v317_v15 = vadd.f32 %v311_v20, %v295_v7  ;;  %v318_v38 = vadd.f32 %v311_v20, %v296_v8  ;;  %v319_v30 = vadd.f32 %v311_v20, %v297_v9  ;;  %v320_v39 = vadd.f32 %v311_v20, %v298_v19 }
 0x12c   :  { %v321_v37 = vadd.f32 %v311_v20, %v299_v12  ;;  %v322_v40 = vadd.f32 %v311_v20, %v300_v16  ;;  %v323_v28 = vadd.f32 %v311_v20, %v301_v10  ;;  %v324_v41 = vadd.f32 %v311_v20, %v302_v29 }
 0x12d   :  { %v325_v35 = vadd.f32 %v311_v20, %v303_v36  ;;  %v326_v42 = vadd.f32 %v311_v20, %v304_v34  ;;  %v327_v43 = vadd.f32 %v311_v20, %v305_v13  ;;  %v328_v44 = vadd.f32 %v311_v20, %v306_v17 }
 0x12e   :  { %v361_v45 = vadd.f32 %v529_v54, %v313_v27  ;;  %v362_v46 = vadd.f32 %v530_v55, %v314_v31  ;;  %v363_v47 = vadd.f32 %v533_v56, %v315_v32  ;;  %v364_v48 = vadd.f32 %v534_v57, %v316_v33 }
 0x12f   :  { %v365_v49 = vadd.f32 %v537_v60, %v317_v15  ;;  %v366_v50 = vadd.f32 %v538_v61, %v318_v38  ;;  %v367_v51 = vadd.f32 %v541_v62, %v319_v30  ;;  %v368_v52 = vadd.f32 %v542_v63, %v320_v39 }
 0x130   :  { %v369_v53 = vadd.f32 %v545_v0, %v321_v37  ;;  %v370_v58 = vadd.f32 %v546_v1, %v322_v40  ;;  %v371_v59 = vadd.f32 %v549_v11, %v323_v28  ;;  %v372_v2 = vadd.f32 %v550_v21, %v324_v41 }
 0x131   :  { %v373_v3 = vadd.f32 %v553_v22, %v325_v35  ;;  %v374_v4 = vadd.f32 %v554_v23, %v326_v42  ;;  %v375_v5 = vadd.f32 %v557_v24, %v327_v43  ;;  %v376_v6 = vadd.f32 %v558_v25, %v328_v44 }
 0x132   :  { %v377_v7 = vmax.f32 %v361_v45, 0.0  ;;  %v378_v8 = vmax.f32 %v362_v46, 0.0  ;;  %v379_v9 = vmax.f32 %v363_v47, 0.0  ;;  %v380_v18 = vmax.f32 %v364_v48, 0.0 }
 0x133   :  { %v381_v54 = vmax.f32 %v365_v49, 0.0  ;;  %v382_v55 = vmax.f32 %v366_v50, 0.0  ;;  %v383_v56 = vmax.f32 %v367_v51, 0.0  ;;  %v384_v57 = vmax.f32 %v368_v52, 0.0 }
 0x134   :  { %v385_v60 = vmax.f32 %v369_v53, 0.0  ;;  %v386_v61 = vmax.f32 %v370_v58, 0.0  ;;  %v387_v62 = vmax.f32 %v371_v59, 0.0  ;;  %v388_v63 = vmax.f32 %v372_v2, 0.0 }
 0x135   :  { %v389_v0 = vmax.f32 %v373_v3, 0.0  ;;  %v390_v1 = vmax.f32 %v374_v4, 0.0  ;;  %v391_v19 = vmax.f32 %v375_v5, 0.0  ;;  %v392_v12 = vmax.f32 %v376_v6, 0.0 }
 0x136   :  { %v562_v16 = vpack.c.bf16 %v378_v8, %v377_v7  ;;  %v567_v10 = vpack.c.bf16 %v380_v18, %v379_v9  ;;  %v572_v14 = vpack.c.bf16 %v382_v55, %v381_v54  ;;  %v577_v26 = vpack.c.bf16 %v384_v57, %v383_v56 }
 0x137   :  { %v582_v29 = vpack.c.bf16 %v386_v61, %v385_v60  ;;  %v587_v36 = vpack.c.bf16 %v388_v63, %v387_v62  ;;  %v592_v34 = vpack.c.bf16 %v390_v1, %v389_v0  ;;  %v597_v13 = vpack.c.bf16 %v392_v12, %v391_v19 }
 0x138   :  { %563 = vst [vmem:[%s902_s5] sm:$0xff] %v562_v16   ;;  %606 = vst [vmem:[%s902_s5 + $0x8] sm:$0xff] %v567_v10  }
 0x139   :  { %607 = vst [vmem:[%s902_s5 + $0x10] sm:$0xff] %v572_v14   ;;  %608 = vst [vmem:[%s902_s5 + $0x18] sm:$0xff] %v577_v26  }
 0x13a   :  { %609 = vst [vmem:[%s902_s5 + $0x20] sm:$0xff] %v582_v29   ;;  %610 = vst [vmem:[%s902_s5 + $0x28] sm:$0xff] %v587_v36  }
 0x13b   :  { %611 = vst [vmem:[%s902_s5 + $0x30] sm:$0xff] %v592_v34   ;;  %612 = vst [vmem:[%s902_s5 + $0x38] sm:$0xff] %v597_v13  }

// kernel: shared_layers_forward.117
= control target key start
LH: loop header
LB: loop body
LE: loop exit
PB: predicated region body
PF: predicated region fallthrough
CT: control target
= control target key end

     0   :  { %vm243_vm0 = vcmask 261120   ;;  %vm470_vm1 = vcmask 257024   ;;  %s892_s1 = inlined_call_operand.vmem [shape: bf16[128,32], index: 1, kind: input, shape index: {}]   ;;  %s893_s0 = inlined_call_operand.vmem [shape: bf16[128,128], index: 0, kind: input, shape index: {}]   ;;  %s894_s2 = inlined_call_operand.vmem [shape: f32[1,32], index: 2, kind: input, shape index: {}]   ;;  %s895_s3 = inlined_call_operand.vmem [shape: f32[1,32], index: 3, kind: input, shape index: {}]   ;;  %s896_s4 = inlined_call_operand.vmem [shape: bf16[128,32], index: 4, kind: output, shape index: {}]  }
   0x1   :  { %v603_v0 = vld [vmem:[%s892_s1] sm:$0xff]   ;;  %v604_v1 = vld [vmem:[%s892_s1 + $0x8] sm:$0xff]   ;;  %v605_v2 = vld [vmem:[%s892_s1 + $0x10] sm:$0xff]  }
   0x2   :  { %555 = vmatprep.subr.bf16.mxu0 %v603_v0  ;;  %587 = vmatprep.subr.bf16.mxu1 %v603_v0  ;;  %v606_v3 = vld [vmem:[%s892_s1 + $0x18] sm:$0xff]   ;;  %v611_v4 = vld [vmem:[%s893_s0] sm:$0xff]   ;;  %v608_v7 = vld [vmem:[%s892_s1 + $0x28] sm:$0xff]  }
   0x3   :  { %556 = vmatpush3.bf16.msra.mxu0 %v603_v0  ;;  %595 = vmatpush3.bf16.msra.mxu1 %v603_v0  ;;  %v607_v5 = vld [vmem:[%s892_s1 + $0x20] sm:$0xff]   ;;  %v609_v8 = vld [vmem:[%s892_s1 + $0x30] sm:$0xff]   ;;  %v610_v9 = vld [vmem:[%s892_s1 + $0x38] sm:$0xff]  }
   0x4   :  { %557 = vmatprep.subr.bf16.mxu0 %v604_v1  ;;  %588 = vmatprep.subr.bf16.mxu1 %v604_v1  ;;  %v615_v6 = vld [vmem:[%s893_s0 + $0x20] sm:$0xff]   ;;  %v612_v10 = vld [vmem:[%s893_s0 + $0x8] sm:$0xff]   ;;  %v613_v12 = vld [vmem:[%s893_s0 + $0x10] sm:$0xff]  }
   0x5   :  { %571 = vmatprep.mubr.bf16.mxu0 %v611_v4  ;;  %579 = vmatprep.mubr.bf16.mxu1 %v615_v6  ;;  %v616_v11 = vld [vmem:[%s893_s0 + $0x28] sm:$0xff]   ;;  %v617_v13 = vld [vmem:[%s893_s0 + $0x30] sm:$0xff]   ;;  %v614_v14 = vld [vmem:[%s893_s0 + $0x18] sm:$0xff]  }
   0x6   :  { %v618_v15 = vld [vmem:[%s893_s0 + $0x38] sm:$0xff]  }
   0x7   :  { %558 = vmatpush3.bf16.msra.mxu0 %v604_v1  ;;  %596 = vmatpush3.bf16.msra.mxu1 %v604_v1 }
   0x8   :  { %559 = vmatprep.subr.bf16.mxu0 %v605_v2  ;;  %589 = vmatprep.subr.bf16.mxu1 %v605_v2 }
   0xb   :  { %560 = vmatpush3.bf16.msra.mxu0 %v605_v2  ;;  %597 = vmatpush3.bf16.msra.mxu1 %v605_v2 }
   0xc   :  { %561 = vmatprep.subr.bf16.mxu0 %v606_v3  ;;  %590 = vmatprep.subr.bf16.mxu1 %v606_v3 }
   0xf   :  { %562 = vmatpush3.bf16.msra.mxu0 %v606_v3  ;;  %598 = vmatpush3.bf16.msra.mxu1 %v606_v3 }
  0x10   :  { %563 = vmatprep.subr.bf16.mxu0 %v607_v5  ;;  %591 = vmatprep.subr.bf16.mxu1 %v607_v5 }
  0x13   :  { %564 = vmatpush3.bf16.msra.mxu0 %v607_v5  ;;  %599 = vmatpush3.bf16.msra.mxu1 %v607_v5 }
  0x14   :  { %565 = vmatprep.subr.bf16.mxu0 %v608_v7  ;;  %592 = vmatprep.subr.bf16.mxu1 %v608_v7 }
  0x17   :  { %566 = vmatpush3.bf16.msra.mxu0 %v608_v7  ;;  %600 = vmatpush3.bf16.msra.mxu1 %v608_v7 }
  0x18   :  { %567 = vmatprep.subr.bf16.mxu0 %v609_v8  ;;  %593 = vmatprep.subr.bf16.mxu1 %v609_v8 }
  0x1b   :  { %568 = vmatpush3.bf16.msra.mxu0 %v609_v8  ;;  %601 = vmatpush3.bf16.msra.mxu1 %v609_v8 }
  0x1c   :  { %569 = vmatprep.subr.bf16.mxu0 %v610_v9  ;;  %594 = vmatprep.subr.bf16.mxu1 %v610_v9 }
  0x1f   :  { %570 = vmatpush3.bf16.msra.mxu0 %v610_v9  ;;  %602 = vmatpush3.bf16.msra.mxu1 %v610_v9 }
  0x22   :  { %572 = vmatmul.mubr.bf16.vlgmr.msra.gmra.mrb[0].mxu0 %v612_v10  ;;  %580 = vmatmul.mubr.bf16.vlgmr.msra.gmra.mrb[0].mxu1 %v616_v11 }
  0x23   :  { %575 = vmatprep.mubr.bf16.mxu0 %v613_v12  ;;  %583 = vmatprep.mubr.bf16.mxu1 %v617_v13 }
  0x2a   :  { %576 = vmatmul.mubr.bf16.gmra.mrb[4].mxu0 %v614_v14  ;;  %584 = vmatmul.mubr.bf16.gmra.mrb[4].mxu1 %v618_v15 }
  0xf5   :  { %v694_v16 = vpop.f32.mrb[0].mxu0  ;;  %v696_v17 = vpop.f32.mrb[0].mxu1 }
  0xf6   :  { %v698_v18 = vpop.f32.mrb[1].mxu0  ;;  %v700_v19 = vpop.f32.mrb[1].mxu1  ;;  %v284_v25 = vmul.f32 %v694_v16, %v694_v16  ;;  %v247_v30 = vsel %vm243_vm0, %v694_v16, 0.0  ;;  %v292_v11 = vmul.f32 %v696_v17, %v696_v17  ;;  %v263_v15 = vsel %vm243_vm0, %v696_v17, 0.0 }
  0xf7   :  { %v282_v20 = vmul.f32 %v698_v18, %v698_v18  ;;  %v704_v21 = vpop.f32.mrb[2].mxu0  ;;  %v706_v22 = vpop.f32.mrb[2].mxu1  ;;  %v244_v26 = vsel %vm243_vm0, %v698_v18, 0.0  ;;  %v290_v62 = vmul.f32 %v700_v19, %v700_v19  ;;  %v259_v3 = vsel %vm243_vm0, %v700_v19, 0.0 }
  0xf8   :  { %v708_v23 = vpop.f32.mrb[3].mxu0  ;;  %v710_v24 = vpop.f32.mrb[3].mxu1  ;;  %v285_v32 = vmul.f32 %v704_v21, %v704_v21  ;;  %v301_v36 = vsel %vm243_vm0, %v284_v25, 0.0  ;;  %v249_v37 = vsel %vm243_vm0, %v704_v21, 0.0 }
  0xf9   :  { %v245_v27 = vsel %vm243_vm0, %v708_v23, 0.0  ;;  %v283_v28 = vmul.f32 %v708_v23, %v708_v23  ;;  %v298_v31 = vsel %vm243_vm0, %v282_v20, 0.0  ;;  %v313_v7 = vsel %vm243_vm0, %v290_v62, 0.0 }
  0xfa   :  { %v246_v29 = vadd.f32 %v245_v27, %v244_v26  ;;  %v303_v44 = vsel %vm243_vm0, %v285_v32, 0.0  ;;  %v291_v8 = vmul.f32 %v710_v24, %v710_v24  ;;  %v261_v12 = vsel %vm243_vm0, %v710_v24, 0.0 }
  0xfb   :  { %v299_v33 = vsel %vm243_vm0, %v283_v28, 0.0  ;;  %v293_v20 = vmul.f32 %v706_v22, %v706_v22 }
  0xfc   :  { %v248_v34 = vadd.f32 %v247_v30, %v246_v29  ;;  %v300_v35 = vadd.f32 %v299_v33, %v298_v31  ;;  %v315_v25 = vsel %vm243_vm0, %v291_v8, 0.0  ;;  %v317_v29 = vsel %vm243_vm0, %v292_v11, 0.0 }
  0xfd   :  { %v729_v38 = vpop.f32.mrb[4].mxu0  ;;  %v731_v39 = vpop.f32.mrb[4].mxu1  ;;  %v265_v30 = vsel %vm243_vm0, %v706_v22, 0.0 }
  0xfe   :  { %v302_v40 = vadd.f32 %v301_v36, %v300_v35  ;;  %v733_v41 = vpop.f32.mrb[5].mxu0  ;;  %v250_v42 = vadd.f32 %v249_v37, %v248_v34  ;;  %v735_v43 = vpop.f32.mrb[5].mxu1  ;;  %v288_v53 = vmul.f32 %v729_v38, %v729_v38  ;;  %v255_v59 = vsel %vm243_vm0, %v729_v38, 0.0 }
  0xff   :  { %v251_v45 = vsel %vm243_vm0, %v733_v41, 0.0  ;;  %v286_v46 = vmul.f32 %v733_v41, %v733_v41  ;;  %v742_v47 = vpop.f32.mrb[6].mxu0  ;;  %v744_v48 = vpop.f32.mrb[6].mxu1  ;;  %v294_v26 = vmul.f32 %v735_v43, %v735_v43  ;;  %v267_v31 = vsel %vm243_vm0, %v735_v43, 0.0 }
 0x100   :  { %v252_v49 = vadd.f32 %v251_v45, %v250_v42  ;;  %v304_v50 = vadd.f32 %v303_v44, %v302_v40  ;;  %v746_v51 = vpop.f32.mrb[7].mxu0  ;;  %v748_v52 = vpop.f32.mrb[7].mxu1  ;;  %v289_v60 = vmul.f32 %v742_v47, %v742_v47  ;;  %v309_v1 = vsel %vm243_vm0, %v288_v53, 0.0 }
 0x101   :  { %v305_v54 = vsel %vm243_vm0, %v286_v46, 0.0  ;;  %v253_v55 = vsel %vm243_vm0, %v746_v51, 0.0  ;;  %v287_v56 = vmul.f32 %v746_v51, %v746_v51  ;;  %v257_v2 = vsel %vm243_vm0, %v742_v47, 0.0 }
 0x102   :  { %v306_v57 = vadd.f32 %v305_v54, %v304_v50  ;;  %v254_v58 = vadd.f32 %v253_v55, %v252_v49  ;;  %v311_v6 = vsel %vm243_vm0, %v289_v60, 0.0  ;;  %v319_v34 = vsel %vm243_vm0, %v293_v20, 0.0 }
 0x103   :  { %v307_v61 = vsel %vm243_vm0, %v287_v56, 0.0  ;;  %v321_v35 = vsel %vm243_vm0, %v294_v26, 0.0  ;;  %v295_v36 = vmul.f32 %v748_v52, %v748_v52  ;;  %v296_v42 = vmul.f32 %v731_v39, %v731_v39  ;;  %v339_v26 = vld [vmem:[%s894_s2] sm:$0x1] }
 0x104   :  { %v256_v63 = vadd.f32 %v255_v59, %v254_v58  ;;  %v308_v0 = vadd.f32 %v307_v61, %v306_v57  ;;  %v269_v44 = vsel %vm243_vm0, %v748_v52, 0.0  ;;  %v271_v49 = vsel %vm243_vm0, %v731_v39, 0.0 }
 0x105   :  { %v297_v50 = vmul.f32 %v744_v48, %v744_v48  ;;  %v323_v53 = vsel %vm243_vm0, %v295_v36, 0.0  ;;  %v325_v56 = vsel %vm243_vm0, %v296_v42, 0.0  ;;  %v273_v57 = vsel %vm243_vm0, %v744_v48, 0.0 }
 0x106   :  { %v310_v4 = vadd.f32 %v309_v1, %v308_v0  ;;  %v258_v5 = vadd.f32 %v257_v2, %v256_v63  ;;  %v347_v20 = vlaneseq }
 0x107   :  { %v327_v60 = vsel %vm243_vm0, %v297_v50, 0.0 }
 0x108   :  { %v260_v9 = vadd.f32 %v259_v3, %v258_v5  ;;  %v312_v10 = vadd.f32 %v311_v6, %v310_v4 }
 0x10a   :  { %v314_v13 = vadd.f32 %v313_v7, %v312_v10  ;;  %v262_v14 = vadd.f32 %v261_v12, %v260_v9 }
 0x10c   :  { %v264_v27 = vadd.f32 %v263_v15, %v262_v14  ;;  %v316_v28 = vadd.f32 %v315_v25, %v314_v13  ;;  %v348_v25 = vshrl.u32 %v347_v20, 7 }
 0x10e   :  { %v318_v32 = vadd.f32 %v317_v29, %v316_v28  ;;  %v266_v33 = vadd.f32 %v265_v30, %v264_v27  ;;  %v349_v27 = vsub.s32 0, %v348_v25  ;;  %v343_v30 = vld [vmem:[%s895_s3] sm:$0x1] }
 0x110   :  { %v268_v37 = vadd.f32 %v267_v31, %v266_v33  ;;  %v320_v40 = vadd.f32 %v319_v34, %v318_v32 }
 0x112   :  { %v322_v45 = vadd.f32 %v321_v35, %v320_v40  ;;  %v270_v46 = vadd.f32 %v269_v44, %v268_v37 }
 0x114   :  { %v272_v54 = vadd.f32 %v271_v49, %v270_v46  ;;  %v324_v55 = vadd.f32 %v323_v53, %v322_v45 }
 0x116   :  { %v274_v58 = vadd.f32 %v273_v57, %v272_v54  ;;  %v326_v59 = vadd.f32 %v325_v56, %v324_v55 }
 0x118   :  { %v275_v61 = vrot.slane %v274_v58, 4  ;;  %v328_v62 = vadd.f32 %v327_v60, %v326_v59 }
 0x11a   :  { %v276_v63 = vadd.f32 %v275_v61, %v274_v58  ;;  %v329_v0 = vrot.slane %v328_v62, 4 }
 0x11c   :  { %v277_v1 = vrot.slane %v276_v63, 2  ;;  %v330_v2 = vadd.f32 %v329_v0, %v328_v62 }
 0x11e   :  { %v278_v3 = vadd.f32 %v277_v1, %v276_v63  ;;  %v331_v4 = vrot.slane %v330_v2, 2 }
 0x120   :  { %v279_v5 = vrot.slane %v278_v3, 1  ;;  %v332_v6 = vadd.f32 %v331_v4, %v330_v2 }
 0x122   :  { %v280_v7 = vadd.f32 %v279_v5, %v278_v3  ;;  %v333_v8 = vrot.slane %v332_v6, 1 }
 0x124   :  { %v281_v9 = vmul.f32 0.0078125, %v280_v7  ;;  %v334_v10 = vadd.f32 %v333_v8, %v332_v6 }
 0x126   :  { %v335_v11 = vmul.f32 0.0078125, %v334_v10  ;;  %v336_v12 = vmul.f32 %v281_v9, %v281_v9 }
 0x128   :  { %v337_v13 = vsub.f32 %v335_v11, %v336_v12 }
 0x12a   :  { %v338_v14 = vmax.f32 %v337_v13, 0.0 }
 0x12c   :  { %v340_v15 = vadd.f32 1e-05, %v338_v14 }
 0x12e   :  { %619 = vrsqrt.f32 %v340_v15 }
 0x138   :  { %v620_v28 = vpop.eup %619 }
 0x139   :  { %v342_v29 = vmul.f32 %v620_v28, %v339_v26 }
 0x13b   :  { %v344_v31 = vmul.f32 %v342_v29, %v281_v9  ;;  %v350_v32 = vrot.slane %v342_v29, %v349_v27 }
 0x13d   :  { %v345_v33 = vsub.f32 %v343_v30, %v344_v31  ;;  %v352_v34 = vmul.f32 %v350_v32, %v698_v18  ;;  %v353_v35 = vmul.f32 %v350_v32, %v708_v23  ;;  %v354_v36 = vmul.f32 %v694_v16, %v350_v32 }
 0x13e   :  { %v355_v37 = vmul.f32 %v704_v21, %v350_v32  ;;  %v356_v40 = vmul.f32 %v350_v32, %v733_v41  ;;  %v357_v42 = vmul.f32 %v350_v32, %v746_v51  ;;  %v358_v44 = vmul.f32 %v729_v38, %v350_v32 }
 0x13f   :  { %v359_v45 = vmul.f32 %v742_v47, %v350_v32  ;;  %v360_v46 = vmul.f32 %v350_v32, %v700_v19  ;;  %v361_v49 = vmul.f32 %v350_v32, %v710_v24  ;;  %v362_v18 = vmul.f32 %v696_v17, %v350_v32 }
 0x140   :  { %v363_v23 = vmul.f32 %v706_v22, %v350_v32  ;;  %v364_v16 = vmul.f32 %v350_v32, %v735_v43  ;;  %v365_v21 = vmul.f32 %v350_v32, %v748_v52  ;;  %v366_v41 = vmul.f32 %v731_v39, %v350_v32 }
 0x141   :  { %v367_v51 = vmul.f32 %v744_v48, %v350_v32  ;;  %v372_v50 = vrot.slane %v345_v33, %v349_v27 }
 0x143   :  { %v374_v38 = vadd.f32 %v372_v50, %v352_v34  ;;  %v375_v47 = vadd.f32 %v372_v50, %v353_v35  ;;  %v376_v53 = vadd.f32 %v372_v50, %v354_v36  ;;  %v377_v19 = vadd.f32 %v372_v50, %v355_v37 }
 0x144   :  { %v378_v54 = vadd.f32 %v372_v50, %v356_v40  ;;  %v379_v24 = vadd.f32 %v372_v50, %v357_v42  ;;  %v380_v55 = vadd.f32 %v372_v50, %v358_v44  ;;  %v381_v17 = vadd.f32 %v372_v50, %v359_v45 }
 0x145   :  { %v382_v56 = vadd.f32 %v372_v50, %v360_v46  ;;  %v383_v22 = vadd.f32 %v372_v50, %v361_v49  ;;  %v384_v57 = vadd.f32 %v372_v50, %v362_v18  ;;  %v385_v43 = vadd.f32 %v372_v50, %v363_v23 }
 0x146   :  { %v386_v58 = vadd.f32 %v372_v50, %v364_v16  ;;  %v387_v52 = vadd.f32 %v372_v50, %v365_v21  ;;  %v388_v59 = vadd.f32 %v372_v50, %v366_v41  ;;  %v389_v39 = vadd.f32 %v372_v50, %v367_v51 }
 0x147   :  { %v390_v60 = vmax.f32 %v374_v38, 0.0  ;;  %v391_v48 = vmax.f32 %v375_v47, 0.0  ;;  %v392_v61 = vmax.f32 %v376_v53, 0.0  ;;  %v393_v62 = vmax.f32 %v377_v19, 0.0 }
 0x148   :  { %v394_v63 = vmax.f32 %v378_v54, 0.0  ;;  %v395_v0 = vmax.f32 %v379_v24, 0.0  ;;  %v396_v1 = vmax.f32 %v380_v55, 0.0  ;;  %v397_v2 = vmax.f32 %v381_v17, 0.0 }
 0x149   :  { %v398_v3 = vmax.f32 %v382_v56, 0.0  ;;  %v399_v4 = vmax.f32 %v383_v22, 0.0  ;;  %v400_v5 = vmax.f32 %v384_v57, 0.0  ;;  %v401_v6 = vmax.f32 %v385_v43, 0.0 }
 0x14a   :  { %v402_v7 = vmax.f32 %v386_v58, 0.0  ;;  %v403_v8 = vmax.f32 %v387_v52, 0.0  ;;  %v404_v9 = vmax.f32 %v388_v59, 0.0  ;;  %v405_v10 = vmax.f32 %v389_v39, 0.0 }
 0x14b   :  { %v523_v11 = vpack.c.bf16 %v390_v60, %v390_v60  ;;  %v524_v12 = vpack.c.bf16 %v391_v48, %v391_v48  ;;  %v525_v13 = vpack.c.bf16 %v392_v61, %v392_v61  ;;  %v526_v14 = vpack.c.bf16 %v393_v62, %v393_v62 }
 0x14c   :  { %v527_v15 = vpack.c.bf16 %v394_v63, %v394_v63  ;;  %v528_v20 = vpack.c.bf16 %v395_v0, %v395_v0  ;;  %v529_v25 = vpack.c.bf16 %v396_v1, %v396_v1  ;;  %v530_v26 = vpack.c.bf16 %v397_v2, %v397_v2 }
 0x14d   :  { %v531_v27 = vpack.c.bf16 %v398_v3, %v398_v3  ;;  %v532_v28 = vpack.c.bf16 %v399_v4, %v399_v4  ;;  %v533_v29 = vpack.c.bf16 %v400_v5, %v400_v5  ;;  %v534_v30 = vpack.c.bf16 %v401_v6, %v401_v6  ;;  %471 = vst.msk [vmem:[%s896_s4] sm:$0xf] %vm470_vm1, %v523_v11 }
 0x14e   :  { %472 = vst.msk [vmem:[%s896_s4 + $0x4] sm:$0xf] %vm470_vm1, %v524_v12  ;;  %473 = vst.msk [vmem:[%s896_s4 + $0x8] sm:$0xf] %vm470_vm1, %v525_v13  ;;  %v535_v31 = vpack.c.bf16 %v402_v7, %v402_v7  ;;  %v536_v32 = vpack.c.bf16 %v403_v8, %v403_v8  ;;  %v537_v33 = vpack.c.bf16 %v404_v9, %v404_v9 }
 0x14f   :  { %474 = vst.msk [vmem:[%s896_s4 + $0xc] sm:$0xf] %vm470_vm1, %v526_v14  ;;  %v538_v34 = vpack.c.bf16 %v405_v10, %v405_v10  ;;  %475 = vst.msk [vmem:[%s896_s4 + $0x10] sm:$0xf] %vm470_vm1, %v527_v15 }
 0x150   :  { %476 = vst.msk [vmem:[%s896_s4 + $0x14] sm:$0xf] %vm470_vm1, %v528_v20  ;;  %477 = vst.msk [vmem:[%s896_s4 + $0x18] sm:$0xf] %vm470_vm1, %v529_v25 }
 0x151   :  { %478 = vst.msk [vmem:[%s896_s4 + $0x1c] sm:$0xf] %vm470_vm1, %v530_v26  ;;  %479 = vst.msk [vmem:[%s896_s4 + $0x20] sm:$0xf] %vm470_vm1, %v531_v27 }
 0x152   :  { %480 = vst.msk [vmem:[%s896_s4 + $0x24] sm:$0xf] %vm470_vm1, %v532_v28  ;;  %481 = vst.msk [vmem:[%s896_s4 + $0x28] sm:$0xf] %vm470_vm1, %v533_v29 }
 0x153   :  { %482 = vst.msk [vmem:[%s896_s4 + $0x2c] sm:$0xf] %vm470_vm1, %v534_v30  ;;  %483 = vst.msk [vmem:[%s896_s4 + $0x30] sm:$0xf] %vm470_vm1, %v535_v31 }
 0x154   :  { %484 = vst.msk [vmem:[%s896_s4 + $0x34] sm:$0xf] %vm470_vm1, %v536_v32  ;;  %485 = vst.msk [vmem:[%s896_s4 + $0x38] sm:$0xf] %vm470_vm1, %v537_v33 }
 0x155   :  { %486 = vst.msk [vmem:[%s896_s4 + $0x3c] sm:$0xf] %vm470_vm1, %v538_v34 }

</bundles_post_ra>
